<compile_context>
chip_gen: v5e
topology: v5e:2x2
jax: 0.10.0
libtpu: 0.0.40
codegen_flags: <defaults>
</compile_context>

<pallas_src>
import functools

import numpy as np
import jax
import jax.numpy as jnp
from jax import lax
from jax.experimental import pallas as pl
from jax.experimental.pallas import tpu as pltpu

# bf16 matmul operands (f32 accumulation). Set to jnp.float32 for bit-exact f32 numerics.
_MXU_DTYPE = jnp.bfloat16


def _round8(n):
    return ((n + 7) // 8) * 8


def _halo(w_img):
    # max |row shift| for a 3x3 tap on a (w_img+2)-wide padded row is w_img+3
    return _round8(w_img + 3)


def _pool_repad_matrix(h, w):
    """Constant matrix mapping the conv output on the padded-flat (h+2)x(w+2) grid to the
    NEXT layer's zero-padded activation on the padded-flat (h//2+2)x(w//2+2) grid:
    2x2 stride-2 average pool + re-zero-padding fused into one matmul."""
    hi, wi = h + 2, w + 2
    ho, wo = h // 2 + 2, w // 2 + 2
    n_in, n_out = _round8(hi * wi), _round8(ho * wo)
    s = np.zeros((n_out, n_in), np.float32)
    for oy in range(h // 2):
        for ox in range(w // 2):
            q = (oy + 1) * wo + (ox + 1)          # interior row of the next padded grid
            for dy in range(2):
                for dx in range(2):
                    p = (2 * oy + dy + 1) * wi + (2 * ox + dx + 1)
                    s[q, p] = 0.25                 # exact in bf16
    return jnp.asarray(s, dtype=_MXU_DTYPE)


def _pick_block_b(batch, max_block=16):
    """Largest divisor of `batch` <= max_block that still leaves >= 2 grid steps when
    batch >= 2 (keeps both v7x TensorCores busy; v5e/v6e have a single core)."""
    best = 1
    for d in range(1, batch + 1):
        if batch % d != 0 or d > max_block:
            continue
        if batch // d >= 2 or batch == 1:
            best = d
    return best


def _lenet_kernel(x_ref, w1_ref, b1_ref, w2_ref, b2_ref, w3_ref, b3_ref,
                  w4_ref, b4_ref, s1_ref, s2_ref, s3_ref, s4_ref, o_ref,
                  *, b_blk, H, W):
    f32 = jnp.float32
    n1 = _round8((H + 2) * (W + 2))
    n2 = _round8((H // 2 + 2) * (W // 2 + 2))
    n3 = _round8((H // 4 + 2) * (W // 4 + 2))
    n4 = _round8((H // 8 + 2) * (W // 8 + 2))
    n5 = _round8((H // 16 + 2) * (W // 16 + 2))

    def taps(w_img):
        # row shifts of the 9 taps in padded-flat coordinates, kh-major / kw-minor
        return [(kh - 1) * (w_img + 2) + (kw - 1) for kh in range(3) for kw in range(3)]

    def conv3x3(a, w_ref, b_ref, w_img):
        """3x3 conv + bias + ReLU on a padded-flat activation a: (b_blk*n, cin) f32.
        9 row-shifted matmuls accumulated in f32; a zero halo keeps every shift in-range
        (only never-read padding rows ever see halo / neighbouring-image data)."""
        m, cin = a.shape
        halo = _halo(w_img)
        z = jnp.zeros((halo, cin), f32)
        ext = jnp.concatenate([z, a, z], axis=0)
        acc = None
        for t, d in enumerate(taps(w_img)):
            src = ext[halo + d: halo + d + m]                      # row shift by d
            y = jnp.dot(src.astype(w_ref.dtype), w_ref[t],
                        preferred_element_type=f32)                # MXU, f32 accumulate
            acc = y if acc is None else acc + y
        return jnp.maximum(acc + b_ref[...], 0.0)                  # bias + ReLU (f32, VPU)

    def pool_repad(y, s_ref, n_in):
        """2x2/2 avg pool + re-zero-pad for the next layer: one bf16 matmul per image."""
        s = s_ref[...]
        outs = [jnp.dot(s, y[b * n_in:(b + 1) * n_in].astype(s.dtype),
                        preferred_element_type=f32) for b in range(b_blk)]
        return outs[0] if b_blk == 1 else jnp.concatenate(outs, axis=0)

    # ---- layer 1 (cin=1): broadcast the padded input across the 64 output lanes ONCE,
    #      then 9 shifted VPU FMAs (a K=1 MXU matmul would waste the systolic depth).
    m1 = b_blk * n1
    x = x_ref[...].reshape(m1, 1)                                  # n1 % 8 == 0 -> free
    x64 = jnp.broadcast_to(x, (m1, 64))
    h1 = _halo(W)
    z1 = jnp.zeros((h1, 64), f32)
    ext1 = jnp.concatenate([z1, x64, z1], axis=0)
    w1 = w1_ref[...]                                               # (9, 64) f32
    acc = None
    for t, d in enumerate(taps(W)):
        src = ext1[h1 + d: h1 + d + m1]
        contrib = src * w1[t:t + 1, :]                             # VPU FMA
        acc = contrib if acc is None else acc + contrib
    y1 = jnp.maximum(acc + b1_ref[...], 0.0)                       # (b_blk*n1, 64)

    # ---- layers 2..4: activations never leave VMEM; dropout in eval mode is identity.
    a2 = pool_repad(y1, s1_ref, n1)                                # (b_blk*n2, 64)
    y2 = conv3x3(a2, w2_ref, b2_ref, W // 2)                       # (b_blk*n2, 128)
    a3 = pool_repad(y2, s2_ref, n2)                                # (b_blk*n3, 128)
    y3 = conv3x3(a3, w3_ref, b3_ref, W // 4)                       # (b_blk*n3, 256) (192 zero-padded)
    a4 = pool_repad(y3, s3_ref, n3)                                # (b_blk*n4, 256)
    y4 = conv3x3(a4, w4_ref, b4_ref, W // 8)                       # (b_blk*n4, 256)
    a5 = pool_repad(y4, s4_ref, n4)                                # (b_blk*n5, 256)

    o_ref[...] = a5.reshape(b_blk, n5, 256).astype(o_ref.dtype)


def lenet_conv_stack(x_pf, prep, pools, H, W, b_blk):
    """x_pf: (B, n1, 1) padded-flat input -> (B, n5, 256) padded-flat output."""
    B, n1, _ = x_pf.shape
    n5 = _round8((H // 16 + 2) * (W // 16 + 2))
    consts = list(prep) + list(pools)

    def const_spec(a):
        # whole (small) array resident in VMEM; constant block index -> fetched once
        if a.ndim == 2:
            return pl.BlockSpec(a.shape, lambda i: (0, 0))
        return pl.BlockSpec(a.shape, lambda i: (0, 0, 0))

    kern = functools.partial(_lenet_kernel, b_blk=b_blk, H=H, W=W)
    return pl.pallas_call(
        kern,
        out_shape=jax.ShapeDtypeStruct((B, n5, 256), jnp.float32),
        grid=(B // b_blk,),
        in_specs=[pl.BlockSpec((b_blk, n1, 1), lambda i: (i, 0, 0))]
                 + [const_spec(c) for c in consts],
        out_specs=pl.BlockSpec((b_blk, n5, 256), lambda i: (i, 0, 0)),
        compiler_params=pltpu.CompilerParams(dimension_semantics=("parallel",)),
    )(x_pf, *consts)


def prepare_params(params):
    """One-time reshape/pad/cast of HWIO conv params into MXU-friendly (9, cin, cout)."""
    (w1, b1), (w2, b2), (w3, b3), (w4, b4) = params                # w: (3, 3, cin, cout)
    w1m = w1.reshape(9, 64).astype(jnp.float32)                    # layer 1 runs on the VPU
    b1m = b1.reshape(1, 64).astype(jnp.float32)
    w2m = w2.reshape(9, 64, 128).astype(_MXU_DTYPE)
    b2m = b2.reshape(1, 128).astype(jnp.float32)
    # Layer 3: pad Cout 192 -> 256 with zero columns (lane-dense); layer 4: zero the
    # matching Cin rows, so the network output is unchanged.
    w3m = jnp.pad(w3, ((0, 0), (0, 0), (0, 0), (0, 64))).reshape(9, 128, 256).astype(_MXU_DTYPE)
    b3m = jnp.pad(b3, (0, 64)).reshape(1, 256).astype(jnp.float32)
    w4m = jnp.pad(w4, ((0, 0), (0, 0), (0, 64), (0, 0))).reshape(9, 256, 256).astype(_MXU_DTYPE)
    b4m = b4.reshape(1, 256).astype(jnp.float32)
    return (w1m, b1m, w2m, b2m, w3m, b3m, w4m, b4m)


def prepare_pools(H, W):
    return (_pool_repad_matrix(H, W),
            _pool_repad_matrix(H // 2, W // 2),
            _pool_repad_matrix(H // 4, W // 4),
            _pool_repad_matrix(H // 8, W // 8))


def init_params(key):
    """Deterministic PyTorch-like (kaiming-uniform-ish) init, HWIO layout."""
    specs = [(1, 64), (64, 128), (128, 192), (192, 256)]
    params = []
    for i, (cin, cout) in enumerate(specs):
        kw_, kb_ = jax.random.split(jax.random.fold_in(key, i))
        fan_in = cin * 3 * 3
        bound = 1.0 / (fan_in ** 0.5)
        w = jax.random.uniform(kw_, (3, 3, cin, cout), jnp.float32, -bound, bound)
        b = jax.random.uniform(kb_, (cout,), jnp.float32, -bound, bound)
        params.append((w, b))
    return params


@jax.jit
def lenet_forward(x_nchw, prep, pools):
    """Matches LeNet.forward in eval mode: 4x (conv3x3 -> ReLU -> dropout(id) -> avgpool2x2)."""
    B, C, H, W = x_nchw.shape
    assert C == 1 and H % 16 == 0 and W % 16 == 0
    n1 = _round8((H + 2) * (W + 2))
    # pack the input into padded-flat form once at the boundary
    x = jnp.pad(x_nchw[:, 0].astype(jnp.float32), ((0, 0), (1, 1), (1, 1)))
    x = x.reshape(B, (H + 2) * (W + 2))
    x = jnp.pad(x, ((0, 0), (0, n1 - (H + 2) * (W + 2))))
    x_pf = x.reshape(B, n1, 1)

    b_blk = _pick_block_b(B)
    y = lenet_conv_stack(x_pf, prep, pools, H, W, b_blk)           # (B, n5, 256)

    ho, wo = H // 16, W // 16
    y = y[:, :(ho + 2) * (wo + 2), :].reshape(B, ho + 2, wo + 2, 256)
    y = y[:, 1:ho + 1, 1:wo + 1, :]                                # interior of padded grid
    return jnp.transpose(y, (0, 3, 1, 2))                          # NHWC -> NCHW


def reference_forward(x_nchw, params):
    """Pure-JAX f32 reference of the PyTorch forward (eval mode)."""
    x = jnp.transpose(x_nchw, (0, 2, 3, 1)).astype(jnp.float32)
    for w, b in params:
        x = lax.conv_general_dilated(x, w.astype(jnp.float32), (1, 1), ((1, 1), (1, 1)),
                                     dimension_numbers=("NHWC", "HWIO", "NHWC"))
        x = jnp.maximum(x + b, 0.0)
        bb, hh, ww, cc = x.shape
        x = x.reshape(bb, hh // 2, 2, ww // 2, 2, cc).mean(axis=(2, 4))
    return jnp.transpose(x, (0, 3, 1, 2))


if __name__ == "__main__":
    key = jax.random.PRNGKey(0)
    kx, kp = jax.random.split(key)

    # Small input consistent with conv1 (in_channels=1): NCHW (2, 1, 16, 16).
    x = jax.random.normal(kx, (2, 1, 16, 16), jnp.float32)
    params = init_params(kp)
    prep = prepare_params(params)
    pools = prepare_pools(16, 16)

    out = jax.block_until_ready(lenet_forward(x, prep, pools))

    assert out.shape == (2, 256, 1, 1), out.shape
    assert bool(jnp.all(jnp.isfinite(out)))

    # correctness vs a pure-JAX f32 reference (generous tolerance for bf16 MXU operands)
    ref = jax.block_until_ready(reference_forward(x, params))
    err = float(jnp.max(jnp.abs(out - ref)))
    scale = float(jnp.max(jnp.abs(ref)))
    assert err <= 0.05 * scale + 1e-4, (err, scale)

    print("KERNEL_OK")
</pallas_src>

<mosaic_0001>
module attributes {stable_mosaic.version = 11 : i64} {
  func.func @_lenet_kernel(%arg0: i32, %arg1: memref<1x328x1xf32, #tpu.memory_space<vmem>>, %arg2: memref<9x64xf32, #tpu.memory_space<vmem>>, %arg3: memref<1x64xf32, #tpu.memory_space<vmem>>, %arg4: memref<9x64x128xbf16, #tpu.memory_space<vmem>>, %arg5: memref<1x128xf32, #tpu.memory_space<vmem>>, %arg6: memref<9x128x256xbf16, #tpu.memory_space<vmem>>, %arg7: memref<1x256xf32, #tpu.memory_space<vmem>>, %arg8: memref<9x256x256xbf16, #tpu.memory_space<vmem>>, %arg9: memref<1x256xf32, #tpu.memory_space<vmem>>, %arg10: memref<104x328xbf16, #tpu.memory_space<vmem>>, %arg11: memref<40x104xbf16, #tpu.memory_space<vmem>>, %arg12: memref<16x40xbf16, #tpu.memory_space<vmem>>, %arg13: memref<16x16xbf16, #tpu.memory_space<vmem>>, %arg14: memref<1x16x256xf32, #tpu.memory_space<vmem>>) attributes {dimension_semantics = [#tpu.dimension_semantics<parallel>], iteration_bounds = array<i64: 2>, scalar_prefetch = 0 : i64, scratch_operands = 0 : i64, tpu.core_type = #tpu.core_type<tc>, window_params = [{transform_indices = @transform_0, window_bounds = array<i64: 1, 328, 1>}, {pipeline_mode = #tpu.pipeline_mode<synchronous>, transform_indices = @transform_1, window_bounds = array<i64: 9, 64>}, {pipeline_mode = #tpu.pipeline_mode<synchronous>, transform_indices = @transform_2, window_bounds = array<i64: 1, 64>}, {pipeline_mode = #tpu.pipeline_mode<synchronous>, transform_indices = @transform_3, window_bounds = array<i64: 9, 64, 128>}, {pipeline_mode = #tpu.pipeline_mode<synchronous>, transform_indices = @transform_4, window_bounds = array<i64: 1, 128>}, {pipeline_mode = #tpu.pipeline_mode<synchronous>, transform_indices = @transform_5, window_bounds = array<i64: 9, 128, 256>}, {pipeline_mode = #tpu.pipeline_mode<synchronous>, transform_indices = @transform_6, window_bounds = array<i64: 1, 256>}, {pipeline_mode = #tpu.pipeline_mode<synchronous>, transform_indices = @transform_7, window_bounds = array<i64: 9, 256, 256>}, {pipeline_mode = #tpu.pipeline_mode<synchronous>, transform_indices = @transform_8, window_bounds = array<i64: 1, 256>}, {pipeline_mode = #tpu.pipeline_mode<synchronous>, transform_indices = @transform_9, window_bounds = array<i64: 104, 328>}, {pipeline_mode = #tpu.pipeline_mode<synchronous>, transform_indices = @transform_10, window_bounds = array<i64: 40, 104>}, {pipeline_mode = #tpu.pipeline_mode<synchronous>, transform_indices = @transform_11, window_bounds = array<i64: 16, 40>}, {pipeline_mode = #tpu.pipeline_mode<synchronous>, transform_indices = @transform_12, window_bounds = array<i64: 16, 16>}, {transform_indices = @transform_13, window_bounds = array<i64: 1, 16, 256>}]} {
    %c0 = arith.constant 0 : index
    %c0_0 = arith.constant 0 : index
    %c0_1 = arith.constant 0 : index
    %0 = vector.load %arg1[%c0, %c0_0, %c0_1] : memref<1x328x1xf32, #tpu.memory_space<vmem>>, vector<1x328x1xf32>
    %1 = vector.shape_cast %0 : vector<1x328x1xf32> to vector<328x1xf32>
    %2 = vector.shape_cast %1 : vector<328x1xf32> to vector<328x1xf32>
    %3 = vector.broadcast %2 : vector<328x1xf32> to vector<328x64xf32>
    %cst = arith.constant 0.000000e+00 : f32
    %4 = vector.broadcast %cst : f32 to vector<24x64xf32>
    %5 = tpu.concatenate %4, %3, %4 in 0 : vector<24x64xf32>, vector<328x64xf32>, vector<24x64xf32> -> vector<376x64xf32>
    %c0_2 = arith.constant 0 : index
    %c0_3 = arith.constant 0 : index
    %6 = vector.load %arg2[%c0_2, %c0_3] : memref<9x64xf32, #tpu.memory_space<vmem>>, vector<9x64xf32>
    %7 = vector.extract_strided_slice %5 {offsets = [5, 0], sizes = [328, 64], strides = [1, 1]} : vector<376x64xf32> to vector<328x64xf32>
    %8 = vector.extract_strided_slice %6 {offsets = [0, 0], sizes = [1, 64], strides = [1, 1]} : vector<9x64xf32> to vector<1x64xf32>
    %9 = vector.broadcast %8 : vector<1x64xf32> to vector<328x64xf32>
    %10 = arith.mulf %7, %9 : vector<328x64xf32>
    %11 = vector.extract_strided_slice %5 {offsets = [6, 0], sizes = [328, 64], strides = [1, 1]} : vector<376x64xf32> to vector<328x64xf32>
    %12 = vector.extract_strided_slice %6 {offsets = [1, 0], sizes = [1, 64], strides = [1, 1]} : vector<9x64xf32> to vector<1x64xf32>
    %13 = vector.broadcast %12 : vector<1x64xf32> to vector<328x64xf32>
    %14 = arith.mulf %11, %13 : vector<328x64xf32>
    %15 = arith.addf %10, %14 : vector<328x64xf32>
    %16 = vector.extract_strided_slice %5 {offsets = [7, 0], sizes = [328, 64], strides = [1, 1]} : vector<376x64xf32> to vector<328x64xf32>
    %17 = vector.extract_strided_slice %6 {offsets = [2, 0], sizes = [1, 64], strides = [1, 1]} : vector<9x64xf32> to vector<1x64xf32>
    %18 = vector.broadcast %17 : vector<1x64xf32> to vector<328x64xf32>
    %19 = arith.mulf %16, %18 : vector<328x64xf32>
    %20 = arith.addf %15, %19 : vector<328x64xf32>
    %21 = vector.extract_strided_slice %5 {offsets = [23, 0], sizes = [328, 64], strides = [1, 1]} : vector<376x64xf32> to vector<328x64xf32>
    %22 = vector.extract_strided_slice %6 {offsets = [3, 0], sizes = [1, 64], strides = [1, 1]} : vector<9x64xf32> to vector<1x64xf32>
    %23 = vector.broadcast %22 : vector<1x64xf32> to vector<328x64xf32>
    %24 = arith.mulf %21, %23 : vector<328x64xf32>
    %25 = arith.addf %20, %24 : vector<328x64xf32>
    %26 = vector.extract_strided_slice %5 {offsets = [24, 0], sizes = [328, 64], strides = [1, 1]} : vector<376x64xf32> to vector<328x64xf32>
    %27 = vector.extract_strided_slice %6 {offsets = [4, 0], sizes = [1, 64], strides = [1, 1]} : vector<9x64xf32> to vector<1x64xf32>
    %28 = vector.broadcast %27 : vector<1x64xf32> to vector<328x64xf32>
    %29 = arith.mulf %26, %28 : vector<328x64xf32>
    %30 = arith.addf %25, %29 : vector<328x64xf32>
    %31 = vector.extract_strided_slice %5 {offsets = [25, 0], sizes = [328, 64], strides = [1, 1]} : vector<376x64xf32> to vector<328x64xf32>
    %32 = vector.extract_strided_slice %6 {offsets = [5, 0], sizes = [1, 64], strides = [1, 1]} : vector<9x64xf32> to vector<1x64xf32>
    %33 = vector.broadcast %32 : vector<1x64xf32> to vector<328x64xf32>
    %34 = arith.mulf %31, %33 : vector<328x64xf32>
    %35 = arith.addf %30, %34 : vector<328x64xf32>
    %36 = vector.extract_strided_slice %5 {offsets = [41, 0], sizes = [328, 64], strides = [1, 1]} : vector<376x64xf32> to vector<328x64xf32>
    %37 = vector.extract_strided_slice %6 {offsets = [6, 0], sizes = [1, 64], strides = [1, 1]} : vector<9x64xf32> to vector<1x64xf32>
    %38 = vector.broadcast %37 : vector<1x64xf32> to vector<328x64xf32>
    %39 = arith.mulf %36, %38 : vector<328x64xf32>
    %40 = arith.addf %35, %39 : vector<328x64xf32>
    %41 = vector.extract_strided_slice %5 {offsets = [42, 0], sizes = [328, 64], strides = [1, 1]} : vector<376x64xf32> to vector<328x64xf32>
    %42 = vector.extract_strided_slice %6 {offsets = [7, 0], sizes = [1, 64], strides = [1, 1]} : vector<9x64xf32> to vector<1x64xf32>
    %43 = vector.broadcast %42 : vector<1x64xf32> to vector<328x64xf32>
    %44 = arith.mulf %41, %43 : vector<328x64xf32>
    %45 = arith.addf %40, %44 : vector<328x64xf32>
    %46 = vector.extract_strided_slice %5 {offsets = [43, 0], sizes = [328, 64], strides = [1, 1]} : vector<376x64xf32> to vector<328x64xf32>
    %47 = vector.extract_strided_slice %6 {offsets = [8, 0], sizes = [1, 64], strides = [1, 1]} : vector<9x64xf32> to vector<1x64xf32>
    %48 = vector.broadcast %47 : vector<1x64xf32> to vector<328x64xf32>
    %49 = arith.mulf %46, %48 : vector<328x64xf32>
    %50 = arith.addf %45, %49 : vector<328x64xf32>
    %c0_4 = arith.constant 0 : index
    %c0_5 = arith.constant 0 : index
    %51 = vector.load %arg3[%c0_4, %c0_5] : memref<1x64xf32, #tpu.memory_space<vmem>>, vector<1x64xf32>
    %52 = vector.broadcast %51 : vector<1x64xf32> to vector<328x64xf32>
    %53 = arith.addf %50, %52 : vector<328x64xf32>
    %cst_6 = arith.constant 0.000000e+00 : f32
    %54 = vector.broadcast %cst_6 : f32 to vector<328x64xf32>
    %55 = arith.maximumf %53, %54 : vector<328x64xf32>
    %c0_7 = arith.constant 0 : index
    %c0_8 = arith.constant 0 : index
    %56 = vector.load %arg10[%c0_7, %c0_8] : memref<104x328xbf16, #tpu.memory_space<vmem>>, vector<104x328xbf16>
    %57 = arith.truncf %55 : vector<328x64xf32> to vector<328x64xbf16>
    %cst_9 = arith.constant dense<0.000000e+00> : vector<104x64xf32>
    %58 = tpu.matmul %56, %57, %cst_9 {dimension_numbers = #tpu.dot_dimension_numbers<[1], [0], [0], [1], [0, 0, 1, 1], [], []>} : vector<104x328xbf16>, vector<328x64xbf16>, vector<104x64xf32> -> vector<104x64xf32>
    %cst_10 = arith.constant 0.000000e+00 : f32
    %59 = vector.broadcast %cst_10 : f32 to vector<16x64xf32>
    %60 = tpu.concatenate %59, %58, %59 in 0 : vector<16x64xf32>, vector<104x64xf32>, vector<16x64xf32> -> vector<136x64xf32>
    %61 = vector.extract_strided_slice %60 {offsets = [5, 0], sizes = [104, 64], strides = [1, 1]} : vector<136x64xf32> to vector<104x64xf32>
    %62 = arith.truncf %61 : vector<104x64xf32> to vector<104x64xbf16>
    %c0_11 = arith.constant 0 : index
    %c0_12 = arith.constant 0 : index
    %c0_13 = arith.constant 0 : index
    %63 = vector.load %arg4[%c0_11, %c0_12, %c0_13] : memref<9x64x128xbf16, #tpu.memory_space<vmem>>, vector<1x64x128xbf16>
    %64 = vector.shape_cast %63 : vector<1x64x128xbf16> to vector<64x128xbf16>
    %cst_14 = arith.constant dense<0.000000e+00> : vector<104x128xf32>
    %65 = tpu.matmul %62, %64, %cst_14 {dimension_numbers = #tpu.dot_dimension_numbers<[1], [0], [0], [1], [0, 0, 1, 1], [], []>} : vector<104x64xbf16>, vector<64x128xbf16>, vector<104x128xf32> -> vector<104x128xf32>
    %66 = vector.extract_strided_slice %60 {offsets = [6, 0], sizes = [104, 64], strides = [1, 1]} : vector<136x64xf32> to vector<104x64xf32>
    %67 = arith.truncf %66 : vector<104x64xf32> to vector<104x64xbf16>
    %c1 = arith.constant 1 : index
    %c0_15 = arith.constant 0 : index
    %c0_16 = arith.constant 0 : index
    %68 = vector.load %arg4[%c1, %c0_15, %c0_16] : memref<9x64x128xbf16, #tpu.memory_space<vmem>>, vector<1x64x128xbf16>
    %69 = vector.shape_cast %68 : vector<1x64x128xbf16> to vector<64x128xbf16>
    %cst_17 = arith.constant dense<0.000000e+00> : vector<104x128xf32>
    %70 = tpu.matmul %67, %69, %cst_17 {dimension_numbers = #tpu.dot_dimension_numbers<[1], [0], [0], [1], [0, 0, 1, 1], [], []>} : vector<104x64xbf16>, vector<64x128xbf16>, vector<104x128xf32> -> vector<104x128xf32>
    %71 = arith.addf %65, %70 : vector<104x128xf32>
    %72 = vector.extract_strided_slice %60 {offsets = [7, 0], sizes = [104, 64], strides = [1, 1]} : vector<136x64xf32> to vector<104x64xf32>
    %73 = arith.truncf %72 : vector<104x64xf32> to vector<104x64xbf16>
    %c2 = arith.constant 2 : index
    %c0_18 = arith.constant 0 : index
    %c0_19 = arith.constant 0 : index
    %74 = vector.load %arg4[%c2, %c0_18, %c0_19] : memref<9x64x128xbf16, #tpu.memory_space<vmem>>, vector<1x64x128xbf16>
    %75 = vector.shape_cast %74 : vector<1x64x128xbf16> to vector<64x128xbf16>
    %cst_20 = arith.constant dense<0.000000e+00> : vector<104x128xf32>
    %76 = tpu.matmul %73, %75, %cst_20 {dimension_numbers = #tpu.dot_dimension_numbers<[1], [0], [0], [1], [0, 0, 1, 1], [], []>} : vector<104x64xbf16>, vector<64x128xbf16>, vector<104x128xf32> -> vector<104x128xf32>
    %77 = arith.addf %71, %76 : vector<104x128xf32>
    %78 = vector.extract_strided_slice %60 {offsets = [15, 0], sizes = [104, 64], strides = [1, 1]} : vector<136x64xf32> to vector<104x64xf32>
    %79 = arith.truncf %78 : vector<104x64xf32> to vector<104x64xbf16>
    %c3 = arith.constant 3 : index
    %c0_21 = arith.constant 0 : index
    %c0_22 = arith.constant 0 : index
    %80 = vector.load %arg4[%c3, %c0_21, %c0_22] : memref<9x64x128xbf16, #tpu.memory_space<vmem>>, vector<1x64x128xbf16>
    %81 = vector.shape_cast %80 : vector<1x64x128xbf16> to vector<64x128xbf16>
    %cst_23 = arith.constant dense<0.000000e+00> : vector<104x128xf32>
    %82 = tpu.matmul %79, %81, %cst_23 {dimension_numbers = #tpu.dot_dimension_numbers<[1], [0], [0], [1], [0, 0, 1, 1], [], []>} : vector<104x64xbf16>, vector<64x128xbf16>, vector<104x128xf32> -> vector<104x128xf32>
    %83 = arith.addf %77, %82 : vector<104x128xf32>
    %84 = vector.extract_strided_slice %60 {offsets = [16, 0], sizes = [104, 64], strides = [1, 1]} : vector<136x64xf32> to vector<104x64xf32>
    %85 = arith.truncf %84 : vector<104x64xf32> to vector<104x64xbf16>
    %c4 = arith.constant 4 : index
    %c0_24 = arith.constant 0 : index
    %c0_25 = arith.constant 0 : index
    %86 = vector.load %arg4[%c4, %c0_24, %c0_25] : memref<9x64x128xbf16, #tpu.memory_space<vmem>>, vector<1x64x128xbf16>
    %87 = vector.shape_cast %86 : vector<1x64x128xbf16> to vector<64x128xbf16>
    %cst_26 = arith.constant dense<0.000000e+00> : vector<104x128xf32>
    %88 = tpu.matmul %85, %87, %cst_26 {dimension_numbers = #tpu.dot_dimension_numbers<[1], [0], [0], [1], [0, 0, 1, 1], [], []>} : vector<104x64xbf16>, vector<64x128xbf16>, vector<104x128xf32> -> vector<104x128xf32>
    %89 = arith.addf %83, %88 : vector<104x128xf32>
    %90 = vector.extract_strided_slice %60 {offsets = [17, 0], sizes = [104, 64], strides = [1, 1]} : vector<136x64xf32> to vector<104x64xf32>
    %91 = arith.truncf %90 : vector<104x64xf32> to vector<104x64xbf16>
    %c5 = arith.constant 5 : index
    %c0_27 = arith.constant 0 : index
    %c0_28 = arith.constant 0 : index
    %92 = vector.load %arg4[%c5, %c0_27, %c0_28] : memref<9x64x128xbf16, #tpu.memory_space<vmem>>, vector<1x64x128xbf16>
    %93 = vector.shape_cast %92 : vector<1x64x128xbf16> to vector<64x128xbf16>
    %cst_29 = arith.constant dense<0.000000e+00> : vector<104x128xf32>
    %94 = tpu.matmul %91, %93, %cst_29 {dimension_numbers = #tpu.dot_dimension_numbers<[1], [0], [0], [1], [0, 0, 1, 1], [], []>} : vector<104x64xbf16>, vector<64x128xbf16>, vector<104x128xf32> -> vector<104x128xf32>
    %95 = arith.addf %89, %94 : vector<104x128xf32>
    %96 = vector.extract_strided_slice %60 {offsets = [25, 0], sizes = [104, 64], strides = [1, 1]} : vector<136x64xf32> to vector<104x64xf32>
    %97 = arith.truncf %96 : vector<104x64xf32> to vector<104x64xbf16>
    %c6 = arith.constant 6 : index
    %c0_30 = arith.constant 0 : index
    %c0_31 = arith.constant 0 : index
    %98 = vector.load %arg4[%c6, %c0_30, %c0_31] : memref<9x64x128xbf16, #tpu.memory_space<vmem>>, vector<1x64x128xbf16>
    %99 = vector.shape_cast %98 : vector<1x64x128xbf16> to vector<64x128xbf16>
    %cst_32 = arith.constant dense<0.000000e+00> : vector<104x128xf32>
    %100 = tpu.matmul %97, %99, %cst_32 {dimension_numbers = #tpu.dot_dimension_numbers<[1], [0], [0], [1], [0, 0, 1, 1], [], []>} : vector<104x64xbf16>, vector<64x128xbf16>, vector<104x128xf32> -> vector<104x128xf32>
    %101 = arith.addf %95, %100 : vector<104x128xf32>
    %102 = vector.extract_strided_slice %60 {offsets = [26, 0], sizes = [104, 64], strides = [1, 1]} : vector<136x64xf32> to vector<104x64xf32>
    %103 = arith.truncf %102 : vector<104x64xf32> to vector<104x64xbf16>
    %c7 = arith.constant 7 : index
    %c0_33 = arith.constant 0 : index
    %c0_34 = arith.constant 0 : index
    %104 = vector.load %arg4[%c7, %c0_33, %c0_34] : memref<9x64x128xbf16, #tpu.memory_space<vmem>>, vector<1x64x128xbf16>
    %105 = vector.shape_cast %104 : vector<1x64x128xbf16> to vector<64x128xbf16>
    %cst_35 = arith.constant dense<0.000000e+00> : vector<104x128xf32>
    %106 = tpu.matmul %103, %105, %cst_35 {dimension_numbers = #tpu.dot_dimension_numbers<[1], [0], [0], [1], [0, 0, 1, 1], [], []>} : vector<104x64xbf16>, vector<64x128xbf16>, vector<104x128xf32> -> vector<104x128xf32>
    %107 = arith.addf %101, %106 : vector<104x128xf32>
    %108 = vector.extract_strided_slice %60 {offsets = [27, 0], sizes = [104, 64], strides = [1, 1]} : vector<136x64xf32> to vector<104x64xf32>
    %109 = arith.truncf %108 : vector<104x64xf32> to vector<104x64xbf16>
    %c8 = arith.constant 8 : index
    %c0_36 = arith.constant 0 : index
    %c0_37 = arith.constant 0 : index
    %110 = vector.load %arg4[%c8, %c0_36, %c0_37] : memref<9x64x128xbf16, #tpu.memory_space<vmem>>, vector<1x64x128xbf16>
    %111 = vector.shape_cast %110 : vector<1x64x128xbf16> to vector<64x128xbf16>
    %cst_38 = arith.constant dense<0.000000e+00> : vector<104x128xf32>
    %112 = tpu.matmul %109, %111, %cst_38 {dimension_numbers = #tpu.dot_dimension_numbers<[1], [0], [0], [1], [0, 0, 1, 1], [], []>} : vector<104x64xbf16>, vector<64x128xbf16>, vector<104x128xf32> -> vector<104x128xf32>
    %113 = arith.addf %107, %112 : vector<104x128xf32>
    %c0_39 = arith.constant 0 : index
    %c0_40 = arith.constant 0 : index
    %114 = vector.load %arg5[%c0_39, %c0_40] : memref<1x128xf32, #tpu.memory_space<vmem>>, vector<1x128xf32>
    %115 = vector.broadcast %114 : vector<1x128xf32> to vector<104x128xf32>
    %116 = arith.addf %113, %115 : vector<104x128xf32>
    %cst_41 = arith.constant 0.000000e+00 : f32
    %117 = vector.broadcast %cst_41 : f32 to vector<104x128xf32>
    %118 = arith.maximumf %116, %117 : vector<104x128xf32>
    %c0_42 = arith.constant 0 : index
    %c0_43 = arith.constant 0 : index
    %119 = vector.load %arg11[%c0_42, %c0_43] : memref<40x104xbf16, #tpu.memory_space<vmem>>, vector<40x104xbf16>
    %120 = arith.truncf %118 : vector<104x128xf32> to vector<104x128xbf16>
    %cst_44 = arith.constant dense<0.000000e+00> : vector<40x128xf32>
    %121 = tpu.matmul %119, %120, %cst_44 {dimension_numbers = #tpu.dot_dimension_numbers<[1], [0], [0], [1], [0, 0, 1, 1], [], []>} : vector<40x104xbf16>, vector<104x128xbf16>, vector<40x128xf32> -> vector<40x128xf32>
    %cst_45 = arith.constant 0.000000e+00 : f32
    %122 = vector.broadcast %cst_45 : f32 to vector<8x128xf32>
    %123 = tpu.concatenate %122, %121, %122 in 0 : vector<8x128xf32>, vector<40x128xf32>, vector<8x128xf32> -> vector<56x128xf32>
    %124 = vector.extract_strided_slice %123 {offsets = [1, 0], sizes = [40, 128], strides = [1, 1]} : vector<56x128xf32> to vector<40x128xf32>
    %125 = arith.truncf %124 : vector<40x128xf32> to vector<40x128xbf16>
    %c0_46 = arith.constant 0 : index
    %c0_47 = arith.constant 0 : index
    %c0_48 = arith.constant 0 : index
    %126 = vector.load %arg6[%c0_46, %c0_47, %c0_48] : memref<9x128x256xbf16, #tpu.memory_space<vmem>>, vector<1x128x256xbf16>
    %127 = vector.shape_cast %126 : vector<1x128x256xbf16> to vector<128x256xbf16>
    %cst_49 = arith.constant dense<0.000000e+00> : vector<40x256xf32>
    %128 = tpu.matmul %125, %127, %cst_49 {dimension_numbers = #tpu.dot_dimension_numbers<[1], [0], [0], [1], [0, 0, 1, 1], [], []>} : vector<40x128xbf16>, vector<128x256xbf16>, vector<40x256xf32> -> vector<40x256xf32>
    %129 = vector.extract_strided_slice %123 {offsets = [2, 0], sizes = [40, 128], strides = [1, 1]} : vector<56x128xf32> to vector<40x128xf32>
    %130 = arith.truncf %129 : vector<40x128xf32> to vector<40x128xbf16>
    %c1_50 = arith.constant 1 : index
    %c0_51 = arith.constant 0 : index
    %c0_52 = arith.constant 0 : index
    %131 = vector.load %arg6[%c1_50, %c0_51, %c0_52] : memref<9x128x256xbf16, #tpu.memory_space<vmem>>, vector<1x128x256xbf16>
    %132 = vector.shape_cast %131 : vector<1x128x256xbf16> to vector<128x256xbf16>
    %cst_53 = arith.constant dense<0.000000e+00> : vector<40x256xf32>
    %133 = tpu.matmul %130, %132, %cst_53 {dimension_numbers = #tpu.dot_dimension_numbers<[1], [0], [0], [1], [0, 0, 1, 1], [], []>} : vector<40x128xbf16>, vector<128x256xbf16>, vector<40x256xf32> -> vector<40x256xf32>
    %134 = arith.addf %128, %133 : vector<40x256xf32>
    %135 = vector.extract_strided_slice %123 {offsets = [3, 0], sizes = [40, 128], strides = [1, 1]} : vector<56x128xf32> to vector<40x128xf32>
    %136 = arith.truncf %135 : vector<40x128xf32> to vector<40x128xbf16>
    %c2_54 = arith.constant 2 : index
    %c0_55 = arith.constant 0 : index
    %c0_56 = arith.constant 0 : index
    %137 = vector.load %arg6[%c2_54, %c0_55, %c0_56] : memref<9x128x256xbf16, #tpu.memory_space<vmem>>, vector<1x128x256xbf16>
    %138 = vector.shape_cast %137 : vector<1x128x256xbf16> to vector<128x256xbf16>
    %cst_57 = arith.constant dense<0.000000e+00> : vector<40x256xf32>
    %139 = tpu.matmul %136, %138, %cst_57 {dimension_numbers = #tpu.dot_dimension_numbers<[1], [0], [0], [1], [0, 0, 1, 1], [], []>} : vector<40x128xbf16>, vector<128x256xbf16>, vector<40x256xf32> -> vector<40x256xf32>
    %140 = arith.addf %134, %139 : vector<40x256xf32>
    %141 = vector.extract_strided_slice %123 {offsets = [7, 0], sizes = [40, 128], strides = [1, 1]} : vector<56x128xf32> to vector<40x128xf32>
    %142 = arith.truncf %141 : vector<40x128xf32> to vector<40x128xbf16>
    %c3_58 = arith.constant 3 : index
    %c0_59 = arith.constant 0 : index
    %c0_60 = arith.constant 0 : index
    %143 = vector.load %arg6[%c3_58, %c0_59, %c0_60] : memref<9x128x256xbf16, #tpu.memory_space<vmem>>, vector<1x128x256xbf16>
    %144 = vector.shape_cast %143 : vector<1x128x256xbf16> to vector<128x256xbf16>
    %cst_61 = arith.constant dense<0.000000e+00> : vector<40x256xf32>
    %145 = tpu.matmul %142, %144, %cst_61 {dimension_numbers = #tpu.dot_dimension_numbers<[1], [0], [0], [1], [0, 0, 1, 1], [], []>} : vector<40x128xbf16>, vector<128x256xbf16>, vector<40x256xf32> -> vector<40x256xf32>
    %146 = arith.addf %140, %145 : vector<40x256xf32>
    %147 = vector.extract_strided_slice %123 {offsets = [8, 0], sizes = [40, 128], strides = [1, 1]} : vector<56x128xf32> to vector<40x128xf32>
    %148 = arith.truncf %147 : vector<40x128xf32> to vector<40x128xbf16>
    %c4_62 = arith.constant 4 : index
    %c0_63 = arith.constant 0 : index
    %c0_64 = arith.constant 0 : index
    %149 = vector.load %arg6[%c4_62, %c0_63, %c0_64] : memref<9x128x256xbf16, #tpu.memory_space<vmem>>, vector<1x128x256xbf16>
    %150 = vector.shape_cast %149 : vector<1x128x256xbf16> to vector<128x256xbf16>
    %cst_65 = arith.constant dense<0.000000e+00> : vector<40x256xf32>
    %151 = tpu.matmul %148, %150, %cst_65 {dimension_numbers = #tpu.dot_dimension_numbers<[1], [0], [0], [1], [0, 0, 1, 1], [], []>} : vector<40x128xbf16>, vector<128x256xbf16>, vector<40x256xf32> -> vector<40x256xf32>
    %152 = arith.addf %146, %151 : vector<40x256xf32>
    %153 = vector.extract_strided_slice %123 {offsets = [9, 0], sizes = [40, 128], strides = [1, 1]} : vector<56x128xf32> to vector<40x128xf32>
    %154 = arith.truncf %153 : vector<40x128xf32> to vector<40x128xbf16>
    %c5_66 = arith.constant 5 : index
    %c0_67 = arith.constant 0 : index
    %c0_68 = arith.constant 0 : index
    %155 = vector.load %arg6[%c5_66, %c0_67, %c0_68] : memref<9x128x256xbf16, #tpu.memory_space<vmem>>, vector<1x128x256xbf16>
    %156 = vector.shape_cast %155 : vector<1x128x256xbf16> to vector<128x256xbf16>
    %cst_69 = arith.constant dense<0.000000e+00> : vector<40x256xf32>
    %157 = tpu.matmul %154, %156, %cst_69 {dimension_numbers = #tpu.dot_dimension_numbers<[1], [0], [0], [1], [0, 0, 1, 1], [], []>} : vector<40x128xbf16>, vector<128x256xbf16>, vector<40x256xf32> -> vector<40x256xf32>
    %158 = arith.addf %152, %157 : vector<40x256xf32>
    %159 = vector.extract_strided_slice %123 {offsets = [13, 0], sizes = [40, 128], strides = [1, 1]} : vector<56x128xf32> to vector<40x128xf32>
    %160 = arith.truncf %159 : vector<40x128xf32> to vector<40x128xbf16>
    %c6_70 = arith.constant 6 : index
    %c0_71 = arith.constant 0 : index
    %c0_72 = arith.constant 0 : index
    %161 = vector.load %arg6[%c6_70, %c0_71, %c0_72] : memref<9x128x256xbf16, #tpu.memory_space<vmem>>, vector<1x128x256xbf16>
    %162 = vector.shape_cast %161 : vector<1x128x256xbf16> to vector<128x256xbf16>
    %cst_73 = arith.constant dense<0.000000e+00> : vector<40x256xf32>
    %163 = tpu.matmul %160, %162, %cst_73 {dimension_numbers = #tpu.dot_dimension_numbers<[1], [0], [0], [1], [0, 0, 1, 1], [], []>} : vector<40x128xbf16>, vector<128x256xbf16>, vector<40x256xf32> -> vector<40x256xf32>
    %164 = arith.addf %158, %163 : vector<40x256xf32>
    %165 = vector.extract_strided_slice %123 {offsets = [14, 0], sizes = [40, 128], strides = [1, 1]} : vector<56x128xf32> to vector<40x128xf32>
    %166 = arith.truncf %165 : vector<40x128xf32> to vector<40x128xbf16>
    %c7_74 = arith.constant 7 : index
    %c0_75 = arith.constant 0 : index
    %c0_76 = arith.constant 0 : index
    %167 = vector.load %arg6[%c7_74, %c0_75, %c0_76] : memref<9x128x256xbf16, #tpu.memory_space<vmem>>, vector<1x128x256xbf16>
    %168 = vector.shape_cast %167 : vector<1x128x256xbf16> to vector<128x256xbf16>
    %cst_77 = arith.constant dense<0.000000e+00> : vector<40x256xf32>
    %169 = tpu.matmul %166, %168, %cst_77 {dimension_numbers = #tpu.dot_dimension_numbers<[1], [0], [0], [1], [0, 0, 1, 1], [], []>} : vector<40x128xbf16>, vector<128x256xbf16>, vector<40x256xf32> -> vector<40x256xf32>
    %170 = arith.addf %164, %169 : vector<40x256xf32>
    %171 = vector.extract_strided_slice %123 {offsets = [15, 0], sizes = [40, 128], strides = [1, 1]} : vector<56x128xf32> to vector<40x128xf32>
    %172 = arith.truncf %171 : vector<40x128xf32> to vector<40x128xbf16>
    %c8_78 = arith.constant 8 : index
    %c0_79 = arith.constant 0 : index
    %c0_80 = arith.constant 0 : index
    %173 = vector.load %arg6[%c8_78, %c0_79, %c0_80] : memref<9x128x256xbf16, #tpu.memory_space<vmem>>, vector<1x128x256xbf16>
    %174 = vector.shape_cast %173 : vector<1x128x256xbf16> to vector<128x256xbf16>
    %cst_81 = arith.constant dense<0.000000e+00> : vector<40x256xf32>
    %175 = tpu.matmul %172, %174, %cst_81 {dimension_numbers = #tpu.dot_dimension_numbers<[1], [0], [0], [1], [0, 0, 1, 1], [], []>} : vector<40x128xbf16>, vector<128x256xbf16>, vector<40x256xf32> -> vector<40x256xf32>
    %176 = arith.addf %170, %175 : vector<40x256xf32>
    %c0_82 = arith.constant 0 : index
    %c0_83 = arith.constant 0 : index
    %177 = vector.load %arg7[%c0_82, %c0_83] : memref<1x256xf32, #tpu.memory_space<vmem>>, vector<1x256xf32>
    %178 = vector.broadcast %177 : vector<1x256xf32> to vector<40x256xf32>
    %179 = arith.addf %176, %178 : vector<40x256xf32>
    %cst_84 = arith.constant 0.000000e+00 : f32
    %180 = vector.broadcast %cst_84 : f32 to vector<40x256xf32>
    %181 = arith.maximumf %179, %180 : vector<40x256xf32>
    %c0_85 = arith.constant 0 : index
    %c0_86 = arith.constant 0 : index
    %182 = vector.load %arg12[%c0_85, %c0_86] : memref<16x40xbf16, #tpu.memory_space<vmem>>, vector<16x40xbf16>
    %183 = arith.truncf %181 : vector<40x256xf32> to vector<40x256xbf16>
    %cst_87 = arith.constant dense<0.000000e+00> : vector<16x256xf32>
    %184 = tpu.matmul %182, %183, %cst_87 {dimension_numbers = #tpu.dot_dimension_numbers<[1], [0], [0], [1], [0, 0, 1, 1], [], []>} : vector<16x40xbf16>, vector<40x256xbf16>, vector<16x256xf32> -> vector<16x256xf32>
    %cst_88 = arith.constant 0.000000e+00 : f32
    %185 = vector.broadcast %cst_88 : f32 to vector<8x256xf32>
    %186 = tpu.concatenate %185, %184, %185 in 0 : vector<8x256xf32>, vector<16x256xf32>, vector<8x256xf32> -> vector<32x256xf32>
    %187 = vector.extract_strided_slice %186 {offsets = [3, 0], sizes = [16, 256], strides = [1, 1]} : vector<32x256xf32> to vector<16x256xf32>
    %188 = arith.truncf %187 : vector<16x256xf32> to vector<16x256xbf16>
    %c0_89 = arith.constant 0 : index
    %c0_90 = arith.constant 0 : index
    %c0_91 = arith.constant 0 : index
    %189 = vector.load %arg8[%c0_89, %c0_90, %c0_91] : memref<9x256x256xbf16, #tpu.memory_space<vmem>>, vector<1x256x256xbf16>
    %190 = vector.shape_cast %189 : vector<1x256x256xbf16> to vector<256x256xbf16>
    %cst_92 = arith.constant dense<0.000000e+00> : vector<16x256xf32>
    %191 = tpu.matmul %188, %190, %cst_92 {dimension_numbers = #tpu.dot_dimension_numbers<[1], [0], [0], [1], [0, 0, 1, 1], [], []>} : vector<16x256xbf16>, vector<256x256xbf16>, vector<16x256xf32> -> vector<16x256xf32>
    %192 = vector.extract_strided_slice %186 {offsets = [4, 0], sizes = [16, 256], strides = [1, 1]} : vector<32x256xf32> to vector<16x256xf32>
    %193 = arith.truncf %192 : vector<16x256xf32> to vector<16x256xbf16>
    %c1_93 = arith.constant 1 : index
    %c0_94 = arith.constant 0 : index
    %c0_95 = arith.constant 0 : index
    %194 = vector.load %arg8[%c1_93, %c0_94, %c0_95] : memref<9x256x256xbf16, #tpu.memory_space<vmem>>, vector<1x256x256xbf16>
    %195 = vector.shape_cast %194 : vector<1x256x256xbf16> to vector<256x256xbf16>
    %cst_96 = arith.constant dense<0.000000e+00> : vector<16x256xf32>
    %196 = tpu.matmul %193, %195, %cst_96 {dimension_numbers = #tpu.dot_dimension_numbers<[1], [0], [0], [1], [0, 0, 1, 1], [], []>} : vector<16x256xbf16>, vector<256x256xbf16>, vector<16x256xf32> -> vector<16x256xf32>
    %197 = arith.addf %191, %196 : vector<16x256xf32>
    %198 = vector.extract_strided_slice %186 {offsets = [5, 0], sizes = [16, 256], strides = [1, 1]} : vector<32x256xf32> to vector<16x256xf32>
    %199 = arith.truncf %198 : vector<16x256xf32> to vector<16x256xbf16>
    %c2_97 = arith.constant 2 : index
    %c0_98 = arith.constant 0 : index
    %c0_99 = arith.constant 0 : index
    %200 = vector.load %arg8[%c2_97, %c0_98, %c0_99] : memref<9x256x256xbf16, #tpu.memory_space<vmem>>, vector<1x256x256xbf16>
    %201 = vector.shape_cast %200 : vector<1x256x256xbf16> to vector<256x256xbf16>
    %cst_100 = arith.constant dense<0.000000e+00> : vector<16x256xf32>
    %202 = tpu.matmul %199, %201, %cst_100 {dimension_numbers = #tpu.dot_dimension_numbers<[1], [0], [0], [1], [0, 0, 1, 1], [], []>} : vector<16x256xbf16>, vector<256x256xbf16>, vector<16x256xf32> -> vector<16x256xf32>
    %203 = arith.addf %197, %202 : vector<16x256xf32>
    %204 = vector.extract_strided_slice %186 {offsets = [7, 0], sizes = [16, 256], strides = [1, 1]} : vector<32x256xf32> to vector<16x256xf32>
    %205 = arith.truncf %204 : vector<16x256xf32> to vector<16x256xbf16>
    %c3_101 = arith.constant 3 : index
    %c0_102 = arith.constant 0 : index
    %c0_103 = arith.constant 0 : index
    %206 = vector.load %arg8[%c3_101, %c0_102, %c0_103] : memref<9x256x256xbf16, #tpu.memory_space<vmem>>, vector<1x256x256xbf16>
    %207 = vector.shape_cast %206 : vector<1x256x256xbf16> to vector<256x256xbf16>
    %cst_104 = arith.constant dense<0.000000e+00> : vector<16x256xf32>
    %208 = tpu.matmul %205, %207, %cst_104 {dimension_numbers = #tpu.dot_dimension_numbers<[1], [0], [0], [1], [0, 0, 1, 1], [], []>} : vector<16x256xbf16>, vector<256x256xbf16>, vector<16x256xf32> -> vector<16x256xf32>
    %209 = arith.addf %203, %208 : vector<16x256xf32>
    %210 = vector.extract_strided_slice %186 {offsets = [8, 0], sizes = [16, 256], strides = [1, 1]} : vector<32x256xf32> to vector<16x256xf32>
    %211 = arith.truncf %210 : vector<16x256xf32> to vector<16x256xbf16>
    %c4_105 = arith.constant 4 : index
    %c0_106 = arith.constant 0 : index
    %c0_107 = arith.constant 0 : index
    %212 = vector.load %arg8[%c4_105, %c0_106, %c0_107] : memref<9x256x256xbf16, #tpu.memory_space<vmem>>, vector<1x256x256xbf16>
    %213 = vector.shape_cast %212 : vector<1x256x256xbf16> to vector<256x256xbf16>
    %cst_108 = arith.constant dense<0.000000e+00> : vector<16x256xf32>
    %214 = tpu.matmul %211, %213, %cst_108 {dimension_numbers = #tpu.dot_dimension_numbers<[1], [0], [0], [1], [0, 0, 1, 1], [], []>} : vector<16x256xbf16>, vector<256x256xbf16>, vector<16x256xf32> -> vector<16x256xf32>
    %215 = arith.addf %209, %214 : vector<16x256xf32>
    %216 = vector.extract_strided_slice %186 {offsets = [9, 0], sizes = [16, 256], strides = [1, 1]} : vector<32x256xf32> to vector<16x256xf32>
    %217 = arith.truncf %216 : vector<16x256xf32> to vector<16x256xbf16>
    %c5_109 = arith.constant 5 : index
    %c0_110 = arith.constant 0 : index
    %c0_111 = arith.constant 0 : index
    %218 = vector.load %arg8[%c5_109, %c0_110, %c0_111] : memref<9x256x256xbf16, #tpu.memory_space<vmem>>, vector<1x256x256xbf16>
    %219 = vector.shape_cast %218 : vector<1x256x256xbf16> to vector<256x256xbf16>
    %cst_112 = arith.constant dense<0.000000e+00> : vector<16x256xf32>
    %220 = tpu.matmul %217, %219, %cst_112 {dimension_numbers = #tpu.dot_dimension_numbers<[1], [0], [0], [1], [0, 0, 1, 1], [], []>} : vector<16x256xbf16>, vector<256x256xbf16>, vector<16x256xf32> -> vector<16x256xf32>
    %221 = arith.addf %215, %220 : vector<16x256xf32>
    %222 = vector.extract_strided_slice %186 {offsets = [11, 0], sizes = [16, 256], strides = [1, 1]} : vector<32x256xf32> to vector<16x256xf32>
    %223 = arith.truncf %222 : vector<16x256xf32> to vector<16x256xbf16>
    %c6_113 = arith.constant 6 : index
    %c0_114 = arith.constant 0 : index
    %c0_115 = arith.constant 0 : index
    %224 = vector.load %arg8[%c6_113, %c0_114, %c0_115] : memref<9x256x256xbf16, #tpu.memory_space<vmem>>, vector<1x256x256xbf16>
    %225 = vector.shape_cast %224 : vector<1x256x256xbf16> to vector<256x256xbf16>
    %cst_116 = arith.constant dense<0.000000e+00> : vector<16x256xf32>
    %226 = tpu.matmul %223, %225, %cst_116 {dimension_numbers = #tpu.dot_dimension_numbers<[1], [0], [0], [1], [0, 0, 1, 1], [], []>} : vector<16x256xbf16>, vector<256x256xbf16>, vector<16x256xf32> -> vector<16x256xf32>
    %227 = arith.addf %221, %226 : vector<16x256xf32>
    %228 = vector.extract_strided_slice %186 {offsets = [12, 0], sizes = [16, 256], strides = [1, 1]} : vector<32x256xf32> to vector<16x256xf32>
    %229 = arith.truncf %228 : vector<16x256xf32> to vector<16x256xbf16>
    %c7_117 = arith.constant 7 : index
    %c0_118 = arith.constant 0 : index
    %c0_119 = arith.constant 0 : index
    %230 = vector.load %arg8[%c7_117, %c0_118, %c0_119] : memref<9x256x256xbf16, #tpu.memory_space<vmem>>, vector<1x256x256xbf16>
    %231 = vector.shape_cast %230 : vector<1x256x256xbf16> to vector<256x256xbf16>
    %cst_120 = arith.constant dense<0.000000e+00> : vector<16x256xf32>
    %232 = tpu.matmul %229, %231, %cst_120 {dimension_numbers = #tpu.dot_dimension_numbers<[1], [0], [0], [1], [0, 0, 1, 1], [], []>} : vector<16x256xbf16>, vector<256x256xbf16>, vector<16x256xf32> -> vector<16x256xf32>
    %233 = arith.addf %227, %232 : vector<16x256xf32>
    %234 = vector.extract_strided_slice %186 {offsets = [13, 0], sizes = [16, 256], strides = [1, 1]} : vector<32x256xf32> to vector<16x256xf32>
    %235 = arith.truncf %234 : vector<16x256xf32> to vector<16x256xbf16>
    %c8_121 = arith.constant 8 : index
    %c0_122 = arith.constant 0 : index
    %c0_123 = arith.constant 0 : index
    %236 = vector.load %arg8[%c8_121, %c0_122, %c0_123] : memref<9x256x256xbf16, #tpu.memory_space<vmem>>, vector<1x256x256xbf16>
    %237 = vector.shape_cast %236 : vector<1x256x256xbf16> to vector<256x256xbf16>
    %cst_124 = arith.constant dense<0.000000e+00> : vector<16x256xf32>
    %238 = tpu.matmul %235, %237, %cst_124 {dimension_numbers = #tpu.dot_dimension_numbers<[1], [0], [0], [1], [0, 0, 1, 1], [], []>} : vector<16x256xbf16>, vector<256x256xbf16>, vector<16x256xf32> -> vector<16x256xf32>
    %239 = arith.addf %233, %238 : vector<16x256xf32>
    %c0_125 = arith.constant 0 : index
    %c0_126 = arith.constant 0 : index
    %240 = vector.load %arg9[%c0_125, %c0_126] : memref<1x256xf32, #tpu.memory_space<vmem>>, vector<1x256xf32>
    %241 = vector.broadcast %240 : vector<1x256xf32> to vector<16x256xf32>
    %242 = arith.addf %239, %241 : vector<16x256xf32>
    %cst_127 = arith.constant 0.000000e+00 : f32
    %243 = vector.broadcast %cst_127 : f32 to vector<16x256xf32>
    %244 = arith.maximumf %242, %243 : vector<16x256xf32>
    %c0_128 = arith.constant 0 : index
    %c0_129 = arith.constant 0 : index
    %245 = vector.load %arg13[%c0_128, %c0_129] : memref<16x16xbf16, #tpu.memory_space<vmem>>, vector<16x16xbf16>
    %246 = arith.truncf %244 : vector<16x256xf32> to vector<16x256xbf16>
    %cst_130 = arith.constant dense<0.000000e+00> : vector<16x256xf32>
    %247 = tpu.matmul %245, %246, %cst_130 {dimension_numbers = #tpu.dot_dimension_numbers<[1], [0], [0], [1], [0, 0, 1, 1], [], []>} : vector<16x16xbf16>, vector<16x256xbf16>, vector<16x256xf32> -> vector<16x256xf32>
    %248 = vector.shape_cast %247 : vector<16x256xf32> to vector<1x16x256xf32>
    %c0_131 = arith.constant 0 : index
    %c0_132 = arith.constant 0 : index
    %c0_133 = arith.constant 0 : index
    %249 = vector.load %arg14[%c0_131, %c0_132, %c0_133] : memref<1x16x256xf32, #tpu.memory_space<vmem>>, vector<1x16x256xf32>
    tpu.vector_store %arg14[%c0_131, %c0_132, %c0_133], %248 {strides = array<i32>} : memref<1x16x256xf32, #tpu.memory_space<vmem>>, vector<1x16x256xf32>,
    return
  }
  func.func @transform_0(%arg0: i32) -> (i32, i32, i32) {
    %c0_i32 = arith.constant 0 : i32
    %c0_i32_0 = arith.constant 0 : i32
    %c0_i32_1 = arith.constant 0 : i32
    return %arg0, %c0_i32, %c0_i32_0 : i32, i32, i32
  }
  func.func @transform_1(%arg0: i32) -> (i32, i32) {
    %c0_i32 = arith.constant 0 : i32
    %c0_i32_0 = arith.constant 0 : i32
    %c0_i32_1 = arith.constant 0 : i32
    return %c0_i32, %c0_i32_0 : i32, i32
  }
  func.func @transform_2(%arg0: i32) -> (i32, i32) {
    %c0_i32 = arith.constant 0 : i32
    %c0_i32_0 = arith.constant 0 : i32
    %c0_i32_1 = arith.constant 0 : i32
    return %c0_i32, %c0_i32_0 : i32, i32
  }
  func.func @transform_3(%arg0: i32) -> (i32, i32, i32) {
    %c0_i32 = arith.constant 0 : i32
    %c0_i32_0 = arith.constant 0 : i32
    %c0_i32_1 = arith.constant 0 : i32
    %c0_i32_2 = arith.constant 0 : i32
    return %c0_i32, %c0_i32_0, %c0_i32_1 : i32, i32, i32
  }
  func.func @transform_4(%arg0: i32) -> (i32, i32) {
    %c0_i32 = arith.constant 0 : i32
    %c0_i32_0 = arith.constant 0 : i32
    %c0_i32_1 = arith.constant 0 : i32
    return %c0_i32, %c0_i32_0 : i32, i32
  }
  func.func @transform_5(%arg0: i32) -> (i32, i32, i32) {
    %c0_i32 = arith.constant 0 : i32
    %c0_i32_0 = arith.constant 0 : i32
    %c0_i32_1 = arith.constant 0 : i32
    %c0_i32_2 = arith.constant 0 : i32
    return %c0_i32, %c0_i32_0, %c0_i32_1 : i32, i32, i32
  }
  func.func @transform_6(%arg0: i32) -> (i32, i32) {
    %c0_i32 = arith.constant 0 : i32
    %c0_i32_0 = arith.constant 0 : i32
    %c0_i32_1 = arith.constant 0 : i32
    return %c0_i32, %c0_i32_0 : i32, i32
  }
  func.func @transform_7(%arg0: i32) -> (i32, i32, i32) {
    %c0_i32 = arith.constant 0 : i32
    %c0_i32_0 = arith.constant 0 : i32
    %c0_i32_1 = arith.constant 0 : i32
    %c0_i32_2 = arith.constant 0 : i32
    return %c0_i32, %c0_i32_0, %c0_i32_1 : i32, i32, i32
  }
  func.func @transform_8(%arg0: i32) -> (i32, i32) {
    %c0_i32 = arith.constant 0 : i32
    %c0_i32_0 = arith.constant 0 : i32
    %c0_i32_1 = arith.constant 0 : i32
    return %c0_i32, %c0_i32_0 : i32, i32
  }
  func.func @transform_9(%arg0: i32) -> (i32, i32) {
    %c0_i32 = arith.constant 0 : i32
    %c0_i32_0 = arith.constant 0 : i32
    %c0_i32_1 = arith.constant 0 : i32
    return %c0_i32, %c0_i32_0 : i32, i32
  }
  func.func @transform_10(%arg0: i32) -> (i32, i32) {
    %c0_i32 = arith.constant 0 : i32
    %c0_i32_0 = arith.constant 0 : i32
    %c0_i32_1 = arith.constant 0 : i32
    return %c0_i32, %c0_i32_0 : i32, i32
  }
  func.func @transform_11(%arg0: i32) -> (i32, i32) {
    %c0_i32 = arith.constant 0 : i32
    %c0_i32_0 = arith.constant 0 : i32
    %c0_i32_1 = arith.constant 0 : i32
    return %c0_i32, %c0_i32_0 : i32, i32
  }
  func.func @transform_12(%arg0: i32) -> (i32, i32) {
    %c0_i32 = arith.constant 0 : i32
    %c0_i32_0 = arith.constant 0 : i32
    %c0_i32_1 = arith.constant 0 : i32
    return %c0_i32, %c0_i32_0 : i32, i32
  }
  func.func @transform_13(%arg0: i32) -> (i32, i32, i32) {
    %c0_i32 = arith.constant 0 : i32
    %c0_i32_0 = arith.constant 0 : i32
    %c0_i32_1 = arith.constant 0 : i32
    return %arg0, %c0_i32, %c0_i32_0 : i32, i32, i32
  }
}

</mosaic_0001>

<bundles_post_ra>
// kernel: lenet_forward.1
= control target key start
LH: loop header
LB: loop body
LE: loop exit
PB: predicated region body
PF: predicated region fallthrough
CT: control target
= control target key end

     0   :  { %s16776_s0 = inlined_call_operand.vmem [shape: f32[2,328,1], index: 0, kind: input, shape index: {}]   ;;  %s16777_s1 = inlined_call_operand.hbm [shape: f32[9,64], index: 1, kind: input, shape index: {}]   ;;  %s16778_s2 = inlined_call_operand.hbm [shape: f32[1,64], index: 2, kind: input, shape index: {}]   ;;  %s16779_s3 = inlined_call_operand.hbm [shape: bf16[9,64,128], index: 3, kind: input, shape index: {}]   ;;  %s16780_s4 = inlined_call_operand.hbm [shape: f32[1,128], index: 4, kind: input, shape index: {}]   ;;  %s16781_s5 = inlined_call_operand.hbm [shape: bf16[9,128,256], index: 5, kind: input, shape index: {}]   ;;  %s16782_s6 = inlined_call_operand.hbm [shape: f32[1,256], index: 6, kind: input, shape index: {}]   ;;  %s16783_s7 = inlined_call_operand.hbm [shape: bf16[9,256,256], index: 7, kind: input, shape index: {}]   ;;  %s16784_s8 = inlined_call_operand.hbm [shape: f32[1,256], index: 8, kind: input, shape index: {}]   ;;  %s16785_s9 = inlined_call_operand.hbm [shape: bf16[104,328], index: 9, kind: input, shape index: {}]   ;;  %s16786_s10 = inlined_call_operand.hbm [shape: bf16[40,104], index: 10, kind: input, shape index: {}]   ;;  %s16787_s11 = inlined_call_operand.hbm [shape: bf16[16,40], index: 11, kind: input, shape index: {}]   ;;  %s16788_s12 = inlined_call_operand.hbm [shape: bf16[16,16], index: 12, kind: input, shape index: {}]   ;;  %s16789_s13 = inlined_call_operand.vmem [shape: f32[2,16,256], index: 13, kind: output, shape index: {}]  }
   0x1   :  { %17211 = sst [smem:[#allocation237_spill]] %s16777_s1 }
   0x2   :  { %17212 = sst [smem:[#allocation238_spill]] %s16778_s2 }
   0x3   :  { %17213 = sst [smem:[#allocation239_spill]] %s16779_s3 }
   0x4   :  { %17214 = sst [smem:[#allocation240_spill]] %s16780_s4 }
   0x5   :  { %18 = vsyncpa [#allocation3], 0 }
   0x6   :  { %19 = vsyncpa [#allocation5], 0 }
   0x7   :  { %20 = vsyncpa [#allocation8], 0 }
   0x8   :  { %21 = vsyncpa [#allocation11], 0 }
   0x9   :  { %22 = vsyncpa [#allocation14], 0 }
   0xa   :  { %23 = vsyncpa [#allocation17], 0 }
   0xb   :  { %24 = vsyncpa [#allocation20], 0  ;;  %s12228_s25 = smov 0  }
   0xc LB: > { %s17215_s2 = sld [smem:[#allocation238_spill]]  ;;  %s12237_s29 = sadd.s32 4294967295, %s12135_s25   ;;  %s12135_s25 = sphi %s12228_s25, %s30_s25  }
   0xd   : > { %p9033_p0 = scmp.ge.s32.totalorder %s12135_s25, 1  ;;  %p339_p1 = scmp.lt.s32.totalorder %s12135_s25, 3 }
   0xe   : > { %p11679_p2 = scmp.eq.s32.totalorder %s12237_s29, 0  ;;  %s12137_s14 = smov [#allocation4]  }
   0xf   : > { %p12242_p3 = pnand %p9033_p0, %p339_p1  ;;  %s367_s15 = sshll.u32 %s12137_s14, 4  ;;  %s368_s15 = int_to_ptr.vmem [resolvable:$true] %s367_s15 }
  0x10   : > { %s17217_s4 = sld [smem:[#allocation240_spill]]  ;;  %s417_s21 = sshll.u32 %s16782_s6, 4  ;;  %s418_s21 = int_to_ptr.hbm [resolvable:$true] %s417_s21 }
  0x11   : > { %p11642_p4 = pneg %p12242_p3  ;;  %s12138_s23 = smov [#allocation7]  }
  0x12   : > { %s365_s28 = sshll.u32 %s17215_s2, 4  ;;  %s393_s24 = sshll.u32 %s12138_s23, 4  ;;  %s366_s28 = int_to_ptr.hbm [resolvable:$true] %s365_s28  ;;  %s394_s24 = int_to_ptr.vmem [resolvable:$true] %s393_s24 }
  0x13   : > { %p12256_p5 = pnand %p11679_p2, %p11642_p4  ;;  %s12139_s26 = smov [#allocation10]  }
  0x14   : > { %s419_s27 = sshll.u32 %s12139_s26, 4  ;;  %s443_s17 = sshll.u32 %s16784_s8, 4  ;;  %s420_s27 = int_to_ptr.vmem [resolvable:$true] %s419_s27  ;;  %s444_s17 = int_to_ptr.hbm [resolvable:$true] %s443_s17 }
  0x15   : > { %11648 = dma.hbm_to_vmem [thread:$0]  (!%p12256_p5), %s366_s28, 16, %s368_s15, [#allocation5]  }
  0x16   : > { %s391_s18 = sshll.u32 %s17217_s4, 4  ;;  %s12140_s19 = smov [#allocation13]   ;;  %s392_s18 = int_to_ptr.hbm [resolvable:$true] %s391_s18 }
  0x17   : > { %11654 = dma.hbm_to_vmem [thread:$0]  (!%p12256_p5), %s392_s18, 16, %s394_s24, [#allocation8]  }
  0x18   : > { %11660 = dma.hbm_to_vmem [thread:$0]  (!%p12256_p5), %s418_s21, 32, %s420_s27, [#allocation11]  }
  0x19   : > { %s445_s20 = sshll.u32 %s12140_s19, 4  ;;  %s468_s28 = sshll.u32 %s16786_s10, 4  ;;  %s446_s20 = int_to_ptr.vmem [resolvable:$true] %s445_s20  ;;  %s469_s28 = int_to_ptr.hbm [resolvable:$true] %s468_s28 }
  0x1a   : > { %11666 = dma.hbm_to_vmem [thread:$0]  (!%p12256_p5), %s444_s17, 32, %s446_s20, [#allocation14]  }
  0x1b   : > { %s12141_s15 = smov [#allocation16]   ;;  %s17219_s1 = sld [smem:[#allocation237_spill]] }
  0x1c   : > { %s470_s18 = sshll.u32 %s12141_s15, 4  ;;  %s16790_s21 = smov 64   ;;  %s471_s18 = int_to_ptr.vmem [resolvable:$true] %s470_s18 }
  0x1d   : > { %s16792_s27 = smov 4   ;;  %s12144_s2 = smov [#allocation2]  }
  0x1e   : > { %11672 = dma.hbm_to_vmem [thread:$0]  (!%p12256_p5), %s469_s28, 320, %s471_s18, [#allocation17], %s16790_s21, %s16790_s21, %s16792_s27  }
  0x1f   : > { %s352_s16 = sshll.u32 %s12144_s2, 4  ;;  %s17220_s3 = sld [smem:[#allocation239_spill]]  ;;  %s353_s16 = int_to_ptr.vmem [resolvable:$true] %s352_s16 }
  0x20   : > { %s12145_s23 = smov 128   ;;  %s12146_s15 = smov 8  }
  0x21   : > { %s350_s14 = sshll.u32 %s17219_s1, 4  ;;  %s12147_s24 = smov [#allocation6]   ;;  %s351_s14 = int_to_ptr.hbm [resolvable:$true] %s350_s14 }
  0x22   : > { %11645 = dma.hbm_to_vmem [thread:$0]  (!%p12256_p5), %s351_s14, 256, %s353_s16, [#allocation3], %s12145_s23, %s12145_s23, %s12146_s15  }
  0x23   : > { %s378_s26 = sshll.u32 %s12147_s24, 4  ;;  %s402_s28 = sshll.u32 %s16781_s5, 4  ;;  %s379_s26 = int_to_ptr.vmem [resolvable:$true] %s378_s26  ;;  %s403_s28 = int_to_ptr.hbm [resolvable:$true] %s402_s28 }
  0x24   : > { %s428_s17 = sshll.u32 %s16783_s7, 4  ;;  %s12148_s14 = smov [#allocation9]   ;;  %s429_s17 = int_to_ptr.hbm [resolvable:$true] %s428_s17 }
  0x25   : > { %s376_s20 = sshll.u32 %s17220_s3, 4  ;;  %s404_s16 = sshll.u32 %s12148_s14, 4  ;;  %s377_s20 = int_to_ptr.hbm [resolvable:$true] %s376_s20  ;;  %s405_s16 = int_to_ptr.vmem [resolvable:$true] %s404_s16 }
  0x26   : > { %11651 = dma.hbm_to_vmem [thread:$0]  (!%p12256_p5), %s377_s20, 4608, %s379_s26, [#allocation5], %s16790_s21, %s16790_s21, %s16792_s27  }
  0x27   : > { %11657 = dma.hbm_to_vmem [thread:$0]  (!%p12256_p5), %s403_s28, 18432, %s405_s16, [#allocation8], %s12145_s23, %s12145_s23, %s12146_s15  }
  0x28   : > { %s12149_s1 = smov [#allocation12]   ;;  %s454_s3 = sshll.u32 %s16785_s9, 4  ;;  %s455_s3 = int_to_ptr.hbm [resolvable:$true] %s454_s3 }
  0x29   : > { %s430_s4 = sshll.u32 %s12149_s1, 4  ;;  %s12150_s20 = smov [#allocation15]   ;;  %s431_s4 = int_to_ptr.vmem [resolvable:$true] %s430_s4 }
  0x2a   : > { %11663 = dma.hbm_to_vmem [thread:$0]  (!%p12256_p5), %s429_s17, 36864, %s431_s4, [#allocation11], %s12145_s23, %s12145_s23, %s12146_s15  }
  0x2b   : > { %s456_s26 = sshll.u32 %s12150_s20, 4  ;;  %s482_s14 = sshll.u32 %s16787_s11, 4  ;;  %s457_s26 = int_to_ptr.vmem [resolvable:$true] %s456_s26  ;;  %s483_s14 = int_to_ptr.hbm [resolvable:$true] %s482_s14 }
  0x2c   : > { %s12151_s28 = smov 192   ;;  %s12152_s16 = smov 12  }
  0x2d   : > { %11669 = dma.hbm_to_vmem [thread:$0]  (!%p12256_p5), %s455_s3, 2496, %s457_s26, [#allocation14], %s12151_s28, %s12151_s28, %s12152_s16  }
  0x2e   : > { %s12153_s1 = smov [#allocation18]   ;;  %s496_s27 = sshll.u32 %s16788_s12, 4  ;;  %s497_s27 = int_to_ptr.hbm [resolvable:$true] %s496_s27 }
  0x2f   : > { %s484_s19 = sshll.u32 %s12153_s1, 4  ;;  %s17221_s23 = smov 4   ;;  %s485_s19 = int_to_ptr.vmem [resolvable:$true] %s484_s19 }
  0x30   : > { %s17222_s15 = smov 64   ;;  %s12154_s17 = smov [#allocation19]  }
  0x31   : > { %11675 = dma.hbm_to_vmem [thread:$0]  (!%p12256_p5), %s483_s14, 128, %s485_s19, [#allocation17], %s17222_s15, %s17222_s15, %s17221_s23  }
  0x32   : > { %s498_s4 = sshll.u32 %s12154_s17, 4  ;;  %522 = sbr.rel (%p12242_p3) target bundleno = 2598 (0xa26), region = 72  ;;  %s499_s4 = int_to_ptr.vmem [resolvable:$true] %s498_s4 }
  0x33   : > { %11678 = dma.hbm_to_vmem [thread:$0]  (!%p12256_p5), %s497_s27, 128, %s499_s4, [#allocation20], %s17222_s15, %s17222_s15, %s17221_s23  }
  0x37   : > { %12106 = dma.done.wait (%p11679_p2), [#allocation3], 256  }
  0x38   : > { %12108 = vsyncadd (%p11679_p2), [#allocation3], 4294967040 }
  0x39   : > { %12110 = dma.done.wait (%p11679_p2), [#allocation5], 4624  }
  0x3a   : > { %12112 = vsyncadd (%p11679_p2), [#allocation5], 4294962672 }
  0x3b   : > { %12114 = dma.done.wait (%p11679_p2), [#allocation8], 18448  }
  0x3c   : > { %12116 = vsyncadd (%p11679_p2), [#allocation8], 4294948848 }
  0x3d   : > { %12118 = dma.done.wait (%p11679_p2), [#allocation11], 36896  }
  0x3e   : > { %12120 = vsyncadd (%p11679_p2), [#allocation11], 4294930400 }
  0x3f   : > { %12122 = dma.done.wait (%p11679_p2), [#allocation14], 2528  }
  0x40   : > { %12124 = vsyncadd (%p11679_p2), [#allocation14], 4294964768 }
  0x41   : > { %12126 = dma.done.wait (%p11679_p2), [#allocation17], 448  }
  0x42   : > { %12128 = vsyncadd (%p11679_p2), [#allocation17], 4294966848 }
  0x43   : > { %12130 = dma.done.wait (%p11679_p2), [#allocation20], 128  }
  0x44   : > { %12132 = vsyncadd (%p11679_p2), [#allocation20], 4294967168  ;;  %p622_p6 = scmp.lt.s32.totalorder %s12237_s29, 1  ;;  %v16794_v0 = vmov 0   ;;  %v12411_v44 = vld [vmem:[#allocation2] sm:$0xff]  ;;  %vm1003_vm0 = vcmask 1046528  }
  0x45   : > { %11734 = vset.pattern.permute.xlu2 %v16794_v0  ;;  %11733 = vset.pattern.permute.xlu1 %v16794_v0  ;;  %v12414_v45 = vperm.slane %v12411_v44, 1  ;;  %v12417_v46 = vperm.slane %v12411_v44, 2  ;;  %v12420_v47 = vperm.slane %v12411_v44, 3  ;;  %v12425_v49 = vperm.slane %v12411_v44, 4 }
  0x46   : > { %11732 = vset.pattern.permute.xlu0 %v16794_v0  ;;  %s18163_s29 = smov (!%p622_p6, %s12237_s29), 1  ;;  %v12428_v50 = vperm.slane %v12411_v44, 5  ;;  %v12443_v54 = vperm.slane %v12411_v44, 0  ;;  %vm1247_vm1 = vcmask 1045504   ;;  %vm1745_vm2 = vcmask 1044480  }
  0x47   : > { %s11593_s3 = smul.u32 328, %s18163_s29  ;;  %vm1996_vm3 = vcmask 1043456   ;;  %vm2489_vm4 = vcmask 1042432   ;;  %vm2734_vm5 = vcmask 1041408   ;;  %vm3133_vm6 = vsmask.f32 5376 }
  0x48   : > { %vm3342_vm7 = vcmask 588800   ;;  %vm3565_vm8 = vcmask 523264   ;;  %vm3789_vm9 = vsmask.f32 4352  ;;  %vm4212_vm10 = vsmask.f32 7424 }
  0x49   : > { %s12364_s21 = scalar_lea.vmem %s16776_s0, %s11593_s3  ;;  %vm4608_vm11 = vsmask.f32 6400  ;;  %vm4792_vm12 = vcmask 850944   ;;  %vm6360_vm13 = vcmask 326656   ;;  %vm8823_vm14 = vcmask 130048   ;;  %s11102_s27 = sshll.u32 %s18163_s29, 5 }
  0x4a   : > { %v648_v1 = vld [vmem:[%s12364_s21 + $0x78] sm:$0xff]  ;;  %v646_v2 = vld [vmem:[%s12364_s21 + $0x68] sm:$0xff]  ;;  %v647_v5 = vld [vmem:[%s12364_s21 + $0x70] sm:$0xff]  ;;  %s631_s18 = scalar_lea.vmem %s16789_s13, %s11102_s27 }
  0x4b   : > { %v644_v3 = vld [vmem:[%s12364_s21 + $0x58] sm:$0xff]  ;;  %751 = vperm.xlu2 %11734, %v648_v1   ;;  %741 = vperm.xlu1 %11733, %v646_v2   ;;  %v645_v6 = vld [vmem:[%s12364_s21 + $0x60] sm:$0xff]  ;;  %v663_v7 = vld [vmem:[%s12364_s21 + $0xf0] sm:$0xff] }
  0x4c   : > { %731 = vperm.xlu0 %11732, %v644_v3   ;;  %v660_v4 = vld [vmem:[%s12364_s21 + $0xd8] sm:$0xff]  ;;  %v662_v8 = vld [vmem:[%s12364_s21 + $0xe8] sm:$0xff]  ;;  %v661_v9 = vld [vmem:[%s12364_s21 + $0xe0] sm:$0xff] }
  0x4d   : > { %v643_v10 = vld [vmem:[%s12364_s21 + $0x50] sm:$0xff]  ;;  %v642_v11 = vld [vmem:[%s12364_s21 + $0x48] sm:$0xff]  ;;  %v664_v12 = vld [vmem:[%s12364_s21 + $0xf8] sm:$0xff] }
  0x4e   : > { %v658_v13 = vld [vmem:[%s12364_s21 + $0xc8] sm:$0xff]  ;;  %v649_v15 = vld [vmem:[%s12364_s21 + $0x80] sm:$0xff]  ;;  %v659_v18 = vld [vmem:[%s12364_s21 + $0xd0] sm:$0xff] }
  0x4f   : > { %v650_v14 = vld [vmem:[%s12364_s21 + $0x88] sm:$0xff]  ;;  %v665_v17 = vld [vmem:[%s12364_s21 + $0x100] sm:$0xff]  ;;  %v656_v19 = vld [vmem:[%s12364_s21 + $0xb8] sm:$0xff] }
  0x50   : > { %v666_v16 = vld [vmem:[%s12364_s21 + $0x108] sm:$0xff]  ;;  %v641_v20 = vld [vmem:[%s12364_s21 + $0x40] sm:$0xff]  ;;  %v640_v21 = vld [vmem:[%s12364_s21 + $0x38] sm:$0xff] }
  0x51   : > { %v671_v22 = vld [vmem:[%s12364_s21 + $0x130] sm:$0xff]  ;;  %v670_v23 = vld [vmem:[%s12364_s21 + $0x128] sm:$0xff]  ;;  %v657_v24 = vld [vmem:[%s12364_s21 + $0xc0] sm:$0xff] }
  0x52   : > { %v667_v25 = vld [vmem:[%s12364_s21 + $0x110] sm:$0xff]  ;;  %v652_v26 = vld [vmem:[%s12364_s21 + $0x98] sm:$0xff]  ;;  %v638_v29 = vld [vmem:[%s12364_s21 + $0x28] sm:$0xff] }
  0x53   : > { %811 = vperm.xlu2 %11734, %v660_v4   ;;  %746 = vperm.xlu1 %11733, %v647_v5   ;;  %v651_v27 = vld [vmem:[%s12364_s21 + $0x90] sm:$0xff]  ;;  %v668_v30 = vld [vmem:[%s12364_s21 + $0x118] sm:$0xff]  ;;  %v669_v31 = vld [vmem:[%s12364_s21 + $0x120] sm:$0xff] }
  0x54   : > { %736 = vperm.xlu0 %11732, %v645_v6   ;;  %v639_v28 = vld [vmem:[%s12364_s21 + $0x30] sm:$0xff]  ;;  %v654_v33 = vld [vmem:[%s12364_s21 + $0xa8] sm:$0xff]  ;;  %v673_v34 = vld [vmem:[%s12364_s21 + $0x140] sm:$0xff] }
  0x55   : > { %v655_v32 = vld [vmem:[%s12364_s21 + $0xb0] sm:$0xff]  ;;  %v636_v35 = vld [vmem:[%s12364_s21 + $0x18] sm:$0xff]  ;;  %v653_v38 = vld [vmem:[%s12364_s21 + $0xa0] sm:$0xff] }
  0x56   : > { %v672_v36 = vld [vmem:[%s12364_s21 + $0x138] sm:$0xff]  ;;  %v634_v39 = vld [vmem:[%s12364_s21 + $0x8] sm:$0xff]  ;;  %v637_v40 = vld [vmem:[%s12364_s21 + $0x20] sm:$0xff] }
  0x57   : > { %v633_v42 = vld [vmem:[%s12364_s21] sm:$0xff]  ;;  %v635_v43 = vld [vmem:[%s12364_s21 + $0x10] sm:$0xff] }
  0x5b   : > { %826 = vperm.xlu2 %11734, %v663_v7   ;;  %821 = vperm.xlu1 %11733, %v662_v8  }
  0x5c   : > { %816 = vperm.xlu0 %11732, %v661_v9  }
  0x63   : > { %726 = vperm.xlu2 %11734, %v643_v10   ;;  %721 = vperm.xlu1 %11733, %v642_v11  }
  0x64   : > { %831 = vperm.xlu0 %11732, %v664_v12  }
  0x6b   : > { %801 = vperm.xlu2 %11734, %v658_v13   ;;  %761 = vperm.xlu1 %11733, %v650_v14  }
  0x6c   : > { %756 = vperm.xlu0 %11732, %v649_v15  }
  0x73   : > { %841 = vperm.xlu2 %11734, %v666_v16   ;;  %836 = vperm.xlu1 %11733, %v665_v17  }
  0x74   : > { %806 = vperm.xlu0 %11732, %v659_v18  }
  0x7b   : > { %791 = vperm.xlu2 %11734, %v656_v19   ;;  %716 = vperm.xlu1 %11733, %v641_v20  }
  0x7c   : > { %711 = vperm.xlu0 %11732, %v640_v21  }
  0x83   : > { %866 = vperm.xlu2 %11734, %v671_v22   ;;  %861 = vperm.xlu1 %11733, %v670_v23  }
  0x84   : > { %796 = vperm.xlu0 %11732, %v657_v24  }
  0x8b   : > { %846 = vperm.xlu2 %11734, %v667_v25   ;;  %771 = vperm.xlu1 %11733, %v652_v26  }
  0x8c   : > { %766 = vperm.xlu0 %11732, %v651_v27  }
  0x93   : > { %706 = vperm.xlu2 %11734, %v639_v28   ;;  %701 = vperm.xlu1 %11733, %v638_v29  }
  0x94   : > { %851 = vperm.xlu0 %11732, %v668_v30  }
  0x9b   : > { %856 = vperm.xlu2 %11734, %v669_v31   ;;  %786 = vperm.xlu1 %11733, %v655_v32  }
  0x9c   : > { %781 = vperm.xlu0 %11732, %v654_v33  }
  0xa3   : > { %876 = vperm.xlu1 %11733, %v673_v34   ;;  %691 = vperm.xlu2 %11734, %v636_v35  }
  0xa4   : > { %871 = vperm.xlu0 %11732, %v672_v36  }
  0xa5   : > { %v12402_v37 = vpop.permute.xlu2 %751 }
  0xa6   : > { %17223 = vst [vmem:[#allocation28_spill] sm:$0xff] %v12402_v37  ;;  %v12432_v51 = vmul.f32 %v12414_v45, %v12402_v37  ;;  %v12436_v52 = vmul.f32 %v12417_v46, %v12402_v37  ;;  %v12440_v53 = vmul.f32 %v12420_v47, %v12402_v37  ;;  %v12447_v55 = vmul.f32 %v12425_v49, %v12402_v37 }
  0xa7   : > { %v12471_v61 = vmul.f32 %v12443_v54, %v12402_v37  ;;  %v12475_v62 = vmul.f32 %v12428_v50, %v12402_v37 }
  0xa8   : > { %17226 = vst [vmem:[#allocation31_spill] sm:$0xff] %v12432_v51 }
  0xa9   : > { %17227 = vst [vmem:[#allocation32_spill] sm:$0xff] %v12436_v52 }
  0xaa   : > { %17228 = vst [vmem:[#allocation33_spill] sm:$0xff] %v12447_v55 }
  0xab   : > { %776 = vperm.xlu1 %11733, %v653_v38   ;;  %681 = vperm.xlu2 %11734, %v634_v39   ;;  %17234 = vst [vmem:[#allocation39_spill] sm:$0xff] %v12471_v61 }
  0xac   : > { %696 = vperm.xlu0 %11732, %v637_v40   ;;  %17235 = vst [vmem:[#allocation40_spill] sm:$0xff] %v12475_v62 }
  0xad   : > { %v12407_v41 = vpop.permute.xlu2 %811 }
  0xae   : > { %17224 = vst [vmem:[#allocation29_spill] sm:$0xff] %v12407_v41  ;;  %v12451_v56 = vmul.f32 %v12414_v45, %v12407_v41  ;;  %v12455_v57 = vmul.f32 %v12417_v46, %v12407_v41  ;;  %v12459_v58 = vmul.f32 %v12420_v47, %v12407_v41  ;;  %v12463_v59 = vmul.f32 %v12425_v49, %v12407_v41 }
  0xaf   : > { %v12467_v60 = vmul.f32 %v12428_v50, %v12407_v41  ;;  %v12495_v7 = vmul.f32 %v12443_v54, %v12407_v41 }
  0xb0   : > { %17229 = vst [vmem:[#allocation34_spill] sm:$0xff] %v12451_v56 }
  0xb1   : > { %17230 = vst [vmem:[#allocation35_spill] sm:$0xff] %v12455_v57 }
  0xb2   : > { %17231 = vst [vmem:[#allocation36_spill] sm:$0xff] %v12459_v58 }
  0xb3   : > { %676 = vperm.xlu1 %11733, %v633_v42   ;;  %17232 = vst [vmem:[#allocation37_spill] sm:$0xff] %v12463_v59 }
  0xb4   : > { %686 = vperm.xlu0 %11732, %v635_v43   ;;  %17233 = vst [vmem:[#allocation38_spill] sm:$0xff] %v12467_v60 }
  0xb5   : > { %v12422_v48 = vpop.permute.xlu2 %826  ;;  %17239 = vst [vmem:[#allocation44_spill] sm:$0xff] %v12495_v7 }
  0xb6   : > { %17225 = vst [vmem:[#allocation30_spill] sm:$0xff] %v12422_v48  ;;  %v12479_v63 = vmul.f32 %v12414_v45, %v12422_v48  ;;  %v12483_v1 = vmul.f32 %v12417_v46, %v12422_v48  ;;  %v12490_v5 = vmul.f32 %v12420_v47, %v12422_v48  ;;  %v12500_v9 = vmul.f32 %v12425_v49, %v12422_v48 }
  0xb7   : > { %v12512_v16 = vmul.f32 %v12443_v54, %v12422_v48  ;;  %v12518_v19 = vmul.f32 %v12428_v50, %v12422_v48 }
  0xb8   : > { %17236 = vst [vmem:[#allocation41_spill] sm:$0xff] %v12479_v63 }
  0xb9   : > { %17237 = vst [vmem:[#allocation42_spill] sm:$0xff] %v12483_v1 }
  0xba   : > { %17238 = vst [vmem:[#allocation43_spill] sm:$0xff] %v12490_v5 }
  0xbb   : > { %17240 = vst [vmem:[#allocation45_spill] sm:$0xff] %v12500_v9 }
  0xbc   : > { %17243 = vst [vmem:[#allocation48_spill] sm:$0xff] %v12512_v16 }
  0xbd   : > { %v12506_v14 = vpop.permute.xlu1 %741  ;;  %v12508_v15 = vpop.permute.xlu2 %726  ;;  %17244 = vst [vmem:[#allocation49_spill] sm:$0xff] %v12518_v19 }
  0xbe   : > { %17241 = vst [vmem:[#allocation46_spill] sm:$0xff] %v12506_v14  ;;  %v12520_v20 = vpop.permute.xlu0 %731  ;;  %v12525_v22 = vmul.f32 %v12414_v45, %v12506_v14  ;;  %v12529_v23 = vmul.f32 %v12417_v46, %v12506_v14  ;;  %v12538_v26 = vmul.f32 %v12443_v54, %v12506_v14  ;;  %v12542_v27 = vmul.f32 %v12420_v47, %v12506_v14 }
  0xbf   : > { %17242 = vst [vmem:[#allocation47_spill] sm:$0xff] %v12508_v15  ;;  %v12533_v24 = vmul.f32 %v12414_v45, %v12520_v20  ;;  %v12546_v28 = vmul.f32 %v12425_v49, %v12506_v14  ;;  %v12550_v29 = vmul.f32 %v12428_v50, %v12506_v14  ;;  %v12554_v30 = vmul.f32 %v12443_v54, %v12520_v20 }
  0xc0   : > { %17245 = vst [vmem:[#allocation50_spill] sm:$0xff] %v12520_v20  ;;  %v12558_v31 = vmul.f32 %v12417_v46, %v12520_v20  ;;  %v12562_v32 = vmul.f32 %v12420_v47, %v12520_v20  ;;  %v12567_v34 = vmul.f32 %v12425_v49, %v12520_v20  ;;  %v12571_v35 = vmul.f32 %v12428_v50, %v12520_v20 }
  0xc1   : > { %17246 = vst [vmem:[#allocation51_spill] sm:$0xff] %v12546_v28  ;;  %v16796_v33 = vrot.slane %v12533_v24, 1  ;;  %v12575_v36 = vmul.f32 %v12414_v45, %v12508_v15  ;;  %v12581_v40 = vmul.f32 %v12417_v46, %v12508_v15  ;;  %v12585_v42 = vmul.f32 %v12420_v47, %v12508_v15 }
  0xc2   : > { %17247 = vst [vmem:[#allocation52_spill] sm:$0xff] %v12550_v29  ;;  %v12591_v13 = vmul.f32 %v12425_v49, %v12508_v15  ;;  %v12595_v12 = vmul.f32 %v12428_v50, %v12508_v15  ;;  %v893_v18 = vmul.f32 %v12443_v54, %v12508_v15  ;;  %v17264_v59 = vrot.slane %v12525_v22, 1 }
  0xc3   : > { %17248 = vst [vmem:[#allocation53_spill] sm:$0xff] %v12562_v32  ;;  %v16797_v0 = vrot.slane %v12575_v36, 1 }
  0xc4   : > { %17249 = vst [vmem:[#allocation54_spill] sm:$0xff] %v12567_v34 }
  0xc5   : > { %17250 = vst [vmem:[#allocation55_spill] sm:$0xff] %v12571_v35  ;;  %v12602_v10 = vpop.permute.xlu1 %746  ;;  %v12604_v6 = vpop.permute.xlu2 %801  ;;  %v1029_v11 = vsel %vm1003_vm0, %v16797_v0, %v16796_v33 }
  0xc6   : > { %17251 = vst [vmem:[#allocation56_spill] sm:$0xff] %v12581_v40  ;;  %v12614_v21 = vpop.permute.xlu0 %736  ;;  %v12619_v25 = vmul.f32 %v12414_v45, %v12602_v10  ;;  %v12623_v4 = vmul.f32 %v12417_v46, %v12602_v10  ;;  %v12627_v43 = vmul.f32 %v12420_v47, %v12602_v10  ;;  %v12633_v8 = vmul.f32 %v12425_v49, %v12602_v10 }
  0xc7   : > { %17252 = vst [vmem:[#allocation57_spill] sm:$0xff] %v12585_v42  ;;  %v12637_v39 = vmul.f32 %v12414_v45, %v12614_v21  ;;  %v12639_v0 = vadd.f32 %v1029_v11, %v893_v18  ;;  %v897_v17 = vmul.f32 %v12443_v54, %v12602_v10  ;;  %v12646_v33 = vmul.f32 %v12417_v46, %v12614_v21 }
  0xc8   : > { %17253 = vst [vmem:[#allocation58_spill] sm:$0xff] %v12591_v13  ;;  %v16811_v38 = vrot.slane %v12619_v25, 1  ;;  %v12650_v3 = vmul.f32 %v12428_v50, %v12602_v10  ;;  %v895_v2 = vmul.f32 %v12443_v54, %v12614_v21  ;;  %v12657_v11 = vmul.f32 %v12420_v47, %v12614_v21 }
  0xc9   : > { %17254 = vst [vmem:[#allocation59_spill] sm:$0xff] %v12595_v12  ;;  %v17262_v18 = vrot.slane %v12432_v51, 1  ;;  %v12668_v60 = vmul.f32 %v12425_v49, %v12614_v21  ;;  %v17265_v58 = vrot.slane %v12637_v39, 1  ;;  %v12685_v48 = vmul.f32 %v12443_v54, %v12604_v6 }
  0xca   : > { %17255 = vst [vmem:[#allocation60_spill] sm:$0xff] %v12602_v10  ;;  %v12689_v61 = vmul.f32 %v12414_v45, %v12604_v6  ;;  %v17317_v42 = vrot.slane %v12575_v36, 1 }
  0xcb   : > { %17256 = vst [vmem:[#allocation61_spill] sm:$0xff] %v12604_v6  ;;  %v1037_v15 = vsel %vm1003_vm0, %v16811_v38, %v17262_v18  ;;  %v1033_v51 = vsel %vm1003_vm0, %v17265_v58, %v17264_v59  ;;  %v12679_v18 = vmul.f32 %v12428_v50, %v12614_v21  ;;  %v12693_v38 = vmul.f32 %v12417_v46, %v12604_v6 }
  0xcc   : > { %17257 = vst [vmem:[#allocation62_spill] sm:$0xff] %v12614_v21  ;;  %v12681_v41 = vadd.f32 %v1037_v15, %v897_v17  ;;  %v12702_v15 = vmul.f32 %v12420_v47, %v12604_v6  ;;  %v12706_v17 = vmul.f32 %v12425_v49, %v12604_v6  ;;  %v12714_v5 = vadd.f32 %v1033_v51, %v895_v2 }
  0xcd   : > { %17258 = vst [vmem:[#allocation63_spill] sm:$0xff] %v12633_v8  ;;  %v12695_v58 = vpop.permute.xlu1 %821  ;;  %v12697_v59 = vpop.permute.xlu2 %841  ;;  %v17281_v2 = vrot.slane %v12479_v63, 1 }
  0xce   : > { %17259 = vst [vmem:[#allocation64_spill] sm:$0xff] %v12639_v0  ;;  %v12712_v9 = vpop.permute.xlu0 %816  ;;  %v953_v19 = vmul.f32 %v12414_v45, %v12695_v58  ;;  %v12721_v16 = vmul.f32 %v12417_v46, %v12695_v58  ;;  %v12729_v51 = vmul.f32 %v12420_v47, %v12695_v58  ;;  %v12735_v20 = vmul.f32 %v12425_v49, %v12695_v58 }
  0xcf   : > { %17260 = vst [vmem:[#allocation65_spill] sm:$0xff] %v12650_v3  ;;  %v12741_v12 = vmul.f32 %v12414_v45, %v12712_v9  ;;  %v12745_v13 = vmul.f32 %v12417_v46, %v12712_v9  ;;  %v12757_v7 = vmul.f32 %v12425_v49, %v12712_v9  ;;  %v12776_v57 = vmul.f32 %v12414_v45, %v12697_v59 }
  0xd0   : > { %17261 = vst [vmem:[#allocation66_spill] sm:$0xff] %v12657_v11  ;;  %v1064_v21 = vrot.slane %v953_v19, 1  ;;  %v12800_v63 = vmul.f32 %v12443_v54, %v12697_v59 }
  0xd1   : > { %17263 = vst [vmem:[#allocation67_spill] sm:$0xff] %v12668_v60 }
  0xd2   : > { %17266 = vst [vmem:[#allocation68_spill] sm:$0xff] %v12679_v18  ;;  %v1067_v19 = vsel %vm1003_vm0, %v1064_v21, %v17281_v2  ;;  %v12767_v2 = vmul.f32 %v12428_v50, %v12712_v9  ;;  %v17340_v18 = vrot.slane %v12451_v56, 1 }
  0xd3   : > { %17267 = vst [vmem:[#allocation69_spill] sm:$0xff] %v12685_v48  ;;  %v12710_v48 = vmul.f32 %v12428_v50, %v12604_v6  ;;  %v912_v6 = vmul.f32 %v12443_v54, %v12695_v58 }
  0xd4   : > { %17268 = vst [vmem:[#allocation70_spill] sm:$0xff] %v12689_v61 }
  0xd5   : > { %17269 = vst [vmem:[#allocation71_spill] sm:$0xff] %v12693_v38  ;;  %v12769_v1 = vadd.f32 %v1067_v19, %v912_v6  ;;  %v12788_v19 = vmul.f32 %v12417_v46, %v12697_v59  ;;  %v12792_v38 = vmul.f32 %v12420_v47, %v12697_v59 }
  0xd6   : > { %17270 = vst [vmem:[#allocation72_spill] sm:$0xff] %v12695_v58 }
  0xd7   : > { %17271 = vst [vmem:[#allocation73_spill] sm:$0xff] %v12697_v59 }
  0xd8   : > { %17272 = vst [vmem:[#allocation74_spill] sm:$0xff] %v12702_v15  ;;  %v12753_v15 = vmul.f32 %v12420_v47, %v12712_v9 }
  0xd9   : > { %17273 = vst [vmem:[#allocation75_spill] sm:$0xff] %v12706_v17  ;;  %v16850_v17 = vrot.slane %v12741_v12, 1 }
  0xda   : > { %17274 = vst [vmem:[#allocation76_spill] sm:$0xff] %v12710_v48  ;;  %v12762_v48 = vmul.f32 %v12428_v50, %v12695_v58  ;;  %v12780_v58 = vpop.permute.xlu1 %721 }
  0xdb   : > { %17275 = vst [vmem:[#allocation77_spill] sm:$0xff] %v12712_v9 }
  0xdc   : > { %17276 = vst [vmem:[#allocation78_spill] sm:$0xff] %v12721_v16  ;;  %v911_v16 = vmul.f32 %v12443_v54, %v12712_v9  ;;  %v12794_v9 = vpop.permute.xlu0 %831 }
  0xdd   : > { %17277 = vst [vmem:[#allocation79_spill] sm:$0xff] %v12729_v51  ;;  %v12778_v51 = vpop.permute.xlu2 %791 }
  0xde   : > { %17278 = vst [vmem:[#allocation80_spill] sm:$0xff] %v12735_v20  ;;  %v12817_v20 = vmul.f32 %v12428_v50, %v12697_v59 }
  0xdf   : > { %17279 = vst [vmem:[#allocation81_spill] sm:$0xff] %v12741_v12  ;;  %v12812_v12 = vmul.f32 %v12414_v45, %v12794_v9 }
  0xe0   : > { %17280 = vst [vmem:[#allocation82_spill] sm:$0xff] %v12745_v13  ;;  %v12838_v13 = vmul.f32 %v12414_v45, %v12778_v51 }
  0xe1   : > { %17282 = vst [vmem:[#allocation83_spill] sm:$0xff] %v12753_v15  ;;  %v12853_v15 = vmul.f32 %v12443_v54, %v12778_v51 }
  0xe2   : > { %17283 = vst [vmem:[#allocation84_spill] sm:$0xff] %v12757_v7  ;;  %v12844_v7 = vmul.f32 %v12428_v50, %v12794_v9 }
  0xe3   : > { %17284 = vst [vmem:[#allocation85_spill] sm:$0xff] %v12762_v48  ;;  %v1065_v48 = vsel %vm1003_vm0, %v16850_v17, %v1064_v21  ;;  %v12804_v21 = vmul.f32 %v12425_v49, %v12697_v59  ;;  %v12830_v17 = vmul.f32 %v12443_v54, %v12794_v9  ;;  %v12857_v59 = vmul.f32 %v12420_v47, %v12778_v51 }
  0xe4   : > { %17285 = vst [vmem:[#allocation86_spill] sm:$0xff] %v12767_v2  ;;  %v12806_v6 = vadd.f32 %v1065_v48, %v911_v16  ;;  %v12825_v48 = vmul.f32 %v12420_v47, %v12794_v9  ;;  %v12848_v16 = vmul.f32 %v12417_v46, %v12778_v51 }
  0xe5   : > { %17286 = vst [vmem:[#allocation87_spill] sm:$0xff] %v12769_v1  ;;  %v12834_v1 = vmul.f32 %v12425_v49, %v12794_v9 }
  0xe6   : > { %17287 = vst [vmem:[#allocation88_spill] sm:$0xff] %v12776_v57 }
  0xe7   : > { %17288 = vst [vmem:[#allocation89_spill] sm:$0xff] %v12778_v51 }
  0xe8   : > { %17289 = vst [vmem:[#allocation90_spill] sm:$0xff] %v12780_v58 }
  0xe9   : > { %17290 = vst [vmem:[#allocation91_spill] sm:$0xff] %v12788_v19  ;;  %v12861_v19 = vmul.f32 %v12425_v49, %v12778_v51 }
  0xea   : > { %17291 = vst [vmem:[#allocation92_spill] sm:$0xff] %v12792_v38 }
  0xeb   : > { %17292 = vst [vmem:[#allocation93_spill] sm:$0xff] %v12794_v9 }
  0xec   : > { %17293 = vst [vmem:[#allocation94_spill] sm:$0xff] %v12800_v63  ;;  %v12821_v63 = vmul.f32 %v12417_v46, %v12794_v9  ;;  %v12866_v9 = vmul.f32 %v12428_v50, %v12778_v51  ;;  %v12885_v51 = vmul.f32 %v12420_v47, %v12780_v58 }
  0xed   : > { %17294 = vst [vmem:[#allocation95_spill] sm:$0xff] %v12804_v21  ;;  %v12898_v21 = vmul.f32 %v12428_v50, %v12780_v58 }
  0xee   : > { %17295 = vst [vmem:[#allocation96_spill] sm:$0xff] %v12806_v6  ;;  %v892_v6 = vmul.f32 %v12443_v54, %v12780_v58 }
  0xef   : > { %17296 = vst [vmem:[#allocation97_spill] sm:$0xff] %v12812_v12  ;;  %v12894_v12 = vmul.f32 %v12425_v49, %v12780_v58 }
  0xf0   : > { %17297 = vst [vmem:[#allocation98_spill] sm:$0xff] %v12817_v20  ;;  %v12876_v20 = vpop.permute.xlu2 %866 }
  0xf1   : > { %17298 = vst [vmem:[#allocation99_spill] sm:$0xff] %v12821_v63 }
  0xf2   : > { %17299 = vst [vmem:[#allocation100_spill] sm:$0xff] %v12825_v48  ;;  %v12887_v48 = vpop.permute.xlu0 %756 }
  0xf3   : > { %17300 = vst [vmem:[#allocation101_spill] sm:$0xff] %v12830_v17  ;;  %v12870_v17 = vmul.f32 %v12414_v45, %v12780_v58  ;;  %v12919_v2 = vmul.f32 %v12420_v47, %v12887_v48  ;;  %v12925_v14 = vmul.f32 %v12443_v54, %v12887_v48  ;;  %v12929_v36 = vmul.f32 %v12425_v49, %v12887_v48 }
  0xf4   : > { %17301 = vst [vmem:[#allocation102_spill] sm:$0xff] %v12834_v1  ;;  %v12908_v1 = vmul.f32 %v12417_v46, %v12887_v48 }
  0xf5   : > { %17302 = vst [vmem:[#allocation103_spill] sm:$0xff] %v12844_v7  ;;  %v12878_v7 = vpop.permute.xlu1 %761  ;;  %v17318_v10 = vrot.slane %v12870_v17, 1  ;;  %v17358_v37 = vrot.slane %v12870_v17, 1 }
  0xf6   : > { %17303 = vst [vmem:[#allocation104_spill] sm:$0xff] %v12848_v16  ;;  %v12904_v16 = vmul.f32 %v12414_v45, %v12887_v48  ;;  %v12937_v38 = vmul.f32 %v12414_v45, %v12878_v7 }
  0xf7   : > { %17304 = vst [vmem:[#allocation105_spill] sm:$0xff] %v12853_v15  ;;  %v12874_v15 = vmul.f32 %v12417_v46, %v12780_v58  ;;  %v1027_v58 = vsel %vm1003_vm0, %v17318_v10, %v17317_v42  ;;  %v12952_v42 = vmul.f32 %v12428_v50, %v12887_v48  ;;  %v12956_v10 = vmul.f32 %v12443_v54, %v12878_v7 }
  0xf8   : > { %17305 = vst [vmem:[#allocation106_spill] sm:$0xff] %v12857_v59  ;;  %v12931_v63 = vadd.f32 %v1027_v58, %v892_v6  ;;  %v12947_v58 = vmul.f32 %v12420_v47, %v12878_v7  ;;  %v12960_v59 = vmul.f32 %v12425_v49, %v12878_v7 }
  0xf9   : > { %17306 = vst [vmem:[#allocation107_spill] sm:$0xff] %v12861_v19  ;;  %v12962_v19 = vpop.permute.xlu2 %846 }
  0xfa   : > { %17307 = vst [vmem:[#allocation108_spill] sm:$0xff] %v12866_v9  ;;  %v12970_v9 = vmul.f32 %v12428_v50, %v12878_v7  ;;  %v13005_v35 = vmul.f32 %v12417_v46, %v12962_v19  ;;  %v13011_v60 = vmul.f32 %v12443_v54, %v12962_v19  ;;  %v13015_v32 = vmul.f32 %v12420_v47, %v12962_v19 }
  0xfb   : > { %17308 = vst [vmem:[#allocation109_spill] sm:$0xff] %v12874_v15 }
  0xfc   : > { %17309 = vst [vmem:[#allocation110_spill] sm:$0xff] %v12876_v20 }
  0xfd   : > { %17310 = vst [vmem:[#allocation111_spill] sm:$0xff] %v12878_v7 }
  0xfe   : > { %17311 = vst [vmem:[#allocation112_spill] sm:$0xff] %v12885_v51 }
  0xff   : > { %17312 = vst [vmem:[#allocation113_spill] sm:$0xff] %v12887_v48  ;;  %v13030_v48 = vmul.f32 %v12425_v49, %v12962_v19 }
 0x100   : > { %17313 = vst [vmem:[#allocation114_spill] sm:$0xff] %v12894_v12  ;;  %v13001_v12 = vmul.f32 %v12414_v45, %v12962_v19 }
 0x101   : > { %17314 = vst [vmem:[#allocation115_spill] sm:$0xff] %v12898_v21  ;;  %v12972_v21 = vpop.permute.xlu0 %806 }
 0x102   : > { %17315 = vst [vmem:[#allocation116_spill] sm:$0xff] %v12904_v16  ;;  %v12981_v51 = vmul.f32 %v12414_v45, %v12972_v21  ;;  %v12985_v16 = vmul.f32 %v12417_v46, %v12972_v21  ;;  %v12989_v6 = vmul.f32 %v12420_v47, %v12972_v21  ;;  %v909_v11 = vmul.f32 %v12443_v54, %v12972_v21 }
 0x103   : > { %17316 = vst [vmem:[#allocation117_spill] sm:$0xff] %v12908_v1  ;;  %v12964_v1 = vpop.permute.xlu1 %836 }
 0x104   : > { %17319 = vst [vmem:[#allocation118_spill] sm:$0xff] %v12925_v14  ;;  %v12943_v14 = vmul.f32 %v12417_v46, %v12878_v7  ;;  %v16933_v34 = vrot.slane %v12981_v51, 1  ;;  %v13040_v0 = vmul.f32 %v12414_v45, %v12964_v1 }
 0x105   : > { %17320 = vst [vmem:[#allocation119_spill] sm:$0xff] %v12929_v36 }
 0x106   : > { %17321 = vst [vmem:[#allocation120_spill] sm:$0xff] %v12931_v63  ;;  %v1061_v40 = vsel %vm1003_vm0, %v16933_v34, %v17340_v18  ;;  %v13044_v18 = vmul.f32 %v12417_v46, %v12964_v1  ;;  %v13055_v63 = vmul.f32 %v12425_v49, %v12964_v1 }
 0x107   : > { %17322 = vst [vmem:[#allocation121_spill] sm:$0xff] %v12937_v38  ;;  %v12997_v38 = vmul.f32 %v12428_v50, %v12972_v21  ;;  %v13046_v7 = vadd.f32 %v1061_v40, %v909_v11  ;;  %v915_v40 = vmul.f32 %v12443_v54, %v12964_v1  ;;  %v16957_v11 = vrot.slane %v13040_v0, 1 }
 0x108   : > { %17323 = vst [vmem:[#allocation122_spill] sm:$0xff] %v12943_v14  ;;  %v12993_v14 = vmul.f32 %v12425_v49, %v12972_v21 }
 0x109   : > { %17324 = vst [vmem:[#allocation123_spill] sm:$0xff] %v12947_v58  ;;  %v13066_v34 = vpop.permute.xlu0 %711 }
 0x10a   : > { %17325 = vst [vmem:[#allocation124_spill] sm:$0xff] %v12952_v42  ;;  %v931_v56 = vmul.f32 %v12414_v45, %v13066_v34 }
 0x10b   : > { %17326 = vst [vmem:[#allocation125_spill] sm:$0xff] %v12956_v10  ;;  %v12976_v10 = vmul.f32 %v12420_v47, %v12876_v20  ;;  %v13057_v15 = vpop.permute.xlu1 %716 }
 0x10c   : > { %17327 = vst [vmem:[#allocation126_spill] sm:$0xff] %v12960_v59 }
 0x10d   : > { %17328 = vst [vmem:[#allocation127_spill] sm:$0xff] %v12962_v19 }
 0x10e   : > { %17329 = vst [vmem:[#allocation128_spill] sm:$0xff] %v12964_v1 }
 0x10f   : > { %17330 = vst [vmem:[#allocation129_spill] sm:$0xff] %v12970_v9 }
 0x110   : > { %17331 = vst [vmem:[#allocation130_spill] sm:$0xff] %v12972_v21  ;;  %v13034_v21 = vmul.f32 %v12428_v50, %v12962_v19 }
 0x111   : > { %17332 = vst [vmem:[#allocation131_spill] sm:$0xff] %v12981_v51  ;;  %v932_v51 = vmul.f32 %v12414_v45, %v13057_v15 }
 0x112   : > { %17333 = vst [vmem:[#allocation132_spill] sm:$0xff] %v12985_v16  ;;  %v17353_v16 = vrot.slane %v12776_v57, 1 }
 0x113   : > { %17334 = vst [vmem:[#allocation133_spill] sm:$0xff] %v12989_v6  ;;  %v13077_v6 = vmul.f32 %v12417_v46, %v13057_v15  ;;  %v1022_v57 = vrot.slane %v932_v51, 1 }
 0x114   : > { %17335 = vst [vmem:[#allocation134_spill] sm:$0xff] %v12993_v14  ;;  %v13059_v14 = vpop.permute.xlu2 %706 }
 0x115   : > { %17336 = vst [vmem:[#allocation135_spill] sm:$0xff] %v12997_v38  ;;  %v13051_v38 = vmul.f32 %v12420_v47, %v12964_v1  ;;  %v1025_v19 = vsel %vm1003_vm0, %v1022_v57, %v17358_v37  ;;  %v13126_v37 = vmul.f32 %v12428_v50, %v13066_v34 }
 0x116   : > { %17337 = vst [vmem:[#allocation136_spill] sm:$0xff] %v13001_v12 }
 0x117   : > { %17338 = vst [vmem:[#allocation137_spill] sm:$0xff] %v13005_v35 }
 0x118   : > { %17339 = vst [vmem:[#allocation138_spill] sm:$0xff] %v13015_v32  ;;  %v891_v32 = vmul.f32 %v12443_v54, %v13057_v15 }
 0x119   : > { %17341 = vst [vmem:[#allocation139_spill] sm:$0xff] %v13030_v48  ;;  %v13088_v48 = vmul.f32 %v12420_v47, %v13057_v15 }
 0x11a   : > { %17342 = vst [vmem:[#allocation140_spill] sm:$0xff] %v13034_v21  ;;  %v1073_v21 = vsel %vm1003_vm0, %v16957_v11, %v17353_v16  ;;  %v1020_v11 = vrot.slane %v931_v56, 1  ;;  %v13128_v17 = vadd.f32 %v1025_v19, %v891_v32  ;;  %v13137_v56 = vpop.permute.xlu1 %861  ;;  %v13147_v32 = vmul.f32 %v12420_v47, %v13059_v14  ;;  %v13149_v19 = vpop.permute.xlu0 %796 }
 0x11b   : > { %17343 = vst [vmem:[#allocation141_spill] sm:$0xff] %v13040_v0  ;;  %v13098_v0 = vmul.f32 %v12428_v50, %v13057_v15  ;;  %v13100_v16 = vadd.f32 %v1073_v21, %v915_v40  ;;  %v13117_v21 = vmul.f32 %v12420_v47, %v13066_v34  ;;  %v13171_v51 = vmul.f32 %v12417_v46, %v13137_v56 }
 0x11c   : > { %17344 = vst [vmem:[#allocation142_spill] sm:$0xff] %v13044_v18  ;;  %v13092_v18 = vmul.f32 %v12425_v49, %v13057_v15  ;;  %v1023_v40 = vsel %vm1003_vm0, %v1020_v11, %v1022_v57  ;;  %v13159_v57 = vmul.f32 %v12428_v50, %v13059_v14 }
 0x11d   : > { %17345 = vst [vmem:[#allocation143_spill] sm:$0xff] %v13046_v7  ;;  %v13071_v7 = vmul.f32 %v12428_v50, %v12964_v1  ;;  %v13113_v1 = vmul.f32 %v12417_v46, %v13066_v34 }
 0x11e   : > { %17346 = vst [vmem:[#allocation144_spill] sm:$0xff] %v13051_v38  ;;  %v13181_v38 = vmul.f32 %v12420_v47, %v13137_v56 }
 0x11f   : > { %17347 = vst [vmem:[#allocation145_spill] sm:$0xff] %v13055_v63  ;;  %v13155_v63 = vmul.f32 %v12425_v49, %v13059_v14 }
 0x120   : > { %17348 = vst [vmem:[#allocation146_spill] sm:$0xff] %v13057_v15  ;;  %v889_v15 = vmul.f32 %v12443_v54, %v13059_v14 }
 0x121   : > { %17349 = vst [vmem:[#allocation147_spill] sm:$0xff] %v13059_v14 }
 0x122   : > { %17350 = vst [vmem:[#allocation148_spill] sm:$0xff] %v13066_v34 }
 0x123   : > { %17351 = vst [vmem:[#allocation149_spill] sm:$0xff] %v13071_v7  ;;  %v890_v7 = vmul.f32 %v12443_v54, %v13066_v34 }
 0x124   : > { %17352 = vst [vmem:[#allocation150_spill] sm:$0xff] %v13077_v6  ;;  %v13199_v6 = vmul.f32 %v12414_v45, %v13149_v19 }
 0x125   : > { %17354 = vst [vmem:[#allocation151_spill] sm:$0xff] %v13088_v48  ;;  %v13135_v48 = vmul.f32 %v12414_v45, %v13059_v14 }
 0x126   : > { %17355 = vst [vmem:[#allocation152_spill] sm:$0xff] %v13092_v18  ;;  %v13161_v18 = vpop.permute.xlu2 %856  ;;  %v17382_v9 = vrot.slane %v13199_v6, 1 }
 0x127   : > { %17356 = vst [vmem:[#allocation153_spill] sm:$0xff] %v13098_v0  ;;  %v13173_v0 = vadd.f32 %v1023_v40, %v890_v7  ;;  %v13188_v7 = vmul.f32 %v12425_v49, %v13137_v56  ;;  %v13251_v29 = vmul.f32 %v12425_v49, %v13161_v18 }
 0x128   : > { %17357 = vst [vmem:[#allocation154_spill] sm:$0xff] %v13100_v16  ;;  %v13122_v16 = vmul.f32 %v12425_v49, %v13066_v34  ;;  %v13143_v34 = vmul.f32 %v12417_v46, %v13059_v14 }
 0x129   : > { %17359 = vst [vmem:[#allocation155_spill] sm:$0xff] %v13113_v1  ;;  %v13167_v1 = vmul.f32 %v12414_v45, %v13137_v56 }
 0x12a   : > { %17360 = vst [vmem:[#allocation156_spill] sm:$0xff] %v13117_v21  ;;  %v17372_v21 = vrot.slane %v13135_v48, 1 }
 0x12b   : > { %17361 = vst [vmem:[#allocation157_spill] sm:$0xff] %v13122_v16  ;;  %v13204_v16 = vmul.f32 %v12417_v46, %v13149_v19 }
 0x12c   : > { %17362 = vst [vmem:[#allocation158_spill] sm:$0xff] %v13126_v37  ;;  %v1021_v14 = vsel %vm1003_vm0, %v17372_v21, %v1020_v11  ;;  %v13195_v21 = vmul.f32 %v12428_v50, %v13137_v56  ;;  %v13222_v37 = vmul.f32 %v12414_v45, %v13161_v18  ;;  %v13234_v11 = vpop.permute.xlu0 %766 }
 0x12d   : > { %17363 = vst [vmem:[#allocation159_spill] sm:$0xff] %v13128_v17  ;;  %v13190_v40 = vadd.f32 %v1021_v14, %v889_v15  ;;  %v13208_v14 = vmul.f32 %v12420_v47, %v13149_v19  ;;  %v13212_v15 = vmul.f32 %v12425_v49, %v13149_v19  ;;  %v13232_v17 = vmul.f32 %v12417_v46, %v13161_v18 }
 0x12e   : > { %17364 = vst [vmem:[#allocation160_spill] sm:$0xff] %v13137_v56  ;;  %v13268_v3 = vpop.permute.xlu2 %691 }
 0x12f   : > { %17365 = vst [vmem:[#allocation161_spill] sm:$0xff] %v13143_v34  ;;  %v907_v34 = vmul.f32 %v12443_v54, %v13149_v19  ;;  %v13319_v59 = vmul.f32 %v12414_v45, %v13268_v3 }
 0x130   : > { %17366 = vst [vmem:[#allocation162_spill] sm:$0xff] %v13147_v32 }
 0x131   : > { %17367 = vst [vmem:[#allocation163_spill] sm:$0xff] %v13149_v19 }
 0x132   : > { %17368 = vst [vmem:[#allocation164_spill] sm:$0xff] %v13155_v63  ;;  %v13224_v63 = vpop.permute.xlu1 %771 }
 0x133   : > { %17369 = vst [vmem:[#allocation165_spill] sm:$0xff] %v13159_v57  ;;  %v13218_v57 = vmul.f32 %v12428_v50, %v13149_v19  ;;  %v13262_v32 = vmul.f32 %v12414_v45, %v13224_v63  ;;  %v13266_v19 = vmul.f32 %v12417_v46, %v13224_v63  ;;  %v13288_v62 = vmul.f32 %v12428_v50, %v13224_v63 }
 0x134   : > { %17370 = vst [vmem:[#allocation166_spill] sm:$0xff] %v13161_v18  ;;  %v13321_v36 = vpop.permute.xlu0 %851 }
 0x135   : > { %17371 = vst [vmem:[#allocation167_spill] sm:$0xff] %v13173_v0  ;;  %v17381_v0 = vrot.slane %v12689_v61, 1  ;;  %v13361_v28 = vmul.f32 %v12425_v49, %v13321_v36 }
 0x136   : > { %17373 = vst [vmem:[#allocation168_spill] sm:$0xff] %v13190_v40  ;;  %v13245_v40 = vmul.f32 %v12420_v47, %v13161_v18 }
 0x137   : > { %17374 = vst [vmem:[#allocation169_spill] sm:$0xff] %v13199_v6  ;;  %v1057_v42 = vsel %vm1003_vm0, %v17382_v9, %v17381_v0  ;;  %v13255_v6 = vmul.f32 %v12428_v50, %v13161_v18  ;;  %v13298_v9 = vmul.f32 %v12417_v46, %v13234_v11 }
 0x138   : > { %17375 = vst [vmem:[#allocation170_spill] sm:$0xff] %v13204_v16  ;;  %v13257_v0 = vadd.f32 %v1057_v42, %v907_v34  ;;  %v13274_v34 = vmul.f32 %v12420_v47, %v13224_v63  ;;  %v13278_v42 = vmul.f32 %v12425_v49, %v13224_v63  ;;  %v13294_v16 = vmul.f32 %v12414_v45, %v13234_v11 }
 0x139   : > { %17376 = vst [vmem:[#allocation171_spill] sm:$0xff] %v13208_v14  ;;  %v13284_v14 = vmul.f32 %v12443_v54, %v13224_v63 }
 0x13a   : > { %17377 = vst [vmem:[#allocation172_spill] sm:$0xff] %v13212_v15  ;;  %v901_v15 = vmul.f32 %v12443_v54, %v13234_v11  ;;  %v13333_v61 = vpop.permute.xlu1 %701 }
 0x13b   : > { %17378 = vst [vmem:[#allocation173_spill] sm:$0xff] %v13218_v57  ;;  %v13308_v57 = vmul.f32 %v12425_v49, %v13234_v11  ;;  %v13400_v8 = vmul.f32 %v12428_v50, %v13333_v61 }
 0x13c   : > { %17379 = vst [vmem:[#allocation174_spill] sm:$0xff] %v13224_v63  ;;  %v17404_v63 = vrot.slane %v13262_v32, 1 }
 0x13d   : > { %17380 = vst [vmem:[#allocation175_spill] sm:$0xff] %v13234_v11 }
 0x13e   : > { %17383 = vst [vmem:[#allocation176_spill] sm:$0xff] %v13245_v40 }
 0x13f   : > { %17384 = vst [vmem:[#allocation177_spill] sm:$0xff] %v13251_v29 }
 0x140   : > { %17385 = vst [vmem:[#allocation178_spill] sm:$0xff] %v13255_v6 }
 0x141   : > { %17386 = vst [vmem:[#allocation179_spill] sm:$0xff] %v13257_v0  ;;  %v13312_v0 = vmul.f32 %v12428_v50, %v13234_v11 }
 0x142   : > { %17387 = vst [vmem:[#allocation180_spill] sm:$0xff] %v13262_v32 }
 0x143   : > { %17388 = vst [vmem:[#allocation181_spill] sm:$0xff] %v13266_v19  ;;  %v13331_v19 = vmul.f32 %v12417_v46, %v13268_v3 }
 0x144   : > { %17389 = vst [vmem:[#allocation182_spill] sm:$0xff] %v13268_v3 }
 0x145   : > { %17390 = vst [vmem:[#allocation183_spill] sm:$0xff] %v13274_v34 }
 0x146   : > { %17391 = vst [vmem:[#allocation184_spill] sm:$0xff] %v13278_v42  ;;  %v17405_v42 = vrot.slane %v13294_v16, 1 }
 0x147   : > { %17392 = vst [vmem:[#allocation185_spill] sm:$0xff] %v13284_v14  ;;  %v13304_v14 = vmul.f32 %v12420_v47, %v13234_v11  ;;  %v13327_v11 = vmul.f32 %v12443_v54, %v13268_v3  ;;  %v13350_v3 = vmul.f32 %v12417_v46, %v13321_v36 }
 0x148   : > { %17393 = vst [vmem:[#allocation186_spill] sm:$0xff] %v13288_v62  ;;  %v1045_v34 = vsel %vm1003_vm0, %v17405_v42, %v17404_v63  ;;  %v13344_v62 = vmul.f32 %v12414_v45, %v13321_v36  ;;  %v918_v63 = vmul.f32 %v12443_v54, %v13321_v36 }
 0x149   : > { %17394 = vst [vmem:[#allocation187_spill] sm:$0xff] %v13294_v16  ;;  %v13354_v16 = vmul.f32 %v12420_v47, %v13321_v36  ;;  %v13367_v55 = vadd.f32 %v1045_v34, %v901_v15  ;;  %v888_v15 = vmul.f32 %v12443_v54, %v13333_v61  ;;  %v13386_v34 = vmul.f32 %v12420_v47, %v13333_v61 }
 0x14a   : > { %17395 = vst [vmem:[#allocation188_spill] sm:$0xff] %v13298_v9  ;;  %v1076_v42 = vrot.slane %v13344_v62, 1  ;;  %v13365_v9 = vmul.f32 %v12428_v50, %v13321_v36  ;;  %v682_v62 = vpop.permute.xlu2 %681 }
 0x14b   : > { %17396 = vst [vmem:[#allocation189_spill] sm:$0xff] %v13304_v14  ;;  %v17412_v14 = vrot.slane %v13222_v37, 1  ;;  %v13403_v58 = vmul.f32 %v12414_v45, %v682_v62 }
 0x14c   : > { %17397 = vst [vmem:[#allocation190_spill] sm:$0xff] %v13308_v57  ;;  %v13376_v57 = vmul.f32 %v12417_v46, %v13333_v61 }
 0x14d   : > { %17398 = vst [vmem:[#allocation191_spill] sm:$0xff] %v13312_v0  ;;  %v13372_v0 = vmul.f32 %v12414_v45, %v13333_v61  ;;  %v1079_v32 = vsel %vm1003_vm0, %v1076_v42, %v17412_v14 }
 0x14e   : > { %17399 = vst [vmem:[#allocation192_spill] sm:$0xff] %v13319_v59  ;;  %v13395_v14 = vadd.f32 %v1079_v32, %v918_v63  ;;  %v13412_v32 = vmul.f32 %v12417_v46, %v682_v62  ;;  %v13415_v63 = vmul.f32 %v12420_v47, %v682_v62  ;;  %v13417_v59 = vpop.permute.xlu0 %781 }
 0x14f   : > { %17400 = vst [vmem:[#allocation193_spill] sm:$0xff] %v13321_v36  ;;  %v13393_v36 = vmul.f32 %v12425_v49, %v13333_v61 }
 0x150   : > { %17401 = vst [vmem:[#allocation194_spill] sm:$0xff] %v13327_v11  ;;  %v17417_v11 = vrot.slane %v13135_v48, 1  ;;  %v13422_v48 = vmul.f32 %v12443_v54, %v682_v62 }
 0x151   : > { %17402 = vst [vmem:[#allocation195_spill] sm:$0xff] %v13331_v19  ;;  %v17057_v19 = vrot.slane %v13372_v0, 1 }
 0x152   : > { %17403 = vst [vmem:[#allocation196_spill] sm:$0xff] %v13333_v61 }
 0x153   : > { %17406 = vst [vmem:[#allocation197_spill] sm:$0xff] %v13354_v16 }
 0x154   : > { %17407 = vst [vmem:[#allocation198_spill] sm:$0xff] %v13361_v28 }
 0x155   : > { %17408 = vst [vmem:[#allocation199_spill] sm:$0xff] %v13365_v9  ;;  %v13460_v9 = vmul.f32 %v12428_v50, %v13417_v59 }
 0x156   : > { %17409 = vst [vmem:[#allocation200_spill] sm:$0xff] %v13367_v55  ;;  %v1019_v55 = vsel %vm1003_vm0, %v17057_v19, %v17417_v11  ;;  %v13425_v11 = vmul.f32 %v12425_v49, %v682_v62  ;;  %v13456_v19 = vmul.f32 %v12425_v49, %v13417_v59 }
 0x157   : > { %17410 = vst [vmem:[#allocation201_spill] sm:$0xff] %v13372_v0  ;;  %v13427_v28 = vadd.f32 %v1019_v55, %v888_v15  ;;  %v13434_v0 = vpop.permute.xlu1 %786  ;;  %v13444_v55 = vmul.f32 %v12417_v46, %v13417_v59  ;;  %v13448_v15 = vmul.f32 %v12443_v54, %v13417_v59 }
 0x158   : > { %17411 = vst [vmem:[#allocation202_spill] sm:$0xff] %v13376_v57  ;;  %v13432_v57 = vmul.f32 %v12428_v50, %v682_v62  ;;  %v13452_v62 = vmul.f32 %v12420_v47, %v13417_v59  ;;  %v13478_v61 = vmul.f32 %v12420_v47, %v13434_v0 }
 0x159   : > { %17413 = vst [vmem:[#allocation203_spill] sm:$0xff] %v13386_v34  ;;  %v13468_v34 = vmul.f32 %v12414_v45, %v13434_v0 }
 0x15a   : > { %17414 = vst [vmem:[#allocation204_spill] sm:$0xff] %v13393_v36  ;;  %v13440_v36 = vmul.f32 %v12414_v45, %v13417_v59 }
 0x15b   : > { %17415 = vst [vmem:[#allocation205_spill] sm:$0xff] %v13400_v8  ;;  %v905_v8 = vmul.f32 %v12443_v54, %v13434_v0 }
 0x15c   : > { %17416 = vst [vmem:[#allocation206_spill] sm:$0xff] %v13403_v58  ;;  %v17439_v58 = vrot.slane %v13468_v34, 1 }
 0x15d   : > { %17418 = vst [vmem:[#allocation207_spill] sm:$0xff] %v13412_v32  ;;  %v17443_v32 = vrot.slane %v13167_v1, 1 }
 0x15e   : > { %17419 = vst [vmem:[#allocation208_spill] sm:$0xff] %v13415_v63  ;;  %v13474_v63 = vmul.f32 %v12417_v46, %v13434_v0 }
 0x15f   : > { %17420 = vst [vmem:[#allocation209_spill] sm:$0xff] %v13417_v59  ;;  %v13483_v59 = vmul.f32 %v12425_v49, %v13434_v0 }
 0x160   : > { %17421 = vst [vmem:[#allocation210_spill] sm:$0xff] %v13422_v48  ;;  %v17438_v48 = vrot.slane %v12838_v13, 1 }
 0x161   : > { %17422 = vst [vmem:[#allocation211_spill] sm:$0xff] %v13425_v11 }
 0x162   : > { %17423 = vst [vmem:[#allocation212_spill] sm:$0xff] %v13427_v28  ;;  %v17437_v28 = vrot.slane %v13001_v12, 1 }
 0x163   : > { %17424 = vst [vmem:[#allocation213_spill] sm:$0xff] %v13432_v57 }
 0x164   : > { %17425 = vst [vmem:[#allocation214_spill] sm:$0xff] %v13434_v0 }
 0x165   : > { %17426 = vst [vmem:[#allocation215_spill] sm:$0xff] %v13440_v36  ;;  %v1053_v36 = vsel %vm1003_vm0, %v17439_v58, %v17438_v48  ;;  %v13516_v58 = vmul.f32 %v12428_v50, %v12876_v20  ;;  %v872_v48 = vpop.permute.xlu0 %871 }
 0x166   : > { %17427 = vst [vmem:[#allocation216_spill] sm:$0xff] %v13444_v55  ;;  %v1077_v55 = vsel %vm1003_vm0, %v17437_v28, %v1076_v42  ;;  %v17440_v28 = vrot.slane %v13350_v3, 2  ;;  %v17441_v42 = vrot.slane %v13005_v35, 2  ;;  %v13518_v57 = vadd.f32 %v1053_v36, %v905_v8 }
 0x167   : > { %17428 = vst [vmem:[#allocation217_spill] sm:$0xff] %v13448_v15  ;;  %v13487_v15 = vmul.f32 %v12428_v50, %v13434_v0  ;;  %v1161_v16 = vadd.f32 %v1077_v55, %v13011_v60  ;;  %v13512_v55 = vmul.f32 %v12425_v49, %v12876_v20  ;;  %v1572_v0 = vrot.slane %v12976_v10, 2 }
 0x168   : > { %17429 = vst [vmem:[#allocation218_spill] sm:$0xff] %v13452_v62  ;;  %v1321_v11 = vsel %vm1247_vm1, %v17441_v42, %v17440_v28  ;;  %v13522_v28 = vperm.slane %v12411_v44, 6  ;;  %v13525_v42 = vperm.slane %v12411_v44, 7  ;;  %v919_v60 = vmul.f32 %v12443_v54, %v13161_v18 }
 0x169   : > { %17430 = vst [vmem:[#allocation219_spill] sm:$0xff] %v13456_v19  ;;  %v1405_v12 = vadd.f32 %v1321_v11, %v1161_v16  ;;  %v1821_v36 = vrot.slane %v13512_v55, 3  ;;  %v2072_v10 = vrot.slane %v13516_v58, 4  ;;  %v13541_v44 = vmul.f32 %v12420_v47, %v872_v48 }
 0x16a   : > { %17431 = vst [vmem:[#allocation220_spill] sm:$0xff] %v13460_v9  ;;  %v17444_v9 = vrot.slane %v13222_v37, 1  ;;  %v13538_v16 = vmul.f32 %v13522_v28, %v12876_v20  ;;  %v13545_v11 = vmul.f32 %v13525_v42, %v12876_v20  ;;  %v17447_v37 = vrot.slane %v13181_v38, 2 }
 0x16b   : > { %17432 = vst [vmem:[#allocation221_spill] sm:$0xff] %v13468_v34  ;;  %v13553_v55 = vmul.f32 %v12425_v49, %v872_v48  ;;  %v17449_v58 = vrot.slane %v13171_v51, 2 }
 0x16c   : > { %17433 = vst [vmem:[#allocation222_spill] sm:$0xff] %v13474_v63  ;;  %v1081_v8 = vsel %vm1003_vm0, %v17444_v9, %v17443_v32  ;;  %v17448_v9 = vrot.slane %v13245_v40, 2  ;;  %v17456_v63 = vrot.slane %v13538_v16, 4 }
 0x16d   : > { %17434 = vst [vmem:[#allocation223_spill] sm:$0xff] %v13478_v61  ;;  %v1163_v18 = vadd.f32 %v1081_v8, %v919_v60  ;;  %v17451_v60 = vrot.slane %v13188_v7, 3  ;;  %v17452_v8 = vrot.slane %v13251_v29, 3  ;;  %v17108_v35 = vrot.slane %v13553_v55, 3 }
 0x16e   : > { %17435 = vst [vmem:[#allocation224_spill] sm:$0xff] %v13483_v59  ;;  %v1571_v32 = vsel %vm1247_vm1, %v17448_v9, %v17447_v37  ;;  %v17104_v59 = vrot.slane %v13541_v44, 2  ;;  %v13567_v9 = vld [vmem:[#allocation2 + $0x8] ss:$0 sm:$0xff] }
 0x16f   : > { %17436 = vst [vmem:[#allocation225_spill] sm:$0xff] %v13487_v15  ;;  %v17450_v15 = vrot.slane %v13232_v17, 2  ;;  %v1657_v62 = vadd.f32 %v1571_v32, %v1405_v12  ;;  %v1820_v61 = vsel %vm1745_vm2, %v17452_v8, %v17451_v60  ;;  %v13577_v32 = vmul.f32 %v13522_v28, %v872_v48 }
 0x170   : > { %17442 = vst [vmem:[#allocation226_spill] sm:$0xff] %v13518_v57  ;;  %v13571_v57 = vmul.f32 %v12428_v50, %v872_v48  ;;  %v1575_v12 = vsel %vm1247_vm1, %v1572_v0, %v17104_v59  ;;  %v1824_v37 = vsel %vm1745_vm2, %v1821_v36, %v17108_v35 }
 0x171   : > { %17445 = vst [vmem:[#allocation227_spill] sm:$0xff] %v13538_v16  ;;  %v1325_v19 = vsel %vm1247_vm1, %v17450_v15, %v17449_v58  ;;  %v1906_v15 = vadd.f32 %v1820_v61, %v1657_v62  ;;  %v13580_v58 = vmul.f32 %v13525_v42, %v872_v48  ;;  %v17454_v61 = vrot.slane %v13195_v21, 4 }
 0x172   : > { %17446 = vst [vmem:[#allocation228_spill] sm:$0xff] %v13545_v11  ;;  %v1407_v40 = vadd.f32 %v1325_v19, %v1163_v18  ;;  %v2074_v18 = vrot.slane %v13571_v57, 4  ;;  %v13585_v19 = vmul.f32 %v13567_v9, %v872_v48  ;;  %v17455_v62 = vrot.slane %v13255_v6, 4  ;;  %v17632_v6 = vld [vmem:[#allocation79_spill] sm:$0xff] }
 0x173   : > { %v2318_v29 = vrot.slane %v13577_v32, 4  ;;  %v2563_v60 = vrot.slane %v13580_v58, 5  ;;  %v920_v48 = vmul.f32 %v12443_v54, %v13137_v56  ;;  %v1206_v32 = vmul.f32 %v12417_v46, %v12876_v20 }
 0x174   : > { %v1659_v8 = vadd.f32 %v1575_v12, %v1407_v40  ;;  %17453 = vst [vmem:[#allocation229_spill] sm:$0xff] %v13585_v19  ;;  %v2071_v59 = vsel %vm1996_vm3, %v17455_v62, %v17454_v61  ;;  %v2075_v57 = vsel %vm1996_vm3, %v2072_v10, %v2074_v18  ;;  %v962_v61 = vmul.f32 %v12414_v45, %v12876_v20  ;;  %v17647_v19 = vld [vmem:[#allocation102_spill] sm:$0xff] }
 0x175   : > { %v2159_v12 = vadd.f32 %v2071_v59, %v1906_v15  ;;  %v2319_v35 = vsel %vm1996_vm3, %v17456_v63, %v2318_v29  ;;  %v921_v15 = vmul.f32 %v12443_v54, %v12876_v20  ;;  %v17460_v63 = vrot.slane %v13350_v3, 2 }
 0x176   : > { %v1908_v40 = vadd.f32 %v1824_v37, %v1659_v8  ;;  %v17457_v37 = vrot.slane %v13545_v11, 5  ;;  %v17459_v8 = vrot.slane %v13232_v17, 2  ;;  %v1082_v16 = vrot.slane %v962_v61, 1 }
 0x177   : > { %v13620_v34 = vadd.f32 %v2319_v35, %v2159_v12  ;;  %v1953_v11 = vmul.f32 0.0, %v12428_v50  ;;  %v2204_v20 = vmul.f32 0.0, %v13522_v28  ;;  %v2448_v17 = vmul.f32 0.0, %v13525_v42 }
 0x178   : > { %v2161_v58 = vadd.f32 %v2075_v57, %v1908_v40  ;;  %v13611_v59 = vsel %vm2489_vm4, %v17457_v37, %v2563_v60  ;;  %v1323_v62 = vsel %vm1247_vm1, %v17460_v63, %v17459_v8  ;;  %v17462_v40 = vrot.slane %v13181_v38, 2 }
 0x179   : > { %17458 = vst [vmem:[#allocation230_spill] sm:$0xff] %v13611_v59  ;;  %v1406_v56 = vadd.f32 %v1323_v62, %v13395_v14  ;;  %v1326_v37 = vrot.slane %v1206_v32, 2  ;;  %v877_v59 = vpop.permute.xlu1 %876  ;;  %v17463_v3 = vrot.slane %v13167_v1, 1  ;;  %v1165_v12 = vadd.f32 %v1082_v16, %v921_v15 }
 0x17a   : > { %17461 = vst [vmem:[#allocation231_spill] sm:$0xff] %v13620_v34  ;;  %v1573_v57 = vsel %vm1247_vm1, %v17462_v40, %v1572_v0  ;;  %v17464_v14 = vrot.slane %v13188_v7, 3  ;;  %v17465_v0 = vrot.slane %v13171_v51, 2  ;;  %v17466_v63 = vrot.slane %v13195_v21, 4 }
 0x17b   : > { %v1083_v35 = vsel %vm1003_vm0, %v17463_v3, %v1082_v16  ;;  %v1658_v61 = vadd.f32 %v1573_v57, %v1406_v56  ;;  %v2078_v40 = vrot.slane %v1953_v11, 4  ;;  %v13641_v1 = vrot.slane %v2204_v20, 4 }
 0x17c   : > { %v1822_v38 = vsel %vm1745_vm2, %v17464_v14, %v1821_v36  ;;  %v1164_v8 = vadd.f32 %v1083_v35, %v920_v48  ;;  %v1327_v32 = vsel %vm1247_vm1, %v17465_v0, %v1326_v37  ;;  %v2073_v62 = vsel %vm1996_vm3, %v17466_v63, %v2072_v10 }
 0x17d   : > { %v1907_v34 = vadd.f32 %v1822_v38, %v1658_v61  ;;  %v1452_v16 = vmul.f32 %v12420_v47, %v877_v59  ;;  %v1703_v56 = vmul.f32 %v12425_v49, %v877_v59  ;;  %v13645_v7 = vrot.slane %v2448_v17, 5 }
 0x17e   : > { %v1952_v36 = vmul.f32 %v12428_v50, %v877_v59  ;;  %v2203_v51 = vmul.f32 %v13522_v28, %v877_v59  ;;  %v13650_v48 = vmul.f32 %v13525_v42, %v877_v59  ;;  %v1409_v21 = vadd.f32 %v1326_v37, %v1165_v12 }
 0x17f   : > { %17467 = vst [vmem:[#allocation232_spill] sm:$0xff] %v13645_v7  ;;  %v1576_v15 = vrot.slane %v1452_v16, 2  ;;  %v1825_v10 = vrot.slane %v1703_v56, 3  ;;  %v13653_v11 = vmul.f32 %v13567_v9, %v877_v59  ;;  %v1408_v20 = vadd.f32 %v1327_v32, %v1164_v8 }
 0x180   : > { %v2076_v57 = vrot.slane %v1952_v36, 4  ;;  %v2320_v3 = vrot.slane %v2203_v51, 4  ;;  %v2565_v35 = vrot.slane %v13650_v48, 5  ;;  %v2160_v17 = vadd.f32 %v2073_v62, %v1907_v34 }
 0x181   : > { %17468 = vst [vmem:[#allocation233_spill] sm:$0xff] %v13653_v11  ;;  %v17469_v61 = vrot.slane %v13541_v44, 2  ;;  %v1661_v38 = vadd.f32 %v1576_v15, %v1409_v21  ;;  %v17470_v0 = vrot.slane %v12637_v39, 1  ;;  %v17471_v37 = vrot.slane %v12533_v24, 1 }
 0x182   : > { %v17472_v59 = vrot.slane %v13553_v55, 3  ;;  %v2321_v32 = vsel %vm1996_vm3, %v2318_v29, %v2320_v3  ;;  %v13672_v44 = vsel %vm1996_vm3, %v2074_v18, %v2076_v57  ;;  %v13675_v39 = vsel %vm1996_vm3, %v2076_v57, %v2078_v40 }
 0x183   : > { %v1577_v14 = vsel %vm1247_vm1, %v17469_v61, %v1576_v15  ;;  %v1031_v12 = vsel %vm1003_vm0, %v17471_v37, %v17470_v0  ;;  %v13669_v62 = vadd.f32 %v1825_v10, %v1661_v38  ;;  %v2323_v24 = vsel %vm1996_vm3, %v2320_v3, %v13641_v1 }
 0x184   : > { %v1660_v63 = vadd.f32 %v1577_v14, %v1408_v20  ;;  %v1826_v8 = vsel %vm1745_vm2, %v17472_v59, %v1825_v10  ;;  %v13681_v55 = vadd.f32 %v2321_v32, %v2160_v17  ;;  %v13686_v29 = vsel %vm2489_vm4, %v2563_v60, %v2565_v35 }
 0x185   : > { %17474 = vst [vmem:[#allocation235_spill] sm:$0xff] %v13686_v29  ;;  %v17475_v56 = vrot.slane %v12619_v25, 1  ;;  %v17476_v18 = vrot.slane %v12525_v22, 1  ;;  %v13693_v40 = vadd.f32 %v2323_v24, %v2161_v58  ;;  %v1138_v51 = vadd.f32 %v1031_v12, %v12554_v30  ;;  %v17492_v24 = vld [vmem:[#allocation123_spill] sm:$0xff] }
 0x186   : > { %v13679_v16 = vadd.f32 %v1826_v8, %v1660_v63  ;;  %17473 = vst [vmem:[#allocation234_spill] sm:$0xff] %v13681_v55  ;;  %v17478_v15 = vrot.slane %v12646_v33, 2  ;;  %v17479_v10 = vrot.slane %v12558_v31, 2  ;;  %v17480_v60 = vrot.slane %v12529_v23, 2 }
 0x187   : > { %v1035_v36 = vsel %vm1003_vm0, %v17476_v18, %v17475_v56  ;;  %17477 = vst [vmem:[#allocation236_spill] sm:$0xff] %v13693_v40  ;;  %v17482_v57 = vrot.slane %v12623_v4, 2  ;;  %v17486_v61 = vrot.slane %v12627_v43, 2  ;;  %v17487_v14 = vrot.slane %v12542_v27, 2 }
 0x188   : > { %v1140_v21 = vadd.f32 %v1035_v36, %v12538_v26  ;;  %v1275_v20 = vsel %vm1247_vm1, %v17479_v10, %v17478_v15  ;;  %v17481_v25 = vmov %v17478_v15  ;;  %v17483_v58 = vmov %v17480_v60  ;;  %v17495_v36 = vld [vmem:[#allocation63_spill] sm:$0xff] }
 0x189   : > { %v1277_v22 = vsel %vm1247_vm1, %v17481_v25, %v17480_v60  ;;  %v1279_v30 = vsel %vm1247_vm1, %v17483_v58, %v17482_v57  ;;  %v17484_v26 = vrot.slane %v12436_v52, 2  ;;  %v17485_v3 = vmov %v17482_v57  ;;  %v17499_v25 = vld [vmem:[#allocation33_spill] sm:$0xff]  ;;  %v17502_v58 = vld [vmem:[#allocation119_spill] sm:$0xff] }
 0x18a   : > { %v1525_v33 = vsel %vm1247_vm1, %v17487_v14, %v17486_v61  ;;  %v1382_v38 = vadd.f32 %v1275_v20, %v1138_v51  ;;  %v1383_v0 = vadd.f32 %v1277_v22, %v12714_v5  ;;  %v1384_v37 = vadd.f32 %v1279_v30, %v1140_v21  ;;  %v17497_v51 = vld [vmem:[#allocation51_spill] sm:$0xff] }
 0x18b   : > { %v1281_v17 = vsel %vm1247_vm1, %v17485_v3, %v17484_v26  ;;  %v17488_v12 = vrot.slane %v12440_v53, 2  ;;  %v17489_v63 = vmov %v17486_v61  ;;  %v17490_v59 = vrot.slane %v12919_v2, 2  ;;  %v17505_v3 = vld [vmem:[#allocation126_spill] sm:$0xff] }
 0x18c   : > { %v1385_v23 = vadd.f32 %v1281_v17, %v12681_v41  ;;  %v17493_v56 = vrot.slane %v17492_v24, 2  ;;  %v17496_v41 = vrot.slane %v17495_v36, 3  ;;  %v17498_v21 = vrot.slane %v17497_v51, 3  ;;  %v17513_v36 = vld [vmem:[#allocation28_spill] sm:$0xff] }
 0x18d   : > { %v1527_v4 = vsel %vm1247_vm1, %v17489_v63, %v17488_v12  ;;  %v17491_v8 = vmov %v17488_v12  ;;  %v17494_v18 = vmov %v17490_v59  ;;  %v1634_v15 = vadd.f32 %v1525_v33, %v1382_v38  ;;  %v17508_v33 = vld [vmem:[#allocation52_spill] sm:$0xff]  ;;  %v17509_v63 = vld [vmem:[#allocation65_spill] sm:$0xff] }
 0x18e   : > { %v1529_v32 = vsel %vm1247_vm1, %v17491_v8, %v17490_v59  ;;  %v1531_v5 = vsel %vm1247_vm1, %v17494_v18, %v17493_v56  ;;  %v1774_v43 = vsel %vm1745_vm2, %v17498_v21, %v17496_v41  ;;  %v1635_v10 = vadd.f32 %v1527_v4, %v1383_v0  ;;  %v17510_v59 = vld [vmem:[#allocation40_spill] sm:$0xff]  ;;  %v17512_v18 = vld [vmem:[#allocation129_spill] sm:$0xff] }
 0x18f   : > { %v1636_v20 = vadd.f32 %v1529_v32, %v1384_v37  ;;  %v1637_v60 = vadd.f32 %v1531_v5, %v1385_v23  ;;  %v17500_v53 = vrot.slane %v17499_v25, 3  ;;  %v17501_v22 = vmov %v17496_v41  ;;  %v17511_v32 = vld [vmem:[#allocation124_spill] sm:$0xff]  ;;  %v17514_v21 = vld [vmem:[#allocation113_spill] sm:$0xff] }
 0x190   : > { %v17503_v2 = vrot.slane %v17502_v58, 3  ;;  %v17506_v17 = vrot.slane %v17505_v3, 3  ;;  %v17117_v38 = vrot.slane %v17508_v33, 4  ;;  %v1883_v0 = vadd.f32 %v1774_v43, %v1634_v15  ;;  %v17516_v15 = vld [vmem:[#allocation175_spill] sm:$0xff] }
 0x191   : > { %v1776_v57 = vsel %vm1745_vm2, %v17501_v22, %v17500_v53  ;;  %v17504_v30 = vmov %v17500_v53  ;;  %v2024_v4 = vrot.slane %v17509_v63, 4  ;;  %v2026_v8 = vrot.slane %v17510_v59, 4  ;;  %v17515_v53 = vld [vmem:[#allocation111_spill] sm:$0xff] }
 0x192   : > { %v1778_v26 = vsel %vm1745_vm2, %v17504_v30, %v17503_v2  ;;  %v17507_v61 = vmov %v17503_v2  ;;  %v1884_v37 = vadd.f32 %v1776_v57, %v1635_v10  ;;  %v2028_v56 = vrot.slane %v17511_v32, 4 }
 0x193   : > { %v1780_v14 = vsel %vm1745_vm2, %v17507_v61, %v17506_v17  ;;  %v1885_v23 = vadd.f32 %v1778_v26, %v1636_v20  ;;  %v17115_v5 = vrot.slane %v17512_v18, 4  ;;  %v13766_v41 = vmul.f32 %v13522_v28, %v17513_v36  ;;  %v17517_v17 = vld [vmem:[#allocation174_spill] sm:$0xff]  ;;  %v17580_v18 = vld [vmem:[#allocation159_spill] sm:$0xff] }
 0x194   : > { %v1886_v12 = vadd.f32 %v1780_v14, %v1637_v60  ;;  %v2179_v25 = vmul.f32 %v13522_v28, %v17514_v21  ;;  %v2180_v43 = vmul.f32 %v13522_v28, %v17515_v53  ;;  %v2181_v10 = vmul.f32 %v13522_v28, %v17516_v15 }
 0x195   : > { %v2025_v20 = vsel %vm1996_vm3, %v17117_v38, %v2024_v4  ;;  %v2027_v60 = vsel %vm1996_vm3, %v2024_v4, %v2026_v8  ;;  %v2029_v22 = vsel %vm1996_vm3, %v2026_v8, %v2028_v56  ;;  %v2031_v57 = vsel %vm1996_vm3, %v2028_v56, %v17115_v5 }
 0x196   : > { %v2136_v58 = vadd.f32 %v2025_v20, %v1883_v0  ;;  %v2137_v2 = vadd.f32 %v2027_v60, %v1884_v37  ;;  %v2138_v30 = vadd.f32 %v2029_v22, %v1885_v23  ;;  %v2139_v26 = vadd.f32 %v2031_v57, %v1886_v12 }
 0x197   : > { %v13784_v61 = vmul.f32 %v13522_v28, %v17517_v17  ;;  %v17116_v14 = vrot.slane %v13766_v41, 4  ;;  %v2272_v63 = vrot.slane %v2179_v25, 4  ;;  %v2274_v59 = vrot.slane %v2180_v43, 4 }
 0x198   : > { %v2276_v32 = vrot.slane %v2181_v10, 4  ;;  %v13789_v4 = vmul.f32 %v13525_v42, %v17513_v36  ;;  %v2423_v8 = vmul.f32 %v13525_v42, %v17514_v21  ;;  %v2424_v0 = vmul.f32 %v13525_v42, %v17515_v53 }
 0x199   : > { %17518 = vst [vmem:[#allocation63_spill] sm:$0xff] %v13784_v61  ;;  %v2273_v37 = vsel %vm1996_vm3, %v17116_v14, %v2272_v63  ;;  %v2275_v23 = vsel %vm1996_vm3, %v2272_v63, %v2274_v59  ;;  %v17119_v12 = vrot.slane %v13784_v61, 4  ;;  %v2425_v56 = vmul.f32 %v13525_v42, %v17516_v15 }
 0x19a   : > { %v2277_v25 = vsel %vm1996_vm3, %v2274_v59, %v2276_v32  ;;  %v2380_v43 = vadd.f32 %v2273_v37, %v2136_v58  ;;  %v2381_v10 = vadd.f32 %v2275_v23, %v2137_v2  ;;  %v13805_v20 = vmul.f32 %v13525_v42, %v17517_v17 }
 0x19b   : > { %v2279_v60 = vsel %vm1996_vm3, %v2276_v32, %v17119_v12  ;;  %v2382_v22 = vadd.f32 %v2277_v25, %v2138_v30  ;;  %v17122_v57 = vrot.slane %v13789_v4, 5  ;;  %v2517_v63 = vrot.slane %v2423_v8, 5 }
 0x19c   : > { %17519 = vst [vmem:[#allocation51_spill] sm:$0xff] %v13805_v20  ;;  %v2383_v5 = vadd.f32 %v2279_v60, %v2139_v26  ;;  %v2519_v34 = vrot.slane %v2424_v0, 5  ;;  %v2521_v14 = vrot.slane %v2425_v56, 5  ;;  %v17118_v38 = vrot.slane %v13805_v20, 5  ;;  %v17522_v60 = vld [vmem:[#allocation56_spill] sm:$0xff] }
 0x19d   : > { %v13816_v58 = vsel %vm2489_vm4, %v2565_v35, %v13645_v7  ;;  %v13820_v2 = vmul.f32 %v13567_v9, %v17513_v36  ;;  %v2668_v30 = vmul.f32 %v13567_v9, %v17514_v21  ;;  %v2669_v26 = vmul.f32 %v13567_v9, %v17515_v53 }
 0x19e   : > { %17520 = vst [vmem:[#allocation33_spill] sm:$0xff] %v13816_v58  ;;  %v2518_v59 = vsel %vm2489_vm4, %v17122_v57, %v2517_v63  ;;  %v2520_v32 = vsel %vm2489_vm4, %v2517_v63, %v2519_v34  ;;  %v2522_v48 = vsel %vm2489_vm4, %v2519_v34, %v2521_v14  ;;  %v2524_v35 = vsel %vm2489_vm4, %v2521_v14, %v17118_v38  ;;  %v17524_v14 = vld [vmem:[#allocation109_spill] sm:$0xff] }
 0x19f   : > { %v2625_v36 = vadd.f32 %v2518_v59, %v2380_v43  ;;  %v2626_v8 = vadd.f32 %v2520_v32, %v2381_v10  ;;  %v2627_v0 = vadd.f32 %v2522_v48, %v2382_v22  ;;  %v2670_v21 = vmul.f32 %v13567_v9, %v17516_v15 }
 0x1a0   : > { %v2628_v37 = vadd.f32 %v2524_v35, %v2383_v5  ;;  %v13838_v53 = vmul.f32 %v13567_v9, %v17517_v17  ;;  %v17120_v23 = vrot.slane %v13820_v2, 6  ;;  %v2762_v56 = vrot.slane %v2668_v30, 6 }
 0x1a1   : > { %v2764_v34 = vrot.slane %v2669_v26, 6  ;;  %v2766_v25 = vrot.slane %v2670_v21, 6  ;;  %v17523_v63 = vrot.slane %v17522_v60, 2  ;;  %v17525_v43 = vrot.slane %v17524_v14, 2  ;;  %v17528_v26 = vld [vmem:[#allocation120_spill] sm:$0xff]  ;;  %v17530_v60 = vld [vmem:[#allocation66_spill] sm:$0xff] }
 0x1a2   : > { %17521 = vst [vmem:[#allocation119_spill] sm:$0xff] %v13838_v53  ;;  %v2763_v5 = vsel %vm2734_vm5, %v17120_v23, %v2762_v56  ;;  %v17121_v15 = vrot.slane %v13838_v53, 6  ;;  %v17526_v17 = vrot.slane %v12558_v31, 2  ;;  %v13858_v21 = vld [vmem:[#allocation4] ss:$0 sm:$0xff]  ;;  %v17531_v23 = vrot.slane %v17530_v60, 2 }
 0x1a3   : > { %v1271_v10 = vsel %vm1247_vm1, %v17525_v43, %v17523_v63  ;;  %v17527_v22 = vmov %v17523_v63  ;;  %v2765_v32 = vsel %vm2734_vm5, %v2762_v56, %v2764_v34  ;;  %v2767_v48 = vsel %vm2734_vm5, %v2764_v34, %v2766_v25  ;;  %v17529_v63 = vld [vmem:[#allocation64_spill] sm:$0xff] }
 0x1a4   : > { %v1273_v30 = vsel %vm1247_vm1, %v17527_v22, %v17526_v17  ;;  %v1380_v59 = vadd.f32 %v1271_v10, %v17528_v26  ;;  %v2870_v35 = vadd.f32 %v2763_v5, %v2625_v36  ;;  %v2769_v38 = vsel %vm2734_vm5, %v2766_v25, %v17121_v15  ;;  %v17532_v17 = vld [vmem:[#allocation53_spill] sm:$0xff] }
 0x1a5   : > { %v1381_v43 = vadd.f32 %v1273_v30, %v17529_v63  ;;  %v2871_v31 = vadd.f32 %v2765_v32, %v2626_v8  ;;  %v2872_v12 = vadd.f32 %v2767_v48, %v2627_v0  ;;  %v17533_v22 = vrot.slane %v17532_v17, 2  ;;  %v17536_v32 = vld [vmem:[#allocation67_spill] sm:$0xff]  ;;  %v17538_v63 = vld [vmem:[#allocation54_spill] sm:$0xff] }
 0x1a6   : > { %v2873_v56 = vadd.f32 %v2769_v38, %v2628_v37  ;;  %v2916_v34 = vadd.f32 %v13858_v21, %v2870_v35  ;;  %v17534_v36 = vrot.slane %v12542_v27, 2  ;;  %v17535_v5 = vmov %v17531_v23 }
 0x1a7   : > { %v1521_v10 = vsel %vm1247_vm1, %v17533_v22, %v17531_v23  ;;  %v2917_v25 = vadd.f32 %v13858_v21, %v2871_v31  ;;  %v2918_v8 = vadd.f32 %v13858_v21, %v2872_v12  ;;  %v17537_v48 = vrot.slane %v17536_v32, 3 }
 0x1a8   : > { %v1523_v30 = vsel %vm1247_vm1, %v17535_v5, %v17534_v36  ;;  %v1632_v26 = vadd.f32 %v1521_v10, %v1380_v59  ;;  %v17539_v15 = vrot.slane %v17538_v63, 3  ;;  %v2919_v37 = vadd.f32 %v13858_v21, %v2873_v56  ;;  %v17544_v36 = vld [vmem:[#allocation55_spill] sm:$0xff] }
 0x1a9   : > { %v1633_v0 = vadd.f32 %v1523_v30, %v1381_v43  ;;  %v2958_v23 = vmax.f32 %v2916_v34, 0.0  ;;  %v17540_v27 = vrot.slane %v17497_v51, 3  ;;  %v17541_v35 = vmov %v17537_v48  ;;  %v17542_v43 = vld [vmem:[#allocation68_spill] sm:$0xff] }
 0x1aa   : > { %v1770_v38 = vsel %vm1745_vm2, %v17539_v15, %v17537_v48  ;;  %v2959_v31 = vmax.f32 %v2917_v25, 0.0  ;;  %v2960_v22 = vmax.f32 %v2918_v8, 0.0  ;;  %v17543_v10 = vrot.slane %v17542_v43, 4  ;;  %v17548_v48 = vld [vmem:[#allocation46_spill] sm:$0xff] }
 0x1ab   : > { %v1772_v59 = vsel %vm1745_vm2, %v17541_v35, %v17540_v27  ;;  %v1881_v60 = vadd.f32 %v1770_v38, %v1632_v26  ;;  %v17545_v5 = vrot.slane %v17544_v36, 4  ;;  %v2961_v15 = vmax.f32 %v2919_v37, 0.0 }
 0x1ac   : > { %v1882_v12 = vadd.f32 %v1772_v59, %v1633_v0  ;;  %v17546_v56 = vrot.slane %v17508_v33, 4  ;;  %v17547_v34 = vmov %v17543_v10  ;;  %v13900_v26 = vmul.f32 %v13522_v28, %v17548_v48  ;;  %v17549_v0 = vld [vmem:[#allocation60_spill] sm:$0xff] }
 0x1ad   : > { %v2021_v30 = vsel %vm1996_vm3, %v17545_v5, %v17543_v10  ;;  %v3019_v25 = vpack.c.bf16 %v2959_v31, %v2958_v23  ;;  %v2177_v38 = vmul.f32 %v13522_v28, %v17549_v0  ;;  %v13906_v27 = vmul.f32 %v13525_v42, %v17548_v48 }
 0x1ae   : > { %v2023_v51 = vsel %vm1996_vm3, %v17547_v34, %v17546_v56  ;;  %v2134_v32 = vadd.f32 %v2021_v30, %v1881_v60  ;;  %v3020_v37 = vpack.c.bf16 %v2961_v15, %v2960_v22  ;;  %v17123_v33 = vrot.slane %v13900_v26, 4 }
 0x1af   : > { %v2135_v8 = vadd.f32 %v2023_v51, %v1882_v12  ;;  %v2421_v35 = vmul.f32 %v13525_v42, %v17549_v0  ;;  %v13913_v59 = vmul.f32 %v13567_v9, %v17548_v48  ;;  %v3197_v60 = vshrl.u32 %v3019_v25, 16  ;;  %v13924_v12 = vpop.permute.xlu1 %776 }
 0x1b0   : > { %v3200_v23 = vshll.u32 %v3019_v25, 16  ;;  %v2268_v31 = vrot.slane %v2177_v38, 4  ;;  %v3206_v43 = vshrl.u32 %v3020_v37, 16  ;;  %v3209_v10 = vshll.u32 %v3020_v37, 16  ;;  %17551 = vst [vmem:[#allocation52_spill] sm:$0xff] %v13924_v12 }
 0x1b1   : > { %v2513_v5 = vrot.slane %v2421_v35, 5  ;;  %v2666_v22 = vmul.f32 %v13567_v9, %v17549_v0  ;;  %v3199_v30 = vrot.slane %v3197_v60, 2  ;;  %v17550_v34 = vrot.slane %v13766_v41, 4 }
 0x1b2   : > { %v3202_v15 = vrot.slane %v3200_v23, 3  ;;  %v2269_v56 = vsel %vm1996_vm3, %v17123_v33, %v2268_v31  ;;  %v3208_v48 = vrot.slane %v3206_v43, 2  ;;  %v3211_v25 = vrot.slane %v3209_v10, 3 }
 0x1b3   : > { %v2271_v51 = vsel %vm1996_vm3, %v2268_v31, %v17550_v34  ;;  %v2378_v38 = vadd.f32 %v2269_v56, %v2134_v32  ;;  %v17552_v0 = vrot.slane %v13906_v27, 5  ;;  %v17553_v60 = vrot.slane %v13789_v4, 5  ;;  %v13962_v56 = vpop.permute.xlu0 %696 }
 0x1b4   : > { %v2379_v57 = vadd.f32 %v2271_v51, %v2135_v8  ;;  %v13926_v37 = vor.u32 %v3202_v15, %v3199_v30  ;;  %v17125_v41 = vrot.slane %v13913_v59, 6  ;;  %v13935_v33 = vor.u32 %v3211_v25, %v3208_v48  ;;  %17560 = vst [vmem:[#allocation111_spill] sm:$0xff] %v13962_v56 }
 0x1b5   : > { %v2514_v35 = vsel %vm2489_vm4, %v17552_v0, %v2513_v5  ;;  %v2516_v23 = vsel %vm2489_vm4, %v2513_v5, %v17553_v60  ;;  %v2758_v32 = vrot.slane %v2666_v22, 6  ;;  %v13939_v8 = vmul.f32 %v12414_v45, %v13924_v12 }
 0x1b6   : > { %17554 = vst [vmem:[#allocation65_spill] sm:$0xff] %v13935_v33  ;;  %v2623_v31 = vadd.f32 %v2514_v35, %v2378_v38  ;;  %v2624_v43 = vadd.f32 %v2516_v23, %v2379_v57  ;;  %v13943_v10 = vmul.f32 %v12417_v46, %v13924_v12  ;;  %v13947_v4 = vmul.f32 %v12420_v47, %v13924_v12  ;;  %v17576_v38 = vld [vmem:[#allocation201_spill] sm:$0xff] }
 0x1b7   : > { %17555 = vst [vmem:[#allocation40_spill] sm:$0xff] %v13939_v8  ;;  %v3213_v5 = vsel %vm3133_vm6, %v13926_v37, %v13935_v33  ;;  %v2759_v57 = vsel %vm2734_vm5, %v17125_v41, %v2758_v32  ;;  %v17558_v22 = vrot.slane %v13820_v2, 6  ;;  %v13960_v15 = vmul.f32 %v12425_v49, %v13924_v12 }
 0x1b8   : > { %17556 = vst [vmem:[#allocation124_spill] sm:$0xff] %v13943_v10  ;;  %v13966_v34 = vadd.f32 %v13675_v39, %v13669_v62  ;;  %3367 = vmatpush.bf16.msra.mxu0 %v3213_v5  ;;  %v2868_v51 = vadd.f32 %v2759_v57, %v2623_v31  ;;  %v17124_v25 = vrot.slane %v13939_v8, 1  ;;  %v903_v2 = vmul.f32 %v12443_v54, %v13924_v12  ;;  %v17562_v39 = vld [vmem:[#allocation215_spill] sm:$0xff] }
 0x1b9   : > { %17557 = vst [vmem:[#allocation28_spill] sm:$0xff] %v13947_v4  ;;  %v2761_v30 = vsel %vm2734_vm5, %v2758_v32, %v17558_v22  ;;  %v13975_v35 = vmul.f32 %v12428_v50, %v13924_v12  ;;  %v17563_v23 = vrot.slane %v17562_v39, 1  ;;  %v13991_v5 = vmul.f32 %v12443_v54, %v13962_v56  ;;  %v17595_v4 = vld [vmem:[#allocation115_spill] sm:$0xff] }
 0x1ba   : > { %17559 = vst [vmem:[#allocation113_spill] sm:$0xff] %v13960_v15  ;;  %v2869_v48 = vadd.f32 %v2761_v30, %v2624_v43  ;;  %v2914_v60 = vadd.f32 %v13858_v21, %v2868_v51  ;;  %v13986_v43 = vmul.f32 %v12414_v45, %v13962_v56  ;;  %v13995_v57 = vmul.f32 %v12417_v46, %v13962_v56  ;;  %v17593_v15 = vld [vmem:[#allocation59_spill] sm:$0xff] }
 0x1bb   : > { %17561 = vst [vmem:[#allocation175_spill] sm:$0xff] %v13975_v35  ;;  %v1049_v31 = vsel %vm1003_vm0, %v17124_v25, %v17563_v23  ;;  %v13999_v22 = vmul.f32 %v12420_v47, %v13962_v56  ;;  %v14004_v23 = vmul.f32 %v12425_v49, %v13962_v56  ;;  %v14013_v33 = vmul.f32 %v12428_v50, %v13962_v56  ;;  %v17579_v56 = vld [vmem:[#allocation167_spill] sm:$0xff] }
 0x1bc   : > { %v2915_v62 = vadd.f32 %v13858_v21, %v2869_v48  ;;  %17564 = vst [vmem:[#allocation174_spill] sm:$0xff] %v13986_v43  ;;  %v2956_v30 = vmax.f32 %v2914_v60, 0.0  ;;  %v14006_v32 = vadd.f32 %v1049_v31, %v903_v2  ;;  %v17570_v60 = vld [vmem:[#allocation150_spill] sm:$0xff]  ;;  %v17572_v48 = vld [vmem:[#allocation155_spill] sm:$0xff]  ;;  %v17574_v2 = vrot.slane %v17524_v14, 2  ;;  %v17581_v14 = vld [vmem:[#allocation57_spill] sm:$0xff] }
 0x1bd   : > { %17565 = vst [vmem:[#allocation56_spill] sm:$0xff] %v13995_v57  ;;  %v17573_v53 = vrot.slane %v17572_v48, 2  ;;  %v17577_v61 = vrot.slane %v17576_v38, 1  ;;  %v17582_v24 = vrot.slane %v17581_v14, 2  ;;  %v17585_v38 = vrot.slane %v17532_v17, 2 }
 0x1be   : > { %17566 = vst [vmem:[#allocation109_spill] sm:$0xff] %v13999_v22  ;;  %v2957_v51 = vmax.f32 %v2915_v62, 0.0  ;;  %v17571_v62 = vrot.slane %v17570_v60, 2  ;;  %v17583_v60 = vld [vmem:[#allocation112_spill] sm:$0xff]  ;;  %v17594_v14 = vrot.slane %v17593_v15, 4 }
 0x1bf   : > { %17567 = vst [vmem:[#allocation120_spill] sm:$0xff] %v14004_v23  ;;  %v17584_v52 = vrot.slane %v17583_v60, 2  ;;  %v17587_v23 = vld [vmem:[#allocation58_spill] sm:$0xff] }
 0x1c0   : > { %17568 = vst [vmem:[#allocation64_spill] sm:$0xff] %v14006_v32  ;;  %v3018_v41 = vpack.c.bf16 %v2957_v51, %v2956_v30  ;;  %v1267_v20 = vsel %vm1247_vm1, %v17573_v53, %v17571_v62  ;;  %v17575_v31 = vmov %v17571_v62  ;;  %v17578_v30 = vrot.slane %v13986_v43, 1 }
 0x1c1   : > { %17569 = vst [vmem:[#allocation66_spill] sm:$0xff] %v14013_v33  ;;  %v1269_v0 = vsel %vm1247_vm1, %v17575_v31, %v17574_v2  ;;  %v1378_v12 = vadd.f32 %v1267_v20, %v17579_v56  ;;  %v1517_v2 = vsel %vm1247_vm1, %v17584_v52, %v17582_v24  ;;  %v17586_v31 = vmov %v17582_v24  ;;  %v17589_v56 = vld [vmem:[#allocation114_spill] sm:$0xff] }
 0x1c2   : > { %v14030_v51 = vsel %vm1003_vm0, %v17578_v30, %v17577_v61  ;;  %v1379_v3 = vadd.f32 %v1269_v0, %v17580_v18  ;;  %v3188_v53 = vshrl.u32 %v3018_v41, 16  ;;  %v3191_v62 = vshll.u32 %v3018_v41, 16 }
 0x1c3   : > { %v1519_v61 = vsel %vm1247_vm1, %v17586_v31, %v17585_v38  ;;  %v1630_v30 = vadd.f32 %v1517_v2, %v1378_v12  ;;  %v17588_v20 = vrot.slane %v17587_v23, 3  ;;  %v17590_v18 = vrot.slane %v17589_v56, 3 }
 0x1c4   : > { %v1631_v25 = vadd.f32 %v1519_v61, %v1379_v3  ;;  %v17591_v0 = vrot.slane %v17538_v63, 3  ;;  %v3190_v24 = vrot.slane %v3188_v53, 2  ;;  %v3193_v17 = vrot.slane %v3191_v62, 3 }
 0x1c5   : > { %v1766_v41 = vsel %vm1745_vm2, %v17590_v18, %v17588_v20  ;;  %v17592_v35 = vmov %v17588_v20  ;;  %v17596_v38 = vrot.slane %v17595_v4, 4  ;;  %v17597_v12 = vrot.slane %v17544_v36, 4  ;;  %v17599_v20 = vld [vmem:[#allocation50_spill] sm:$0xff] }
 0x1c6   : > { %v1768_v52 = vsel %vm1745_vm2, %v17592_v35, %v17591_v0  ;;  %v17598_v2 = vmov %v17594_v14  ;;  %v1879_v61 = vadd.f32 %v1766_v41, %v1630_v30  ;;  %v14067_v23 = vmul.f32 %v13522_v28, %v17599_v20  ;;  %v17600_v35 = vld [vmem:[#allocation62_spill] sm:$0xff] }
 0x1c7   : > { %v2017_v3 = vsel %vm1996_vm3, %v17596_v38, %v17594_v14  ;;  %v2019_v31 = vsel %vm1996_vm3, %v17598_v2, %v17597_v12  ;;  %v1880_v63 = vadd.f32 %v1768_v52, %v1631_v25  ;;  %v2175_v53 = vmul.f32 %v13522_v28, %v17600_v35  ;;  %v17609_v2 = vld [vmem:[#allocation41_spill] sm:$0xff] }
 0x1c8   : > { %v14071_v62 = vor.u32 %v3193_v17, %v3190_v24  ;;  %v14075_v18 = vmul.f32 %v13525_v42, %v17599_v20  ;;  %v2419_v36 = vmul.f32 %v13525_v42, %v17600_v35  ;;  %v14081_v15 = vmul.f32 %v13567_v9, %v17599_v20 }
 0x1c9   : > { %v2132_v25 = vadd.f32 %v2017_v3, %v1879_v61  ;;  %v2133_v30 = vadd.f32 %v2019_v31, %v1880_v63  ;;  %v17144_v41 = vrot.slane %v14067_v23, 4  ;;  %v2264_v0 = vrot.slane %v2175_v53, 4  ;;  %v17602_v31 = vld [vmem:[#allocation81_spill] sm:$0xff] }
 0x1ca   : > { %v3204_v52 = vsel %vm3133_vm6, %v14071_v62, %v13926_v37  ;;  %v17147_v24 = vrot.slane %v14075_v18, 5  ;;  %v2509_v17 = vrot.slane %v2419_v36, 5  ;;  %v2664_v14 = vmul.f32 %v13567_v9, %v17600_v35  ;;  %v17604_v37 = vld [vmem:[#allocation34_spill] sm:$0xff] }
 0x1cb   : > { %3368 = vmatpush.bf16.msra.mxu0 %v3204_v52  ;;  %v2265_v38 = vsel %vm1996_vm3, %v17144_v41, %v2264_v0  ;;  %v17601_v3 = vrot.slane %v13900_v26, 4  ;;  %v17603_v61 = vrot.slane %v17602_v31, 1  ;;  %v17605_v63 = vrot.slane %v17604_v37, 1  ;;  %v17611_v37 = vld [vmem:[#allocation44_spill] sm:$0xff] }
 0x1cc   : > { %v2376_v53 = vadd.f32 %v2265_v38, %v2132_v25  ;;  %v2510_v35 = vsel %vm2489_vm4, %v17147_v24, %v2509_v17  ;;  %v17606_v52 = vrot.slane %v13906_v27, 5  ;;  %v2754_v41 = vrot.slane %v2664_v14, 6  ;;  %v17616_v27 = vld [vmem:[#allocation48_spill] sm:$0xff] }
 0x1cd   : > { %v2267_v12 = vsel %vm1996_vm3, %v2264_v0, %v17601_v3  ;;  %v1063_v20 = vsel %vm1003_vm0, %v17605_v63, %v17603_v61  ;;  %v17607_v0 = vld [vmem:[#allocation97_spill] sm:$0xff]  ;;  %v17610_v32 = vrot.slane %v17609_v2, 1  ;;  %v17612_v61 = vld [vmem:[#allocation82_spill] sm:$0xff] }
 0x1ce   : > { %v2377_v36 = vadd.f32 %v2267_v12, %v2133_v30  ;;  %v2512_v26 = vsel %vm2489_vm4, %v2509_v17, %v17606_v52  ;;  %v17608_v3 = vrot.slane %v17607_v0, 1  ;;  %v1154_v10 = vadd.f32 %v1063_v20, %v17611_v37  ;;  %v17614_v30 = vld [vmem:[#allocation35_spill] sm:$0xff]  ;;  %v17617_v17 = vld [vmem:[#allocation78_spill] sm:$0xff] }
 0x1cf   : > { %v17613_v25 = vrot.slane %v17612_v61, 2  ;;  %v17615_v38 = vrot.slane %v17614_v30, 2  ;;  %v2621_v63 = vadd.f32 %v2510_v35, %v2376_v53  ;;  %v17618_v14 = vrot.slane %v17617_v17, 2  ;;  %v17622_v0 = vld [vmem:[#allocation42_spill] sm:$0xff]  ;;  %v17625_v35 = vld [vmem:[#allocation99_spill] sm:$0xff] }
 0x1d0   : > { %v1069_v31 = vsel %vm1003_vm0, %v17610_v32, %v17608_v3  ;;  %v2622_v24 = vadd.f32 %v2512_v26, %v2377_v36  ;;  %v17620_v32 = vrot.slane %v14081_v15, 6  ;;  %v17621_v3 = vrot.slane %v13913_v59, 6  ;;  %v17629_v59 = vld [vmem:[#allocation87_spill] sm:$0xff] }
 0x1d1   : > { %v1307_v12 = vsel %vm1247_vm1, %v17615_v38, %v17613_v25  ;;  %v1157_v8 = vadd.f32 %v1069_v31, %v17616_v27  ;;  %v17619_v52 = vmov %v17613_v25  ;;  %v17623_v25 = vrot.slane %v17622_v0, 2 }
 0x1d2   : > { %v1309_v2 = vsel %vm1247_vm1, %v17619_v52, %v17618_v14  ;;  %v2755_v20 = vsel %vm2734_vm5, %v17620_v32, %v2754_v41  ;;  %v2757_v37 = vsel %vm2734_vm5, %v2754_v41, %v17621_v3  ;;  %v17624_v53 = vmov %v17618_v14  ;;  %v17628_v52 = vld [vmem:[#allocation96_spill] sm:$0xff]  ;;  %v17630_v3 = vld [vmem:[#allocation43_spill] sm:$0xff] }
 0x1d3   : > { %v1311_v36 = vsel %vm1247_vm1, %v17624_v53, %v17623_v25  ;;  %v17626_v26 = vrot.slane %v17625_v35, 2  ;;  %v17627_v31 = vmov %v17623_v25  ;;  %v2866_v38 = vadd.f32 %v2755_v20, %v2621_v63  ;;  %v17634_v53 = vld [vmem:[#allocation100_spill] sm:$0xff] }
 0x1d4   : > { %v2867_v27 = vadd.f32 %v2757_v37, %v2622_v24  ;;  %v1398_v14 = vadd.f32 %v1307_v12, %v1154_v10  ;;  %v1399_v32 = vadd.f32 %v1309_v2, %v17628_v52  ;;  %v1400_v57 = vadd.f32 %v1311_v36, %v17629_v59  ;;  %v17637_v12 = vld [vmem:[#allocation144_spill] sm:$0xff] }
 0x1d5   : > { %v1313_v61 = vsel %vm1247_vm1, %v17627_v31, %v17626_v26  ;;  %v17631_v43 = vrot.slane %v17630_v3, 2  ;;  %v17633_v17 = vrot.slane %v17632_v6, 2  ;;  %v17635_v35 = vrot.slane %v17634_v53, 2  ;;  %v17640_v20 = vld [vmem:[#allocation92_spill] sm:$0xff]  ;;  %v17643_v3 = vld [vmem:[#allocation45_spill] sm:$0xff] }
 0x1d6   : > { %v1401_v41 = vadd.f32 %v1313_v61, %v1157_v8  ;;  %v2912_v24 = vadd.f32 %v13858_v21, %v2866_v38  ;;  %v2913_v10 = vadd.f32 %v13858_v21, %v2867_v27  ;;  %v17638_v63 = vrot.slane %v17637_v12, 2 }
 0x1d7   : > { %v1557_v25 = vsel %vm1247_vm1, %v17633_v17, %v17631_v43  ;;  %v17636_v0 = vmov %v17631_v43  ;;  %v17639_v8 = vmov %v17635_v35  ;;  %v17641_v37 = vrot.slane %v17640_v20, 2  ;;  %v17645_v17 = vld [vmem:[#allocation80_spill] sm:$0xff]  ;;  %v17650_v20 = vld [vmem:[#allocation145_spill] sm:$0xff] }
 0x1d8   : > { %v1559_v26 = vsel %vm1247_vm1, %v17636_v0, %v17635_v35  ;;  %v1561_v2 = vsel %vm1247_vm1, %v17639_v8, %v17638_v63  ;;  %v17642_v43 = vmov %v17638_v63  ;;  %v1650_v31 = vadd.f32 %v1557_v25, %v1398_v14 }
 0x1d9   : > { %v1563_v36 = vsel %vm1247_vm1, %v17642_v43, %v17641_v37  ;;  %v1651_v61 = vadd.f32 %v1559_v26, %v1399_v32  ;;  %v1652_v52 = vadd.f32 %v1561_v2, %v1400_v57  ;;  %v2954_v59 = vmax.f32 %v2912_v24, 0.0  ;;  %v17653_v32 = vld [vmem:[#allocation95_spill] sm:$0xff] }
 0x1da   : > { %v1653_v35 = vadd.f32 %v1563_v36, %v1401_v41  ;;  %v2955_v38 = vmax.f32 %v2913_v10, 0.0  ;;  %v17644_v27 = vrot.slane %v17643_v3, 3  ;;  %v17646_v0 = vrot.slane %v17645_v17, 3  ;;  %v17656_v3 = vld [vmem:[#allocation85_spill] sm:$0xff] }
 0x1db   : > { %v17648_v63 = vrot.slane %v17647_v19, 3  ;;  %v17651_v37 = vrot.slane %v17650_v20, 3  ;;  %v17654_v41 = vrot.slane %v17653_v32, 3  ;;  %v17659_v19 = vld [vmem:[#allocation149_spill] sm:$0xff] }
 0x1dc   : > { %v1806_v53 = vsel %vm1745_vm2, %v17646_v0, %v17644_v27  ;;  %v17649_v8 = vmov %v17644_v27  ;;  %v3017_v2 = vpack.c.bf16 %v2955_v38, %v2954_v59  ;;  %v17157_v27 = vrot.slane %v17656_v3, 4  ;;  %v17657_v0 = vld [vmem:[#allocation49_spill] sm:$0xff] }
 0x1dd   : > { %v1808_v12 = vsel %vm1745_vm2, %v17649_v8, %v17648_v63  ;;  %v17652_v14 = vmov %v17648_v63  ;;  %v17655_v25 = vmov %v17651_v37  ;;  %v1899_v24 = vadd.f32 %v1806_v53, %v1650_v31  ;;  %v17658_v8 = vld [vmem:[#allocation103_spill] sm:$0xff]  ;;  %v17661_v20 = vld [vmem:[#allocation93_spill] sm:$0xff]  ;;  %v17662_v31 = vld [vmem:[#allocation128_spill] sm:$0xff] }
 0x1de   : > { %v1810_v57 = vsel %vm1745_vm2, %v17652_v14, %v17651_v37  ;;  %v1812_v26 = vsel %vm1745_vm2, %v17655_v25, %v17654_v41  ;;  %v1900_v10 = vadd.f32 %v1808_v12, %v1651_v61  ;;  %v2056_v63 = vrot.slane %v17657_v0, 4  ;;  %v17660_v37 = vld [vmem:[#allocation98_spill] sm:$0xff]  ;;  %v17663_v0 = vld [vmem:[#allocation73_spill] sm:$0xff] }
 0x1df   : > { %v1901_v43 = vadd.f32 %v1810_v57, %v1652_v52  ;;  %v1902_v36 = vadd.f32 %v1812_v26, %v1653_v35  ;;  %v2058_v11 = vrot.slane %v17658_v8, 4  ;;  %v2060_v58 = vrot.slane %v17659_v19, 4  ;;  %v17664_v19 = vld [vmem:[#allocation127_spill] sm:$0xff] }
 0x1e0   : > { %v17158_v14 = vrot.slane %v17660_v37, 4  ;;  %v3179_v32 = vshrl.u32 %v3017_v2, 16  ;;  %v3182_v40 = vshll.u32 %v3017_v2, 16  ;;  %v14192_v41 = vmul.f32 %v13522_v28, %v17661_v20 }
 0x1e1   : > { %v2195_v61 = vmul.f32 %v13522_v28, %v17662_v31  ;;  %v2057_v52 = vsel %vm1996_vm3, %v17157_v27, %v2056_v63  ;;  %v2059_v35 = vsel %vm1996_vm3, %v2056_v63, %v2058_v11  ;;  %v2061_v59 = vsel %vm1996_vm3, %v2058_v11, %v2060_v58  ;;  %v17665_v63 = vld [vmem:[#allocation193_spill] sm:$0xff] }
 0x1e2   : > { %v2063_v38 = vsel %vm1996_vm3, %v2060_v58, %v17158_v14  ;;  %v3181_v53 = vrot.slane %v3179_v32, 2  ;;  %v3184_v12 = vrot.slane %v3182_v40, 3  ;;  %v2152_v57 = vadd.f32 %v2057_v52, %v1899_v24 }
 0x1e3   : > { %v2153_v25 = vadd.f32 %v2059_v35, %v1900_v10  ;;  %v2154_v26 = vadd.f32 %v2061_v59, %v1901_v43  ;;  %v2155_v2 = vadd.f32 %v2063_v38, %v1902_v36  ;;  %v2196_v8 = vmul.f32 %v13522_v28, %v17663_v0 }
 0x1e4   : > { %v2197_v27 = vmul.f32 %v13522_v28, %v17664_v19  ;;  %v14208_v29 = vor.u32 %v3184_v12, %v3181_v53  ;;  %v14212_v11 = vmul.f32 %v13522_v28, %v17665_v63  ;;  %v17159_v58 = vrot.slane %v14192_v41, 4 }
 0x1e5   : > { %v2304_v32 = vrot.slane %v2195_v61, 4  ;;  %v2306_v40 = vrot.slane %v2196_v8, 4  ;;  %v14217_v10 = vmul.f32 %v13525_v42, %v17661_v20  ;;  %v2439_v43 = vmul.f32 %v13525_v42, %v17662_v31 }
 0x1e6   : > { %17666 = vst [vmem:[#allocation53_spill] sm:$0xff] %v14212_v11  ;;  %v2308_v24 = vrot.slane %v2197_v27, 4  ;;  %v3195_v36 = vsel %vm3133_vm6, %v14208_v29, %v14071_v62  ;;  %v17161_v35 = vrot.slane %v14212_v11, 4  ;;  %v2440_v27 = vmul.f32 %v13525_v42, %v17663_v0 }
 0x1e7   : > { %v2305_v52 = vsel %vm1996_vm3, %v17159_v58, %v2304_v32  ;;  %3369 = vmatpush.bf16.msra.mxu0 %v3195_v36  ;;  %v2307_v61 = vsel %vm1996_vm3, %v2304_v32, %v2306_v40  ;;  %v2441_v53 = vmul.f32 %v13525_v42, %v17664_v19  ;;  %v14239_v14 = vmul.f32 %v13525_v42, %v17665_v63 }
 0x1e8   : > { %v2309_v59 = vsel %vm1996_vm3, %v2306_v40, %v2308_v24  ;;  %v2396_v38 = vadd.f32 %v2305_v52, %v2152_v57  ;;  %v2311_v62 = vsel %vm1996_vm3, %v2308_v24, %v17161_v35  ;;  %v2397_v12 = vadd.f32 %v2307_v61, %v2153_v25 }
 0x1e9   : > { %v2398_v8 = vadd.f32 %v2309_v59, %v2154_v26  ;;  %17667 = vst [vmem:[#allocation67_spill] sm:$0xff] %v14239_v14  ;;  %v2399_v58 = vadd.f32 %v2311_v62, %v2155_v2  ;;  %v17162_v36 = vrot.slane %v14217_v10, 5  ;;  %v2549_v32 = vrot.slane %v2439_v43, 5 }
 0x1ea   : > { %v2551_v37 = vrot.slane %v2440_v27, 5  ;;  %v2553_v40 = vrot.slane %v2441_v53, 5  ;;  %v17165_v57 = vrot.slane %v14239_v14, 5  ;;  %v14245_v52 = vmul.f32 %v13567_v9, %v17661_v20 }
 0x1eb   : > { %v2684_v25 = vmul.f32 %v13567_v9, %v17662_v31  ;;  %v2550_v26 = vsel %vm2489_vm4, %v17162_v36, %v2549_v32  ;;  %v2685_v24 = vmul.f32 %v13567_v9, %v17663_v0  ;;  %v2686_v43 = vmul.f32 %v13567_v9, %v17664_v19  ;;  %v17669_v19 = vld [vmem:[#allocation131_spill] sm:$0xff] }
 0x1ec   : > { %v2552_v2 = vsel %vm2489_vm4, %v2549_v32, %v2551_v37  ;;  %v2554_v27 = vsel %vm2489_vm4, %v2551_v37, %v2553_v40  ;;  %v2556_v20 = vsel %vm2489_vm4, %v2553_v40, %v17165_v57  ;;  %v2641_v61 = vadd.f32 %v2550_v26, %v2396_v38  ;;  %v17671_v37 = vld [vmem:[#allocation70_spill] sm:$0xff]  ;;  %v17676_v26 = vld [vmem:[#allocation71_spill] sm:$0xff] }
 0x1ed   : > { %v2642_v31 = vadd.f32 %v2552_v2, %v2397_v12  ;;  %v2643_v59 = vadd.f32 %v2554_v27, %v2398_v8  ;;  %v2644_v53 = vadd.f32 %v2556_v20, %v2399_v58  ;;  %v14263_v62 = vmul.f32 %v13567_v9, %v17665_v63  ;;  %v17673_v12 = vld [vmem:[#allocation69_spill] sm:$0xff]  ;;  %v17674_v58 = vld [vmem:[#allocation132_spill] sm:$0xff]  ;;  %v17680_v27 = vld [vmem:[#allocation143_spill] sm:$0xff] }
 0x1ee   : > { %v17166_v32 = vrot.slane %v14245_v52, 6  ;;  %v2794_v0 = vrot.slane %v2684_v25, 6  ;;  %v2796_v35 = vrot.slane %v2685_v24, 6  ;;  %v2798_v36 = vrot.slane %v2686_v43, 6 }
 0x1ef   : > { %17668 = vst [vmem:[#allocation54_spill] sm:$0xff] %v14263_v62  ;;  %v17670_v11 = vrot.slane %v17669_v19, 1  ;;  %v17672_v55 = vrot.slane %v17671_v37, 1  ;;  %v17167_v38 = vrot.slane %v14263_v62, 6  ;;  %v17675_v40 = vrot.slane %v17674_v58, 2 }
 0x1f0   : > { %v17677_v63 = vrot.slane %v17676_v26, 2  ;;  %v17678_v25 = vrot.slane %v17614_v30, 2 }
 0x1f1   : > { %v1059_v14 = vsel %vm1003_vm0, %v17672_v55, %v17670_v11  ;;  %v17679_v24 = vmov %v17675_v40  ;;  %v2795_v55 = vsel %vm2734_vm5, %v17166_v32, %v2794_v0  ;;  %v2797_v11 = vsel %vm2734_vm5, %v2794_v0, %v2796_v35 }
 0x1f2   : > { %v1152_v8 = vadd.f32 %v1059_v14, %v17673_v12  ;;  %v1303_v2 = vsel %vm1247_vm1, %v17677_v63, %v17675_v40  ;;  %v1305_v43 = vsel %vm1247_vm1, %v17679_v24, %v17678_v25  ;;  %v2799_v14 = vsel %vm2734_vm5, %v2796_v35, %v2798_v36  ;;  %v17681_v63 = vld [vmem:[#allocation83_spill] sm:$0xff]  ;;  %v17683_v24 = vld [vmem:[#allocation36_spill] sm:$0xff] }
 0x1f3   : > { %v1397_v20 = vadd.f32 %v1305_v43, %v17680_v27  ;;  %v2801_v19 = vsel %vm2734_vm5, %v2798_v36, %v17167_v38  ;;  %v2886_v37 = vadd.f32 %v2795_v55, %v2641_v61  ;;  %v2887_v30 = vadd.f32 %v2797_v11, %v2642_v31  ;;  %v17689_v55 = vld [vmem:[#allocation37_spill] sm:$0xff]  ;;  %v17712_v38 = vld [vmem:[#allocation210_spill] sm:$0xff] }
 0x1f4   : > { %v2888_v12 = vadd.f32 %v2799_v14, %v2643_v59  ;;  %v2889_v58 = vadd.f32 %v2801_v19, %v2644_v53  ;;  %v1396_v40 = vadd.f32 %v1303_v2, %v1152_v8  ;;  %v17682_v25 = vrot.slane %v17681_v63, 2  ;;  %v17687_v8 = vld [vmem:[#allocation84_spill] sm:$0xff] }
 0x1f5   : > { %v17684_v57 = vrot.slane %v17683_v24, 2  ;;  %v17685_v0 = vrot.slane %v17632_v6, 2  ;;  %v2932_v27 = vadd.f32 %v13858_v21, %v2886_v37  ;;  %v2933_v36 = vadd.f32 %v13858_v21, %v2887_v30 }
 0x1f6   : > { %v17686_v35 = vmov %v17682_v25  ;;  %v2934_v61 = vadd.f32 %v13858_v21, %v2888_v12  ;;  %v2935_v59 = vadd.f32 %v13858_v21, %v2889_v58  ;;  %v17688_v2 = vrot.slane %v17687_v8, 3  ;;  %v17693_v58 = vld [vmem:[#allocation86_spill] sm:$0xff] }
 0x1f7   : > { %v1553_v32 = vsel %vm1247_vm1, %v17684_v57, %v17682_v25  ;;  %v1555_v43 = vsel %vm1247_vm1, %v17686_v35, %v17685_v0  ;;  %v17690_v57 = vrot.slane %v17689_v55, 3  ;;  %v17691_v11 = vrot.slane %v17645_v17, 3 }
 0x1f8   : > { %v1649_v31 = vadd.f32 %v1555_v43, %v1397_v20  ;;  %v1648_v53 = vadd.f32 %v1553_v32, %v1396_v40  ;;  %v17692_v14 = vmov %v17688_v2  ;;  %v2974_v37 = vmax.f32 %v2932_v27, 0.0  ;;  %v17695_v40 = vld [vmem:[#allocation38_spill] sm:$0xff]  ;;  %v17699_v27 = vld [vmem:[#allocation72_spill] sm:$0xff] }
 0x1f9   : > { %v1802_v6 = vsel %vm1745_vm2, %v17690_v57, %v17688_v2  ;;  %v1804_v19 = vsel %vm1745_vm2, %v17692_v14, %v17691_v11  ;;  %v2975_v30 = vmax.f32 %v2933_v36, 0.0  ;;  %v2976_v63 = vmax.f32 %v2934_v61, 0.0  ;;  %v17700_v61 = vld [vmem:[#allocation30_spill] sm:$0xff] }
 0x1fa   : > { %v1898_v12 = vadd.f32 %v1804_v19, %v1649_v31  ;;  %v2977_v20 = vmax.f32 %v2935_v59, 0.0  ;;  %v1897_v25 = vadd.f32 %v1802_v6, %v1648_v53  ;;  %v17694_v32 = vrot.slane %v17693_v58, 4 }
 0x1fb   : > { %v17696_v0 = vrot.slane %v17695_v40, 4  ;;  %v17697_v43 = vrot.slane %v17656_v3, 4  ;;  %v3027_v2 = vpack.c.bf16 %v2975_v30, %v2974_v37  ;;  %v14328_v36 = vmul.f32 %v13522_v28, %v17699_v27 }
 0x1fc   : > { %v17698_v17 = vmov %v17694_v32  ;;  %v2193_v31 = vmul.f32 %v13522_v28, %v17700_v61  ;;  %v3028_v59 = vpack.c.bf16 %v2977_v20, %v2976_v63  ;;  %v14334_v6 = vmul.f32 %v13525_v42, %v17699_v27 }
 0x1fd   : > { %v2053_v35 = vsel %vm1996_vm3, %v17696_v0, %v17694_v32  ;;  %v2055_v8 = vsel %vm1996_vm3, %v17698_v17, %v17697_v43  ;;  %v2437_v3 = vmul.f32 %v13525_v42, %v17700_v61  ;;  %v3269_v11 = vshrl.u32 %v3027_v2, 16 }
 0x1fe   : > { %v2151_v57 = vadd.f32 %v2055_v8, %v1898_v12  ;;  %v2150_v53 = vadd.f32 %v2053_v35, %v1897_v25  ;;  %v3272_v14 = vshll.u32 %v3027_v2, 16  ;;  %v17170_v19 = vrot.slane %v14328_v36, 4 }
 0x1ff   : > { %v2300_v37 = vrot.slane %v2193_v31, 4  ;;  %v3278_v30 = vshrl.u32 %v3028_v59, 16  ;;  %v3281_v12 = vshll.u32 %v3028_v59, 16  ;;  %v17169_v58 = vrot.slane %v14334_v6, 5  ;;  %v14346_v31 = vpop.permute.xlu0 %686 }
 0x200   : > { %v2545_v32 = vrot.slane %v2437_v3, 5  ;;  %v3271_v0 = vrot.slane %v3269_v11, 2  ;;  %v3274_v63 = vrot.slane %v3272_v14, 3  ;;  %v17701_v25 = vrot.slane %v14192_v41, 4  ;;  %17702 = vst [vmem:[#allocation68_spill] sm:$0xff] %v14346_v31 }
 0x201   : > { %v2301_v20 = vsel %vm1996_vm3, %v17170_v19, %v2300_v37  ;;  %v3280_v43 = vrot.slane %v3278_v30, 2  ;;  %v3283_v17 = vrot.slane %v3281_v12, 3  ;;  %v14350_v59 = vadd.f32 %v14030_v51, %v13991_v5  ;;  %v17715_v19 = vld [vmem:[#allocation195_spill] sm:$0xff] }
 0x202   : > { %v2303_v35 = vsel %vm1996_vm3, %v2300_v37, %v17701_v25  ;;  %v2394_v8 = vadd.f32 %v2301_v20, %v2150_v53  ;;  %v14352_v3 = vor.u32 %v3274_v63, %v3271_v0  ;;  %v2546_v11 = vsel %vm2489_vm4, %v17169_v58, %v2545_v32 }
 0x203   : > { %v2395_v2 = vadd.f32 %v2303_v35, %v2151_v57  ;;  %17703 = vst [vmem:[#allocation55_spill] sm:$0xff] %v14350_v59  ;;  %v14359_v41 = vmul.f32 %v13567_v9, %v17699_v27  ;;  %v14361_v14 = vor.u32 %v3283_v17, %v3280_v43  ;;  %v17705_v57 = vrot.slane %v14217_v10, 5  ;;  %v17721_v59 = vld [vmem:[#allocation211_spill] sm:$0xff] }
 0x204   : > { %v2639_v37 = vadd.f32 %v2546_v11, %v2394_v8  ;;  %v2682_v5 = vmul.f32 %v13567_v9, %v17700_v61  ;;  %v926_v12 = vmul.f32 %v12414_v45, %v14346_v31  ;;  %v1170_v27 = vmul.f32 %v12417_v46, %v14346_v31 }
 0x205   : > { %17704 = vst [vmem:[#allocation46_spill] sm:$0xff] %v14361_v14  ;;  %v2548_v53 = vsel %vm2489_vm4, %v2545_v32, %v17705_v57  ;;  %v17168_v30 = vrot.slane %v14359_v41, 6  ;;  %v3285_v10 = vsel %vm3133_vm6, %v14352_v3, %v14361_v14  ;;  %v1665_v63 = vmul.f32 %v12425_v49, %v14346_v31 }
 0x206   : > { %v2640_v51 = vadd.f32 %v2548_v53, %v2395_v2  ;;  %v2790_v32 = vrot.slane %v2682_v5, 6  ;;  %3410 = vmatpush.bf16.msra.mxu1 %v3285_v10  ;;  %v885_v9 = vmul.f32 %v12443_v54, %v14346_v31  ;;  %v1010_v61 = vrot.slane %v926_v12, 1  ;;  %v17708_v53 = vld [vmem:[#allocation206_spill] sm:$0xff] }
 0x207   : > { %v1254_v20 = vrot.slane %v1170_v27, 2  ;;  %v14383_v25 = vmul.f32 %v12428_v50, %v14346_v31  ;;  %v17707_v43 = vrot.slane %v14245_v52, 6  ;;  %v14392_v8 = vmul.f32 0.0, %v12443_v54  ;;  %v17710_v27 = vld [vmem:[#allocation192_spill] sm:$0xff] }
 0x208   : > { %v2791_v35 = vsel %vm2734_vm5, %v17168_v30, %v2790_v32  ;;  %v14395_v2 = vmul.f32 0.0, %v12414_v45  ;;  %v17709_v5 = vrot.slane %v17708_v53, 1  ;;  %v17711_v10 = vrot.slane %v17710_v27, 1 }
 0x209   : > { %17706 = vst [vmem:[#allocation60_spill] sm:$0xff] %v14383_v25  ;;  %v2793_v17 = vsel %vm2734_vm5, %v2790_v32, %v17707_v43  ;;  %v2884_v11 = vadd.f32 %v2791_v35, %v2639_v37  ;;  %v1414_v32 = vmul.f32 %v12420_v47, %v14346_v31  ;;  %v1749_v43 = vrot.slane %v1665_v63, 3 }
 0x20a   : > { %v2885_v57 = vadd.f32 %v2793_v17, %v2640_v51  ;;  %v1011_v12 = vsel %vm1003_vm0, %v17709_v5, %v1010_v61  ;;  %v1013_v0 = vsel %vm1003_vm0, %v1010_v61, %v17711_v10  ;;  %v17713_v51 = vld [vmem:[#allocation207_spill] sm:$0xff]  ;;  %v1004_v5 = vrot.slane %v14395_v2, 1 }
 0x20b   : > { %v1128_v52 = vadd.f32 %v1011_v12, %v17712_v38  ;;  %v1129_v30 = vadd.f32 %v1013_v0, %v885_v9  ;;  %v2930_v58 = vadd.f32 %v13858_v21, %v2884_v11  ;;  %v17714_v35 = vrot.slane %v17713_v51, 2  ;;  %v17717_v12 = vld [vmem:[#allocation182_spill] sm:$0xff] }
 0x20c   : > { %v2931_v37 = vadd.f32 %v13858_v21, %v2885_v57  ;;  %v17716_v14 = vrot.slane %v17715_v19, 2  ;;  %v1167_v0 = vmul.f32 0.0, %v12417_v46  ;;  %v1411_v63 = vmul.f32 0.0, %v12420_v47 }
 0x20d   : > { %v1255_v17 = vsel %vm1247_vm1, %v17714_v35, %v1254_v20  ;;  %v2972_v9 = vmax.f32 %v2930_v58, 0.0  ;;  %v1125_v57 = vadd.f32 %v1004_v5, %v14392_v8  ;;  %v1415_v10 = vmul.f32 %v12420_v47, %v17717_v12 }
 0x20e   : > { %v1257_v61 = vsel %vm1247_vm1, %v1254_v20, %v17716_v14  ;;  %v2973_v11 = vmax.f32 %v2931_v37, 0.0  ;;  %v14421_v35 = vadd.f32 %v1255_v17, %v1128_v52  ;;  %v1248_v2 = vrot.slane %v1167_v0, 2 }
 0x20f   : > { %v1500_v33 = vrot.slane %v1414_v32, 2  ;;  %v14425_v14 = vmul.f32 %v12425_v49, %v17717_v12  ;;  %v14427_v38 = vadd.f32 %v1257_v61, %v1129_v30  ;;  %v1495_v62 = vrot.slane %v1411_v63, 2  ;;  %v17723_v63 = vld [vmem:[#allocation208_spill] sm:$0xff] }
 0x210   : > { %17718 = vst [vmem:[#allocation215_spill] sm:$0xff] %v14421_v35  ;;  %v3026_v20 = vpack.c.bf16 %v2973_v11, %v2972_v9  ;;  %v14431_v58 = vmul.f32 %v12428_v50, %v17717_v12  ;;  %v1502_v37 = vrot.slane %v1415_v10, 2  ;;  %v17722_v19 = vrot.slane %v17721_v59, 3 }
 0x211   : > { %17719 = vst [vmem:[#allocation150_spill] sm:$0xff] %v14425_v14  ;;  %v17178_v32 = vrot.slane %v14425_v14, 3  ;;  %v14441_v17 = vmul.f32 %v13522_v28, %v14346_v31  ;;  %v1369_v61 = vadd.f32 %v1248_v2, %v1125_v57  ;;  %v17724_v9 = vrot.slane %v17723_v63, 2 }
 0x212   : > { %17720 = vst [vmem:[#allocation155_spill] sm:$0xff] %v14427_v38  ;;  %v14436_v52 = vsel %vm1745_vm2, %v17722_v19, %v1749_v43  ;;  %v3260_v0 = vshrl.u32 %v3026_v20, 16  ;;  %v3263_v30 = vshll.u32 %v3026_v20, 16  ;;  %v677_v38 = vpop.permute.xlu1 %676  ;;  %v1503_v10 = vsel %vm1247_vm1, %v1500_v33, %v1502_v37 }
 0x213   : > { %v1501_v11 = vsel %vm1247_vm1, %v17724_v9, %v1500_v33  ;;  %v17725_v35 = vrot.slane %v13999_v22, 2  ;;  %v1752_v27 = vsel %vm1745_vm2, %v1749_v43, %v17178_v32  ;;  %v14457_v20 = vmul.f32 %v13522_v28, %v17717_v12 }
 0x214   : > { %v3262_v57 = vrot.slane %v3260_v0, 2  ;;  %v3265_v7 = vrot.slane %v3263_v30, 3  ;;  %v17183_v9 = vrot.slane %v14431_v58, 4  ;;  %v14462_v33 = vmul.f32 %v13525_v42, %v14346_v31 }
 0x215   : > { %v14450_v19 = vsel %vm1247_vm1, %v1502_v37, %v17725_v35  ;;  %v2245_v22 = vrot.slane %v14441_v17, 4  ;;  %v883_v35 = vmul.f32 %v12443_v54, %v677_v38  ;;  %v924_v37 = vmul.f32 %v12414_v45, %v677_v38  ;;  %v17729_v54 = vld [vmem:[#allocation169_spill] sm:$0xff] }
 0x216   : > { %17726 = vst [vmem:[#allocation201_spill] sm:$0xff] %v14462_v33  ;;  %v1168_v43 = vmul.f32 %v12417_v46, %v677_v38  ;;  %v14468_v32 = vor.u32 %v3265_v7, %v3262_v57  ;;  %v17727_v0 = vrot.slane %v14383_v25, 4  ;;  %v1412_v12 = vmul.f32 %v12420_v47, %v677_v38 }
 0x217   : > { %v1663_v31 = vmul.f32 %v12425_v49, %v677_v38  ;;  %v1006_v14 = vrot.slane %v924_v37, 1  ;;  %v1912_v25 = vmul.f32 %v12428_v50, %v677_v38  ;;  %v17728_v47 = vrot.slane %v17708_v53, 1 }
 0x218   : > { %v2003_v30 = vsel %vm1996_vm3, %v17727_v0, %v17183_v9  ;;  %v1250_v45 = vrot.slane %v1168_v43, 2  ;;  %v3276_v46 = vsel %vm3133_vm6, %v14468_v32, %v14352_v3  ;;  %v1496_v7 = vrot.slane %v1412_v12, 2 }
 0x219   : > { %v1746_v57 = vrot.slane %v1663_v31, 3  ;;  %3411 = vmatpush.bf16.msra.mxu1 %v3276_v46  ;;  %v1007_v0 = vsel %vm1003_vm0, %v1004_v5, %v1006_v14  ;;  %v1009_v49 = vsel %vm1003_vm0, %v1006_v14, %v17728_v47  ;;  %v17730_v37 = vrot.slane %v17729_v54, 1 }
 0x21a   : > { %v1251_v9 = vsel %vm1247_vm1, %v1248_v2, %v1250_v45  ;;  %v17731_v43 = vrot.slane %v12838_v13, 1  ;;  %v1126_v3 = vadd.f32 %v1007_v0, %v14392_v8  ;;  %v1127_v31 = vadd.f32 %v1009_v49, %v883_v35  ;;  %v17735_v35 = vld [vmem:[#allocation105_spill] sm:$0xff] }
 0x21b   : > { %v1497_v50 = vsel %vm1247_vm1, %v1495_v62, %v1496_v7  ;;  %v17732_v38 = vrot.slane %v17723_v63, 2  ;;  %v17733_v53 = vrot.slane %v17713_v51, 2  ;;  %v17734_v54 = vrot.slane %v17721_v59, 3  ;;  %v17736_v63 = vld [vmem:[#allocation170_spill] sm:$0xff] }
 0x21c   : > { %v1055_v17 = vsel %vm1003_vm0, %v17731_v43, %v17730_v37  ;;  %v1620_v2 = vadd.f32 %v1497_v50, %v1369_v61  ;;  %v1370_v46 = vadd.f32 %v1251_v9, %v1126_v3  ;;  %v1997_v8 = vrot.slane %v1912_v25, 4  ;;  %v17742_v25 = vld [vmem:[#allocation179_spill] sm:$0xff] }
 0x21d   : > { %v1499_v5 = vsel %vm1247_vm1, %v1496_v7, %v17732_v38  ;;  %v1253_v12 = vsel %vm1247_vm1, %v1250_v45, %v17733_v53  ;;  %v1748_v13 = vsel %vm1745_vm2, %v1746_v57, %v17734_v54  ;;  %v1150_v0 = vadd.f32 %v1055_v17, %v17735_v35  ;;  %v17738_v7 = vld [vmem:[#allocation104_spill] sm:$0xff] }
 0x21e   : > { %v1621_v14 = vadd.f32 %v1499_v5, %v1369_v61  ;;  %v1371_v47 = vadd.f32 %v1253_v12, %v1127_v31  ;;  %v1869_v62 = vadd.f32 %v1746_v57, %v1620_v2  ;;  %v17737_v37 = vrot.slane %v17736_v63, 2  ;;  %v17744_v5 = vld [vmem:[#allocation133_spill] sm:$0xff]  ;;  %v17746_v12 = vld [vmem:[#allocation74_spill] sm:$0xff] }
 0x21f   : > { %v17739_v43 = vrot.slane %v17738_v7, 2  ;;  %v17740_v45 = vrot.slane %v17676_v26, 2  ;;  %v1622_v50 = vadd.f32 %v1501_v11, %v1370_v46  ;;  %v17743_v17 = vrot.slane %v14457_v20, 4 }
 0x220   : > { %v1870_v49 = vadd.f32 %v1748_v13, %v1621_v14  ;;  %v17741_v61 = vmov %v17737_v37  ;;  %v1623_v9 = vadd.f32 %v1503_v10, %v1371_v47  ;;  %v2122_v38 = vadd.f32 %v1997_v8, %v1869_v62  ;;  %v17750_v13 = vld [vmem:[#allocation213_spill] sm:$0xff] }
 0x221   : > { %v1299_v51 = vsel %vm1247_vm1, %v17739_v43, %v17737_v37  ;;  %v1301_v59 = vsel %vm1247_vm1, %v17741_v61, %v17740_v45  ;;  %v14519_v57 = vsel %vm1996_vm3, %v2245_v22, %v17743_v17  ;;  %v17745_v53 = vrot.slane %v17744_v5, 2  ;;  %v17752_v37 = vld [vmem:[#allocation134_spill] sm:$0xff] }
 0x222   : > { %v1394_v3 = vadd.f32 %v1299_v51, %v1150_v0  ;;  %v1395_v31 = vadd.f32 %v1301_v59, %v17742_v25  ;;  %v17747_v2 = vrot.slane %v17746_v12, 2  ;;  %v17748_v14 = vrot.slane %v17683_v24, 2  ;;  %v17754_v51 = vld [vmem:[#allocation75_spill] sm:$0xff]  ;;  %v17760_v25 = vld [vmem:[#allocation76_spill] sm:$0xff] }
 0x223   : > { %v17749_v11 = vmov %v17745_v53  ;;  %v1872_v54 = vadd.f32 %v1752_v27, %v1623_v9  ;;  %v17751_v46 = vrot.slane %v17750_v13, 4  ;;  %v14535_v62 = vadd.f32 %v14436_v52, %v1622_v50 }
 0x224   : > { %v1549_v26 = vsel %vm1247_vm1, %v17747_v2, %v17745_v53  ;;  %v1551_v10 = vsel %vm1247_vm1, %v17749_v11, %v17748_v14  ;;  %v17753_v43 = vrot.slane %v17752_v37, 3  ;;  %v17755_v24 = vrot.slane %v17754_v51, 3  ;;  %v17764_v2 = vld [vmem:[#allocation29_spill] sm:$0xff] }
 0x225   : > { %v1999_v47 = vsel %vm1996_vm3, %v1997_v8, %v17751_v46  ;;  %v1646_v35 = vadd.f32 %v1549_v26, %v1394_v3  ;;  %v1647_v0 = vadd.f32 %v1551_v10, %v1395_v31  ;;  %v17756_v61 = vrot.slane %v17689_v55, 3  ;;  %v14576_v46 = vld [vmem:[#allocation2 + $0x8] ss:$0 sm:$0xff] }
 0x226   : > { %v14537_v63 = vadd.f32 %v1999_v47, %v1870_v49  ;;  %v1798_v45 = vsel %vm1745_vm2, %v17755_v24, %v17753_v43  ;;  %v17757_v27 = vmov %v17753_v43  ;;  %v14549_v8 = vadd.f32 %v2003_v30, %v1872_v54  ;;  %v17758_v49 = vld [vmem:[#allocation135_spill] sm:$0xff]  ;;  %v17766_v43 = vld [vmem:[#allocation161_spill] sm:$0xff] }
 0x227   : > { %v1800_v59 = vsel %vm1745_vm2, %v17757_v27, %v17756_v61  ;;  %v14551_v9 = vadd.f32 %v2245_v22, %v2122_v38  ;;  %v1895_v52 = vadd.f32 %v1798_v45, %v1646_v35  ;;  %v17759_v3 = vrot.slane %v17758_v49, 4  ;;  %v17765_v22 = vld [vmem:[#allocation77_spill] sm:$0xff]  ;;  %v17768_v45 = vld [vmem:[#allocation202_spill] sm:$0xff] }
 0x228   : > { %v1896_v50 = vadd.f32 %v1800_v59, %v1647_v0  ;;  %v17761_v31 = vrot.slane %v17760_v25, 4  ;;  %v17762_v5 = vrot.slane %v17695_v40, 4  ;;  %v14565_v30 = vmul.f32 %v13522_v28, %v17764_v2 }
 0x229   : > { %v17763_v55 = vmov %v17759_v3  ;;  %v2191_v38 = vmul.f32 %v13522_v28, %v17765_v22  ;;  %v14571_v11 = vmul.f32 %v13525_v42, %v17764_v2  ;;  %v2435_v40 = vmul.f32 %v13525_v42, %v17765_v22 }
 0x22a   : > { %v2049_v17 = vsel %vm1996_vm3, %v17761_v31, %v17759_v3  ;;  %v2051_v53 = vsel %vm1996_vm3, %v17763_v55, %v17762_v5  ;;  %v2294_v10 = vrot.slane %v14565_v30, 4  ;;  %v14580_v47 = vmul.f32 %v14576_v46, %v17764_v2 }
 0x22b   : > { %v2148_v26 = vadd.f32 %v2049_v17, %v1895_v52  ;;  %v2149_v14 = vadd.f32 %v2051_v53, %v1896_v50  ;;  %v2296_v54 = vrot.slane %v2191_v38, 4  ;;  %v2680_v35 = vmul.f32 %v14576_v46, %v17765_v22 }
 0x22c   : > { %v2539_v0 = vrot.slane %v14571_v11, 5  ;;  %v2541_v37 = vrot.slane %v2435_v40, 5  ;;  %v17767_v24 = vrot.slane %v17766_v43, 2  ;;  %v17769_v61 = vrot.slane %v17768_v45, 2 }
 0x22d   : > { %v17770_v59 = vrot.slane %v17572_v48, 2  ;;  %v2297_v49 = vsel %vm1996_vm3, %v2294_v10, %v2296_v54  ;;  %v17772_v3 = vrot.slane %v14328_v36, 4  ;;  %v2784_v17 = vrot.slane %v14580_v47, 6  ;;  %v17832_v47 = vld [vmem:[#allocation234_spill] sm:$0xff] }
 0x22e   : > { %v1263_v27 = vsel %vm1247_vm1, %v17769_v61, %v17767_v24  ;;  %v17771_v52 = vmov %v17767_v24  ;;  %v2786_v5 = vrot.slane %v2680_v35, 6  ;;  %v2392_v55 = vadd.f32 %v2297_v49, %v2148_v26  ;;  %v17776_v26 = vld [vmem:[#allocation168_spill] sm:$0xff]  ;;  %v17777_v61 = vld [vmem:[#allocation151_spill] sm:$0xff] }
 0x22f   : > { %v1265_v50 = vsel %vm1247_vm1, %v17771_v52, %v17770_v59  ;;  %v2299_v31 = vsel %vm1996_vm3, %v2296_v54, %v17772_v3  ;;  %v2542_v48 = vsel %vm2489_vm4, %v2539_v0, %v2541_v37  ;;  %v17773_v2 = vrot.slane %v14334_v6, 5  ;;  %v17775_v54 = vld [vmem:[#allocation212_spill] sm:$0xff] }
 0x230   : > { %v2393_v53 = vadd.f32 %v2299_v31, %v2149_v14  ;;  %v2787_v38 = vsel %vm2734_vm5, %v2784_v17, %v2786_v5  ;;  %v17774_v36 = vrot.slane %v14359_v41, 6  ;;  %v1376_v35 = vadd.f32 %v1263_v27, %v17775_v54  ;;  %v17779_v52 = vld [vmem:[#allocation156_spill] sm:$0xff] }
 0x231   : > { %v2544_v22 = vsel %vm2489_vm4, %v2541_v37, %v17773_v2  ;;  %v1377_v14 = vadd.f32 %v1265_v50, %v17776_v26  ;;  %v2637_v43 = vadd.f32 %v2542_v48, %v2392_v55  ;;  %v17778_v59 = vrot.slane %v17777_v61, 2  ;;  %v17783_v2 = vld [vmem:[#allocation152_spill] sm:$0xff]  ;;  %v17789_v26 = vld [vmem:[#allocation153_spill] sm:$0xff] }
 0x232   : > { %v2789_v40 = vsel %vm2734_vm5, %v2786_v5, %v17774_v36  ;;  %v2638_v24 = vadd.f32 %v2544_v22, %v2393_v53  ;;  %v17780_v6 = vrot.slane %v17779_v52, 2  ;;  %v17781_v49 = vrot.slane %v17583_v60, 2  ;;  %v17785_v36 = vld [vmem:[#allocation157_spill] sm:$0xff] }
 0x233   : > { %v17782_v3 = vmov %v17778_v59  ;;  %v17784_v27 = vrot.slane %v17783_v2, 3  ;;  %v17786_v50 = vrot.slane %v17785_v36, 3  ;;  %v17787_v53 = vrot.slane %v17589_v56, 3 }
 0x234   : > { %v1513_v37 = vsel %vm1247_vm1, %v17780_v6, %v17778_v59  ;;  %v1515_v41 = vsel %vm1247_vm1, %v17782_v3, %v17781_v49  ;;  %v2882_v54 = vadd.f32 %v2787_v38, %v2637_v43  ;;  %v2883_v60 = vadd.f32 %v2789_v40, %v2638_v24  ;;  %v17791_v59 = vld [vmem:[#allocation158_spill] sm:$0xff]  ;;  %v17796_v38 = vld [vmem:[#allocation47_spill] sm:$0xff] }
 0x235   : > { %v1628_v31 = vadd.f32 %v1513_v37, %v1376_v35  ;;  %v1629_v5 = vadd.f32 %v1515_v41, %v1377_v14  ;;  %v1762_v55 = vsel %vm1745_vm2, %v17786_v50, %v17784_v27  ;;  %v17788_v48 = vmov %v17784_v27  ;;  %v17795_v41 = vld [vmem:[#allocation90_spill] sm:$0xff] }
 0x236   : > { %v1764_v22 = vsel %vm1745_vm2, %v17788_v48, %v17787_v53  ;;  %v17790_v61 = vrot.slane %v17789_v26, 4  ;;  %v17792_v6 = vrot.slane %v17791_v59, 4  ;;  %v17793_v14 = vrot.slane %v17595_v4, 4 }
 0x237   : > { %v1877_v3 = vadd.f32 %v1762_v55, %v1628_v31  ;;  %v1878_v56 = vadd.f32 %v1764_v22, %v1629_v5  ;;  %v14648_v2 = vmul.f32 %v13522_v28, %v17795_v41  ;;  %v2173_v40 = vmul.f32 %v13522_v28, %v17796_v38 }
 0x238   : > { %v2013_v35 = vsel %vm1996_vm3, %v17792_v6, %v17790_v61  ;;  %v17794_v37 = vmov %v17790_v61  ;;  %v2928_v43 = vadd.f32 %v13858_v21, %v2882_v54  ;;  %v2929_v24 = vadd.f32 %v13858_v21, %v2883_v60 }
 0x239   : > { %v2015_v49 = vsel %vm1996_vm3, %v17794_v37, %v17793_v14  ;;  %v14656_v4 = vmul.f32 %v13525_v42, %v17795_v41  ;;  %v2417_v27 = vmul.f32 %v13525_v42, %v17796_v38  ;;  %v2130_v31 = vadd.f32 %v2013_v35, %v1877_v3 }
 0x23a   : > { %v2131_v5 = vadd.f32 %v2015_v49, %v1878_v56  ;;  %v17189_v50 = vrot.slane %v14648_v2, 4  ;;  %v2260_v55 = vrot.slane %v2173_v40, 4  ;;  %v2970_v53 = vmax.f32 %v2928_v43, 0.0  ;;  %v17799_v43 = vld [vmem:[#allocation221_spill] sm:$0xff] }
 0x23b   : > { %v2971_v48 = vmax.f32 %v2929_v24, 0.0  ;;  %v17188_v22 = vrot.slane %v14656_v4, 5  ;;  %v2505_v26 = vrot.slane %v2417_v27, 5  ;;  %v17797_v54 = vrot.slane %v14067_v23, 4 }
 0x23c   : > { %v2261_v21 = vsel %vm1996_vm3, %v17189_v50, %v2260_v55  ;;  %v14670_v61 = vmul.f32 %v14576_v46, %v17795_v41  ;;  %v2662_v6 = vmul.f32 %v14576_v46, %v17796_v38  ;;  %v17798_v3 = vrot.slane %v14075_v18, 5  ;;  %v17865_v50 = vld [vmem:[#allocation227_spill] sm:$0xff] }
 0x23d   : > { %v2263_v60 = vsel %vm1996_vm3, %v2260_v55, %v17797_v54  ;;  %v3025_v35 = vpack.c.bf16 %v2971_v48, %v2970_v53  ;;  %v2374_v14 = vadd.f32 %v2261_v21, %v2130_v31  ;;  %v2506_v49 = vsel %vm2489_vm4, %v17188_v22, %v2505_v26  ;;  %v17804_v54 = vld [vmem:[#allocation222_spill] sm:$0xff] }
 0x23e   : > { %v2375_v37 = vadd.f32 %v2263_v60, %v2131_v5  ;;  %v2508_v23 = vsel %vm2489_vm4, %v2505_v26, %v17798_v3  ;;  %v17184_v56 = vrot.slane %v14670_v61, 6  ;;  %v2750_v40 = vrot.slane %v2662_v6, 6  ;;  %v17803_v26 = vld [vmem:[#allocation217_spill] sm:$0xff]  ;;  %v17806_v6 = vld [vmem:[#allocation216_spill] sm:$0xff] }
 0x23f   : > { %v17800_v41 = vrot.slane %v17799_v43, 1  ;;  %v17801_v24 = vrot.slane %v17562_v39, 1  ;;  %v3251_v27 = vshrl.u32 %v3025_v35, 16  ;;  %v3254_v31 = vshll.u32 %v3025_v35, 16 }
 0x240   : > { %v2619_v5 = vadd.f32 %v2506_v49, %v2374_v14  ;;  %v2620_v55 = vadd.f32 %v2508_v23, %v2375_v37  ;;  %v2751_v53 = vsel %vm2734_vm5, %v17184_v56, %v2750_v40  ;;  %v17802_v18 = vrot.slane %v14081_v15, 6 }
 0x241   : > { %v1051_v38 = vsel %vm1003_vm0, %v17801_v24, %v17800_v41  ;;  %v17805_v60 = vrot.slane %v17804_v54, 2  ;;  %v17807_v39 = vrot.slane %v17806_v6, 2  ;;  %v3253_v43 = vrot.slane %v3251_v27, 2 }
 0x242   : > { %v2753_v48 = vsel %vm2734_vm5, %v2750_v40, %v17802_v18  ;;  %v1148_v21 = vadd.f32 %v1051_v38, %v17803_v26  ;;  %v3256_v35 = vrot.slane %v3254_v31, 3  ;;  %v2864_v14 = vadd.f32 %v2751_v53, %v2619_v5  ;;  %v17810_v40 = vld [vmem:[#allocation171_spill] sm:$0xff]  ;;  %v17812_v38 = vld [vmem:[#allocation106_spill] sm:$0xff] }
 0x243   : > { %v1295_v3 = vsel %vm1247_vm1, %v17807_v39, %v17805_v60  ;;  %v2865_v37 = vadd.f32 %v2753_v48, %v2620_v55  ;;  %v17808_v49 = vrot.slane %v17738_v7, 2  ;;  %v17809_v23 = vmov %v17805_v60  ;;  %v14715_v7 = vld [vmem:[#allocation4] ss:$0 sm:$0xff]  ;;  %v17816_v48 = vld [vmem:[#allocation226_spill] sm:$0xff]  ;;  %v17817_v60 = vld [vmem:[#allocation172_spill] sm:$0xff] }
 0x244   : > { %v1392_v41 = vadd.f32 %v1295_v3, %v1148_v21  ;;  %v17811_v24 = vrot.slane %v17810_v40, 2  ;;  %v17813_v18 = vrot.slane %v17812_v38, 2  ;;  %v17814_v56 = vrot.slane %v17746_v12, 2  ;;  %v17819_v3 = vld [vmem:[#allocation107_spill] sm:$0xff] }
 0x245   : > { %v1297_v15 = vsel %vm1247_vm1, %v17809_v23, %v17808_v49  ;;  %v14713_v5 = vor.u32 %v3256_v35, %v3253_v43  ;;  %v2910_v55 = vadd.f32 %v14715_v7, %v2864_v14  ;;  %v2911_v53 = vadd.f32 %v14715_v7, %v2865_v37  ;;  %v17823_v35 = vld [vmem:[#allocation173_spill] sm:$0xff]  ;;  %v17825_v14 = vld [vmem:[#allocation108_spill] sm:$0xff] }
 0x246   : > { %v1545_v26 = vsel %vm1247_vm1, %v17813_v18, %v17811_v24  ;;  %v17815_v27 = vmov %v17811_v24  ;;  %v1393_v21 = vadd.f32 %v1297_v15, %v17816_v48  ;;  %v17818_v39 = vrot.slane %v17817_v60, 3 }
 0x247   : > { %v1547_v31 = vsel %vm1247_vm1, %v17815_v27, %v17814_v56  ;;  %v1644_v54 = vadd.f32 %v1545_v26, %v1392_v41  ;;  %v17820_v49 = vrot.slane %v17819_v3, 3  ;;  %v17821_v23 = vrot.slane %v17754_v51, 3 }
 0x248   : > { %v17822_v56 = vmov %v17818_v39  ;;  %v17824_v40 = vrot.slane %v17823_v35, 4  ;;  %v17826_v24 = vrot.slane %v17825_v14, 4  ;;  %v3267_v15 = vsel %vm3133_vm6, %v14713_v5, %v14468_v32 }
 0x249   : > { %v1794_v12 = vsel %vm1745_vm2, %v17820_v49, %v17818_v39  ;;  %v1796_v43 = vsel %vm1745_vm2, %v17822_v56, %v17821_v23  ;;  %v2952_v41 = vmax.f32 %v2910_v55, 0.0  ;;  %v2953_v18 = vmax.f32 %v2911_v53, 0.0  ;;  %3412 = vmatpush.bf16.msra.mxu1 %v3267_v15  ;;  %v17829_v39 = vld [vmem:[#allocation61_spill] sm:$0xff]  ;;  %v17830_v23 = vld [vmem:[#allocation130_spill] sm:$0xff] }
 0x24a   : > { %v2045_v37 = vsel %vm1996_vm3, %v17826_v24, %v17824_v40  ;;  %v1645_v26 = vadd.f32 %v1547_v31, %v1393_v21  ;;  %v1893_v27 = vadd.f32 %v1794_v12, %v1644_v54  ;;  %v17827_v51 = vrot.slane %v17760_v25, 4 }
 0x24b   : > { %v17828_v48 = vmov %v17824_v40  ;;  %v14745_v49 = vmul.f32 %v13522_v28, %v17829_v39  ;;  %v2189_v56 = vmul.f32 %v13522_v28, %v17830_v23  ;;  %v3016_v40 = vpack.c.bf16 %v2953_v18, %v2952_v41 }
 0x24c   : > { %v2047_v60 = vsel %vm1996_vm3, %v17828_v48, %v17827_v51  ;;  %v1894_v32 = vadd.f32 %v1796_v43, %v1645_v26  ;;  %v14751_v31 = vmul.f32 %v13525_v42, %v17829_v39  ;;  %v2433_v25 = vmul.f32 %v13525_v42, %v17830_v23 }
 0x24d   : > { %v2146_v55 = vadd.f32 %v2045_v37, %v1893_v27  ;;  %v17187_v53 = vrot.slane %v14745_v49, 4  ;;  %v2292_v21 = vrot.slane %v2189_v56, 4  ;;  %v14758_v54 = vmul.f32 %v14576_v46, %v17829_v39 }
 0x24e   : > { %v3170_v12 = vshrl.u32 %v3016_v40, 16  ;;  %v3173_v35 = vshll.u32 %v3016_v40, 16  ;;  %v2147_v24 = vadd.f32 %v2047_v60, %v1894_v32  ;;  %v17186_v43 = vrot.slane %v14751_v31, 5 }
 0x24f   : > { %v2293_v15 = vsel %vm1996_vm3, %v17187_v53, %v2292_v21  ;;  %v2295_v37 = vsel %vm1996_vm3, %v2292_v21, %v2294_v10  ;;  %v2537_v41 = vrot.slane %v2433_v25, 5  ;;  %v2678_v18 = vmul.f32 %v14576_v46, %v17830_v23 }
 0x250   : > { %v3172_v26 = vrot.slane %v3170_v12, 2  ;;  %v3175_v27 = vrot.slane %v3173_v35, 3  ;;  %v2390_v51 = vadd.f32 %v2293_v15, %v2146_v55  ;;  %v2391_v48 = vadd.f32 %v2295_v37, %v2147_v24  ;;  %v17833_v37 = vld [vmem:[#allocation235_spill] sm:$0xff] }
 0x251   : > { %v2538_v60 = vsel %vm2489_vm4, %v17186_v43, %v2537_v41  ;;  %v2540_v39 = vsel %vm2489_vm4, %v2537_v41, %v2539_v0  ;;  %v17185_v30 = vrot.slane %v14758_v54, 6  ;;  %v2782_v56 = vrot.slane %v2678_v18, 6  ;;  %v17834_v41 = vld [vmem:[#allocation236_spill] sm:$0xff]  ;;  %v17835_v18 = vld [vmem:[#allocation33_spill] sm:$0xff] }
 0x252   : > { %v14776_v10 = vor.u32 %v3175_v27, %v3172_v26  ;;  %v2635_v40 = vadd.f32 %v2538_v60, %v2390_v51  ;;  %v2636_v32 = vadd.f32 %v2540_v39, %v2391_v48  ;;  %v2162_v23 = vadd.f32 %v13672_v44, %v13679_v16  ;;  %v17831_v16 = vld [vmem:[#allocation232_spill] sm:$0xff]  ;;  %v17836_v51 = vld [vmem:[#allocation233_spill] sm:$0xff] }
 0x253   : > { %v2783_v25 = vsel %vm2734_vm5, %v17185_v30, %v2782_v56  ;;  %v2785_v11 = vsel %vm2734_vm5, %v2782_v56, %v2784_v17  ;;  %v2407_v0 = vadd.f32 %v13641_v1, %v13966_v34  ;;  %v2693_v55 = vmul.f32 0.0, %v14576_v46  ;;  %v17838_v60 = vld [vmem:[#allocation229_spill] sm:$0xff] }
 0x254   : > { %v3186_v21 = vsel %vm3133_vm6, %v14776_v10, %v14208_v29  ;;  %v2880_v12 = vadd.f32 %v2783_v25, %v2635_v40  ;;  %v2881_v35 = vadd.f32 %v2785_v11, %v2636_v32  ;;  %v2406_v44 = vadd.f32 %v13641_v1, %v2162_v23  ;;  %v17841_v25 = vld [vmem:[#allocation136_spill] sm:$0xff] }
 0x255   : > { %3370 = vmatpush.bf16.msra.mxu0 %v3186_v21  ;;  %v2652_v24 = vadd.f32 %v17831_v16, %v2407_v0  ;;  %v2812_v15 = vrot.slane %v2693_v55, 6  ;;  %v2649_v17 = vadd.f32 %v17833_v37, %v17832_v47  ;;  %v2650_v34 = vadd.f32 %v17835_v18, %v17834_v41  ;;  %v17843_v0 = vld [vmem:[#allocation88_spill] sm:$0xff]  ;;  %v17846_v18 = vld [vmem:[#allocation137_spill] sm:$0xff] }
 0x256   : > { %v2926_v26 = vadd.f32 %v14715_v7, %v2880_v12  ;;  %v2927_v27 = vadd.f32 %v14715_v7, %v2881_v35  ;;  %v2651_v29 = vadd.f32 %v17831_v16, %v2406_v44  ;;  %v17837_v48 = vrot.slane %v17836_v51, 6 }
 0x257   : > { %v17839_v1 = vrot.slane %v17838_v60, 6  ;;  %v2897_v56 = vadd.f32 %v2812_v15, %v2652_v24  ;;  %v17842_v11 = vrot.slane %v17841_v25, 1  ;;  %v17844_v55 = vrot.slane %v17843_v0, 1  ;;  %v17845_v24 = vld [vmem:[#allocation94_spill] sm:$0xff] }
 0x258   : > { %v17840_v40 = vmov %v17837_v48  ;;  %v2968_v12 = vmax.f32 %v2926_v26, 0.0  ;;  %v2969_v35 = vmax.f32 %v2927_v27, 0.0  ;;  %v2896_v44 = vadd.f32 %v2812_v15, %v2651_v29  ;;  %v17850_v27 = vld [vmem:[#allocation176_spill] sm:$0xff] }
 0x259   : > { %v2811_v39 = vsel %vm2734_vm5, %v17839_v1, %v17837_v48  ;;  %v2813_v32 = vsel %vm2734_vm5, %v17840_v40, %v2812_v15  ;;  %v1075_v21 = vsel %vm1003_vm0, %v17844_v55, %v17842_v11  ;;  %v2943_v47 = vadd.f32 %v14715_v7, %v2897_v56  ;;  %v17848_v48 = vld [vmem:[#allocation91_spill] sm:$0xff]  ;;  %v17854_v11 = vld [vmem:[#allocation177_spill] sm:$0xff]  ;;  %v17856_v55 = vld [vmem:[#allocation198_spill] sm:$0xff] }
 0x25a   : > { %v2894_v23 = vadd.f32 %v2811_v39, %v2649_v17  ;;  %v2895_v16 = vadd.f32 %v2813_v32, %v2650_v34  ;;  %v1160_v41 = vadd.f32 %v1075_v21, %v17845_v24  ;;  %v17847_v51 = vrot.slane %v17846_v18, 2  ;;  %v17852_v34 = vld [vmem:[#allocation197_spill] sm:$0xff] }
 0x25b   : > { %v17849_v17 = vrot.slane %v17848_v48, 2  ;;  %v3024_v39 = vpack.c.bf16 %v2969_v35, %v2968_v12  ;;  %v2942_v40 = vadd.f32 %v14715_v7, %v2896_v44  ;;  %v17851_v15 = vrot.slane %v17850_v27, 2  ;;  %v17860_v27 = vld [vmem:[#allocation199_spill] sm:$0xff] }
 0x25c   : > { %v2940_v37 = vadd.f32 %v14715_v7, %v2894_v23  ;;  %v2941_v26 = vadd.f32 %v14715_v7, %v2895_v16  ;;  %v17853_v29 = vrot.slane %v17852_v34, 2  ;;  %v2985_v32 = vmax.f32 %v2943_v47, 0.0  ;;  %v17862_v47 = vld [vmem:[#allocation160_spill] sm:$0xff] }
 0x25d   : > { %v1319_v1 = vsel %vm1247_vm1, %v17849_v17, %v17847_v51  ;;  %v17855_v0 = vrot.slane %v17854_v11, 3  ;;  %v17857_v21 = vrot.slane %v17856_v55, 3  ;;  %v3242_v12 = vshrl.u32 %v3024_v39, 16  ;;  %v17858_v51 = vld [vmem:[#allocation178_spill] sm:$0xff]  ;;  %v17863_v11 = vld [vmem:[#allocation231_spill] sm:$0xff] }
 0x25e   : > { %v1569_v56 = vsel %vm1247_vm1, %v17853_v29, %v17851_v15  ;;  %v2982_v23 = vmax.f32 %v2940_v37, 0.0  ;;  %v1404_v25 = vadd.f32 %v1319_v1, %v1160_v41  ;;  %v3245_v35 = vshll.u32 %v3024_v39, 16 }
 0x25f   : > { %v1818_v24 = vsel %vm1745_vm2, %v17857_v21, %v17855_v0  ;;  %v2984_v44 = vmax.f32 %v2942_v40, 0.0  ;;  %v2983_v18 = vmax.f32 %v2941_v26, 0.0  ;;  %v17859_v17 = vrot.slane %v17858_v51, 4  ;;  %v17864_v0 = vld [vmem:[#allocation230_spill] sm:$0xff] }
 0x260   : > { %v1656_v16 = vadd.f32 %v1569_v56, %v1404_v25  ;;  %v17861_v30 = vrot.slane %v17860_v27, 4  ;;  %v14841_v37 = vmul.f32 %v13522_v28, %v17862_v47  ;;  %v14845_v41 = vmul.f32 %v13525_v42, %v17862_v47 }
 0x261   : > { %v3244_v1 = vrot.slane %v3242_v12, 2  ;;  %v3247_v29 = vrot.slane %v3245_v35, 3  ;;  %v3032_v39 = vpack.c.bf16 %v2985_v32, %v2984_v44  ;;  %v3031_v40 = vpack.c.bf16 %v2983_v18, %v2982_v23  ;;  %v17867_v23 = vld [vmem:[#allocation228_spill] sm:$0xff] }
 0x262   : > { %v2069_v15 = vsel %vm1996_vm3, %v17861_v30, %v17859_v17  ;;  %v1905_v26 = vadd.f32 %v1818_v24, %v1656_v16  ;;  %v17192_v56 = vrot.slane %v14841_v37, 4  ;;  %v17190_v25 = vrot.slane %v14845_v41, 5 }
 0x263   : > { %v2648_v30 = vadd.f32 %v17864_v0, %v17863_v11  ;;  %v14851_v21 = vor.u32 %v3247_v29, %v3244_v1  ;;  %v3314_v51 = vshrl.u32 %v3032_v39, 16  ;;  %v3317_v17 = vshll.u32 %v3032_v39, 16  ;;  %v17869_v39 = vld [vmem:[#allocation110_spill] sm:$0xff] }
 0x264   : > { %v3305_v43 = vshrl.u32 %v3031_v40, 16  ;;  %v3308_v53 = vshll.u32 %v3031_v40, 16  ;;  %v2158_v22 = vadd.f32 %v2069_v15, %v1905_v26  ;;  %v17866_v12 = vrot.slane %v17865_v50, 4  ;;  %v17870_v11 = vld [vmem:[#allocation174_spill] sm:$0xff] }
 0x265   : > { %v17868_v24 = vrot.slane %v17867_v23, 5  ;;  %v3258_v44 = vsel %vm3133_vm6, %v14851_v21, %v14713_v5  ;;  %v3316_v18 = vrot.slane %v3314_v51, 2  ;;  %v3319_v16 = vrot.slane %v3317_v17, 3  ;;  %v17874_v51 = vld [vmem:[#allocation56_spill] sm:$0xff] }
 0x266   : > { %v2317_v32 = vsel %vm1996_vm3, %v17192_v56, %v17866_v12  ;;  %v3307_v1 = vrot.slane %v3305_v43, 2  ;;  %3413 = vmatpush.bf16.msra.mxu1 %v3258_v44  ;;  %v3310_v15 = vrot.slane %v3308_v53, 3  ;;  %v14868_v29 = vmul.f32 %v14576_v46, %v17862_v47  ;;  %v17872_v12 = vld [vmem:[#allocation192_spill] sm:$0xff]  ;;  %v17876_v43 = vld [vmem:[#allocation195_spill] sm:$0xff]  ;;  %v17897_v56 = vld [vmem:[#allocation205_spill] sm:$0xff] }
 0x267   : > { %v2562_v35 = vsel %vm2489_vm4, %v17190_v25, %v17868_v24  ;;  %v2402_v50 = vadd.f32 %v2317_v32, %v2158_v22  ;;  %v2690_v40 = vmul.f32 %v14576_v46, %v17869_v39  ;;  %v3320_v26 = vor.u32 %v3319_v16, %v3316_v18  ;;  %v17882_v25 = vld [vmem:[#allocation162_spill] sm:$0xff] }
 0x268   : > { %v17871_v0 = vrot.slane %v17870_v11, 1  ;;  %v17873_v23 = vrot.slane %v17872_v12, 1  ;;  %v17875_v17 = vrot.slane %v17874_v51, 2  ;;  %v17877_v24 = vrot.slane %v17876_v43, 2 }
 0x269   : > { %v17878_v53 = vrot.slane %v17768_v45, 2  ;;  %v14887_v44 = vor.u32 %v3310_v15, %v3307_v1  ;;  %v2647_v18 = vadd.f32 %v2562_v35, %v2402_v50  ;;  %v17191_v16 = vrot.slane %v14868_v29, 6 }
 0x26a   : > { %v1015_v5 = vsel %vm1003_vm0, %v17873_v23, %v17871_v0  ;;  %v1259_v22 = vsel %vm1247_vm1, %v17877_v24, %v17875_v17  ;;  %v17879_v47 = vmov %v17875_v17  ;;  %v2806_v39 = vrot.slane %v2690_v40, 6  ;;  %v17880_v0 = vld [vmem:[#allocation194_spill] sm:$0xff]  ;;  %v17881_v23 = vld [vmem:[#allocation55_spill] sm:$0xff] }
 0x26b   : > { %v1261_v32 = vsel %vm1247_vm1, %v17879_v47, %v17878_v53  ;;  %v3365_v11 = vsel %vm1996_vm3, %v3320_v26, 0  ;;  %v1130_v12 = vadd.f32 %v1015_v5, %v17880_v0  ;;  %v17883_v17 = vrot.slane %v17882_v25, 2  ;;  %v17884_v24 = vld [vmem:[#allocation203_spill] sm:$0xff] }
 0x26c   : > { %v1375_v43 = vadd.f32 %v1261_v32, %v17881_v23  ;;  %v17885_v45 = vrot.slane %v17884_v24, 2  ;;  %3456 = vmatpush.bf16.msra.mxu2 %v3365_v11  ;;  %v3321_v1 = vsel %vm3133_vm6, %v14887_v44, %v3320_v26  ;;  %v2807_v35 = vsel %vm2734_vm5, %v17191_v16, %v2806_v39  ;;  %v17889_v23 = vld [vmem:[#allocation164_spill] sm:$0xff] }
 0x26d   : > { %v17886_v15 = vrot.slane %v17838_v60, 6  ;;  %v17887_v40 = vrot.slane %v17779_v52, 2  ;;  %v17888_v5 = vmov %v17883_v17  ;;  %v2892_v47 = vadd.f32 %v2807_v35, %v2647_v18 }
 0x26e   : > { %v1509_v51 = vsel %vm1247_vm1, %v17885_v45, %v17883_v17  ;;  %v1374_v11 = vadd.f32 %v1259_v22, %v1130_v12  ;;  %v17890_v26 = vrot.slane %v17889_v23, 3  ;;  %v17891_v17 = vld [vmem:[#allocation204_spill] sm:$0xff]  ;;  %v17893_v60 = vrot.slane %v17785_v36, 3  ;;  %v17902_v23 = vld [vmem:[#allocation146_spill] sm:$0xff] }
 0x26f   : > { %v2809_v50 = vsel %vm2734_vm5, %v2806_v39, %v17886_v15  ;;  %v1511_v53 = vsel %vm1247_vm1, %v17888_v5, %v17887_v40  ;;  %v17892_v45 = vrot.slane %v17891_v17, 3  ;;  %v17895_v15 = vld [vmem:[#allocation165_spill] sm:$0xff]  ;;  %v17898_v40 = vrot.slane %v17897_v56, 4  ;;  %v17901_v5 = vld [vmem:[#allocation148_spill] sm:$0xff] }
 0x270   : > { %v2893_v32 = vadd.f32 %v2809_v50, %v2648_v30  ;;  %v1627_v0 = vadd.f32 %v1511_v53, %v1375_v43  ;;  %v17894_v39 = vmov %v17890_v26  ;;  %v17896_v25 = vrot.slane %v17895_v15, 4  ;;  %3457 = vmatpush.bf16.msra.mxu2 %v3321_v1 }
 0x271   : > { %v1758_v16 = vsel %vm1745_vm2, %v17892_v45, %v17890_v26  ;;  %v1760_v52 = vsel %vm1745_vm2, %v17894_v39, %v17893_v60  ;;  %v17899_v22 = vrot.slane %v17791_v59, 4  ;;  %v2938_v43 = vadd.f32 %v14715_v7, %v2892_v47 }
 0x272   : > { %v2009_v30 = vsel %vm1996_vm3, %v17898_v40, %v17896_v25  ;;  %v17900_v18 = vmov %v17896_v25  ;;  %v2939_v36 = vadd.f32 %v14715_v7, %v2893_v32  ;;  %v1626_v35 = vadd.f32 %v1509_v51, %v1374_v11 }
 0x273   : > { %v2011_v12 = vsel %vm1996_vm3, %v17900_v18, %v17899_v22  ;;  %v1876_v50 = vadd.f32 %v1760_v52, %v1627_v0  ;;  %v14935_v53 = vmul.f32 %v13522_v28, %v17901_v5  ;;  %v2171_v26 = vmul.f32 %v13522_v28, %v17902_v23 }
 0x274   : > { %v14941_v59 = vmul.f32 %v13525_v42, %v17901_v5  ;;  %v2415_v45 = vmul.f32 %v13525_v42, %v17902_v23  ;;  %v2980_v47 = vmax.f32 %v2938_v43, 0.0  ;;  %v2981_v60 = vmax.f32 %v2939_v36, 0.0 }
 0x275   : > { %v1875_v32 = vadd.f32 %v1758_v16, %v1626_v35  ;;  %v2129_v51 = vadd.f32 %v2011_v12, %v1876_v50  ;;  %v17194_v1 = vrot.slane %v14935_v53, 4  ;;  %v2256_v11 = vrot.slane %v2171_v26, 4 }
 0x276   : > { %v17193_v0 = vrot.slane %v14941_v59, 5  ;;  %v2501_v39 = vrot.slane %v2415_v45, 5  ;;  %v3030_v52 = vpack.c.bf16 %v2981_v60, %v2980_v47  ;;  %v14949_v25 = vmul.f32 %v14576_v46, %v17901_v5  ;;  %v17905_v45 = vld [vmem:[#allocation40_spill] sm:$0xff] }
 0x277   : > { %v2128_v15 = vadd.f32 %v2009_v30, %v1875_v32  ;;  %v2660_v40 = vmul.f32 %v14576_v46, %v17902_v23  ;;  %v2257_v16 = vsel %vm1996_vm3, %v17194_v1, %v2256_v11  ;;  %v17903_v22 = vrot.slane %v14648_v2, 4  ;;  %v17907_v2 = vld [vmem:[#allocation180_spill] sm:$0xff] }
 0x278   : > { %v2502_v12 = vsel %vm2489_vm4, %v17193_v0, %v2501_v39  ;;  %v17904_v30 = vrot.slane %v14656_v4, 5  ;;  %v3296_v36 = vshrl.u32 %v3030_v52, 16  ;;  %v3299_v35 = vshll.u32 %v3030_v52, 16  ;;  %v17911_v0 = vld [vmem:[#allocation181_spill] sm:$0xff] }
 0x279   : > { %v2259_v18 = vsel %vm1996_vm3, %v2256_v11, %v17903_v22  ;;  %v2372_v50 = vadd.f32 %v2257_v16, %v2128_v15  ;;  %v17195_v23 = vrot.slane %v14949_v25, 6  ;;  %v2746_v26 = vrot.slane %v2660_v40, 6  ;;  %v17909_v11 = vld [vmem:[#allocation124_spill] sm:$0xff] }
 0x27a   : > { %v2504_v43 = vsel %vm2489_vm4, %v2501_v39, %v17904_v30  ;;  %v2373_v5 = vadd.f32 %v2259_v18, %v2129_v51  ;;  %v17906_v47 = vrot.slane %v17905_v45, 1  ;;  %v17908_v60 = vrot.slane %v17907_v2, 1  ;;  %v17914_v18 = vld [vmem:[#allocation185_spill] sm:$0xff] }
 0x27b   : > { %v17910_v22 = vrot.slane %v17909_v11, 2  ;;  %v17912_v1 = vrot.slane %v17911_v0, 2  ;;  %v3298_v39 = vrot.slane %v3296_v36, 2  ;;  %v3301_v30 = vrot.slane %v3299_v35, 3  ;;  %v17917_v35 = vld [vmem:[#allocation64_spill] sm:$0xff] }
 0x27c   : > { %v1047_v32 = vsel %vm1003_vm0, %v17908_v60, %v17906_v47  ;;  %v2617_v52 = vadd.f32 %v2502_v12, %v2372_v50  ;;  %v2618_v15 = vadd.f32 %v2504_v43, %v2373_v5  ;;  %v2747_v51 = vsel %vm2734_vm5, %v17195_v23, %v2746_v26  ;;  %v17918_v60 = vld [vmem:[#allocation223_spill] sm:$0xff] }
 0x27d   : > { %v1291_v4 = vsel %vm1247_vm1, %v17912_v1, %v17910_v22  ;;  %v17913_v40 = vrot.slane %v14670_v61, 6  ;;  %v1146_v45 = vadd.f32 %v1047_v32, %v17914_v18  ;;  %v17915_v47 = vrot.slane %v17806_v6, 2  ;;  %v17920_v61 = vld [vmem:[#allocation218_spill] sm:$0xff] }
 0x27e   : > { %v17916_v2 = vmov %v17910_v22  ;;  %v14988_v36 = vor.u32 %v3301_v30, %v3298_v39  ;;  %v2862_v12 = vadd.f32 %v2747_v51, %v2617_v52  ;;  %v17919_v22 = vrot.slane %v17918_v60, 2  ;;  %v17926_v30 = vld [vmem:[#allocation219_spill] sm:$0xff] }
 0x27f   : > { %v2749_v16 = vsel %vm2734_vm5, %v2746_v26, %v17913_v40  ;;  %v1293_v1 = vsel %vm1247_vm1, %v17916_v2, %v17915_v47  ;;  %v1390_v5 = vadd.f32 %v1291_v4, %v1146_v45  ;;  %v17921_v23 = vrot.slane %v17920_v61, 2  ;;  %v17924_v40 = vld [vmem:[#allocation224_spill] sm:$0xff]  ;;  %v17930_v2 = vld [vmem:[#allocation225_spill] sm:$0xff] }
 0x280   : > { %v2863_v43 = vadd.f32 %v2749_v16, %v2618_v15  ;;  %v1391_v50 = vadd.f32 %v1293_v1, %v17917_v35  ;;  %v17922_v32 = vrot.slane %v17812_v38, 2  ;;  %v17923_v6 = vmov %v17919_v22  ;;  %v17932_v35 = vld [vmem:[#allocation220_spill] sm:$0xff] }
 0x281   : > { %v1541_v26 = vsel %vm1247_vm1, %v17921_v23, %v17919_v22  ;;  %v17925_v39 = vrot.slane %v17924_v40, 3  ;;  %v17927_v52 = vrot.slane %v17926_v30, 3  ;;  %v3312_v4 = vsel %vm3133_vm6, %v14988_v36, %v14887_v44 }
 0x282   : > { %v1543_v11 = vsel %vm1247_vm1, %v17923_v6, %v17922_v32  ;;  %v2908_v51 = vadd.f32 %v14715_v7, %v2862_v12  ;;  %v2909_v23 = vadd.f32 %v14715_v7, %v2863_v43  ;;  %3458 = vmatpush.bf16.msra.mxu2 %v3312_v4  ;;  %v1642_v38 = vadd.f32 %v1541_v26, %v1390_v5 }
 0x283   : > { %v1790_v15 = vsel %vm1745_vm2, %v17927_v52, %v17925_v39  ;;  %v1643_v16 = vadd.f32 %v1543_v11, %v1391_v50  ;;  %v17928_v18 = vrot.slane %v17819_v3, 3  ;;  %v17929_v45 = vmov %v17925_v39  ;;  %v17936_v3 = vld [vmem:[#allocation89_spill] sm:$0xff]  ;;  %v17937_v11 = vld [vmem:[#allocation163_spill] sm:$0xff] }
 0x284   : > { %v17931_v1 = vrot.slane %v17930_v2, 4  ;;  %v17933_v60 = vrot.slane %v17932_v35, 4  ;;  %v17934_v44 = vrot.slane %v17825_v14, 4  ;;  %v2950_v50 = vmax.f32 %v2908_v51, 0.0 }
 0x285   : > { %v1792_v47 = vsel %vm1745_vm2, %v17929_v45, %v17928_v18  ;;  %v2951_v5 = vmax.f32 %v2909_v23, 0.0  ;;  %v15028_v32 = vmul.f32 %v13522_v28, %v17936_v3  ;;  %v1891_v6 = vadd.f32 %v1790_v15, %v1642_v38 }
 0x286   : > { %v2041_v22 = vsel %vm1996_vm3, %v17933_v60, %v17931_v1  ;;  %v17935_v12 = vmov %v17931_v1  ;;  %v1892_v26 = vadd.f32 %v1792_v47, %v1643_v16  ;;  %v2187_v40 = vmul.f32 %v13522_v28, %v17937_v11  ;;  %v17946_v1 = vld [vmem:[#allocation99_spill] sm:$0xff] }
 0x287   : > { %v2043_v43 = vsel %vm1996_vm3, %v17935_v12, %v17934_v44  ;;  %v15034_v39 = vmul.f32 %v13525_v42, %v17936_v3  ;;  %v2431_v14 = vmul.f32 %v13525_v42, %v17937_v11  ;;  %v3015_v52 = vpack.c.bf16 %v2951_v5, %v2950_v50 }
 0x288   : > { %v2145_v4 = vadd.f32 %v2043_v43, %v1892_v26  ;;  %v17196_v51 = vrot.slane %v15028_v32, 4  ;;  %v15041_v23 = vmul.f32 %v14576_v46, %v17936_v3  ;;  %v2144_v16 = vadd.f32 %v2041_v22, %v1891_v6 }
 0x289   : > { %v2288_v15 = vrot.slane %v2187_v40, 4  ;;  %v17199_v38 = vrot.slane %v15034_v39, 5  ;;  %v2533_v18 = vrot.slane %v2431_v14, 5  ;;  %v3161_v45 = vshrl.u32 %v3015_v52, 16  ;;  %v17940_v40 = vld [vmem:[#allocation141_spill] sm:$0xff] }
 0x28a   : > { %v3164_v47 = vshll.u32 %v3015_v52, 16  ;;  %v2676_v2 = vmul.f32 %v14576_v46, %v17937_v11  ;;  %v17938_v44 = vrot.slane %v14745_v49, 4  ;;  %v17939_v43 = vrot.slane %v14751_v31, 5  ;;  %v17942_v52 = vld [vmem:[#allocation97_spill] sm:$0xff] }
 0x28b   : > { %v2289_v60 = vsel %vm1996_vm3, %v17196_v51, %v2288_v15  ;;  %v2534_v22 = vsel %vm2489_vm4, %v17199_v38, %v2533_v18  ;;  %v3163_v5 = vrot.slane %v3161_v45, 2  ;;  %v17941_v14 = vrot.slane %v17940_v40, 1  ;;  %v17954_v40 = vld [vmem:[#allocation138_spill] sm:$0xff] }
 0x28c   : > { %v2291_v12 = vsel %vm1996_vm3, %v2288_v15, %v17938_v44  ;;  %v2536_v50 = vsel %vm2489_vm4, %v2533_v18, %v17939_v43  ;;  %v3166_v26 = vrot.slane %v3164_v47, 3  ;;  %v2388_v3 = vadd.f32 %v2289_v60, %v2144_v16  ;;  %v17944_v15 = vld [vmem:[#allocation142_spill] sm:$0xff] }
 0x28d   : > { %v2389_v6 = vadd.f32 %v2291_v12, %v2145_v4  ;;  %v2778_v11 = vrot.slane %v2676_v2, 6  ;;  %v17943_v51 = vrot.slane %v17942_v52, 1  ;;  %v17945_v44 = vrot.slane %v17944_v15, 2  ;;  %v17950_v2 = vld [vmem:[#allocation101_spill] sm:$0xff]  ;;  %v17953_v43 = vld [vmem:[#allocation154_spill] sm:$0xff]  ;;  %v17956_v52 = vld [vmem:[#allocation92_spill] sm:$0xff] }
 0x28e   : > { %v17947_v33 = vrot.slane %v17946_v1, 2  ;;  %v17948_v31 = vrot.slane %v17848_v48, 2  ;;  %v15074_v4 = vor.u32 %v3166_v26, %v3163_v5  ;;  %v2633_v45 = vadd.f32 %v2534_v22, %v2388_v3 }
 0x28f   : > { %v1071_v49 = vsel %vm1003_vm0, %v17943_v51, %v17941_v14  ;;  %v17949_v18 = vmov %v17945_v44  ;;  %v2634_v47 = vadd.f32 %v2536_v50, %v2389_v6  ;;  %v17951_v51 = vrot.slane %v15041_v23, 6 }
 0x290   : > { %v1315_v38 = vsel %vm1247_vm1, %v17947_v33, %v17945_v44  ;;  %v1317_v16 = vsel %vm1247_vm1, %v17949_v18, %v17948_v31  ;;  %v1158_v60 = vadd.f32 %v1071_v49, %v17950_v2  ;;  %v17952_v1 = vrot.slane %v14758_v54, 6  ;;  %v17960_v49 = vld [vmem:[#allocation139_spill] sm:$0xff] }
 0x291   : > { %v2779_v12 = vsel %vm2734_vm5, %v17951_v51, %v2778_v11  ;;  %v1403_v48 = vadd.f32 %v1317_v16, %v17953_v43  ;;  %v17955_v14 = vrot.slane %v17954_v40, 2  ;;  %v17957_v15 = vrot.slane %v17956_v52, 2  ;;  %v17962_v31 = vld [vmem:[#allocation95_spill] sm:$0xff]  ;;  %v17972_v52 = vld [vmem:[#allocation166_spill] sm:$0xff] }
 0x292   : > { %v2781_v33 = vsel %vm2734_vm5, %v2778_v11, %v17952_v1  ;;  %v3177_v22 = vsel %vm3133_vm6, %v15074_v4, %v14776_v10  ;;  %v2878_v50 = vadd.f32 %v2779_v12, %v2633_v45  ;;  %v1402_v3 = vadd.f32 %v1315_v38, %v1158_v60  ;;  %v17966_v38 = vld [vmem:[#allocation140_spill] sm:$0xff]  ;;  %v17968_v60 = vld [vmem:[#allocation98_spill] sm:$0xff] }
 0x293   : > { %v1565_v5 = vsel %vm1247_vm1, %v17957_v15, %v17955_v14  ;;  %v2879_v26 = vadd.f32 %v2781_v33, %v2634_v47  ;;  %3371 = vmatpush.bf16.msra.mxu0 %v3177_v22  ;;  %v17958_v54 = vrot.slane %v17852_v34, 2  ;;  %v17959_v6 = vmov %v17955_v14 }
 0x294   : > { %v17961_v44 = vrot.slane %v17960_v49, 3  ;;  %v17963_v18 = vrot.slane %v17962_v31, 3  ;;  %v17964_v2 = vrot.slane %v17856_v55, 3  ;;  %v17967_v47 = vrot.slane %v17966_v38, 4 }
 0x295   : > { %v1567_v11 = vsel %vm1247_vm1, %v17959_v6, %v17958_v54  ;;  %v17969_v34 = vrot.slane %v17968_v60, 4  ;;  %v2924_v12 = vadd.f32 %v14715_v7, %v2878_v50  ;;  %v2925_v1 = vadd.f32 %v14715_v7, %v2879_v26 }
 0x296   : > { %v1814_v16 = vsel %vm1745_vm2, %v17963_v18, %v17961_v44  ;;  %v17965_v10 = vmov %v17961_v44  ;;  %v1654_v33 = vadd.f32 %v1565_v5, %v1402_v3  ;;  %v1655_v43 = vadd.f32 %v1567_v11, %v1403_v48  ;;  %v17973_v11 = vld [vmem:[#allocation187_spill] sm:$0xff]  ;;  %v17975_v44 = vld [vmem:[#allocation121_spill] sm:$0xff] }
 0x297   : > { %v1816_v45 = vsel %vm1745_vm2, %v17965_v10, %v17964_v2  ;;  %v2065_v51 = vsel %vm1996_vm3, %v17969_v34, %v17967_v47  ;;  %v17970_v40 = vrot.slane %v17860_v27, 4  ;;  %v17971_v55 = vmov %v17967_v47  ;;  %v17977_v47 = vld [vmem:[#allocation125_spill] sm:$0xff] }
 0x298   : > { %v2199_v15 = vmul.f32 %v13522_v28, %v17972_v52  ;;  %v2443_v22 = vmul.f32 %v13525_v42, %v17972_v52  ;;  %v2688_v54 = vmul.f32 %v14576_v46, %v17972_v52  ;;  %v2966_v50 = vmax.f32 %v2924_v12, 0.0  ;;  %v17978_v34 = vld [vmem:[#allocation53_spill] sm:$0xff] }
 0x299   : > { %v2067_v14 = vsel %vm1996_vm3, %v17971_v55, %v17970_v40  ;;  %v2967_v6 = vmax.f32 %v2925_v1, 0.0  ;;  %v1903_v26 = vadd.f32 %v1814_v16, %v1654_v33  ;;  %v1904_v5 = vadd.f32 %v1816_v45, %v1655_v43  ;;  %v17981_v1 = vld [vmem:[#allocation67_spill] sm:$0xff] }
 0x29a   : > { %v2312_v48 = vrot.slane %v2199_v15, 4  ;;  %v2557_v3 = vrot.slane %v2443_v22, 5  ;;  %v2802_v27 = vrot.slane %v2688_v54, 6  ;;  %v17974_v49 = vrot.slane %v17973_v11, 1  ;;  %v17984_v54 = vld [vmem:[#allocation54_spill] sm:$0xff] }
 0x29b   : > { %v17976_v31 = vrot.slane %v17975_v44, 1  ;;  %v3023_v2 = vpack.c.bf16 %v2967_v6, %v2966_v50  ;;  %v2156_v10 = vadd.f32 %v2065_v51, %v1903_v26  ;;  %v2157_v38 = vadd.f32 %v2067_v14, %v1904_v5  ;;  %v17987_v5 = vld [vmem:[#allocation188_spill] sm:$0xff]  ;;  %v17989_v11 = vld [vmem:[#allocation122_spill] sm:$0xff] }
 0x29c   : > { %v17979_v40 = vrot.slane %v17978_v34, 4  ;;  %v17980_v16 = vrot.slane %v14841_v37, 4  ;;  %v17982_v33 = vrot.slane %v17981_v1, 5  ;;  %v17983_v55 = vrot.slane %v14845_v41, 5 }
 0x29d   : > { %v1043_v18 = vsel %vm1003_vm0, %v17976_v31, %v17974_v49  ;;  %v3233_v51 = vshrl.u32 %v3023_v2, 16  ;;  %v3236_v14 = vshll.u32 %v3023_v2, 16  ;;  %v17985_v50 = vrot.slane %v17984_v54, 6 }
 0x29e   : > { %v1144_v60 = vadd.f32 %v1043_v18, %v17977_v47  ;;  %v2313_v12 = vsel %vm1996_vm3, %v17979_v40, %v2312_v48  ;;  %v2315_v45 = vsel %vm1996_vm3, %v2312_v48, %v17980_v16  ;;  %v2558_v43 = vsel %vm2489_vm4, %v17982_v33, %v2557_v3  ;;  %v17996_v16 = vld [vmem:[#allocation183_spill] sm:$0xff] }
 0x29f   : > { %v2560_v52 = vsel %vm2489_vm4, %v2557_v3, %v17983_v55  ;;  %v2400_v15 = vadd.f32 %v2313_v12, %v2156_v10  ;;  %v2401_v22 = vadd.f32 %v2315_v45, %v2157_v38  ;;  %v2803_v6 = vsel %vm2734_vm5, %v17985_v50, %v2802_v27 }
 0x2a0   : > { %v17986_v37 = vrot.slane %v14868_v29, 6  ;;  %v17988_v48 = vrot.slane %v17987_v5, 2  ;;  %v17990_v49 = vrot.slane %v17989_v11, 2  ;;  %v17991_v3 = vrot.slane %v17911_v0, 2  ;;  %v17993_v29 = vld [vmem:[#allocation200_spill] sm:$0xff] }
 0x2a1   : > { %v3235_v2 = vrot.slane %v3233_v51, 2  ;;  %v3238_v10 = vrot.slane %v3236_v14, 3  ;;  %v2645_v38 = vadd.f32 %v2558_v43, %v2400_v15  ;;  %v2646_v47 = vadd.f32 %v2560_v52, %v2401_v22  ;;  %v18000_v52 = vld [vmem:[#allocation113_spill] sm:$0xff]  ;;  %v18002_v14 = vld [vmem:[#allocation184_spill] sm:$0xff] }
 0x2a2   : > { %v2805_v26 = vsel %vm2734_vm5, %v2802_v27, %v17986_v37  ;;  %v1287_v41 = vsel %vm1247_vm1, %v17990_v49, %v17988_v48  ;;  %v17992_v31 = vmov %v17988_v48  ;;  %v17994_v27 = vld [vmem:[#allocation28_spill] sm:$0xff]  ;;  %v17997_v45 = vrot.slane %v17996_v16, 2  ;;  %v18006_v49 = vld [vmem:[#allocation175_spill] sm:$0xff] }
 0x2a3   : > { %v1289_v18 = vsel %vm1247_vm1, %v17992_v31, %v17991_v3  ;;  %v1388_v34 = vadd.f32 %v1287_v41, %v1144_v60  ;;  %v17995_v12 = vrot.slane %v17994_v27, 2  ;;  %v17998_v33 = vrot.slane %v17920_v61, 2  ;;  %v18008_v3 = vld [vmem:[#allocation186_spill] sm:$0xff] }
 0x2a4   : > { %v1389_v40 = vadd.f32 %v1289_v18, %v17993_v29  ;;  %v15170_v54 = vor.u32 %v3238_v10, %v3235_v2  ;;  %v2890_v51 = vadd.f32 %v2803_v6, %v2645_v38  ;;  %v2891_v43 = vadd.f32 %v2805_v26, %v2646_v47  ;;  %v18012_v29 = vld [vmem:[#allocation209_spill] sm:$0xff]  ;;  %v18013_v27 = vld [vmem:[#allocation214_spill] sm:$0xff] }
 0x2a5   : > { %v1537_v1 = vsel %vm1247_vm1, %v17997_v45, %v17995_v12  ;;  %v17999_v0 = vmov %v17995_v12  ;;  %v18001_v60 = vrot.slane %v18000_v52, 3  ;;  %v18003_v15 = vrot.slane %v18002_v14, 3 }
 0x2a6   : > { %v1539_v55 = vsel %vm1247_vm1, %v17999_v0, %v17998_v33  ;;  %v1640_v50 = vadd.f32 %v1537_v1, %v1388_v34  ;;  %v18004_v5 = vrot.slane %v17926_v30, 3  ;;  %v18007_v41 = vrot.slane %v18006_v49, 4  ;;  %v15209_v33 = vld [vmem:[#allocation15 + $0x8] sm:$0xf]  ;;  %v15211_v0 = vld [vmem:[#allocation15 + $0x10] sm:$0xf0] }
 0x2a7   : > { %v1786_v22 = vsel %vm1745_vm2, %v18003_v15, %v18001_v60  ;;  %v1641_v37 = vadd.f32 %v1539_v55, %v1389_v40  ;;  %v18005_v61 = vmov %v18001_v60  ;;  %v18009_v31 = vrot.slane %v18008_v3, 4 }
 0x2a8   : > { %v1788_v48 = vsel %vm1745_vm2, %v18005_v61, %v18004_v5  ;;  %v3249_v26 = vsel %vm3133_vm6, %v15170_v54, %v14851_v21  ;;  %v2936_v18 = vadd.f32 %v14715_v7, %v2890_v51  ;;  %v2937_v2 = vadd.f32 %v14715_v7, %v2891_v43 }
 0x2a9   : > { %v2037_v6 = vsel %vm1996_vm3, %v18009_v31, %v18007_v41  ;;  %v18010_v30 = vrot.slane %v17932_v35, 4  ;;  %v18011_v10 = vmov %v18007_v41  ;;  %3414 = vmatpush.bf16.msra.mxu1 %v3249_v26  ;;  %v1889_v47 = vadd.f32 %v1786_v22, %v1640_v50 }
 0x2aa   : > { %v1890_v34 = vadd.f32 %v1788_v48, %v1641_v37  ;;  %v15199_v40 = vmul.f32 %v13522_v28, %v18012_v29  ;;  %v2185_v21 = vmul.f32 %v13522_v28, %v18013_v27  ;;  %v2978_v12 = vmax.f32 %v2936_v18, 0.0 }
 0x2ab   : > { %v2039_v38 = vsel %vm1996_vm3, %v18011_v10, %v18010_v30  ;;  %v2979_v45 = vmax.f32 %v2937_v2, 0.0  ;;  %v15205_v1 = vmul.f32 %v13525_v42, %v18012_v29  ;;  %v2429_v35 = vmul.f32 %v13525_v42, %v18013_v27 }
 0x2ac   : > { %v2142_v55 = vadd.f32 %v2037_v6, %v1889_v47  ;;  %v2143_v51 = vadd.f32 %v2039_v38, %v1890_v34  ;;  %v2282_v43 = vrot.slane %v15199_v40, 4  ;;  %v2284_v52 = vrot.slane %v2185_v21, 4 }
 0x2ad   : > { %v3029_v60 = vpack.c.bf16 %v2979_v45, %v2978_v12  ;;  %v2527_v15 = vrot.slane %v15205_v1, 5  ;;  %v2529_v22 = vrot.slane %v2429_v35, 5  ;;  %v15217_v50 = vmul.f32 %v14576_v46, %v18012_v29  ;;  %v18018_v45 = vld [vmem:[#allocation109_spill] sm:$0xff] }
 0x2ae   : > { %v2285_v37 = vsel %vm1996_vm3, %v2282_v43, %v2284_v52  ;;  %v18014_v5 = vrot.slane %v15028_v32, 4  ;;  %v2674_v48 = vmul.f32 %v14576_v46, %v18013_v27  ;;  %v9074_v49 = vor.u32 %v15211_v0, %v15209_v33 }
 0x2af   : > { %v3287_v41 = vshrl.u32 %v3029_v60, 16  ;;  %v3290_v31 = vshll.u32 %v3029_v60, 16  ;;  %v2386_v6 = vadd.f32 %v2285_v37, %v2142_v55  ;;  %v2530_v18 = vsel %vm2489_vm4, %v2527_v15, %v2529_v22 }
 0x2b0   : > { %v2287_v61 = vsel %vm1996_vm3, %v2284_v52, %v18014_v5  ;;  %v18015_v2 = vrot.slane %v15034_v39, 5  ;;  %v2772_v30 = vrot.slane %v15217_v50, 6  ;;  %v2774_v10 = vrot.slane %v2674_v48, 6  ;;  %v18020_v52 = vld [vmem:[#allocation215_spill] sm:$0xff]  ;;  %v18022_v5 = vld [vmem:[#allocation120_spill] sm:$0xff] }
 0x2b1   : > { %v2387_v26 = vadd.f32 %v2287_v61, %v2143_v51  ;;  %v3289_v38 = vrot.slane %v3287_v41, 2  ;;  %v3292_v47 = vrot.slane %v3290_v31, 3  ;;  %v2631_v34 = vadd.f32 %v2530_v18, %v2386_v6 }
 0x2b2   : > { %v2532_v32 = vsel %vm2489_vm4, %v2529_v22, %v18015_v2  ;;  %v2775_v27 = vsel %vm2734_vm5, %v2772_v30, %v2774_v10  ;;  %v18016_v21 = vrot.slane %v15041_v23, 6  ;;  %v18017_v39 = vrot.slane %v17884_v24, 2  ;;  %v18021_v22 = vld [vmem:[#allocation155_spill] sm:$0xff]  ;;  %v18024_v23 = vld [vmem:[#allocation150_spill] sm:$0xff] }
 0x2b3   : > { %v2632_v29 = vadd.f32 %v2532_v32, %v2387_v26  ;;  %v18019_v35 = vrot.slane %v18018_v45, 2  ;;  %v3293_v0 = vor.u32 %v3292_v47, %v3289_v38  ;;  %v2876_v55 = vadd.f32 %v2775_v27, %v2631_v34  ;;  %v18028_v26 = vld [vmem:[#allocation66_spill] sm:$0xff] }
 0x2b4   : > { %v2777_v12 = vsel %vm2734_vm5, %v2774_v10, %v18016_v21  ;;  %v1624_v60 = vadd.f32 %v14450_v19, %v18020_v52  ;;  %v18023_v61 = vrot.slane %v18022_v5, 3  ;;  %v18025_v48 = vrot.slane %v18024_v23, 3  ;;  %v18031_v47 = vld [vmem:[#allocation46_spill] sm:$0xff] }
 0x2b5   : > { %v1507_v33 = vsel %vm1247_vm1, %v18019_v35, %v18017_v39  ;;  %v2877_v51 = vadd.f32 %v2777_v12, %v2632_v29  ;;  %v18026_v24 = vrot.slane %v17891_v17, 3  ;;  %v18029_v18 = vrot.slane %v18028_v26, 4  ;;  %v18034_v12 = vld [vmem:[#allocation196_spill] sm:$0xff]  ;;  %v18035_v35 = vld [vmem:[#allocation147_spill] sm:$0xff] }
 0x2b6   : > { %v1625_v37 = vadd.f32 %v1507_v33, %v18021_v22  ;;  %v1754_v41 = vsel %vm1745_vm2, %v18025_v48, %v18023_v61  ;;  %v18027_v31 = vmov %v18023_v61  ;;  %v18030_v2 = vrot.slane %v14431_v58, 4  ;;  %v18036_v48 = vld [vmem:[#allocation116_spill] sm:$0xff] }
 0x2b7   : > { %v1756_v6 = vsel %vm1745_vm2, %v18027_v31, %v18026_v24  ;;  %v3303_v32 = vsel %vm3133_vm6, %v3293_v0, %v14988_v36  ;;  %v2922_v10 = vadd.f32 %v14715_v7, %v2876_v55  ;;  %v2923_v38 = vadd.f32 %v14715_v7, %v2877_v51  ;;  %v18038_v24 = vld [vmem:[#allocation31_spill] sm:$0xff] }
 0x2b8   : > { %v2005_v19 = vsel %vm1996_vm3, %v18030_v2, %v18029_v18  ;;  %v3294_v17 = vsel %vm3133_vm6, %v18031_v47, %v3293_v0  ;;  %3459 = vmatpush.bf16.msra.mxu2 %v3303_v32  ;;  %v1873_v34 = vadd.f32 %v1754_v41, %v1624_v60  ;;  %v1874_v29 = vadd.f32 %v1756_v6, %v1625_v37 }
 0x2b9   : > { %v18032_v27 = vrot.slane %v17897_v56, 4  ;;  %v18033_v21 = vmov %v18029_v18  ;;  %v15278_v39 = vmul.f32 %v13522_v28, %v18034_v12  ;;  %v2964_v36 = vmax.f32 %v2922_v10, 0.0 }
 0x2ba   : > { %v2965_v45 = vmax.f32 %v2923_v38, 0.0  ;;  %v2169_v33 = vmul.f32 %v13522_v28, %v18035_v35  ;;  %v15284_v0 = vmul.f32 %v13525_v42, %v18034_v12  ;;  %v2126_v55 = vadd.f32 %v2005_v19, %v1873_v34 }
 0x2bb   : > { %v2007_v58 = vsel %vm1996_vm3, %v18033_v21, %v18032_v27  ;;  %v2250_v56 = vrot.slane %v15278_v39, 4  ;;  %v2413_v52 = vmul.f32 %v13525_v42, %v18035_v35  ;;  %v15292_v5 = vmul.f32 %v14576_v46, %v18034_v12  ;;  %v18084_v39 = vld [vmem:[#allocation201_spill] sm:$0xff] }
 0x2bc   : > { %v2127_v51 = vadd.f32 %v2007_v58, %v1874_v29  ;;  %v3022_v60 = vpack.c.bf16 %v2965_v45, %v2964_v36  ;;  %v2252_v22 = vrot.slane %v2169_v33, 4  ;;  %v2495_v37 = vrot.slane %v15284_v0, 5  ;;  %3460 = vmatpush.bf16.msra.mxu2 %v3294_v17 }
 0x2bd   : > { %v2497_v61 = vrot.slane %v2413_v52, 5  ;;  %v2658_v23 = vmul.f32 %v14576_v46, %v18035_v35  ;;  %v18037_v41 = vrot.slane %v18036_v48, 1  ;;  %v18039_v31 = vrot.slane %v18038_v24, 1  ;;  %v18044_v35 = vld [vmem:[#allocation39_spill] sm:$0xff]  ;;  %v18049_v48 = vld [vmem:[#allocation32_spill] sm:$0xff] }
 0x2be   : > { %v18040_v26 = vrot.slane %v17975_v44, 1  ;;  %v3224_v19 = vshrl.u32 %v3022_v60, 16  ;;  %v3227_v32 = vshll.u32 %v3022_v60, 16  ;;  %v2253_v10 = vsel %vm1996_vm3, %v2250_v56, %v2252_v22 }
 0x2bf   : > { %v1039_v6 = vsel %vm1003_vm0, %v18039_v31, %v18037_v41  ;;  %v18041_v18 = vmov %v18037_v41  ;;  %v18042_v38 = vrot.slane %v14935_v53, 4  ;;  %v2370_v17 = vadd.f32 %v2253_v10, %v2126_v55  ;;  %9135 = vmatmul.msk.bf16.vlgmr.msra.gmra.mxu2 %vm3342_vm7, %v9074_v49  ;;  %v18045_v55 = vld [vmem:[#allocation118_spill] sm:$0xff]  ;;  %v18047_v49 = vld [vmem:[#allocation117_spill] sm:$0xff] }
 0x2c0   : > { %v1041_v2 = vsel %vm1003_vm0, %v18041_v18, %v18040_v26  ;;  %v2498_v44 = vsel %vm2489_vm4, %v2495_v37, %v2497_v61  ;;  %v18043_v29 = vrot.slane %v14941_v59, 5  ;;  %v3226_v21 = vrot.slane %v3224_v19, 2 }
 0x2c1   : > { %v2255_v47 = vsel %vm1996_vm3, %v2252_v22, %v18042_v38  ;;  %v3229_v58 = vrot.slane %v3227_v32, 3  ;;  %v2740_v12 = vrot.slane %v15292_v5, 6  ;;  %v2742_v36 = vrot.slane %v2658_v23, 6  ;;  %v18053_v32 = vld [vmem:[#allocation189_spill] sm:$0xff]  ;;  %v18055_v38 = vld [vmem:[#allocation123_spill] sm:$0xff] }
 0x2c2   : > { %v2371_v34 = vadd.f32 %v2255_v47, %v2127_v51  ;;  %v2500_v27 = vsel %vm2489_vm4, %v2497_v61, %v18043_v29  ;;  %v2615_v53 = vadd.f32 %v2498_v44, %v2370_v17  ;;  %v1142_v33 = vadd.f32 %v1039_v6, %v18044_v35 }
 0x2c3   : > { %v1143_v51 = vadd.f32 %v1041_v2, %v18045_v55  ;;  %v15322_v52 = vor.u32 %v3229_v58, %v3226_v21  ;;  %v2743_v59 = vsel %vm2734_vm5, %v2740_v12, %v2742_v36  ;;  %v18046_v60 = vrot.slane %v14949_v25, 6 }
 0x2c4   : > { %v2616_v45 = vadd.f32 %v2500_v27, %v2371_v34  ;;  %v18048_v61 = vrot.slane %v18047_v49, 2  ;;  %v18050_v23 = vrot.slane %v18049_v48, 2  ;;  %v2860_v24 = vadd.f32 %v2743_v59, %v2615_v53 }
 0x2c5   : > { %v2745_v22 = vsel %vm2734_vm5, %v2742_v36, %v18046_v60  ;;  %v18051_v6 = vrot.slane %v17989_v11, 2  ;;  %v3240_v25 = vsel %vm3133_vm6, %v15322_v52, %v15170_v54  ;;  %v18054_v10 = vrot.slane %v18053_v32, 2  ;;  %v18059_v54 = vld [vmem:[#allocation190_spill] sm:$0xff]  ;;  %v18067_v60 = vld [vmem:[#allocation129_spill] sm:$0xff] }
 0x2c6   : > { %v1283_v41 = vsel %vm1247_vm1, %v18050_v23, %v18048_v61  ;;  %v2861_v31 = vadd.f32 %v2745_v22, %v2616_v45  ;;  %v18052_v26 = vmov %v18048_v61  ;;  %v18056_v47 = vrot.slane %v18055_v38, 2  ;;  %3415 = vmatpush.bf16.msra.mxu1 %v3240_v25  ;;  %v18061_v36 = vld [vmem:[#allocation126_spill] sm:$0xff]  ;;  %v18072_v25 = vld [vmem:[#allocation60_spill] sm:$0xff] }
 0x2c7   : > { %v1285_v18 = vsel %vm1247_vm1, %v18052_v26, %v18051_v6  ;;  %v1386_v2 = vadd.f32 %v1283_v41, %v1142_v33  ;;  %v18057_v34 = vrot.slane %v17996_v16, 2  ;;  %v18058_v11 = vmov %v18054_v10 }
 0x2c8   : > { %v1387_v19 = vadd.f32 %v1285_v18, %v1143_v51  ;;  %v1533_v17 = vsel %vm1247_vm1, %v18056_v47, %v18054_v10  ;;  %v2906_v29 = vadd.f32 %v14715_v7, %v2860_v24  ;;  %v2907_v27 = vadd.f32 %v14715_v7, %v2861_v31  ;;  %v18065_v51 = vld [vmem:[#allocation191_spill] sm:$0xff] }
 0x2c9   : > { %v1535_v44 = vsel %vm1247_vm1, %v18058_v11, %v18057_v34  ;;  %v1638_v21 = vadd.f32 %v1533_v17, %v1386_v2  ;;  %v18060_v58 = vrot.slane %v18059_v54, 3  ;;  %v18062_v53 = vrot.slane %v18061_v36, 3 }
 0x2ca   : > { %v1639_v35 = vadd.f32 %v1535_v44, %v1387_v19  ;;  %v18063_v33 = vrot.slane %v18002_v14, 3  ;;  %v18066_v59 = vrot.slane %v18065_v51, 4  ;;  %v18068_v22 = vrot.slane %v18067_v60, 4  ;;  %v18071_v14 = vld [vmem:[#allocation52_spill] sm:$0xff]  ;;  %v18080_v51 = vld [vmem:[#allocation119_spill] sm:$0xff] }
 0x2cb   : > { %v1782_v45 = vsel %vm1745_vm2, %v18062_v53, %v18060_v58  ;;  %v18064_v16 = vmov %v18060_v58  ;;  %v18069_v61 = vrot.slane %v18008_v3, 4  ;;  %v2948_v41 = vmax.f32 %v2906_v29, 0.0  ;;  %v18075_v29 = vld [vmem:[#allocation111_spill] sm:$0xff] }
 0x2cc   : > { %v1784_v55 = vsel %vm1745_vm2, %v18064_v16, %v18063_v33  ;;  %v2033_v49 = vsel %vm1996_vm3, %v18068_v22, %v18066_v59  ;;  %v18070_v48 = vmov %v18066_v59  ;;  %v2949_v24 = vmax.f32 %v2907_v27, 0.0 }
 0x2cd   : > { %v2035_v23 = vsel %vm1996_vm3, %v18070_v48, %v18069_v61  ;;  %v1887_v31 = vadd.f32 %v1782_v45, %v1638_v21  ;;  %v2183_v6 = vmul.f32 %v13522_v28, %v18071_v14  ;;  %v1888_v26 = vadd.f32 %v1784_v55, %v1639_v35  ;;  %v18078_v35 = vld [vmem:[#allocation51_spill] sm:$0xff]  ;;  %v18082_v61 = vld [vmem:[#allocation182_spill] sm:$0xff] }
 0x2ce   : > { %v2427_v18 = vmul.f32 %v13525_v42, %v18071_v14  ;;  %v2672_v2 = vmul.f32 %v14576_v46, %v18071_v14  ;;  %v18073_v19 = vrot.slane %v18072_v25, 4  ;;  %v18074_v3 = vrot.slane %v17750_v13, 4  ;;  %v18076_v46 = vld [vmem:[#allocation63_spill] sm:$0xff] }
 0x2cf   : > { %v3014_v10 = vpack.c.bf16 %v2949_v24, %v2948_v41  ;;  %v2140_v38 = vadd.f32 %v2033_v49, %v1887_v31  ;;  %v2280_v47 = vrot.slane %v2183_v6, 4  ;;  %v2141_v34 = vadd.f32 %v2035_v23, %v1888_v26 }
 0x2d0   : > { %v2001_v32 = vsel %vm1996_vm3, %v18074_v3, %v18073_v19  ;;  %v2525_v11 = vrot.slane %v2427_v18, 5  ;;  %v2770_v44 = vrot.slane %v2672_v2, 6  ;;  %v2167_v27 = vmul.f32 %v13522_v28, %v18075_v29 }
 0x2d1   : > { %v2124_v17 = vadd.f32 %v2001_v32, %v14535_v62  ;;  %v3152_v21 = vshrl.u32 %v3014_v10, 16  ;;  %v3155_v54 = vshll.u32 %v3014_v10, 16  ;;  %v18077_v58 = vrot.slane %v18076_v46, 4 }
 0x2d2   : > { %v2283_v13 = vsel %vm1996_vm3, %v2280_v47, %v2282_v43  ;;  %v18079_v62 = vrot.slane %v18078_v35, 5  ;;  %v2528_v28 = vsel %vm2489_vm4, %v2525_v11, %v2527_v15  ;;  %v18081_v59 = vrot.slane %v18080_v51, 6  ;;  %v11740_v15 = vld [vmem:[#allocation2 + $0x8] ss:$0 sm:$0xff] }
 0x2d3   : > { %v2281_v36 = vsel %vm1996_vm3, %v18077_v58, %v2280_v47  ;;  %v2385_v45 = vadd.f32 %v2283_v13, %v2141_v34  ;;  %v3154_v16 = vrot.slane %v3152_v21, 2  ;;  %v3157_v55 = vrot.slane %v3155_v54, 3  ;;  %v9085_v34 = vld [vmem:[#allocation15 + $0x20] sm:$0xf] }
 0x2d4   : > { %v2384_v53 = vadd.f32 %v2281_v36, %v2140_v38  ;;  %v2526_v33 = vsel %vm2489_vm4, %v18079_v62, %v2525_v11  ;;  %v2771_v60 = vsel %vm2734_vm5, %v18081_v59, %v2770_v44  ;;  %v2773_v40 = vsel %vm2734_vm5, %v2770_v44, %v2772_v30  ;;  %v11108_v11 = vld [vmem:[#allocation15 + $0x28] sm:$0xf0] }
 0x2d5   : > { %v2630_v22 = vadd.f32 %v2528_v28, %v2385_v45  ;;  %v2248_v49 = vrot.slane %v2167_v27, 4  ;;  %v2410_v48 = vmul.f32 %v13525_v42, %v18082_v61  ;;  %v15409_v23 = vor.u32 %v3157_v55, %v3154_v16 }
 0x2d6   : > { %v2629_v43 = vadd.f32 %v2526_v33, %v2384_v53  ;;  %v2411_v1 = vmul.f32 %v13525_v42, %v18075_v29  ;;  %v2655_v41 = vmul.f32 %v11740_v15, %v18082_v61  ;;  %v2656_v24 = vmul.f32 %v11740_v15, %v18075_v29 }
 0x2d7   : > { %v2875_v50 = vadd.f32 %v2773_v40, %v2630_v22  ;;  %v18083_v30 = vrot.slane %v14457_v20, 4  ;;  %v2251_v6 = vsel %vm1996_vm3, %v2248_v49, %v2250_v56  ;;  %v2367_v26 = vadd.f32 %v14519_v57, %v14537_v63  ;;  %v18086_v63 = vld [vmem:[#allocation68_spill] sm:$0xff] }
 0x2d8   : > { %v2874_v31 = vadd.f32 %v2771_v60, %v2629_v43  ;;  %v3168_v42 = vsel %vm3133_vm6, %v15409_v23, %v15074_v4  ;;  %v2369_v2 = vadd.f32 %v2251_v6, %v14549_v8  ;;  %v2491_v19 = vrot.slane %v2410_v48, 5  ;;  %v18088_v6 = vld [vmem:[#allocation65_spill] sm:$0xff] }
 0x2d9   : > { %v2249_v14 = vsel %vm1996_vm3, %v18083_v30, %v2248_v49  ;;  %3372 = vmatpush.bf16.msra.mxu0 %v3168_v42  ;;  %v2921_v20 = vadd.f32 %v14715_v7, %v2875_v50  ;;  %v2493_v3 = vrot.slane %v2411_v1, 5  ;;  %v18085_v56 = vrot.slane %v18084_v39, 5  ;;  %v9097_v42 = vld [vmem:[#allocation15 + $0x38] sm:$0xf]  ;;  %v11104_v39 = vld [vmem:[#allocation15 + $0x8] sm:$0xf0] }
 0x2da   : > { %v2368_v18 = vadd.f32 %v2249_v14, %v2124_v17  ;;  %v2920_v25 = vadd.f32 %v14715_v7, %v2874_v31  ;;  %v2736_v10 = vrot.slane %v2655_v41, 6  ;;  %v2738_v57 = vrot.slane %v2656_v24, 6  ;;  %v9067_v41 = vld [vmem:[#allocation15 + $0xc] sm:$0xf0] }
 0x2db   : > { %v2611_v32 = vadd.f32 %v18085_v56, %v14551_v9  ;;  %v2654_v38 = vmul.f32 %v11740_v15, %v18086_v63  ;;  %v2963_v4 = vmax.f32 %v2921_v20, 0.0  ;;  %v2494_v17 = vsel %vm2489_vm4, %v2491_v19, %v2493_v3  ;;  %v11103_v15 = vld [vmem:[#allocation15 + $0x4] sm:$0xf]  ;;  %v9079_v63 = vld [vmem:[#allocation15 + $0x24] sm:$0xf0] }
 0x2dc   : > { %v2962_v47 = vmax.f32 %v2920_v25, 0.0  ;;  %v2496_v8 = vsel %vm2489_vm4, %v2493_v3, %v2495_v37  ;;  %v2613_v44 = vadd.f32 %v2494_v17, %v2368_v18  ;;  %v2739_v27 = vsel %vm2734_vm5, %v2736_v10, %v2738_v57  ;;  %v11111_v18 = vld [vmem:[#allocation15 + $0x40] sm:$0xf0]  ;;  %v9065_v3 = vld [vmem:[#allocation15] sm:$0xf] }
 0x2dd   : > { %v2614_v29 = vadd.f32 %v2496_v8, %v2369_v2  ;;  %v18087_v9 = vmov %v18085_v56  ;;  %v2741_v46 = vsel %vm2734_vm5, %v2738_v57, %v2740_v12  ;;  %v2735_v36 = vrot.slane %v2654_v38, 6  ;;  %v11106_v57 = vld [vmem:[#allocation15 + $0x1c] sm:$0xf]  ;;  %v11107_v8 = vld [vmem:[#allocation15 + $0x20] sm:$0xf0] }
 0x2de   : > { %v2492_v21 = vsel %vm2489_vm4, %v18087_v9, %v2491_v19  ;;  %v3021_v54 = vpack.c.bf16 %v2963_v4, %v2962_v47  ;;  %v2858_v0 = vadd.f32 %v2739_v27, %v2613_v44  ;;  %v9086_v37 = vor.u32 %v11108_v11, %v9085_v34  ;;  %v9109_v47 = vld [vmem:[#allocation15 + $0x50] sm:$0xf]  ;;  %v11114_v4 = vld [vmem:[#allocation15 + $0x58] sm:$0xf0]  ;;  %v11109_v11 = vld [vmem:[#allocation15 + $0x34] sm:$0xf] }
 0x2df   : > { %v2612_v58 = vadd.f32 %v2492_v21, %v2367_v26  ;;  %v2859_v13 = vadd.f32 %v2741_v46, %v2614_v29  ;;  %v2737_v35 = vsel %vm2734_vm5, %v2735_v36, %v2736_v10  ;;  %v2856_v62 = vadd.f32 %v2735_v36, %v2611_v32  ;;  %v9091_v44 = vld [vmem:[#allocation15 + $0x3c] sm:$0xf0]  ;;  %v9121_v27 = vld [vmem:[#allocation15 + $0x68] sm:$0xf]  ;;  %v11117_v9 = vld [vmem:[#allocation15 + $0x70] sm:$0xf0] }
 0x2e0   : > { %v3215_v53 = vshrl.u32 %v3021_v54, 16  ;;  %v3218_v45 = vshll.u32 %v3021_v54, 16  ;;  %v2904_v33 = vadd.f32 %v14715_v7, %v2858_v0  ;;  %9136 = vmatmul.msk.bf16.gmra.mxu2 %vm3342_vm7, %v9086_v37  ;;  %v9070_v26 = vor.u32 %v11103_v15, %v9067_v41  ;;  %v9089_v54 = vld [vmem:[#allocation15 + $0x30] sm:$0xf]  ;;  %v11110_v46 = vld [vmem:[#allocation15 + $0x38] sm:$0xf0] }
 0x2e1   : > { %v2905_v28 = vadd.f32 %v14715_v7, %v2859_v13  ;;  %v2857_v16 = vadd.f32 %v2737_v35, %v2612_v58  ;;  %v2902_v12 = vadd.f32 %v14715_v7, %v2856_v62  ;;  %v9098_v19 = vor.u32 %v11111_v18, %v9097_v42  ;;  %v11112_v36 = vld [vmem:[#allocation15 + $0x4c] sm:$0xf]  ;;  %v9103_v0 = vld [vmem:[#allocation15 + $0x54] sm:$0xf0]  ;;  %v9133_v37 = vld [vmem:[#allocation15 + $0x80] sm:$0xf] }
 0x2e2   : > { %v3217_v5 = vrot.slane %v3215_v53, 2  ;;  %v3220_v55 = vrot.slane %v3218_v45, 3  ;;  %v2946_v51 = vmax.f32 %v2904_v33, 0.0  ;;  %v9066_v10 = vor.u32 %v11104_v39, %v9065_v3  ;;  %v11120_v53 = vld [vmem:[#allocation15 + $0x88] sm:$0xf0]  ;;  %v3010_v15 = vld [vmem:[#allocation15 + $0x90] sm:$0xff] }
 0x2e3   : > { %v2947_v59 = vmax.f32 %v2905_v28, 0.0  ;;  %v2903_v60 = vadd.f32 %v14715_v7, %v2857_v16  ;;  %v2944_v43 = vmax.f32 %v2902_v12, 0.0  ;;  %v9082_v38 = vor.u32 %v11106_v57, %v9079_v63  ;;  %v9101_v35 = vld [vmem:[#allocation15 + $0x48] sm:$0xf]  ;;  %v11113_v62 = vld [vmem:[#allocation15 + $0x50] sm:$0xf0] }
 0x2e4   : > { %v3221_v40 = vor.u32 %v3220_v55, %v3217_v5  ;;  %v9110_v17 = vor.u32 %v11114_v4, %v9109_v47  ;;  %v9094_v29 = vor.u32 %v11109_v11, %v9091_v44  ;;  %v9122_v21 = vor.u32 %v11117_v9, %v9121_v27  ;;  %v3011_v28 = vld [vmem:[#allocation15 + $0x98] sm:$0xf]  ;;  %v11115_v16 = vld [vmem:[#allocation15 + $0x64] sm:$0xf]  ;;  %v9115_v5 = vld [vmem:[#allocation15 + $0x6c] sm:$0xf0] }
 0x2e5   : > { %v3013_v22 = vpack.c.bf16 %v2947_v59, %v2946_v51  ;;  %v2945_v49 = vmax.f32 %v2903_v60, 0.0  ;;  %v9090_v58 = vor.u32 %v11110_v46, %v9089_v54  ;;  %v9106_v13 = vor.u32 %v11112_v36, %v9103_v0  ;;  %v9113_v59 = vld [vmem:[#allocation15 + $0x60] sm:$0xf]  ;;  %v11116_v60 = vld [vmem:[#allocation15 + $0x68] sm:$0xf0] }
 0x2e6   : > { %v3231_v61 = vsel %vm3133_vm6, %v3221_v40, %v15322_v52  ;;  %v3222_v7 = vsel %vm3133_vm6, %v18088_v6, %v3221_v40  ;;  %v9134_v45 = vor.u32 %v11120_v53, %v9133_v37  ;;  %v9102_v33 = vor.u32 %v11113_v62, %v9101_v35  ;;  %v11139_v42 = vld [vmem:[#allocation6 + $0x90] sm:$0xff]  ;;  %v11137_v39 = vld [vmem:[#allocation6 + $0x80] sm:$0xff] }
 0x2e7   : > { %3416 = vmatpush.bf16.msra.mxu1 %v3231_v61  ;;  %v3143_v48 = vshrl.u32 %v3013_v22, 16  ;;  %v3146_v1 = vshll.u32 %v3013_v22, 16  ;;  %v3012_v24 = vpack.c.bf16 %v2945_v49, %v2944_v43  ;;  %v3097_v55 = vunpack.c.l.b16 %v3011_v28  ;;  %v11118_v43 = vld [vmem:[#allocation15 + $0x7c] sm:$0xf]  ;;  %v9127_v22 = vld [vmem:[#allocation15 + $0x84] sm:$0xf0] }
 0x2e8   : > { %v9118_v12 = vor.u32 %v11115_v16, %v9115_v5  ;;  %v9114_v40 = vor.u32 %v11116_v60, %v9113_v59  ;;  %v9130_v49 = vor.u32 %v11118_v43, %v9127_v22  ;;  %v9125_v61 = vld [vmem:[#allocation15 + $0x78] sm:$0xf]  ;;  %v3096_v41 = vunpack.c.h.b16 %v3010_v15  ;;  %v11127_v18 = vld [vmem:[#allocation6 + $0x30] sm:$0xff] }
 0x2e9   : > { %v3145_v31 = vrot.slane %v3143_v48, 2  ;;  %v3148_v50 = vrot.slane %v3146_v1, 3  ;;  %v3135_v30 = vshrl.u32 %v3012_v24, 16  ;;  %v3138_v14 = vshll.u32 %v3012_v24, 16  ;;  %v11119_v48 = vld [vmem:[#allocation15 + $0x80] sm:$0xf0] }
 0x2ea   : > { %v3118_v51 = vpack.c.b16 %v3097_v55, %v3097_v55  ;;  %v9126_v1 = vor.u32 %v11119_v48, %v9125_v61  ;;  %v3117_v24 = vpack.c.b16 %v3096_v41, %v3096_v41  ;;  %v11135_v57 = vld [vmem:[#allocation6 + $0x70] sm:$0xff]  ;;  %v11133_v47 = vld [vmem:[#allocation6 + $0x60] sm:$0xff]  ;;  %v17200_v36 = vmov 0.0|0.0  }
 0x2eb   : > { %v3149_v2 = vor.u32 %v3148_v50, %v3145_v31  ;;  %3417 = vmatpush.bf16.msra.mxu1 %v3222_v7  ;;  %v3137_v25 = vrot.slane %v3135_v30, 2  ;;  %v3140_v52 = vrot.slane %v3138_v14, 3  ;;  %v3095_v31 = vunpack.c.l.b16 %v3010_v15  ;;  %v11140_v14 = vld [vmem:[#allocation6 + $0x98] sm:$0xff] }
 0x2ec   : > { %v11128_v7 = vld [vmem:[#allocation6 + $0x38] sm:$0xff]  ;;  %v3528_v0 = vrot.slane %v17200_v36, 3 }
 0x2ed   : > { %v3159_v20 = vsel %vm3133_vm6, %v3149_v2, %v15409_v23  ;;  %v3141_v56 = vor.u32 %v3140_v52, %v3137_v25  ;;  %v9077_v23 = vld [vmem:[#allocation15 + $0x18] sm:$0xf]  ;;  %v3116_v50 = vpack.c.b16 %v3095_v31, %v3095_v31  ;;  %3591 = vmatpush.bf16.msra.mxu3 %v11128_v7  ;;  %v11126_v25 = vld [vmem:[#allocation6 + $0x28] sm:$0xff]  ;;  %v11131_v52 = vld [vmem:[#allocation6 + $0x50] sm:$0xff] }
 0x2ee   : > { %3373 = vmatpush.bf16.msra.mxu0 %v3159_v20  ;;  %3418 = vmatmul.bf16.vlgmr.msra.gmra.mxu1 %v9070_v26  ;;  %v9078_v34 = vor.u32 %v11107_v8, %v9077_v23  ;;  %v11132_v26 = vld [vmem:[#allocation6 + $0x58] sm:$0xff]  ;;  %v11130_v20 = vld [vmem:[#allocation6 + $0x48] sm:$0xff] }
 0x2ef   : > { %v3150_v32 = vsel %vm3133_vm6, %v3141_v56, %v3149_v2  ;;  %4150 = vmatpush.bf16.msrb.mxu1 %v11140_v14  ;;  %3866 = vmatpush.bf16.msrb.mxu2 %v11132_v26  ;;  %v11138_v2 = vld [vmem:[#allocation6 + $0x88] sm:$0xff]  ;;  %v11125_v56 = vld [vmem:[#allocation6 + $0x20] sm:$0xff] }
 0x2f0   : > { %9137 = vmatmul.msk.bf16.gmra.mxu2 %vm3342_vm7, %v9098_v19  ;;  %v11136_v19 = vld [vmem:[#allocation6 + $0x78] sm:$0xff] }
 0x2f1   : > { %3592 = vmatpush.bf16.msra.mxu3 %v11127_v18 }
 0x2f2   : > { %3374 = vmatpush.bf16.msra.mxu0 %v3150_v32 }
 0x2f3   : > { %4151 = vmatpush.bf16.msrb.mxu1 %v11139_v42  ;;  %3867 = vmatpush.bf16.msrb.mxu2 %v11131_v52 }
 0x2f5   : > { %3375 = vmatmul.bf16.vlgmr.msra.gmra.mxu0 %v9066_v10  ;;  %3593 = vmatpush.bf16.msra.mxu3 %v11126_v25  ;;  %v11129_v10 = vld [vmem:[#allocation6 + $0x40] sm:$0xff] }
 0x2f6   : > { %4045 = vmatpush.bf16.msrb.mxu0 %v11136_v19 }
 0x2f7   : > { %4152 = vmatpush.bf16.msrb.mxu1 %v11138_v2  ;;  %3868 = vmatpush.bf16.msrb.mxu2 %v11130_v20 }
 0x2f9   : > { %3594 = vmatpush.bf16.msra.mxu3 %v11125_v56 }
 0x2fa   : > { %4046 = vmatpush.bf16.msrb.mxu0 %v11135_v57 }
 0x2fb   : > { %4153 = vmatpush.bf16.msrb.mxu1 %v11137_v39  ;;  %3869 = vmatpush.bf16.msrb.mxu2 %v11129_v10 }
 0x2fe   : > { %3423 = vmatmul.bf16.gmra.mxu1 %v9082_v38  ;;  %v11134_v38 = vld [vmem:[#allocation6 + $0x68] sm:$0xff] }
 0x2ff   : > { %4047 = vmatpush.bf16.msrb.mxu0 %v11134_v38 }
 0x300   : > { %9138 = vmatmul.msk.bf16.gmra.mxu2 %vm3342_vm7, %v9110_v17 }
 0x303   : > { %4048 = vmatpush.bf16.msrb.mxu0 %v11133_v47 }
 0x305   : > { %3380 = vmatmul.bf16.gmra.mxu0 %v9078_v34 }
 0x30e   : > { %3428 = vmatmul.bf16.gmra.mxu1 %v9094_v29 }
 0x310   : > { %9139 = vmatmul.msk.bf16.gmra.mxu2 %vm3342_vm7, %v9122_v21  ;;  %v18089_v21 = vmov 0  }
 0x311   : > { %v15467_v54 = vrot.slane %v18089_v21, 3  ;;  %v3791_v46 = vrot.slane %v18089_v21, 4 }
 0x315   : > { %3385 = vmatmul.bf16.gmra.mxu0 %v9090_v58 }
 0x31e   : > { %3433 = vmatmul.bf16.gmra.mxu1 %v9106_v13 }
 0x320   : > { %9140 = vmatmul.msk.bf16.gmra.mxu2 %vm3342_vm7, %v9134_v45  ;;  %v17201_v45 = vmov 0.0  }
 0x325   : > { %3390 = vmatmul.bf16.gmra.mxu0 %v9102_v33  ;;  %v3792_v33 = vor.u32 %v3791_v46, %v15467_v54 }
 0x32e   : > { %3438 = vmatmul.bf16.gmra.mxu1 %v9118_v12 }
 0x330   : > { %9141 = vmatmul.msk.bf16.gmra.mxu2 %vm3342_vm7, %v3118_v51 }
 0x335   : > { %3395 = vmatmul.bf16.gmra.mxu0 %v9114_v40 }
 0x33e   : > { %3443 = vmatmul.bf16.gmra.mxu1 %v9130_v49 }
 0x342   : > { %v3462_v30 = vpop.f32.mrf.mxu2 }
 0x345   : > { %3400 = vmatmul.bf16.gmra.mxu0 %v9126_v1 }
 0x34a   : > { %v3464_v6 = vpop.f32.mrf.mxu2 }
 0x34e   : > { %3448 = vmatmul.bf16.gmra.mxu1 %v3117_v24 }
 0x355   : > { %3405 = vmatmul.bf16.gmra.mxu0 %v3116_v50 }
 0x363   : > { %v3467_v3 = vpop.f32.mrf.mxu2 }
 0x36b   : > { %v3419_v32 = vpop.f32.mrf.mxu1  ;;  %v3469_v63 = vpop.f32.mrf.mxu2 }
 0x372   : > { %v3376_v4 = vpop.f32.mrf.mxu0 }
 0x373   : > { %v3421_v17 = vpop.f32.mrf.mxu1  ;;  %v15462_v23 = vpop.f32.mrf.mxu2  ;;  %v3420_v8 = vadd.f32 %v3419_v32, %v3376_v4 }
 0x375   : > { %v3463_v27 = vadd.f32 %v3462_v30, %v3420_v8 }
 0x377   : > { %v3918_v35 = vpack.c.bf16 %v3463_v27, %v17201_v45 }
 0x379   : > { %v3935_v40 = vshrl.u32 %v3918_v35, 16  ;;  %v3938_v43 = vshll.u32 %v3918_v35, 16 }
 0x37a   : > { %v3378_v34 = vpop.f32.mrf.mxu0 }
 0x37b   : > { %v3422_v11 = vadd.f32 %v3421_v17, %v3378_v34  ;;  %v3424_v44 = vpop.f32.mrf.mxu1  ;;  %v15464_v29 = vpop.f32.mrf.mxu2  ;;  %v3937_v1 = vrot.slane %v3935_v40, 3  ;;  %v3940_v15 = vrot.slane %v3938_v43, 4 }
 0x37d   : > { %v3465_v9 = vadd.f32 %v3464_v6, %v3422_v11  ;;  %v3941_v7 = vor.u32 %v3940_v15, %v3937_v1 }
 0x37f   : > { %v3497_v58 = vpack.c.bf16 %v3465_v9, %v3463_v27 }
 0x381   : > { %v15471_v13 = vshrl.u32 %v3497_v58, 16  ;;  %v15473_v37 = vshll.u32 %v3497_v58, 16  ;;  %9250 = vmatmul.msk.bf16.vlgmr.msrb.gmra.mxu1 %vm3565_vm8, %v3497_v58  ;;  %v3529_v53 = vrot.slane %v3497_v58, 3 }
 0x382   : > { %v3381_v62 = vpop.f32.mrf.mxu0 }
 0x383   : > { %v3425_v28 = vadd.f32 %v3424_v44, %v3381_v62  ;;  %v3530_v16 = vsel %vm1745_vm2, %v3528_v0, %v3529_v53  ;;  %v3426_v5 = vpop.f32.mrf.mxu1  ;;  %v3793_v55 = vrot.slane %v15471_v13, 3  ;;  %v3794_v12 = vrot.slane %v15473_v37, 4  ;;  %v15482_v51 = vpop.f32.mrf.mxu2 }
 0x384   : > { %9158 = vmatmul.msk.bf16.vlgmr.msra.gmra.mxu3 %vm3565_vm8, %v3530_v16 }
 0x385   : > { %v3468_v59 = vadd.f32 %v3467_v3, %v3425_v28  ;;  %v3795_v60 = vor.u32 %v3794_v12, %v3793_v55 }
 0x387   : > { %v15484_v22 = vpack.c.bf16 %v3468_v59, %v3465_v9  ;;  %v3796_v49 = vsel %vm3789_vm9, %v3792_v33, %v3795_v60 }
 0x388   : > { %9204 = vmatmul.msk.bf16.vlgmr.msrb.gmra.mxu2 %vm3565_vm8, %v3796_v49 }
 0x389   : > { %v15489_v61 = vshrl.u32 %v15484_v22, 16  ;;  %v15492_v48 = vshll.u32 %v15484_v22, 16 }
 0x38a   : > { %v3383_v41 = vpop.f32.mrf.mxu0 }
 0x38b   : > { %v3427_v24 = vadd.f32 %v3426_v5, %v3383_v41  ;;  %v3429_v31 = vpop.f32.mrf.mxu1  ;;  %v3945_v50 = vrot.slane %v15489_v61, 3  ;;  %v3948_v30 = vrot.slane %v15492_v48, 4  ;;  %v15496_v14 = vpop.f32.mrf.mxu2  ;;  %v3641_v41 = vrot.slane %v15471_v13, 2 }
 0x38d   : > { %v3470_v6 = vadd.f32 %v3469_v63, %v3427_v24  ;;  %v3949_v26 = vor.u32 %v3948_v30, %v3945_v50  ;;  %v3644_v24 = vrot.slane %v15473_v37, 3 }
 0x38f   : > { %v3498_v42 = vpack.c.bf16 %v3470_v6, %v3468_v59  ;;  %v3950_v18 = vsel %vm3789_vm9, %v3941_v7, %v3949_v26 }
 0x390   : > { %9227 = vmatmul.msk.bf16.vlgmr.msrb.gmra.mxu0 %vm3565_vm8, %v3950_v18 }
 0x391   : > { %9251 = vmatmul.msk.bf16.gmra.mxu1 %vm3565_vm8, %v3498_v42  ;;  %v3531_v2 = vrot.slane %v3498_v42, 3  ;;  %v15501_v25 = vshrl.u32 %v3498_v42, 16  ;;  %v15503_v52 = vshll.u32 %v3498_v42, 16 }
 0x392   : > { %v3386_v20 = vpop.f32.mrf.mxu0 }
 0x393   : > { %v3430_v19 = vadd.f32 %v3429_v31, %v3386_v20  ;;  %v3532_v3 = vsel %vm1745_vm2, %v3529_v53, %v3531_v2  ;;  %v3431_v39 = vpop.f32.mrf.mxu1  ;;  %v3797_v56 = vrot.slane %v15501_v25, 3  ;;  %v3798_v32 = vrot.slane %v15503_v52, 4  ;;  %v15509_v10 = vpop.f32.mrf.mxu2 }
 0x394   : > { %9159 = vmatmul.msk.bf16.gmra.mxu3 %vm3565_vm8, %v3532_v3  ;;  %v4609_v3 = vrot.slane %v15489_v61, 1 }
 0x395   : > { %v3473_v57 = vadd.f32 %v15462_v23, %v3430_v19  ;;  %v3799_v63 = vor.u32 %v3798_v32, %v3797_v56 }
 0x397   : > { %v15512_v38 = vpack.c.bf16 %v3473_v57, %v3470_v6  ;;  %v3800_v47 = vsel %vm3789_vm9, %v3795_v60, %v3799_v63 }
 0x398   : > { %9205 = vmatmul.msk.bf16.gmra.mxu2 %vm3565_vm8, %v3800_v47 }
 0x399   : > { %v15517_v4 = vshrl.u32 %v15512_v38, 16  ;;  %v15520_v17 = vshll.u32 %v15512_v38, 16 }
 0x39a   : > { %v3388_v8 = vpop.f32.mrf.mxu0 }
 0x39b   : > { %v3432_v34 = vadd.f32 %v3431_v39, %v3388_v8  ;;  %v3434_v11 = vpop.f32.mrf.mxu1  ;;  %v3954_v44 = vrot.slane %v15517_v4, 3  ;;  %v3957_v23 = vrot.slane %v15520_v17, 4  ;;  %v15524_v27 = vpop.f32.mrf.mxu2  ;;  %v4610_v39 = vrot.slane %v15492_v48, 2 }
 0x39d   : > { %v3475_v9 = vadd.f32 %v15464_v29, %v3432_v34  ;;  %v3958_v46 = vor.u32 %v3957_v23, %v3954_v44 }
 0x39f   : > { %v3499_v58 = vpack.c.bf16 %v3475_v9, %v3473_v57  ;;  %v3959_v0 = vsel %vm3789_vm9, %v3949_v26, %v3958_v46  ;;  %v15558_v26 = vor.u32 %v3644_v24, %v3641_v41 }
 0x3a0   : > { %9228 = vmatmul.msk.bf16.gmra.mxu0 %vm3565_vm8, %v3959_v0 }
 0x3a1   : > { %9252 = vmatmul.msk.bf16.gmra.mxu1 %vm3565_vm8, %v3499_v58  ;;  %v3533_v53 = vrot.slane %v3499_v58, 3  ;;  %v15530_v35 = vshrl.u32 %v3499_v58, 16  ;;  %v15532_v62 = vshll.u32 %v3499_v58, 16 }
 0x3a2   : > { %v3391_v33 = vpop.f32.mrf.mxu0 }
 0x3a3   : > { %v3435_v28 = vadd.f32 %v3434_v11, %v3391_v33  ;;  %v3534_v16 = vsel %vm1745_vm2, %v3531_v2, %v3533_v53  ;;  %v3436_v5 = vpop.f32.mrf.mxu1  ;;  %v3801_v29 = vrot.slane %v15530_v35, 3  ;;  %v3802_v55 = vrot.slane %v15532_v62, 4  ;;  %v15538_v12 = vpop.f32.mrf.mxu2 }
 0x3a4   : > { %9160 = vmatmul.msk.bf16.gmra.mxu3 %vm3565_vm8, %v3534_v16  ;;  %v4611_v11 = vor.u32 %v4610_v39, %v4609_v3 }
 0x3a5   : > { %v3478_v59 = vadd.f32 %v15482_v51, %v3435_v28  ;;  %v3803_v60 = vor.u32 %v3802_v55, %v3801_v29  ;;  %v4213_v51 = vrot.slane %v15473_v37, 1  ;;  %v4348_v37 = vrot.slane %v15492_v48, 1 }
 0x3a6   : > { %v3650_v28 = vrot.slane %v15501_v25, 2 }
 0x3a7   : > { %v15541_v40 = vpack.c.bf16 %v3478_v59, %v3475_v9  ;;  %v3804_v43 = vsel %vm3789_vm9, %v3799_v63, %v3803_v60  ;;  %v4214_v42 = vor.u32 %v4213_v51, %v15471_v13  ;;  %v4349_v44 = vor.u32 %v4348_v37, %v15489_v61 }
 0x3a8   : > { %9206 = vmatmul.msk.bf16.gmra.mxu2 %vm3565_vm8, %v3804_v43  ;;  %v3653_v61 = vrot.slane %v15503_v52, 3 }
 0x3a9   : > { %v15546_v49 = vshrl.u32 %v15541_v40, 16  ;;  %v15549_v1 = vshll.u32 %v15541_v40, 16 }
 0x3aa   : > { %v3393_v15 = vpop.f32.mrf.mxu0  ;;  %v15601_v43 = vor.u32 %v3653_v61, %v3650_v28  ;;  %v11154_v61 = vld [vmem:[#allocation6 + $0x108] sm:$0xff] }
 0x3ab   : > { %v3437_v31 = vadd.f32 %v3436_v5, %v3393_v15  ;;  %v3439_v50 = vpop.f32.mrf.mxu1  ;;  %v3963_v30 = vrot.slane %v15546_v49, 3  ;;  %v3966_v6 = vrot.slane %v15549_v1, 4  ;;  %v15556_v7 = vpop.f32.mrf.mxu2 }
 0x3ad   : > { %v3480_v18 = vadd.f32 %v15496_v14, %v3437_v31  ;;  %v3967_v2 = vor.u32 %v3966_v6, %v3963_v30  ;;  %v15614_v31 = vsel %vm3133_vm6, %v15558_v26, %v15601_v43  ;;  %v4485_v6 = vrot.slane %v15484_v22, 1 }
 0x3ae   : > { %v4350_v22 = vrot.slane %v15520_v17, 1 }
 0x3af   : > { %v15562_v20 = vpack.c.bf16 %v3480_v18, %v3478_v59  ;;  %v3968_v19 = vsel %vm3789_vm9, %v3958_v46, %v3967_v2  ;;  %v11124_v59 = vld [vmem:[#allocation6 + $0x18] sm:$0xff] }
 0x3b0   : > { %9229 = vmatmul.msk.bf16.gmra.mxu0 %vm3565_vm8, %v3968_v19  ;;  %3741 = vmatpush.bf16.msrb.mxu3 %v11124_v59 }
 0x3b1   : > { %9253 = vmatmul.msk.bf16.gmra.mxu1 %vm3565_vm8, %v15562_v20  ;;  %v3535_v13 = vrot.slane %v15562_v20, 3  ;;  %v15573_v14 = vshrl.u32 %v15562_v20, 16  ;;  %v15576_v56 = vshll.u32 %v15562_v20, 16 }
 0x3b2   : > { %v3396_v32 = vpop.f32.mrf.mxu0 }
 0x3b3   : > { %v3440_v57 = vadd.f32 %v3439_v50, %v3396_v32  ;;  %v3536_v63 = vsel %vm1745_vm2, %v3533_v53, %v3535_v13  ;;  %v3441_v47 = vpop.f32.mrf.mxu1  ;;  %v3805_v48 = vrot.slane %v15573_v14, 3  ;;  %v3806_v8 = vrot.slane %v15576_v56, 4  ;;  %v15582_v34 = vpop.f32.mrf.mxu2 }
 0x3b4   : > { %9161 = vmatmul.msk.bf16.gmra.mxu3 %vm3565_vm8, %v3536_v63 }
 0x3b5   : > { %v3483_v23 = vadd.f32 %v15509_v10, %v3440_v57  ;;  %v3807_v9 = vor.u32 %v3806_v8, %v3805_v48  ;;  %v4215_v10 = vrot.slane %v15503_v52, 1  ;;  %v4486_v52 = vrot.slane %v15512_v38, 1  ;;  %v11151_v38 = vld [vmem:[#allocation6 + $0xf0] sm:$0xff] }
 0x3b6   : > { %v15648_v48 = vsel %vm4212_vm10, %v4349_v44, %v4350_v22  ;;  %v15651_v8 = vor.u32 %v4350_v22, %v15517_v4  ;;  %v11123_v44 = vld [vmem:[#allocation6 + $0x10] sm:$0xff] }
 0x3b7   : > { %v15586_v46 = vpack.c.bf16 %v3483_v23, %v3480_v18  ;;  %v3808_v58 = vsel %vm3789_vm9, %v3803_v60, %v3807_v9  ;;  %v15604_v15 = vsel %vm4212_vm10, %v4214_v42, %v4215_v10  ;;  %v4217_v41 = vor.u32 %v4215_v10, %v15501_v25  ;;  %3742 = vmatpush.bf16.msrb.mxu3 %v11123_v44 }
 0x3b8   : > { %9207 = vmatmul.msk.bf16.gmra.mxu2 %vm3565_vm8, %v3808_v58  ;;  %v4612_v25 = vrot.slane %v15517_v4, 1  ;;  %v15637_v37 = vsel %vm1003_vm0, %v4485_v6, %v4486_v52  ;;  %v11148_v4 = vld [vmem:[#allocation6 + $0xd8] sm:$0xff]  ;;  %v11153_v6 = vld [vmem:[#allocation6 + $0x100] sm:$0xff] }
 0x3b9   : > { %v15591_v0 = vshrl.u32 %v15586_v46, 16  ;;  %v15594_v53 = vshll.u32 %v15586_v46, 16  ;;  %4417 = vmatpush.bf16.msra.mxu2 %v11148_v4 }
 0x3ba   : > { %v3398_v33 = vpop.f32.mrf.mxu0 }
 0x3bb   : > { %v3442_v16 = vadd.f32 %v3441_v47, %v3398_v33  ;;  %v3444_v5 = vpop.f32.mrf.mxu1  ;;  %v3972_v29 = vrot.slane %v15591_v0, 3  ;;  %v3975_v55 = vrot.slane %v15594_v53, 4  ;;  %v3494_v60 = vpop.f32.mrf.mxu2  ;;  %v11155_v47 = vld [vmem:[#allocation6 + $0x110] sm:$0xff] }
 0x3bd   : > { %v3485_v24 = vadd.f32 %v15524_v27, %v3442_v16  ;;  %v15608_v51 = vor.u32 %v3975_v55, %v3972_v29  ;;  %v4613_v27 = vrot.slane %v15520_v17, 2  ;;  %v3659_v29 = vrot.slane %v15530_v35, 2 }
 0x3be   : > { %v4218_v55 = vrot.slane %v15532_v62, 1 }
 0x3bf   : > { %v15616_v50 = vpack.c.bf16 %v3485_v24, %v3483_v23  ;;  %v3977_v30 = vsel %vm3789_vm9, %v3967_v2, %v15608_v51  ;;  %v11156_v2 = vld [vmem:[#allocation6 + $0x118] sm:$0xff]  ;;  %v15645_v17 = vor.u32 %v4613_v27, %v4612_v25 }
 0x3c0   : > { %9230 = vmatmul.msk.bf16.gmra.mxu0 %vm3565_vm8, %v3977_v30  ;;  %4685 = vmatpush.bf16.msra.mxu1 %v11156_v2  ;;  %v15679_v27 = vsel %vm4212_vm10, %v4217_v41, %v4218_v55  ;;  %v4220_v2 = vor.u32 %v4218_v55, %v15530_v35  ;;  %v4488_v41 = vrot.slane %v15541_v40, 1  ;;  %v4617_v40 = vrot.slane %v15549_v1, 2 }
 0x3c1   : > { %9254 = vmatmul.msk.bf16.gmra.mxu1 %vm3565_vm8, %v15616_v50  ;;  %v3537_v42 = vrot.slane %v15616_v50, 3  ;;  %v15628_v18 = vshrl.u32 %v15616_v50, 16  ;;  %v15631_v20 = vshll.u32 %v15616_v50, 16  ;;  %v15658_v58 = vsel %vm4608_vm11, %v4611_v11, %v15645_v17  ;;  %v11122_v11 = vld [vmem:[#allocation6 + $0x8] sm:$0xff] }
 0x3c2   : > { %v3401_v19 = vpop.f32.mrf.mxu0  ;;  %3743 = vmatpush.bf16.msrb.mxu3 %v11122_v11 }
 0x3c3   : > { %v3445_v3 = vadd.f32 %v3444_v5, %v3401_v19  ;;  %v3538_v39 = vsel %vm1745_vm2, %v3535_v13, %v3537_v42  ;;  %v3446_v32 = vpop.f32.mrf.mxu1  ;;  %v3809_v57 = vrot.slane %v15628_v18, 3  ;;  %v3810_v63 = vrot.slane %v15631_v20, 4  ;;  %v11147_v5 = vld [vmem:[#allocation6 + $0xd0] sm:$0xff] }
 0x3c4   : > { %9162 = vmatmul.msk.bf16.gmra.mxu3 %vm3565_vm8, %v3538_v39  ;;  %4686 = vmatpush.bf16.msra.mxu1 %v11155_v47  ;;  %v4616_v47 = vrot.slane %v15546_v49, 1 }
 0x3c5   : > { %v3488_v23 = vadd.f32 %v15538_v12, %v3445_v3  ;;  %v15654_v13 = vor.u32 %v3810_v63, %v3809_v57  ;;  %4418 = vmatpush.bf16.msra.mxu2 %v11147_v5  ;;  %v11146_v57 = vld [vmem:[#allocation6 + $0xc8] sm:$0xff]  ;;  %v11152_v63 = vld [vmem:[#allocation6 + $0xf8] sm:$0xff] }
 0x3c6   : > { %4547 = vmatpush.bf16.msra.mxu0 %v11152_v63  ;;  %v4618_v5 = vor.u32 %v4617_v40, %v4616_v47  ;;  %v4490_v47 = vrot.slane %v15586_v46, 1  ;;  %v4356_v40 = vrot.slane %v15594_v53, 1 }
 0x3c7   : > { %v15660_v33 = vpack.c.bf16 %v3488_v23, %v3485_v24  ;;  %v3812_v28 = vsel %vm3789_vm9, %v3807_v9, %v15654_v13  ;;  %v3662_v9 = vrot.slane %v15532_v62, 3 }
 0x3c8   : > { %9208 = vmatmul.msk.bf16.gmra.mxu2 %vm3565_vm8, %v3812_v28  ;;  %4687 = vmatpush.bf16.msra.mxu1 %v11154_v61  ;;  %v15709_v28 = vsel %vm1003_vm0, %v4486_v52, %v4488_v41  ;;  %v4358_v46 = vor.u32 %v4356_v40, %v15591_v0 }
 0x3c9   : > { %v15666_v12 = vshrl.u32 %v15660_v33, 16  ;;  %v15669_v10 = vshll.u32 %v15660_v33, 16  ;;  %v15676_v25 = vor.u32 %v3662_v9, %v3659_v29  ;;  %4419 = vmatpush.bf16.msra.mxu2 %v11146_v57  ;;  %v15727_v9 = vsel %vm4608_vm11, %v15645_v17, %v4618_v5 }
 0x3ca   : > { %v3403_v16 = vpop.f32.mrf.mxu0  ;;  %4548 = vmatpush.bf16.msra.mxu0 %v11151_v38  ;;  %v3668_v17 = vrot.slane %v15573_v14, 2  ;;  %v4492_v38 = vrot.slane %v15660_v33, 1 }
 0x3cb   : > { %v3447_v59 = vadd.f32 %v3446_v32, %v3403_v16  ;;  %v3981_v60 = vrot.slane %v15666_v12, 3  ;;  %v3984_v24 = vrot.slane %v15669_v10, 4  ;;  %v3449_v30 = vpop.f32.mrf.mxu1  ;;  %v15686_v62 = vsel %vm3133_vm6, %v15601_v43, %v15676_v25  ;;  %v11121_v32 = vld [vmem:[#allocation6] sm:$0xff] }
 0x3cc   : > { %4688 = vmatpush.bf16.msra.mxu1 %v11153_v6  ;;  %3744 = vmatpush.bf16.msrb.mxu3 %v11121_v32 }
 0x3cd   : > { %v3490_v19 = vadd.f32 %v15556_v7, %v3447_v59  ;;  %v3985_v22 = vor.u32 %v3984_v24, %v3981_v60  ;;  %v3671_v24 = vrot.slane %v15576_v56, 3 }
 0x3cf   : > { %v15688_v3 = vpack.c.bf16 %v3490_v19, %v3488_v23  ;;  %v3986_v39 = vsel %vm3789_vm9, %v15608_v51, %v3985_v22  ;;  %v4353_v23 = vrot.slane %v15549_v1, 1  ;;  %v11145_v1 = vld [vmem:[#allocation6 + $0xc0] sm:$0xff] }
 0x3d0   : > { %9231 = vmatmul.msk.bf16.gmra.mxu0 %vm3565_vm8, %v3986_v39  ;;  %4420 = vmatpush.bf16.msra.mxu2 %v11145_v1 }
 0x3d1   : > { %v15694_v35 = vshrl.u32 %v15688_v3, 16  ;;  %v15697_v7 = vshll.u32 %v15688_v3, 16  ;;  %9255 = vmatmul.msk.bf16.gmra.mxu1 %vm3565_vm8, %v15688_v3  ;;  %v3539_v43 = vrot.slane %v15688_v3, 3  ;;  %v15719_v52 = vsel %vm4212_vm10, %v15651_v8, %v4353_v23  ;;  %v11150_v8 = vld [vmem:[#allocation6 + $0xe8] sm:$0xff] }
 0x3d2   : > { %v3406_v51 = vpop.f32.mrf.mxu0  ;;  %v4355_v50 = vor.u32 %v4353_v23, %v15546_v49  ;;  %4549 = vmatpush.bf16.msra.mxu0 %v11150_v8  ;;  %v3672_v3 = vor.u32 %v3671_v24, %v3668_v17  ;;  %v15764_v23 = vsel %vm1003_vm0, %v4488_v41, %v4490_v47  ;;  %v15777_v41 = vrot.slane %v18089_v21, 2 }
 0x3d3   : > { %v3450_v44 = vadd.f32 %v3449_v30, %v3406_v51  ;;  %v3540_v4 = vsel %vm1745_vm2, %v3537_v42, %v3539_v43  ;;  %v3813_v61 = vrot.slane %v15694_v35, 3  ;;  %v3814_v16 = vrot.slane %v15697_v7, 4  ;;  %v3451_v11 = vpop.f32.mrf.mxu1 }
 0x3d4   : > { %9163 = vmatmul.msk.bf16.gmra.mxu3 %vm3565_vm8, %v3540_v4  ;;  %v4221_v30 = vrot.slane %v15576_v56, 1  ;;  %v15754_v51 = vsel %vm3133_vm6, %v15676_v25, %v3672_v3  ;;  %v3677_v4 = vrot.slane %v15628_v18, 2  ;;  %v15788_v1 = vor.u32 %v15467_v54, %v15777_v41 }
 0x3d5   : > { %v15723_v42 = vadd.f32 %v15582_v34, %v3450_v44  ;;  %v3815_v29 = vor.u32 %v3814_v16, %v3813_v61  ;;  %v3680_v61 = vrot.slane %v15631_v20, 3 }
 0x3d6   : > { %v15747_v39 = vsel %vm4212_vm10, %v4220_v2, %v4221_v30  ;;  %v4223_v32 = vor.u32 %v4221_v30, %v15573_v14  ;;  %v4620_v2 = vrot.slane %v15591_v0, 1  ;;  %v4621_v14 = vrot.slane %v15594_v53, 2  ;;  %18090 = vst [vmem:[#allocation167_spill] sm:$0xff] %v15788_v1 }
 0x3d7   : > { %v15730_v55 = vpack.c.bf16 %v15723_v42, %v3490_v19  ;;  %v3816_v59 = vsel %vm3789_vm9, %v15654_v13, %v3815_v29  ;;  %v11149_v19 = vld [vmem:[#allocation6 + $0xe0] sm:$0xff]  ;;  %v4097_v57 = vpack.c.bf16 %v15723_v42, %v15723_v42  ;;  %v4224_v53 = vrot.slane %v15631_v20, 1 }
 0x3d8   : > { %9209 = vmatmul.msk.bf16.gmra.mxu2 %vm3565_vm8, %v3816_v59  ;;  %4550 = vmatpush.bf16.msra.mxu0 %v11149_v19  ;;  %v4622_v25 = vor.u32 %v4621_v14, %v4620_v2  ;;  %v4624_v20 = vrot.slane %v15666_v12, 1  ;;  %v3646_v54 = vsel %vm3133_vm6, %v15788_v1, %v15558_v26  ;;  %v17204_v8 = vpack.c.bf16 0.0, %v15723_v42 }
 0x3d9   : > { %v15736_v49 = vshrl.u32 %v15730_v55, 16  ;;  %v15739_v34 = vshll.u32 %v15730_v55, 16  ;;  %v15780_v16 = vsel %vm4212_vm10, %v4223_v32, %v4224_v53  ;;  %v4226_v11 = vor.u32 %v4224_v53, %v15628_v18 }
 0x3da   : > { %v3408_v60 = vpop.f32.mrf.mxu0  ;;  %v4623_v44 = vsel %vm4608_vm11, %v4618_v5, %v4622_v25  ;;  %v4625_v5 = vrot.slane %v15669_v10, 2  ;;  %v4359_v18 = vrot.slane %v15669_v10, 1  ;;  %v3686_v10 = vrot.slane %v15694_v35, 2 }
 0x3db   : > { %v3990_v13 = vrot.slane %v15736_v49, 3  ;;  %v3993_v6 = vrot.slane %v15739_v34, 4  ;;  %v3689_v60 = vrot.slane %v15697_v7, 3  ;;  %v4227_v26 = vrot.slane %v15697_v7, 1 }
 0x3dc   : > { %v4626_v33 = vor.u32 %v4625_v5, %v4624_v20  ;;  %v15815_v17 = vshll.u32 %v17204_v8, 16  ;;  %v4494_v7 = vrot.slane %v15730_v55, 1  ;;  %v4628_v19 = vrot.slane %v15736_v49, 1  ;;  %v11144_v20 = vld [vmem:[#allocation6 + $0xb8] sm:$0xff] }
 0x3dd   : > { %v3994_v63 = vor.u32 %v3993_v6, %v3990_v13  ;;  %v15817_v24 = vor.u32 %v3689_v60, %v3686_v10  ;;  %v4229_v30 = vor.u32 %v4227_v26, %v15694_v35  ;;  %v4629_v35 = vrot.slane %v15739_v34, 2  ;;  %4287 = vmatpush.bf16.msra.mxu3 %v11144_v20  ;;  %v11142_v60 = vld [vmem:[#allocation6 + $0xa8] sm:$0xff] }
 0x3de   : > { %v4627_v59 = vsel %vm4608_vm11, %v4622_v25, %v4626_v33  ;;  %v17203_v6 = vrot.slane %v15815_v17, 1  ;;  %v4495_v32 = vsel %vm1003_vm0, %v4492_v38, %v4494_v7 }
 0x3df   : > { %v3995_v56 = vsel %vm3789_vm9, %v3985_v22, %v3994_v63  ;;  %v15768_v22 = vsel %vm4212_vm10, %v4355_v50, %v4356_v40  ;;  %v15798_v50 = vsel %vm1003_vm0, %v4490_v47, %v4492_v38 }
 0x3e0   : > { %9232 = vmatmul.msk.bf16.gmra.mxu0 %vm3565_vm8, %v3995_v56 }
 0x3e1   : > { %9256 = vmatmul.msk.bf16.gmra.mxu1 %vm3565_vm8, %v4097_v57  ;;  %v4630_v57 = vor.u32 %v4629_v35, %v4628_v19 }
 0x3e4   : > { %9164 = vmatmul.msk.bf16.gmra.mxu3 %vm3565_vm8, %v3539_v43  ;;  %v3681_v43 = vor.u32 %v3680_v61, %v3677_v4 }
 0x3e6   : > { %v15784_v0 = vsel %vm3133_vm6, %v3672_v3, %v3681_v43  ;;  %v4362_v3 = vrot.slane %v15739_v34, 1  ;;  %v4631_v34 = vsel %vm4608_vm11, %v4626_v33, %v4630_v57 }
 0x3e8   : > { %9210 = vmatmul.msk.bf16.gmra.mxu2 %vm3565_vm8, %v3815_v29  ;;  %v4360_v29 = vsel %vm4212_vm10, %v4358_v46, %v4359_v18 }
 0x3f0   : > { %9233 = vmatmul.msk.bf16.gmra.mxu0 %vm3565_vm8, %v3994_v63 }
 0x3f1   : > { %9342 = vmatmul.msk.bf16.vlgmr.msra.gmra.mxu1 %vm3565_vm8, %v15658_v58  ;;  %v4361_v58 = vor.u32 %v4359_v18, %v15666_v12  ;;  %v15820_v12 = vsel %vm4212_vm10, %v4226_v11, %v4227_v26 }
 0x3f3   : > { %v4363_v63 = vsel %vm4212_vm10, %v4361_v58, %v4362_v3  ;;  %v15927_v58 = vrot.slane %v18089_v21, 1  ;;  %v11141_v21 = vld [vmem:[#allocation6 + $0xa0] sm:$0xff] }
 0x3f4   : > { %9181 = vmatmul.msk.bf16.vlgmr.msrb.gmra.mxu3 %vm3565_vm8, %v3646_v54 }
 0x3f5   : > { %18098 = vst [vmem:[#allocation50_spill] sm:$0xff] %v15927_v58 }
 0x3f8   : > { %9296 = vmatmul.msk.bf16.vlgmr.msra.gmra.mxu2 %vm3565_vm8, %v15648_v48  ;;  %v15827_v48 = vsel %vm3133_vm6, %v3681_v43, %v15817_v24 }
 0x3fe   : > { %v15823_v13 = vpop.f32.mrf.mxu1 }
 0x400   : > { %9319 = vmatmul.msk.bf16.vlgmr.msra.gmra.mxu0 %vm3565_vm8, %v15637_v37  ;;  %v15845_v37 = vor.u32 %v4362_v3, %v15736_v49 }
 0x401   : > { %9343 = vmatmul.msk.bf16.gmra.mxu1 %vm3565_vm8, %v15727_v9  ;;  %v15850_v9 = vsel %vm4212_vm10, %v4229_v30, %v17203_v6 }
 0x404   : > { %9182 = vmatmul.msk.bf16.gmra.mxu3 %vm3565_vm8, %v15614_v31 }
 0x406   : > { %v15852_v56 = vpop.f32.mrf.mxu1 }
 0x407   : > { %v15855_v47 = vpop.f32.mrf.mxu3 }
 0x408   : > { %9297 = vmatmul.msk.bf16.gmra.mxu2 %vm3565_vm8, %v15719_v52 }
 0x40b   : > { %v15859_v31 = vpop.f32.mrf.mxu2 }
 0x40d   : > { %v15861_v2 = vpop.f32.mrf.mxu0 }
 0x40e   : > { %v15863_v49 = vpop.f32.mrf.mxu1 }
 0x40f   : > { %v15865_v14 = vpop.f32.mrf.mxu3 }
 0x410   : > { %9320 = vmatmul.msk.bf16.gmra.mxu0 %vm3565_vm8, %v15709_v28 }
 0x411   : > { %9344 = vmatmul.msk.bf16.gmra.mxu1 %vm3565_vm8, %v4623_v44 }
 0x413   : > { %v15870_v40 = vpop.f32.mrf.mxu2 }
 0x414   : > { %9183 = vmatmul.msk.bf16.gmra.mxu3 %vm3565_vm8, %v15686_v62 }
 0x415   : > { %v15874_v25 = vpop.f32.mrf.mxu0 }
 0x416   : > { %v15876_v52 = vpop.f32.mrf.mxu1 }
 0x417   : > { %v15878_v46 = vpop.f32.mrf.mxu3 }
 0x418   : > { %9298 = vmatmul.msk.bf16.gmra.mxu2 %vm3565_vm8, %v15768_v22 }
 0x41b   : > { %v15882_v4 = vpop.f32.mrf.mxu2 }
 0x41d   : > { %v15884_v61 = vpop.f32.mrf.mxu0 }
 0x41e   : > { %v15886_v28 = vpop.f32.mrf.mxu1 }
 0x41f   : > { %v15888_v44 = vpop.f32.mrf.mxu3 }
 0x420   : > { %9321 = vmatmul.msk.bf16.gmra.mxu0 %vm3565_vm8, %v15764_v23 }
 0x421   : > { %9345 = vmatmul.msk.bf16.gmra.mxu1 %vm3565_vm8, %v4627_v59  ;;  %v15933_v59 = vor.u32 %v15927_v58, %v15777_v41 }
 0x423   : > { %v15893_v62 = vpop.f32.mrf.mxu2  ;;  %18100 = vst [vmem:[#allocation81_spill] sm:$0xff] %v15933_v59  ;;  %v4635_v30 = vsel %vm4608_vm11, %v4630_v57, %v15933_v59  ;;  %v4366_v57 = vsel %vm4212_vm10, %v15845_v37, %v15927_v58 }
 0x424   : > { %9184 = vmatmul.msk.bf16.gmra.mxu3 %vm3565_vm8, %v15754_v51 }
 0x425   : > { %v15897_v53 = vpop.f32.mrf.mxu0 }
 0x426   : > { %v15899_v22 = vpop.f32.mrf.mxu1 }
 0x427   : > { %18091 = vst [vmem:[#allocation159_spill] sm:$0xff] %v15899_v22  ;;  %v15901_v43 = vpop.f32.mrf.mxu3 }
 0x428   : > { %9299 = vmatmul.msk.bf16.gmra.mxu2 %vm3565_vm8, %v4360_v29  ;;  %v11143_v29 = vld [vmem:[#allocation6 + $0xb0] sm:$0xff] }
 0x429   : > { %4288 = vmatpush.bf16.msra.mxu3 %v11143_v29 }
 0x42b   : > { %v15904_v11 = vpop.f32.mrf.mxu2 }
 0x42d   : > { %v15906_v38 = vpop.f32.mrf.mxu0  ;;  %4289 = vmatpush.bf16.msra.mxu3 %v11142_v60 }
 0x42e   : > { %v15908_v23 = vpop.f32.mrf.mxu1 }
 0x42f   : > { %18092 = vst [vmem:[#allocation57_spill] sm:$0xff] %v15908_v23  ;;  %v15910_v5 = vpop.f32.mrf.mxu3 }
 0x430   : > { %18093 = vst [vmem:[#allocation112_spill] sm:$0xff] %v15910_v5  ;;  %9322 = vmatmul.msk.bf16.gmra.mxu0 %vm3565_vm8, %v15798_v50 }
 0x431   : > { %9346 = vmatmul.msk.bf16.gmra.mxu1 %vm3565_vm8, %v4631_v34  ;;  %4290 = vmatpush.bf16.msra.mxu3 %v11141_v21 }
 0x433   : > { %v15915_v51 = vpop.f32.mrf.mxu2 }
 0x434   : > { %18094 = vst [vmem:[#allocation58_spill] sm:$0xff] %v15915_v51  ;;  %9185 = vmatmul.msk.bf16.gmra.mxu3 %vm3565_vm8, %v15784_v0  ;;  %v18119_v51 = vrot.slane %v15815_v17, 1 }
 0x435   : > { %v15919_v18 = vpop.f32.mrf.mxu0 }
 0x436   : > { %18095 = vst [vmem:[#allocation114_spill] sm:$0xff] %v15919_v18  ;;  %v15921_v54 = vpop.f32.mrf.mxu1 }
 0x437   : > { %18096 = vst [vmem:[#allocation59_spill] sm:$0xff] %v15921_v54  ;;  %v15923_v33 = vpop.f32.mrf.mxu3 }
 0x438   : > { %18097 = vst [vmem:[#allocation115_spill] sm:$0xff] %v15923_v33  ;;  %9300 = vmatmul.msk.bf16.gmra.mxu2 %vm3565_vm8, %v4363_v63  ;;  %v4496_v63 = vrot.slane %v17200_v36, 1 }
 0x43a   : > { %v4497_v29 = vsel %vm1003_vm0, %v4494_v7, %v4496_v63 }
 0x43b   : > { %v15929_v50 = vpop.f32.mrf.mxu2 }
 0x43c   : > { %18099 = vst [vmem:[#allocation62_spill] sm:$0xff] %v15929_v50 }
 0x43d   : > { %v15935_v0 = vpop.f32.mrf.mxu0 }
 0x43e   : > { %18101 = vst [vmem:[#allocation34_spill] sm:$0xff] %v15935_v0  ;;  %v15937_v10 = vpop.f32.mrf.mxu1  ;;  %v18118_v0 = vpack.c.bf16 0.0, %v15723_v42 }
 0x43f   : > { %18102 = vst [vmem:[#allocation41_spill] sm:$0xff] %v15937_v10  ;;  %v15939_v26 = vpop.f32.mrf.mxu3 }
 0x440   : > { %9323 = vmatmul.msk.bf16.gmra.mxu0 %vm3565_vm8, %v4495_v32 }
 0x441   : > { %9347 = vmatmul.msk.bf16.gmra.mxu1 %vm3565_vm8, %v4635_v30 }
 0x443   : > { %v15945_v19 = vpop.f32.mrf.mxu2 }
 0x444   : > { %18103 = vst [vmem:[#allocation44_spill] sm:$0xff] %v15945_v19  ;;  %9186 = vmatmul.msk.bf16.gmra.mxu3 %vm3565_vm8, %v15827_v48 }
 0x445   : > { %v15949_v41 = vpop.f32.mrf.mxu0 }
 0x446   : > { %18104 = vst [vmem:[#allocation82_spill] sm:$0xff] %v15949_v41  ;;  %v15951_v35 = vpop.f32.mrf.mxu1 }
 0x447   : > { %18105 = vst [vmem:[#allocation35_spill] sm:$0xff] %v15951_v35  ;;  %v15953_v3 = vpop.f32.mrf.mxu3  ;;  %v4235_v35 = vshrl.u32 %v18118_v0, 16 }
 0x448   : > { %9301 = vmatmul.msk.bf16.gmra.mxu2 %vm3565_vm8, %v4366_v57 }
 0x44b   : > { %v15959_v32 = vpop.f32.mrf.mxu2 }
 0x44c   : > { %18106 = vst [vmem:[#allocation48_spill] sm:$0xff] %v15959_v32 }
 0x44d   : > { %v15962_v34 = vpop.f32.mrf.mxu0 }
 0x44e   : > { %18107 = vst [vmem:[#allocation78_spill] sm:$0xff] %v15962_v34  ;;  %v15964_v48 = vpop.f32.mrf.mxu1 }
 0x44f   : > { %18108 = vst [vmem:[#allocation42_spill] sm:$0xff] %v15964_v48  ;;  %v15966_v20 = vpop.f32.mrf.mxu3 }
 0x450   : > { %9324 = vmatmul.msk.bf16.gmra.mxu0 %vm3565_vm8, %v4497_v29 }
 0x451   : > { %9348 = vmatmul.msk.bf16.gmra.mxu1 %vm3565_vm8, %v15933_v59 }
 0x453   : > { %v15974_v37 = vpop.f32.mrf.mxu2 }
 0x454   : > { %9187 = vmatmul.msk.bf16.gmra.mxu3 %vm3565_vm8, %v15817_v24 }
 0x455   : > { %v15978_v60 = vpop.f32.mrf.mxu0 }
 0x456   : > { %18109 = vst [vmem:[#allocation96_spill] sm:$0xff] %v15978_v60  ;;  %v15980_v30 = vpop.f32.mrf.mxu1 }
 0x457   : > { %18110 = vst [vmem:[#allocation87_spill] sm:$0xff] %v15980_v30  ;;  %v15982_v21 = vpop.f32.mrf.mxu3 }
 0x458   : > { %9302 = vmatmul.msk.bf16.gmra.mxu2 %vm3565_vm8, %v15927_v58 }
 0x45b   : > { %v15986_v55 = vpop.f32.mrf.mxu2 }
 0x45d   : > { %v15988_v7 = vpop.f32.mrf.mxu0 }
 0x45e   : > { %18111 = vst [vmem:[#allocation43_spill] sm:$0xff] %v15988_v7  ;;  %v15990_v57 = vpop.f32.mrf.mxu1 }
 0x45f   : > { %18112 = vst [vmem:[#allocation79_spill] sm:$0xff] %v15990_v57  ;;  %v15992_v29 = vpop.f32.mrf.mxu3 }
 0x460   : > { %9325 = vmatmul.msk.bf16.gmra.mxu0 %vm3565_vm8, %v4496_v63 }
 0x463   : > { %v15995_v24 = vpop.f32.mrf.mxu2 }
 0x464   : > { %9273 = vmatmul.msk.bf16.vlgmr.msra.gmra.mxu3 %vm3565_vm8, %v15604_v15 }
 0x465   : > { %v15999_v36 = vpop.f32.mrf.mxu0 }
 0x466   : > { %18113 = vst [vmem:[#allocation100_spill] sm:$0xff] %v15999_v36  ;;  %v4187_v45 = vpop.f32.mrf.mxu1 }
 0x467   : > { %v16001_v6 = vpop.f32.mrf.mxu3 }
 0x46b   : > { %v16003_v8 = vpop.f32.mrf.mxu2 }
 0x46c   : > { %18114 = vst [vmem:[#allocation144_spill] sm:$0xff] %v16003_v8 }
 0x46d   : > { %v16005_v1 = vpop.f32.mrf.mxu0 }
 0x46e   : > { %18115 = vst [vmem:[#allocation45_spill] sm:$0xff] %v16005_v1  ;;  %v4237_v1 = vor.u32 %v4235_v35, %v18119_v51 }
 0x46f   : > { %v3628_v59 = vpop.f32.mrf.mxu3 }
 0x473   : > { %v3903_v58 = vpop.f32.mrf.mxu2 }
 0x474   : > { %9274 = vmatmul.msk.bf16.gmra.mxu3 %vm3565_vm8, %v15679_v27 }
 0x475   : > { %v4082_v63 = vpop.f32.mrf.mxu0 }
 0x477   : > { %v3746_v22 = vpop.f32.mrf.mxu3 }
 0x47b   : > { %v16023_v59 = vpop.f32.mrf.mxu2 }
 0x47d   : > { %v16025_v63 = vpop.f32.mrf.mxu0 }
 0x47f   : > { %v3748_v23 = vpop.f32.mrf.mxu3 }
 0x483   : > { %v16033_v57 = vpop.f32.mrf.mxu2 }
 0x484   : > { %9275 = vmatmul.msk.bf16.gmra.mxu3 %vm3565_vm8, %v15747_v39  ;;  %v16027_v39 = vpop.f32.mrf.mxu1 }
 0x485   : > { %v16035_v10 = vpop.f32.mrf.mxu0 }
 0x487   : > { %v3751_v15 = vpop.f32.mrf.mxu3 }
 0x48b   : > { %v16045_v48 = vpop.f32.mrf.mxu2 }
 0x48d   : > { %v16047_v34 = vpop.f32.mrf.mxu0 }
 0x48f   : > { %v16011_v54 = vpop.f32.mrf.mxu3 }
 0x493   : > { %v16054_v30 = vpop.f32.mrf.mxu2 }
 0x494   : > { %9276 = vmatmul.msk.bf16.gmra.mxu3 %vm3565_vm8, %v15780_v16 }
 0x495   : > { %v16056_v60 = vpop.f32.mrf.mxu0 }
 0x497   : > { %v3756_v45 = vpop.f32.mrf.mxu3 }
 0x49b   : > { %v16064_v51 = vpop.f32.mrf.mxu2 }
 0x49c   : > { %18120 = vst [vmem:[#allocation145_spill] sm:$0xff] %v16064_v51 }
 0x49d   : > { %v16066_v35 = vpop.f32.mrf.mxu0 }
 0x49e   : > { %18121 = vst [vmem:[#allocation85_spill] sm:$0xff] %v16066_v35  ;;  %v3752_v35 = vadd.f32 %v3751_v15, %v15878_v46  ;;  %v3757_v15 = vadd.f32 %v3756_v45, %v15901_v43 }
 0x49f   : > { %v16015_v18 = vpop.f32.mrf.mxu3 }
 0x4a0   : > { %18116 = vst [vmem:[#allocation80_spill] sm:$0xff] %v16015_v18 }
 0x4a3   : > { %v16072_v8 = vpop.f32.mrf.mxu2 }
 0x4a4   : > { %9277 = vmatmul.msk.bf16.gmra.mxu3 %vm3565_vm8, %v15820_v12  ;;  %v16037_v12 = vpop.f32.mrf.mxu1 }
 0x4a5   : > { %v16074_v7 = vpop.f32.mrf.mxu0 }
 0x4a7   : > { %v16019_v58 = vpop.f32.mrf.mxu3 }
 0x4a8   : > { %18117 = vst [vmem:[#allocation102_spill] sm:$0xff] %v16019_v58 }
 0x4af   : > { %v16021_v27 = vpop.f32.mrf.mxu3 }
 0x4b4   : > { %9278 = vmatmul.msk.bf16.gmra.mxu3 %vm3565_vm8, %v15850_v9  ;;  %v16050_v9 = vpop.f32.mrf.mxu1 }
 0x4b7   : > { %v16031_v16 = vpop.f32.mrf.mxu3 }
 0x4bc   : > { %v16058_v42 = vpop.f32.mrf.mxu1 }
 0x4bf   : > { %v16041_v41 = vpop.f32.mrf.mxu3 }
 0x4c4   : > { %9279 = vmatmul.msk.bf16.gmra.mxu3 %vm3565_vm8, %v4237_v1  ;;  %v16068_v19 = vpop.f32.mrf.mxu1  ;;  %v3747_v1 = vadd.f32 %v3746_v22, %v15855_v47  ;;  %v16083_v47 = vpop.f32.mrf.mxu0  ;;  %v3907_v22 = vadd.f32 %v15882_v4, %v3752_v35 }
 0x4c5   : > { %18122 = vst [vmem:[#allocation49_spill] sm:$0xff] %v16068_v19  ;;  %v16081_v19 = vpop.f32.mrf.mxu2 }
 0x4c6   : > { %v3905_v18 = vadd.f32 %v15859_v31, %v3747_v1  ;;  %v4086_v1 = vadd.f32 %v15884_v61, %v3907_v22  ;;  %v3749_v61 = vadd.f32 %v3748_v23, %v15865_v14 }
 0x4c7   : > { %v16052_v50 = vpop.f32.mrf.mxu3 }
 0x4c8   : > { %v4084_v32 = vadd.f32 %v15861_v2, %v3905_v18 }
 0x4ca   : > { %v4189_v33 = vadd.f32 %v15823_v13, %v4084_v32  ;;  %v4191_v13 = vadd.f32 %v15863_v49, %v4086_v1  ;;  %v3906_v49 = vadd.f32 %v15870_v40, %v3749_v61  ;;  %v3754_v40 = vadd.f32 %v16011_v54, %v15888_v44  ;;  %v16137_v54 = vld [vmem:[#allocation7] ss:$0 sm:$0xff] }
 0x4cc   : > { %v16077_v58 = vpop.f32.mrf.mxu1  ;;  %v16091_v18 = vpop.f32.mrf.mxu0  ;;  %v4085_v43 = vadd.f32 %v15874_v25, %v3906_v49  ;;  %v3908_v61 = vadd.f32 %v15893_v62, %v3754_v40 }
 0x4cd   : > { %18123 = vst [vmem:[#allocation103_spill] sm:$0xff] %v16077_v58  ;;  %v16089_v2 = vpop.f32.mrf.mxu2 }
 0x4ce   : > { %v4190_v14 = vadd.f32 %v15852_v56, %v4085_v43 }
 0x4cf   : > { %v16060_v0 = vpop.f32.mrf.mxu3 }
 0x4d4   : > { %v16085_v31 = vpop.f32.mrf.mxu1  ;;  %v16100_v4 = vpop.f32.mrf.mxu0 }
 0x4d5   : > { %18124 = vst [vmem:[#allocation149_spill] sm:$0xff] %v16085_v31  ;;  %v16098_v31 = vpop.f32.mrf.mxu2 }
 0x4d7   : > { %v16062_v17 = vpop.f32.mrf.mxu3 }
 0x4dc   : > { %v16113_v45 = vpop.f32.mrf.mxu0 }
 0x4df   : > { %v3778_v5 = vpop.f32.mrf.mxu3 }
 0x4e4   : > { %v16126_v25 = vpop.f32.mrf.mxu0 }
 0x4e7   : > { %v4292_v51 = vpop.f32.mrf.mxu3 }
 0x4e8   : > { %v4326_v36 = vadd.f32 %v4292_v51, %v4189_v33  ;;  %v16094_v33 = vpop.f32.mrf.mxu1  ;;  %v3909_v51 = vadd.f32 %v15904_v11, %v3757_v15  ;;  %v16111_v11 = vpop.f32.mrf.mxu2 }
 0x4e9   : > { %18125 = vst [vmem:[#allocation93_spill] sm:$0xff] %v16094_v33 }
 0x4ea   : > { %v4088_v22 = vadd.f32 %v15906_v38, %v3909_v51 }
 0x4ec   : > { %v4193_v1 = vadd.f32 %v15886_v28, %v4088_v22  ;;  %v4456_v28 = vadd.f32 %v16023_v59, %v4326_v36  ;;  %v4087_v36 = vadd.f32 %v15897_v53, %v3908_v61 }
 0x4ee   : > { %v4586_v56 = vadd.f32 %v16025_v63, %v4456_v28  ;;  %v4192_v59 = vadd.f32 %v15876_v52, %v4087_v36 }
 0x4ef   : > { %v4294_v5 = vpop.f32.mrf.mxu3 }
 0x4f0   : > { %v16103_v35 = vpop.f32.mrf.mxu1  ;;  %v4327_v23 = vadd.f32 %v4294_v5, %v4190_v14  ;;  %v16124_v51 = vpop.f32.mrf.mxu2  ;;  %v4724_v44 = vadd.f32 %v16027_v39, %v4586_v56 }
 0x4f2   : > { %v4457_v38 = vadd.f32 %v16033_v57, %v4327_v23  ;;  %v4741_v62 = vadd.f32 %v16137_v54, %v4724_v44 }
 0x4f4   : > { %v4587_v5 = vadd.f32 %v16035_v10, %v4457_v38  ;;  %v4754_v14 = vmax.f32 %v4741_v62, 0.0 }
 0x4f6   : > { %v4725_v57 = vadd.f32 %v16037_v12, %v4587_v5 }
 0x4f7   : > { %v4297_v46 = vpop.f32.mrf.mxu3 }
 0x4f8   : > { %v4328_v32 = vadd.f32 %v4297_v46, %v4191_v13  ;;  %v16115_v15 = vpop.f32.mrf.mxu1  ;;  %v4742_v39 = vadd.f32 %v16137_v54, %v4725_v57 }
 0x4fa   : > { %v4458_v53 = vadd.f32 %v16045_v48, %v4328_v32  ;;  %v4755_v23 = vmax.f32 %v4742_v39, 0.0 }
 0x4fc   : > { %v16151_v40 = vpack.c.bf16 %v4755_v23, %v4754_v14  ;;  %v4588_v52 = vadd.f32 %v16047_v34, %v4458_v53  ;;  %v3767_v14 = vadd.f32 %v16031_v16, %v15953_v3  ;;  %v18131_v3 = vld [vmem:[#allocation144_spill] sm:$0xff] }
 0x4fe   : > { %v4726_v5 = vadd.f32 %v16050_v9, %v4588_v52  ;;  %v3772_v9 = vadd.f32 %v16052_v50, %v15982_v21  ;;  %v18126_v50 = vld [vmem:[#allocation100_spill] sm:$0xff]  ;;  %v18127_v52 = vld [vmem:[#allocation115_spill] sm:$0xff] }
 0x4ff   : > { %v4299_v58 = vpop.f32.mrf.mxu3 }
 0x500   : > { %v16129_v22 = vpop.f32.mrf.mxu1  ;;  %v4329_v10 = vadd.f32 %v4299_v58, %v4192_v59  ;;  %v4743_v32 = vadd.f32 %v16137_v54, %v4726_v5  ;;  %v3915_v23 = vadd.f32 %v15986_v55, %v3772_v9  ;;  %v18130_v5 = vld [vmem:[#allocation43_spill] sm:$0xff]  ;;  %v18132_v55 = vld [vmem:[#allocation112_spill] sm:$0xff]  ;;  %v18139_v9 = vld [vmem:[#allocation42_spill] sm:$0xff] }
 0x502   : > { %v4459_v12 = vadd.f32 %v16054_v30, %v4329_v10  ;;  %v4756_v59 = vmax.f32 %v4743_v32, 0.0  ;;  %v18133_v32 = vld [vmem:[#allocation80_spill] sm:$0xff] }
 0x504   : > { %v4589_v61 = vadd.f32 %v16056_v60, %v4459_v12  ;;  %v3774_v60 = vadd.f32 %v16060_v0, %v15992_v29  ;;  %v3777_v12 = vadd.f32 %v16062_v17, %v16001_v6  ;;  %v3764_v29 = vadd.f32 %v16021_v27, %v15939_v26  ;;  %v18134_v6 = vld [vmem:[#allocation44_spill] sm:$0xff]  ;;  %v18136_v27 = vld [vmem:[#allocation87_spill] sm:$0xff] }
 0x506   : > { %v4727_v48 = vadd.f32 %v16058_v42, %v4589_v61  ;;  %v3769_v42 = vadd.f32 %v16041_v41, %v15966_v20  ;;  %v3916_v39 = vadd.f32 %v15995_v24, %v3774_v60  ;;  %v18128_v41 = vld [vmem:[#allocation102_spill] sm:$0xff]  ;;  %v18129_v24 = vld [vmem:[#allocation48_spill] sm:$0xff]  ;;  %v3917_v16 = vadd.f32 %v18131_v3, %v3777_v12 }
 0x507   : > { %v4302_v13 = vpop.f32.mrf.mxu3  ;;  %v3762_v20 = vadd.f32 %v18128_v41, %v18127_v52  ;;  %v3913_v61 = vadd.f32 %v18129_v24, %v3767_v14  ;;  %v3912_v17 = vadd.f32 %v18134_v6, %v3764_v29  ;;  %v18140_v14 = vld [vmem:[#allocation45_spill] sm:$0xff]  ;;  %v18141_v12 = vld [vmem:[#allocation58_spill] sm:$0xff]  ;;  %v18143_v24 = vld [vmem:[#allocation35_spill] sm:$0xff] }
 0x508   : > { %v16108_v46 = vadd.f32 %v4302_v13, %v4193_v1  ;;  %v4449_v1 = vpop.f32.mrf.mxu2  ;;  %v16142_v13 = vpop.f32.mrf.mxu0  ;;  %v4744_v34 = vadd.f32 %v16137_v54, %v4727_v48  ;;  %v3914_v0 = vadd.f32 %v15974_v37, %v3769_v42  ;;  %v4095_v21 = vadd.f32 %v18126_v50, %v3916_v39  ;;  %v18142_v52 = vld [vmem:[#allocation82_spill] sm:$0xff]  ;;  %v18146_v6 = vld [vmem:[#allocation79_spill] sm:$0xff] }
 0x509   : > { %v16144_v63 = vpop.f32.mrf.mxu1  ;;  %v4094_v48 = vadd.f32 %v18130_v5, %v3915_v23  ;;  %v4096_v23 = vadd.f32 %v18140_v14, %v3917_v16  ;;  %v4091_v41 = vadd.f32 %v18142_v52, %v3912_v17 }
 0x50a   : > { %v4757_v62 = vmax.f32 %v4744_v34, 0.0  ;;  %v4200_v37 = vadd.f32 %v18136_v27, %v4095_v21  ;;  %v18137_v34 = vld [vmem:[#allocation62_spill] sm:$0xff]  ;;  %v18145_v21 = vld [vmem:[#allocation41_spill] sm:$0xff]  ;;  %v18148_v27 = vld [vmem:[#allocation59_spill] sm:$0xff] }
 0x50b   : > { %v4199_v42 = vadd.f32 %v18139_v9, %v4094_v48 }
 0x50c   : > { %v16165_v10 = vpack.c.bf16 %v4757_v62, %v4756_v59  ;;  %v3911_v59 = vadd.f32 %v18137_v34, %v3762_v20  ;;  %v18138_v62 = vld [vmem:[#allocation78_spill] sm:$0xff]  ;;  %v18149_v34 = vld [vmem:[#allocation57_spill] sm:$0xff] }
 0x50d   : > { %v4092_v60 = vadd.f32 %v18138_v62, %v3913_v61  ;;  %v4201_v61 = vadd.f32 %v18146_v6, %v4096_v23  ;;  %v18150_v62 = vld [vmem:[#allocation159_spill] sm:$0xff] }
 0x50f   : > { %v16118_v33 = vpop.f32.mrf.mxu3 }
 0x510   : > { %v4452_v28 = vpop.f32.mrf.mxu2  ;;  %v16154_v38 = vpop.f32.mrf.mxu0 }
 0x511   : > { %v16157_v56 = vpop.f32.mrf.mxu1 }
 0x517   : > { %v16133_v49 = vpop.f32.mrf.mxu3 }
 0x518   : > { %v4454_v44 = vpop.f32.mrf.mxu2  ;;  %v4584_v30 = vpop.f32.mrf.mxu0 }
 0x519   : > { %v4722_v57 = vpop.f32.mrf.mxu1  ;;  %v3759_v44 = vadd.f32 %v18133_v32, %v18132_v55  ;;  %v18135_v30 = vld [vmem:[#allocation96_spill] sm:$0xff]  ;;  %v4197_v55 = vadd.f32 %v18145_v21, %v4092_v60 }
 0x51a   : > { %v4093_v26 = vadd.f32 %v18135_v30, %v3914_v0  ;;  %v18144_v0 = vld [vmem:[#allocation34_spill] sm:$0xff] }
 0x51b   : > { %v3910_v50 = vadd.f32 %v18141_v12, %v3759_v44  ;;  %v4090_v3 = vadd.f32 %v18144_v0, %v3911_v59  ;;  %v18147_v30 = vld [vmem:[#allocation114_spill] sm:$0xff]  ;;  %v18154_v0 = vld [vmem:[#allocation149_spill] sm:$0xff] }
 0x51c   : > { %v4198_v29 = vadd.f32 %v18143_v24, %v4093_v26 }
 0x51d   : > { %v4089_v48 = vadd.f32 %v18147_v30, %v3910_v50  ;;  %v4195_v26 = vadd.f32 %v18149_v34, %v4090_v3  ;;  %v18155_v3 = vld [vmem:[#allocation103_spill] sm:$0xff] }
 0x51f   : > { %v16146_v43 = vpop.f32.mrf.mxu3  ;;  %v4194_v60 = vadd.f32 %v18150_v62, %v4089_v48  ;;  %v4332_v9 = vadd.f32 %v16133_v49, %v4195_v26 }
 0x527   : > { %v4312_v58 = vpop.f32.mrf.mxu3 }
 0x528   : > { %v4334_v16 = vadd.f32 %v4312_v58, %v4197_v55 }
 0x52f   : > { %v4314_v36 = vpop.f32.mrf.mxu3 }
 0x530   : > { %v4335_v32 = vadd.f32 %v4314_v36, %v4198_v29  ;;  %v18153_v29 = vld [vmem:[#allocation85_spill] sm:$0xff] }
 0x532   : > { %v4465_v59 = vadd.f32 %v16111_v11, %v4335_v32 }
 0x537   : > { %v4317_v53 = vpop.f32.mrf.mxu3 }
 0x538   : > { %v4336_v5 = vadd.f32 %v4317_v53, %v4199_v42  ;;  %v4464_v42 = vadd.f32 %v16098_v31, %v4334_v16 }
 0x53a   : > { %v4466_v44 = vadd.f32 %v16124_v51, %v4336_v5  ;;  %v4594_v49 = vadd.f32 %v16100_v4, %v4464_v42 }
 0x53c   : > { %v4596_v58 = vadd.f32 %v16126_v25, %v4466_v44  ;;  %v4732_v4 = vadd.f32 %v16103_v35, %v4594_v49  ;;  %v9474_v49 = vld [vmem:[#allocation9 + $0x60] sm:$0xf] }
 0x53e   : > { %v4734_v31 = vadd.f32 %v16129_v22, %v4596_v58  ;;  %v4749_v35 = vadd.f32 %v16137_v54, %v4732_v4  ;;  %v11158_v4 = vld [vmem:[#allocation16 + $0x8] sm:$0xff] }
 0x53f   : > { %v4319_v57 = vpop.f32.mrf.mxu3 }
 0x540   : > { %v4337_v39 = vadd.f32 %v4319_v57, %v4200_v37  ;;  %v4196_v37 = vadd.f32 %v18148_v27, %v4091_v41  ;;  %v4751_v22 = vadd.f32 %v16137_v54, %v4734_v31  ;;  %v11172_v31 = vld [vmem:[#allocation9 + $0x64] sm:$0xf0] }
 0x542   : > { %v4467_v20 = vadd.f32 %v4449_v1, %v4337_v39  ;;  %v4333_v53 = vadd.f32 %v16146_v43, %v4196_v37  ;;  %v4331_v39 = vadd.f32 %v16118_v33, %v4194_v60  ;;  %v4595_v43 = vadd.f32 %v16113_v45, %v4465_v59  ;;  %v9418_v59 = vld [vmem:[#allocation9 + $0xf0] sm:$0xf]  ;;  %v9420_v60 = vld [vmem:[#allocation9 + $0xf8] sm:$0xf0] }
 0x544   : > { %v4597_v36 = vadd.f32 %v16142_v13, %v4467_v20  ;;  %v4463_v14 = vadd.f32 %v16089_v2, %v4333_v53  ;;  %v4733_v2 = vadd.f32 %v16115_v15, %v4595_v43  ;;  %v18156_v20 = vld [vmem:[#allocation49_spill] sm:$0xff]  ;;  %v11157_v53 = vld [vmem:[#allocation16] sm:$0xff]  ;;  %v11188_v43 = vld [vmem:[#allocation9 + $0xe4] sm:$0xf0] }
 0x546   : > { %v4735_v11 = vadd.f32 %v16144_v63, %v4597_v36  ;;  %v4593_v33 = vadd.f32 %v16091_v18, %v4463_v14  ;;  %v4750_v15 = vadd.f32 %v16137_v54, %v4733_v2  ;;  %v11190_v36 = vld [vmem:[#allocation9 + $0xf4] sm:$0xf0]  ;;  %v9410_v14 = vld [vmem:[#allocation9 + $0xe0] sm:$0xf] }
 0x547   : > { %v4322_v57 = vpop.f32.mrf.mxu3  ;;  %v9419_v62 = vor.u32 %v11190_v36, %v9418_v59  ;;  %v11186_v2 = vld [vmem:[#allocation9 + $0xd4] sm:$0xf0]  ;;  %v11180_v59 = vld [vmem:[#allocation9 + $0xa4] sm:$0xf0]  ;;  %v11179_v36 = vld [vmem:[#allocation9 + $0xa4] sm:$0xf] }
 0x548   : > { %v4338_v17 = vadd.f32 %v4322_v57, %v4201_v61  ;;  %v4752_v45 = vadd.f32 %v16137_v54, %v4735_v11  ;;  %v4763_v32 = vmax.f32 %v4750_v15, 0.0  ;;  %v4762_v61 = vmax.f32 %v4749_v35, 0.0  ;;  %v11187_v11 = vld [vmem:[#allocation9 + $0xe4] sm:$0xf]  ;;  %v9396_v35 = vld [vmem:[#allocation9 + $0xc8] sm:$0xf0] }
 0x549   : > { %4955 = vmatpush.bf16.msrb.mxu2 %v9419_v62 }
 0x54a   : > { %v4468_v1 = vadd.f32 %v4452_v28, %v4338_v17  ;;  %v4462_v28 = vadd.f32 %v16081_v19, %v4332_v9  ;;  %v4765_v18 = vmax.f32 %v4752_v45, 0.0  ;;  %v4776_v48 = vpack.c.bf16 %v4763_v32, %v4762_v61  ;;  %v11174_v9 = vld [vmem:[#allocation9 + $0x74] sm:$0xf0]  ;;  %v11167_v32 = vld [vmem:[#allocation9 + $0x44] sm:$0xf] }
 0x54b   : > { %v9386_v61 = vld [vmem:[#allocation9 + $0xb0] sm:$0xf] }
 0x54c   : > { %v4598_v51 = vadd.f32 %v16154_v38, %v4468_v1  ;;  %v4461_v38 = vadd.f32 %v16072_v8, %v4331_v39  ;;  %v4592_v19 = vadd.f32 %v16083_v47, %v4462_v28  ;;  %v18152_v8 = vld [vmem:[#allocation93_spill] sm:$0xff]  ;;  %v4764_v47 = vmax.f32 %v4751_v22, 0.0  ;;  %v11189_v1 = vld [vmem:[#allocation9 + $0xf4] sm:$0xf]  ;;  %v9484_v39 = vld [vmem:[#allocation9 + $0x78] sm:$0xf0] }
 0x54d   : > { %v4731_v41 = vadd.f32 %v18152_v8, %v4593_v33  ;;  %v9423_v42 = vor.u32 %v11189_v1, %v9420_v60  ;;  %v9402_v33 = vld [vmem:[#allocation9 + $0xd0] sm:$0xf]  ;;  %v9380_v1 = vld [vmem:[#allocation9 + $0xa8] sm:$0xf0] }
 0x54e   : > { %v4736_v13 = vadd.f32 %v16157_v56, %v4598_v51  ;;  %v18151_v56 = vld [vmem:[#allocation145_spill] sm:$0xff]  ;;  %v4591_v52 = vadd.f32 %v16074_v7, %v4461_v38  ;;  %v4777_v55 = vpack.c.bf16 %v4765_v18, %v4764_v47  ;;  %v11173_v51 = vld [vmem:[#allocation9 + $0x74] sm:$0xf]  ;;  %v11183_v47 = vld [vmem:[#allocation9 + $0xc4] sm:$0xf] }
 0x54f   : > { %v4324_v23 = vpop.f32.mrf.mxu3  ;;  %v4460_v12 = vadd.f32 %v18151_v56, %v16108_v46  ;;  %v4730_v46 = vadd.f32 %v18154_v0, %v4592_v19  ;;  %v4748_v7 = vadd.f32 %v16137_v54, %v4731_v41  ;;  %4978 = vmatpush.bf16.msrb.mxu0 %v9423_v42  ;;  %v9476_v38 = vld [vmem:[#allocation9 + $0x68] sm:$0xf0]  ;;  %v9404_v56 = vld [vmem:[#allocation9 + $0xd8] sm:$0xf0]  ;;  %v4771_v22 = vld [vmem:[#allocation16 + $0x10] sm:$0xf] }
 0x550   : > { %v4753_v25 = vadd.f32 %v16137_v54, %v4736_v13  ;;  %v4729_v21 = vadd.f32 %v18155_v3, %v4591_v52  ;;  %v9411_v13 = vor.u32 %v11188_v43, %v9410_v14  ;;  %v11171_v23 = vld [vmem:[#allocation9 + $0x64] sm:$0xf]  ;;  %v9466_v8 = vld [vmem:[#allocation9 + $0x50] sm:$0xf]  ;;  %v11170_v41 = vld [vmem:[#allocation9 + $0x54] sm:$0xf0] }
 0x551   : > { %v4590_v5 = vadd.f32 %v18153_v29, %v4460_v12  ;;  %v4747_v30 = vadd.f32 %v16137_v54, %v4730_v46  ;;  %v4761_v27 = vmax.f32 %v4748_v7, 0.0  ;;  %v9479_v45 = vor.u32 %v11171_v23, %v9476_v38  ;;  %v11169_v18 = vld [vmem:[#allocation9 + $0x54] sm:$0xf]  ;;  %v9394_v29 = vld [vmem:[#allocation9 + $0xc0] sm:$0xf] }
 0x552   : > { %v4766_v63 = vmax.f32 %v4753_v25, 0.0  ;;  %v4746_v37 = vadd.f32 %v16137_v54, %v4729_v21  ;;  %v9475_v25 = vor.u32 %v11172_v31, %v9474_v49  ;;  %4956 = vmatpush.bf16.msrb.mxu2 %v9411_v13  ;;  %v9403_v12 = vor.u32 %v11186_v2, %v9402_v33  ;;  %v9458_v3 = vld [vmem:[#allocation9 + $0x40] sm:$0xf]  ;;  %v9460_v7 = vld [vmem:[#allocation9 + $0x48] sm:$0xf0] }
 0x553   : > { %v4728_v6 = vadd.f32 %v18156_v20, %v4590_v5  ;;  %v4760_v16 = vmax.f32 %v4747_v30, 0.0  ;;  %v9467_v15 = vor.u32 %v11170_v41, %v9466_v8  ;;  %v11184_v5 = vld [vmem:[#allocation9 + $0xc4] sm:$0xf0]  ;;  %v9399_v21 = vor.u32 %v11183_v47, %v9396_v35  ;;  %v11182_v30 = vld [vmem:[#allocation9 + $0xb4] sm:$0xf0] }
 0x554   : > { %v4778_v50 = vpack.c.bf16 %v4766_v63, %v4766_v63  ;;  %v4759_v17 = vmax.f32 %v4746_v37, 0.0  ;;  %v11185_v63 = vld [vmem:[#allocation9 + $0xd4] sm:$0xf]  ;;  %v9395_v46 = vor.u32 %v11184_v5, %v9394_v29  ;;  %v9388_v37 = vld [vmem:[#allocation9 + $0xb8] sm:$0xf0] }
 0x555   : > { %v4745_v44 = vadd.f32 %v16137_v54, %v4728_v6  ;;  %v4775_v57 = vpack.c.bf16 %v4761_v27, %v4760_v16  ;;  %v9482_v54 = vld [vmem:[#allocation9 + $0x70] sm:$0xf]  ;;  %v9407_v19 = vor.u32 %v11185_v63, %v9404_v56  ;;  %v9463_v6 = vor.u32 %v11167_v32, %v9460_v7  ;;  %v11163_v42 = vld [vmem:[#allocation9 + $0x24] sm:$0xf]  ;;  %v11178_v14 = vld [vmem:[#allocation9 + $0x94] sm:$0xf0] }
 0x556   : > { %v4803_v24 = vsel %vm1996_vm3, %v4778_v50, 0  ;;  %v9483_v58 = vor.u32 %v11174_v9, %v9482_v54  ;;  %4957 = vmatpush.bf16.msrb.mxu2 %v9403_v12  ;;  %v4788_v50 = vunpack.c.l.b16 %v4771_v22  ;;  %v9387_v27 = vor.u32 %v11182_v30, %v9386_v61  ;;  %v9450_v16 = vld [vmem:[#allocation9 + $0x30] sm:$0xf]  ;;  %v9442_v54 = vld [vmem:[#allocation9 + $0x20] sm:$0xf] }
 0x557   : > { %4806 = vmatpush.bf16.msrb.mxu3 %v4803_v24  ;;  %v4758_v34 = vmax.f32 %v4745_v44, 0.0  ;;  %v9468_v24 = vld [vmem:[#allocation9 + $0x58] sm:$0xf0]  ;;  %v11166_v44 = vld [vmem:[#allocation9 + $0x34] sm:$0xf0] }
 0x558   : > { %5107 = vmatpush.bf16.msrb.mxu1 %v9483_v58  ;;  %v4791_v52 = vpack.c.b16 %v4788_v50, %v4788_v50  ;;  %v9471_v0 = vor.u32 %v11169_v18, %v9468_v24  ;;  %v11164_v9 = vld [vmem:[#allocation9 + $0x24] sm:$0xf0]  ;;  %v9383_v58 = vor.u32 %v11179_v36, %v9380_v1  ;;  %v9372_v43 = vld [vmem:[#allocation9 + $0x98] sm:$0xf0]  ;;  %v9434_v49 = vld [vmem:[#allocation9 + $0x10] sm:$0xf] }
 0x559   : > { %v4774_v26 = vpack.c.bf16 %v4759_v17, %v4758_v34  ;;  %v11165_v17 = vld [vmem:[#allocation9 + $0x34] sm:$0xf]  ;;  %v9452_v34 = vld [vmem:[#allocation9 + $0x38] sm:$0xf0]  ;;  %v11162_v31 = vld [vmem:[#allocation9 + $0x14] sm:$0xf0] }
 0x55a   : > { %4958 = vmatpush.bf16.msrb.mxu2 %v9395_v46  ;;  %v9455_v62 = vor.u32 %v11165_v17, %v9452_v34  ;;  %v11161_v23 = vld [vmem:[#allocation9 + $0x14] sm:$0xf]  ;;  %v9436_v38 = vld [vmem:[#allocation9 + $0x18] sm:$0xf0]  ;;  %v9362_v33 = vld [vmem:[#allocation9 + $0x80] sm:$0xf] }
 0x55b   : > { %4807 = vmatpush.bf16.msrb.mxu3 %v4777_v55  ;;  %v11168_v55 = vld [vmem:[#allocation9 + $0x44] sm:$0xf0]  ;;  %v11175_v56 = vld [vmem:[#allocation9 + $0x84] sm:$0xf]  ;;  %v9364_v12 = vld [vmem:[#allocation9 + $0x88] sm:$0xf0] }
 0x55c   : > { %5108 = vmatpush.bf16.msrb.mxu1 %v9475_v25  ;;  %v9459_v20 = vor.u32 %v11168_v55, %v9458_v3  ;;  %v9435_v25 = vor.u32 %v11162_v31, %v9434_v49  ;;  %v11176_v2 = vld [vmem:[#allocation9 + $0x84] sm:$0xf0]  ;;  %v11159_v50 = vld [vmem:[#allocation9 + $0x4] sm:$0xf]  ;;  %v9546_v29 = vld [vmem:[#allocation9 + $0x170] sm:$0xf] }
 0x55d   : > { %v9363_v63 = vor.u32 %v11176_v2, %v9362_v33  ;;  %v11160_v22 = vld [vmem:[#allocation9 + $0x4] sm:$0xf0]  ;;  %v11206_v5 = vld [vmem:[#allocation9 + $0x174] sm:$0xf0]  ;;  %v9548_v35 = vld [vmem:[#allocation9 + $0x178] sm:$0xf0] }
 0x55e   : > { %4959 = vmatpush.bf16.msrb.mxu2 %v9387_v27  ;;  %v9547_v47 = vor.u32 %v11206_v5, %v9546_v29  ;;  %v11222_v55 = vld [vmem:[#allocation9 + $0x1f4] sm:$0xf0]  ;;  %v11221_v32 = vld [vmem:[#allocation9 + $0x1f4] sm:$0xf]  ;;  %v11204_v61 = vld [vmem:[#allocation9 + $0x164] sm:$0xf0] }
 0x55f   : > { %4808 = vmatpush.bf16.msrb.mxu3 %v4776_v48  ;;  %v11181_v48 = vld [vmem:[#allocation9 + $0xb4] sm:$0xf]  ;;  %v11220_v17 = vld [vmem:[#allocation9 + $0x1e4] sm:$0xf0]  ;;  %v11219_v34 = vld [vmem:[#allocation9 + $0x1e4] sm:$0xf] }
 0x560   : > { %5109 = vmatpush.bf16.msrb.mxu1 %v9467_v15  ;;  %v18157_v15 = vmov 0.0   ;;  %v11202_v36 = vld [vmem:[#allocation9 + $0x154] sm:$0xf0]  ;;  %v9524_v49 = vld [vmem:[#allocation9 + $0x148] sm:$0xf0] }
 0x561   : > { %v9586_v31 = vld [vmem:[#allocation9 + $0x1c0] sm:$0xf]  ;;  %v11198_v29 = vld [vmem:[#allocation9 + $0x134] sm:$0xf0] }
 0x563   : > { %4809 = vmatpush.bf16.msrb.mxu3 %v4775_v57  ;;  %v9391_v57 = vor.u32 %v11181_v48, %v9388_v37  ;;  %v11203_v37 = vld [vmem:[#allocation9 + $0x164] sm:$0xf] }
 0x564   : > { %5110 = vmatpush.bf16.msrb.mxu1 %v9459_v20  ;;  %v9612_v20 = vld [vmem:[#allocation9 + $0x1f8] sm:$0xf0] }
 0x565   : > { %v9615_v48 = vor.u32 %v11221_v32, %v9612_v20  ;;  %v11213_v32 = vld [vmem:[#allocation9 + $0x1b4] sm:$0xf]  ;;  %v9580_v20 = vld [vmem:[#allocation9 + $0x1b8] sm:$0xf0] }
 0x567   : > { %4810 = vmatpush.bf16.msrb.mxu3 %v4774_v26  ;;  %v9378_v26 = vld [vmem:[#allocation9 + $0xa0] sm:$0xf] }
 0x568   : > { %v9379_v60 = vor.u32 %v11180_v59, %v9378_v26  ;;  %v9530_v59 = vld [vmem:[#allocation9 + $0x150] sm:$0xf] }
 0x56a   : > { %4960 = vmatpush.bf16.msrb.mxu2 %v9379_v60  ;;  %v11201_v60 = vld [vmem:[#allocation9 + $0x154] sm:$0xf] }
 0x56b   : > { %4811 = vmatpush.bf16.msrb.mxu3 %v16165_v10  ;;  %v9487_v10 = vor.u32 %v11173_v51, %v9484_v39  ;;  %v9444_v51 = vld [vmem:[#allocation9 + $0x28] sm:$0xf0]  ;;  %v9370_v39 = vld [vmem:[#allocation9 + $0x90] sm:$0xf] }
 0x56c   : > { %v9371_v13 = vor.u32 %v11178_v14, %v9370_v39  ;;  %v9596_v39 = vld [vmem:[#allocation9 + $0x1d8] sm:$0xf0] }
 0x56e   : > { %4961 = vmatpush.bf16.msrb.mxu2 %v9371_v13 }
 0x56f   : > { %4812 = vmatpush.bf16.msrb.mxu3 %v16151_v40  ;;  %v9412_v40 = vld [vmem:[#allocation9 + $0xe8] sm:$0xf0] }
 0x570   : > { %v9415_v28 = vor.u32 %v11187_v11, %v9412_v40  ;;  %v9443_v11 = vor.u32 %v11164_v9, %v9442_v54  ;;  %v9447_v40 = vor.u32 %v11163_v42, %v9444_v51  ;;  %v9532_v54 = vld [vmem:[#allocation9 + $0x158] sm:$0xf0]  ;;  %v9594_v9 = vld [vmem:[#allocation9 + $0x1d0] sm:$0xf]  ;;  %v11217_v51 = vld [vmem:[#allocation9 + $0x1d4] sm:$0xf] }
 0x571   : > { %v9535_v42 = vor.u32 %v11201_v60, %v9532_v54  ;;  %v9500_v54 = vld [vmem:[#allocation9 + $0x118] sm:$0xf0] }
 0x572   : > { %9357 = vmatmul.msk.bf16.vlgmr.msrb.gmra.mxu3 %vm4792_vm12, %v11157_v53  ;;  %4979 = vmatpush.bf16.msrb.mxu0 %v9415_v28  ;;  %v9451_v53 = vor.u32 %v11166_v44, %v9450_v16  ;;  %v9540_v16 = vld [vmem:[#allocation9 + $0x168] sm:$0xf0] }
 0x573   : > { %5130 = vmatpush.bf16.msra.mxu3 %v9487_v10  ;;  %v11177_v10 = vld [vmem:[#allocation9 + $0x94] sm:$0xf]  ;;  %4962 = vmatpush.bf16.msrb.mxu2 %v9363_v63  ;;  %v9543_v44 = vor.u32 %v11203_v37, %v9540_v16  ;;  %v9588_v63 = vld [vmem:[#allocation9 + $0x1c8] sm:$0xf0]  ;;  %v11195_v37 = vld [vmem:[#allocation9 + $0x124] sm:$0xf] }
 0x574   : > { %5111 = vmatpush.bf16.msrb.mxu1 %v9451_v53  ;;  %v9375_v28 = vor.u32 %v11177_v10, %v9372_v43  ;;  %v9604_v53 = vld [vmem:[#allocation9 + $0x1e8] sm:$0xf0]  ;;  %v9522_v43 = vld [vmem:[#allocation9 + $0x140] sm:$0xf] }
 0x575   : > { %v9607_v1 = vor.u32 %v11219_v34, %v9604_v53  ;;  %v9508_v16 = vld [vmem:[#allocation9 + $0x128] sm:$0xf0]  ;;  %v11211_v34 = vld [vmem:[#allocation9 + $0x1a4] sm:$0xf] }
 0x576   : > { %4980 = vmatpush.bf16.msrb.mxu0 %v9407_v19  ;;  %v9426_v19 = vld [vmem:[#allocation9] sm:$0xf] }
 0x577   : > { %5131 = vmatpush.bf16.msra.mxu3 %v9479_v45  ;;  %v9439_v45 = vor.u32 %v11161_v23, %v9436_v38  ;;  %v9427_v8 = vor.u32 %v11160_v22, %v9426_v19  ;;  %5264 = vmatpush.bf16.msra.mxu2 %v9547_v47  ;;  %v11216_v23 = vld [vmem:[#allocation9 + $0x1c4] sm:$0xf0] }
 0x578   : > { %5112 = vmatpush.bf16.msrb.mxu1 %v9443_v11  ;;  %v11200_v11 = vld [vmem:[#allocation9 + $0x144] sm:$0xf0] }
 0x579   : > { %v9523_v38 = vor.u32 %v11200_v11, %v9522_v43 }
 0x57a   : > { %4981 = vmatpush.bf16.msrb.mxu0 %v9399_v21  ;;  %v9610_v21 = vld [vmem:[#allocation9 + $0x1f0] sm:$0xf] }
 0x57b   : > { %5132 = vmatpush.bf16.msra.mxu3 %v9471_v0  ;;  %v11205_v0 = vld [vmem:[#allocation9 + $0x174] sm:$0xf]  ;;  %v9611_v7 = vor.u32 %v11222_v55, %v9610_v21  ;;  %v9578_v21 = vld [vmem:[#allocation9 + $0x1b0] sm:$0xf]  ;;  %v11214_v55 = vld [vmem:[#allocation9 + $0x1b4] sm:$0xf0] }
 0x57c   : > { %5113 = vmatpush.bf16.msrb.mxu1 %v9435_v25  ;;  %v9551_v3 = vor.u32 %v11205_v0, %v9548_v35  ;;  %v9516_v35 = vld [vmem:[#allocation9 + $0x138] sm:$0xf0] }
 0x57e   : > { %4982 = vmatpush.bf16.msrb.mxu0 %v9391_v57  ;;  %v9602_v57 = vld [vmem:[#allocation9 + $0x1e0] sm:$0xf] }
 0x57f   : > { %5133 = vmatpush.bf16.msra.mxu3 %v9463_v6  ;;  %v9538_v6 = vld [vmem:[#allocation9 + $0x160] sm:$0xf]  ;;  %v9603_v26 = vor.u32 %v11220_v17, %v9602_v57  ;;  %v9511_v57 = vor.u32 %v11195_v37, %v9508_v16  ;;  %v11212_v17 = vld [vmem:[#allocation9 + $0x1a4] sm:$0xf0] }
 0x580   : > { %5114 = vmatpush.bf16.msrb.mxu1 %v9427_v8  ;;  %v9539_v27 = vor.u32 %v11204_v61, %v9538_v6  ;;  %v9506_v6 = vld [vmem:[#allocation9 + $0x120] sm:$0xf]  ;;  %v11196_v61 = vld [vmem:[#allocation9 + $0x124] sm:$0xf0] }
 0x582   : > { %9358 = vmatmul.msk.bf16.gmra.mxu3 %vm4792_vm12, %v11158_v4  ;;  %4983 = vmatpush.bf16.msrb.mxu0 %v9383_v58  ;;  %v9367_v4 = vor.u32 %v11175_v56, %v9364_v12  ;;  %v11218_v58 = vld [vmem:[#allocation9 + $0x1d4] sm:$0xf0] }
 0x583   : > { %5134 = vmatpush.bf16.msra.mxu3 %v9455_v62  ;;  %5265 = vmatpush.bf16.msra.mxu2 %v9539_v27  ;;  %v9531_v62 = vor.u32 %v11202_v36, %v9530_v59  ;;  %v9595_v10 = vor.u32 %v11218_v58, %v9594_v9  ;;  %v9507_v27 = vor.u32 %v11196_v61, %v9506_v6  ;;  %v9498_v59 = vld [vmem:[#allocation9 + $0x110] sm:$0xf]  ;;  %v11194_v36 = vld [vmem:[#allocation9 + $0x114] sm:$0xf0]  ;;  %v11209_v58 = vld [vmem:[#allocation9 + $0x194] sm:$0xf] }
 0x584   : > { %5431 = vmatpush.bf16.msra.mxu1 %v9611_v7  ;;  %v9579_v7 = vor.u32 %v11214_v55, %v9578_v21  ;;  %v9499_v60 = vor.u32 %v11194_v36, %v9498_v59  ;;  %v9562_v9 = vld [vmem:[#allocation9 + $0x190] sm:$0xf]  ;;  %v9676_v59 = vld [vmem:[#allocation9 + $0x278] sm:$0xf0] }
 0x586   : > { %4984 = vmatpush.bf16.msrb.mxu0 %v9375_v28  ;;  %v9599_v28 = vor.u32 %v11217_v51, %v9596_v39  ;;  %v9564_v51 = vld [vmem:[#allocation9 + $0x198] sm:$0xf0]  ;;  %v9490_v39 = vld [vmem:[#allocation9 + $0x100] sm:$0xf] }
 0x587   : > { %5135 = vmatpush.bf16.msra.mxu3 %v9447_v40  ;;  %v11199_v40 = vld [vmem:[#allocation9 + $0x144] sm:$0xf]  ;;  %5266 = vmatpush.bf16.msra.mxu2 %v9531_v62 }
 0x588   : > { %5432 = vmatpush.bf16.msra.mxu1 %v9603_v26  ;;  %v9527_v19 = vor.u32 %v11199_v40, %v9524_v49  ;;  %v9572_v26 = vld [vmem:[#allocation9 + $0x1a8] sm:$0xf0]  ;;  %v11192_v40 = vld [vmem:[#allocation9 + $0x104] sm:$0xf0] }
 0x589   : > { %v9575_v62 = vor.u32 %v11211_v34, %v9572_v26 }
 0x58a   : > { %4985 = vmatpush.bf16.msrb.mxu0 %v9367_v4  ;;  %v9587_v4 = vor.u32 %v11216_v23, %v9586_v31  ;;  %v9492_v31 = vld [vmem:[#allocation9 + $0x108] sm:$0xf0]  ;;  %v9554_v23 = vld [vmem:[#allocation9 + $0x180] sm:$0xf] }
 0x58b   : > { %5136 = vmatpush.bf16.msra.mxu3 %v9439_v45  ;;  %v11215_v45 = vld [vmem:[#allocation9 + $0x1c4] sm:$0xf]  ;;  %5267 = vmatpush.bf16.msra.mxu2 %v9523_v38  ;;  %v9567_v38 = vor.u32 %v11209_v58, %v9564_v51  ;;  %v9740_v58 = vld [vmem:[#allocation9 + $0x2f8] sm:$0xf0]  ;;  %v9666_v51 = vld [vmem:[#allocation9 + $0x260] sm:$0xf] }
 0x58c   : > { %5433 = vmatpush.bf16.msra.mxu1 %v9595_v10  ;;  %v9591_v8 = vor.u32 %v11215_v45, %v9588_v63  ;;  %v9491_v45 = vor.u32 %v11192_v40, %v9490_v39  ;;  %v11236_v39 = vld [vmem:[#allocation9 + $0x264] sm:$0xf0]  ;;  %v11235_v40 = vld [vmem:[#allocation9 + $0x264] sm:$0xf] }
 0x58e   : > { %5287 = vmatpush.bf16.msra.mxu0 %v9551_v3 }
 0x590   : > { %5434 = vmatpush.bf16.msra.mxu1 %v9587_v4  ;;  %v9556_v4 = vld [vmem:[#allocation9 + $0x188] sm:$0xf0] }
 0x592   : > { %9359 = vmatmul.msk.bf16.gmra.mxu3 %vm4792_vm12, %v4791_v52  ;;  %v9428_v52 = vld [vmem:[#allocation9 + $0x8] sm:$0xf0]  ;;  %5288 = vmatpush.bf16.msra.mxu0 %v9543_v44  ;;  %v9570_v44 = vld [vmem:[#allocation9 + $0x1a0] sm:$0xf] }
 0x593   : > { %v9431_v41 = vor.u32 %v11159_v50, %v9428_v52  ;;  %v9571_v53 = vor.u32 %v11212_v17, %v9570_v44  ;;  %v9674_v44 = vld [vmem:[#allocation9 + $0x270] sm:$0xf]  ;;  %v11237_v17 = vld [vmem:[#allocation9 + $0x274] sm:$0xf] }
 0x594   : > { %5435 = vmatpush.bf16.msra.mxu1 %v9579_v7 }
 0x595   : > { %5137 = vmatpush.bf16.msra.mxu3 %v9431_v41  ;;  %v9514_v41 = vld [vmem:[#allocation9 + $0x130] sm:$0xf] }
 0x596   : > { %5289 = vmatpush.bf16.msra.mxu0 %v9535_v42  ;;  %v9515_v47 = vor.u32 %v11198_v29, %v9514_v41  ;;  %v11210_v42 = vld [vmem:[#allocation9 + $0x194] sm:$0xf0] }
 0x597   : > { %v9563_v11 = vor.u32 %v11210_v42, %v9562_v9  ;;  %v11253_v9 = vld [vmem:[#allocation9 + $0x2f4] sm:$0xf] }
 0x598   : > { %5268 = vmatpush.bf16.msra.mxu2 %v9515_v47  ;;  %5436 = vmatpush.bf16.msra.mxu1 %v9571_v53 }
 0x599   : > { %5454 = vmatpush.bf16.msrb.mxu3 %v9615_v48  ;;  %v9583_v48 = vor.u32 %v11213_v32, %v9580_v20 }
 0x59a   : > { %5290 = vmatpush.bf16.msra.mxu0 %v9527_v19  ;;  %v11207_v19 = vld [vmem:[#allocation9 + $0x184] sm:$0xf] }
 0x59c   : > { %5269 = vmatpush.bf16.msra.mxu2 %v9507_v27  ;;  %5437 = vmatpush.bf16.msra.mxu1 %v9563_v11  ;;  %v9667_v11 = vor.u32 %v11236_v39, %v9666_v51 }
 0x59d   : > { %5455 = vmatpush.bf16.msrb.mxu3 %v9607_v1  ;;  %v11193_v1 = vld [vmem:[#allocation9 + $0x114] sm:$0xf] }
 0x59e   : > { %v9503_v43 = vor.u32 %v11193_v1, %v9500_v54  ;;  %v11254_v54 = vld [vmem:[#allocation9 + $0x2f4] sm:$0xf0] }
 0x5a0   : > { %5270 = vmatpush.bf16.msra.mxu2 %v9499_v60  ;;  %v9738_v60 = vld [vmem:[#allocation9 + $0x2f0] sm:$0xf] }
 0x5a1   : > { %5456 = vmatpush.bf16.msrb.mxu3 %v9599_v28  ;;  %v11191_v28 = vld [vmem:[#allocation9 + $0x104] sm:$0xf]  ;;  %v9739_v42 = vor.u32 %v11254_v54, %v9738_v60 }
 0x5a4   : > { %5271 = vmatpush.bf16.msra.mxu2 %v9491_v45  ;;  %v9732_v45 = vld [vmem:[#allocation9 + $0x2e8] sm:$0xf0] }
 0x5a5   : > { %5457 = vmatpush.bf16.msrb.mxu3 %v9591_v8 }
 0x5a9   : > { %5458 = vmatpush.bf16.msrb.mxu3 %v9583_v48 }
 0x5ad   : > { %5459 = vmatpush.bf16.msrb.mxu3 %v9575_v62  ;;  %v9679_v62 = vor.u32 %v11237_v17, %v9676_v59  ;;  %v11231_v17 = vld [vmem:[#allocation9 + $0x244] sm:$0xf] }
 0x5b1   : > { %5460 = vmatpush.bf16.msrb.mxu3 %v9567_v38  ;;  %v11251_v38 = vld [vmem:[#allocation9 + $0x2e4] sm:$0xf] }
 0x5f5   : > { %v16249_v18 = vpop.f32.mrf.mxu3 }
 0x5f6   : > { %v16253_v24 = vpack.c.bf16 %v16249_v18, %v18157_v15 }
 0x5f8   : > { %v16258_v30 = vshll.u32 %v16253_v24, 16  ;;  %v4867_v56 = vrot.slane %v16253_v24, 1  ;;  %v16273_v12 = vshrl.u32 %v16253_v24, 16  ;;  %v11197_v24 = vld [vmem:[#allocation9 + $0x134] sm:$0xf] }
 0x5f9   : > { %v9519_v3 = vor.u32 %v11197_v24, %v9516_v35 }
 0x5fa   : > { %v5006_v25 = vrot.slane %v16258_v30, 1  ;;  %v5170_v21 = vrot.slane %v16273_v12, 1  ;;  %v5171_v55 = vrot.slane %v16258_v30, 2  ;;  %v5337_v32 = vrot.slane %v16273_v12, 3 }
 0x5fb   : > { %5291 = vmatpush.bf16.msra.mxu0 %v9519_v3 }
 0x5fc   : > { %v5007_v50 = vor.u32 %v5006_v25, %v16273_v12  ;;  %v11208_v25 = vld [vmem:[#allocation9 + $0x184] sm:$0xf0] }
 0x5fd   : > { %v16255_v46 = vpop.f32.mrf.mxu3  ;;  %v9555_v8 = vor.u32 %v11208_v25, %v9554_v23  ;;  %v11252_v25 = vld [vmem:[#allocation9 + $0x2e4] sm:$0xf0] }
 0x5ff   : > { %5292 = vmatpush.bf16.msra.mxu0 %v9511_v57  ;;  %5438 = vmatpush.bf16.msra.mxu1 %v9555_v8  ;;  %v11238_v57 = vld [vmem:[#allocation9 + $0x274] sm:$0xf0]  ;;  %v11233_v8 = vld [vmem:[#allocation9 + $0x254] sm:$0xf] }
 0x600   : > { %v9675_v53 = vor.u32 %v11238_v57, %v9674_v44  ;;  %v11232_v57 = vld [vmem:[#allocation9 + $0x244] sm:$0xf0] }
 0x603   : > { %5293 = vmatpush.bf16.msra.mxu0 %v9503_v43  ;;  %v9743_v43 = vor.u32 %v11253_v9, %v9740_v58  ;;  %v9716_v58 = vld [vmem:[#allocation9 + $0x2c8] sm:$0xf0] }
 0x605   : > { %v16260_v14 = vpop.f32.mrf.mxu3 }
 0x606   : > { %v16264_v13 = vpack.c.bf16 %v16260_v14, %v16255_v46 }
 0x608   : > { %v4868_v33 = vrot.slane %v16264_v13, 1  ;;  %v16269_v2 = vshll.u32 %v16264_v13, 16  ;;  %v16290_v63 = vshrl.u32 %v16264_v13, 16 }
 0x60a   : > { %v4869_v22 = vsel %vm1003_vm0, %v4867_v56, %v4868_v33  ;;  %v5011_v52 = vrot.slane %v16269_v2, 1  ;;  %v5174_v61 = vrot.slane %v16269_v2, 2  ;;  %v5340_v48 = vrot.slane %v16290_v63, 3 }
 0x60b   : > { %4963 = vmatmul.bf16.vlgmr.msrb.gmra.mxu2 %v4869_v22  ;;  %4986 = vmatmul.bf16.vlgmr.msrb.gmra.mxu0 %v4869_v22  ;;  %v5341_v27 = vrot.slane %v16269_v2, 4 }
 0x60c   : > { %v5012_v0 = vsel %vm4212_vm10, %v5007_v50, %v5011_v52  ;;  %v9495_v50 = vor.u32 %v11191_v28, %v9492_v31  ;;  %v5015_v41 = vor.u32 %v16290_v63, %v5011_v52  ;;  %v16304_v52 = vpack.c.bf16 %v16255_v46, %v16249_v18  ;;  %5587 = vmatpush.bf16.msrb.mxu2 %v9675_v53  ;;  %v9668_v28 = vld [vmem:[#allocation9 + $0x268] sm:$0xf0]  ;;  %v11248_v53 = vld [vmem:[#allocation9 + $0x2c4] sm:$0xf0] }
 0x60d   : > { %v16280_v5 = vpop.f32.mrf.mxu3  ;;  %5115 = vmatmul.bf16.vlgmr.msrb.gmra.mxu1 %v5012_v0  ;;  %5138 = vmatmul.bf16.vlgmr.msra.gmra.mxu3 %v5012_v0  ;;  %v9559_v0 = vor.u32 %v11207_v19, %v9556_v4  ;;  %v5338_v18 = vrot.slane %v16258_v30, 4  ;;  %v5173_v46 = vrot.slane %v16290_v63, 1  ;;  %v9671_v23 = vor.u32 %v11235_v40, %v9668_v28 }
 0x60e   : > { %5294 = vmatpush.bf16.msra.mxu0 %v9495_v50  ;;  %v16307_v13 = vshll.u32 %v16304_v52, 16  ;;  %v16313_v3 = vshrl.u32 %v16304_v52, 16  ;;  %v6010_v1 = vrot.slane %v16304_v52, 3  ;;  %5767 = vmatpush.bf16.msrb.mxu1 %v9739_v42  ;;  %v9735_v4 = vor.u32 %v11251_v38, %v9732_v45  ;;  %v11234_v50 = vld [vmem:[#allocation9 + $0x254] sm:$0xf0] }
 0x60f   : > { %5461 = vmatpush.bf16.msrb.mxu3 %v9559_v0  ;;  %v16338_v31 = vor.u32 %v5174_v61, %v5173_v46  ;;  %v9660_v0 = vld [vmem:[#allocation9 + $0x258] sm:$0xf0]  ;;  %v11249_v46 = vld [vmem:[#allocation9 + $0x2d4] sm:$0xf]  ;;  %v9650_v61 = vld [vmem:[#allocation9 + $0x240] sm:$0xf]  ;;  %v16363_v30 = vor.u32 %v5341_v27, %v5340_v48 }
 0x610   : > { %v6171_v7 = vrot.slane %v16313_v3, 3  ;;  %v6172_v6 = vrot.slane %v16307_v13, 4  ;;  %v5666_v36 = vrot.slane %v16307_v13, 1  ;;  %5588 = vmatpush.bf16.msrb.mxu2 %v9667_v11  ;;  %v5840_v59 = vrot.slane %v16313_v3, 2  ;;  %v11247_v42 = vld [vmem:[#allocation9 + $0x2c4] sm:$0xf] }
 0x611   : > { %v9651_v60 = vor.u32 %v11232_v57, %v9650_v61  ;;  %v9636_v57 = vld [vmem:[#allocation9 + $0x228] sm:$0xf0] }
 0x612   : > { %v16331_v34 = vor.u32 %v6172_v6, %v6171_v7  ;;  %5610 = vmatpush.bf16.msrb.mxu0 %v9679_v62  ;;  %v9663_v7 = vor.u32 %v11233_v8, %v9660_v0  ;;  %v9724_v6 = vld [vmem:[#allocation9 + $0x2d8] sm:$0xf0]  ;;  %v5841_v62 = vrot.slane %v16307_v13, 3  ;;  %v5667_v51 = vor.u32 %v5666_v36, %v16313_v3  ;;  %v11245_v0 = vld [vmem:[#allocation9 + $0x2b4] sm:$0xf] }
 0x613   : > { %5790 = vmatpush.bf16.msra.mxu3 %v9743_v43  ;;  %v9719_v36 = vor.u32 %v11247_v42, %v9716_v58  ;;  %v9690_v42 = vld [vmem:[#allocation9 + $0x290] sm:$0xf]  ;;  %v11242_v58 = vld [vmem:[#allocation9 + $0x294] sm:$0xf0] }
 0x614   : > { %v5842_v40 = vor.u32 %v5841_v62, %v5840_v59  ;;  %v11226_v59 = vld [vmem:[#allocation9 + $0x214] sm:$0xf0]  ;;  %v11225_v62 = vld [vmem:[#allocation9 + $0x214] sm:$0xf] }
 0x615   : > { %v16285_v10 = vpop.f32.mrf.mxu3 }
 0x616   : > { %v4830_v49 = vpack.c.bf16 %v16285_v10, %v16280_v5  ;;  %5611 = vmatpush.bf16.msrb.mxu0 %v9671_v23  ;;  %v11230_v23 = vld [vmem:[#allocation9 + $0x234] sm:$0xf0] }
 0x617   : > { %5791 = vmatpush.bf16.msra.mxu3 %v9735_v4 }
 0x618   : > { %v16292_v56 = vshll.u32 %v4830_v49, 16  ;;  %v4870_v22 = vrot.slane %v4830_v49, 1  ;;  %v16321_v20 = vshrl.u32 %v4830_v49, 16  ;;  %v9730_v49 = vld [vmem:[#allocation9 + $0x2e0] sm:$0xf] }
 0x619   : > { %v9731_v19 = vor.u32 %v11252_v25, %v9730_v49  ;;  %v9642_v49 = vld [vmem:[#allocation9 + $0x230] sm:$0xf]  ;;  %v11229_v25 = vld [vmem:[#allocation9 + $0x234] sm:$0xf] }
 0x61a   : > { %v5019_v29 = vrot.slane %v16292_v56, 1  ;;  %v4871_v24 = vsel %vm1003_vm0, %v4868_v33, %v4870_v22  ;;  %v16310_v33 = vpack.c.bf16 0.0, %v16285_v10  ;;  %5612 = vmatpush.bf16.msrb.mxu0 %v9663_v7  ;;  %v5177_v48 = vrot.slane %v16321_v20, 1  ;;  %v9708_v7 = vld [vmem:[#allocation9 + $0x2b8] sm:$0xf0] }
 0x61b   : > { %4968 = vmatmul.bf16.gmra.mxu2 %v4871_v24  ;;  %4991 = vmatmul.bf16.gmra.mxu0 %v4871_v24  ;;  %v5178_v27 = vrot.slane %v16292_v56, 2  ;;  %v5344_v45 = vrot.slane %v16321_v20, 3  ;;  %v9643_v4 = vor.u32 %v11230_v23, %v9642_v49  ;;  %v9711_v61 = vor.u32 %v11245_v0, %v9708_v7 }
 0x61c   : > { %v5020_v47 = vsel %vm4212_vm10, %v5015_v41, %v5019_v29  ;;  %v16328_v37 = vshll.u32 %v16310_v33, 16  ;;  %v5023_v16 = vor.u32 %v16321_v20, %v5019_v29  ;;  %v16334_v26 = vshrl.u32 %v16310_v33, 16  ;;  %5768 = vmatpush.bf16.msrb.mxu1 %v9731_v19 }
 0x61d   : > { %v4826_v35 = vpop.f32.mrf.mxu3  ;;  %5120 = vmatmul.bf16.gmra.mxu1 %v5020_v47  ;;  %5143 = vmatmul.bf16.gmra.mxu3 %v5020_v47  ;;  %v16342_v41 = vpack.c.bf16 %v16280_v5, %v16260_v14  ;;  %v5172_v29 = vor.u32 %v5171_v55, %v5170_v21  ;;  %v9722_v47 = vld [vmem:[#allocation9 + $0x2d0] sm:$0xf]  ;;  %v9652_v14 = vld [vmem:[#allocation9 + $0x248] sm:$0xf0]  ;;  %v5339_v5 = vor.u32 %v5338_v18, %v5337_v32  ;;  %v9714_v55 = vld [vmem:[#allocation9 + $0x2c0] sm:$0xf] }
 0x61e   : > { %v11250_v35 = vld [vmem:[#allocation9 + $0x2d4] sm:$0xf0]  ;;  %v9727_v21 = vor.u32 %v11249_v46, %v9724_v6  ;;  %v9655_v32 = vor.u32 %v11231_v17, %v9652_v14  ;;  %v9715_v18 = vor.u32 %v11248_v53, %v9714_v55  ;;  %v5345_v19 = vrot.slane %v16292_v56, 4  ;;  %v9634_v46 = vld [vmem:[#allocation9 + $0x220] sm:$0xf] }
 0x61f   : > { %v9723_v44 = vor.u32 %v11250_v35, %v9722_v47  ;;  %v16353_v54 = vshll.u32 %v16342_v41, 16  ;;  %v16356_v9 = vshrl.u32 %v16342_v41, 16  ;;  %v6011_v12 = vrot.slane %v16342_v41, 3  ;;  %v11228_v6 = vld [vmem:[#allocation9 + $0x224] sm:$0xf0] }
 0x620   : > { %5792 = vmatpush.bf16.msra.mxu3 %v9727_v21  ;;  %5613 = vmatpush.bf16.msrb.mxu0 %v9655_v32  ;;  %v9698_v17 = vld [vmem:[#allocation9 + $0x2a0] sm:$0xf]  ;;  %v11243_v21 = vld [vmem:[#allocation9 + $0x2a4] sm:$0xf]  ;;  %v9700_v55 = vld [vmem:[#allocation9 + $0x2a8] sm:$0xf0]  ;;  %v5179_v49 = vor.u32 %v5178_v27, %v5177_v48  ;;  %v5346_v23 = vor.u32 %v5345_v19, %v5344_v45 }
 0x621   : > { %5769 = vmatpush.bf16.msrb.mxu1 %v9723_v44  ;;  %v5671_v39 = vrot.slane %v16353_v54, 1  ;;  %v5843_v43 = vrot.slane %v16356_v9, 2  ;;  %v5844_v63 = vrot.slane %v16353_v54, 3  ;;  %v16376_v2 = vsel %vm1745_vm2, %v6010_v1, %v6011_v12  ;;  %v11227_v44 = vld [vmem:[#allocation9 + $0x224] sm:$0xf] }
 0x622   : > { %v6174_v13 = vrot.slane %v16356_v9, 3  ;;  %v6175_v3 = vrot.slane %v16353_v54, 4  ;;  %v5343_v1 = vsel %vm3789_vm9, %v5339_v5, %v16363_v30  ;;  %v9639_v14 = vor.u32 %v11227_v44, %v9636_v57  ;;  %v11244_v5 = vld [vmem:[#allocation9 + $0x2a4] sm:$0xf0]  ;;  %v9684_v48 = vld [vmem:[#allocation9 + $0x288] sm:$0xf0] }
 0x623   : > { %v16385_v11 = vsel %vm4212_vm10, %v5667_v51, %v5671_v39  ;;  %v16387_v28 = vor.u32 %v5844_v63, %v5843_v43  ;;  %v9699_v53 = vor.u32 %v11244_v5, %v9698_v17  ;;  %v11241_v51 = vld [vmem:[#allocation9 + $0x294] sm:$0xf]  ;;  %v9692_v43 = vld [vmem:[#allocation9 + $0x298] sm:$0xf0]  ;;  %v9618_v63 = vld [vmem:[#allocation9 + $0x200] sm:$0xf] }
 0x624   : > { %v16391_v38 = vor.u32 %v6175_v3, %v6174_v13  ;;  %5793 = vmatpush.bf16.msra.mxu3 %v9719_v36  ;;  %v9691_v3 = vor.u32 %v11242_v58, %v9690_v42  ;;  %v11224_v36 = vld [vmem:[#allocation9 + $0x204] sm:$0xf0]  ;;  %v5679_v0 = vrot.slane %v16328_v37, 1  ;;  %v5848_v20 = vrot.slane %v16328_v37, 3  ;;  %v11269_v44 = vld [vmem:[#allocation9 + $0x374] sm:$0xf] }
 0x625   : > { %5770 = vmatpush.bf16.msrb.mxu1 %v9715_v18  ;;  %v9628_v18 = vld [vmem:[#allocation9 + $0x218] sm:$0xf0]  ;;  %v16415_v27 = vrot.slane %v16310_v33, 3  ;;  %v6178_v45 = vrot.slane %v16334_v26, 3  ;;  %v6179_v54 = vrot.slane %v16328_v37, 4 }
 0x626   : > { %v16402_v47 = vsel %vm3789_vm9, %v16331_v34, %v16391_v38  ;;  %v9626_v34 = vld [vmem:[#allocation9 + $0x210] sm:$0xf]  ;;  %v9631_v13 = vor.u32 %v11225_v62, %v9628_v18  ;;  %v9804_v17 = vld [vmem:[#allocation9 + $0x378] sm:$0xf0]  ;;  %v11286_v5 = vld [vmem:[#allocation9 + $0x3f4] sm:$0xf0] }
 0x627   : > { %v9627_v32 = vor.u32 %v11226_v59, %v9626_v34  ;;  %v16430_v33 = vsel %vm1745_vm2, %v6011_v12, %v16415_v27  ;;  %v16432_v7 = vor.u32 %v6179_v54, %v6178_v45  ;;  %v11268_v34 = vld [vmem:[#allocation9 + $0x364] sm:$0xf0]  ;;  %v9858_v18 = vld [vmem:[#allocation9 + $0x3e0] sm:$0xf]  ;;  %v9780_v45 = vld [vmem:[#allocation9 + $0x348] sm:$0xf0] }
 0x628   : > { %5794 = vmatpush.bf16.msra.mxu3 %v9711_v61  ;;  %v11284_v58 = vld [vmem:[#allocation9 + $0x3e4] sm:$0xf0]  ;;  %v9922_v37 = vld [vmem:[#allocation9 + $0x460] sm:$0xf] }
 0x629   : > { %v16444_v12 = vsel %vm3789_vm9, %v16391_v38, %v16432_v7  ;;  %v9866_v38 = vld [vmem:[#allocation9 + $0x3f0] sm:$0xf] }
 0x62b   : > { %4973 = vmatmul.bf16.gmra.mxu2 %v4870_v22  ;;  %4996 = vmatmul.bf16.gmra.mxu0 %v4870_v22  ;;  %v9658_v22 = vld [vmem:[#allocation9 + $0x250] sm:$0xf] }
 0x62c   : > { %v9659_v24 = vor.u32 %v11234_v50, %v9658_v22  ;;  %v9644_v22 = vld [vmem:[#allocation9 + $0x238] sm:$0xf0]  ;;  %v16397_v50 = vsel %vm3133_vm6, %v5842_v40, %v16387_v28  ;;  %v11223_v40 = vld [vmem:[#allocation9 + $0x204] sm:$0xf] }
 0x62d   : > { %5125 = vmatmul.bf16.gmra.mxu1 %v5023_v16  ;;  %5148 = vmatmul.bf16.gmra.mxu3 %v5023_v16  ;;  %v5176_v16 = vsel %vm4608_vm11, %v5172_v29, %v16338_v31  ;;  %v9647_v8 = vor.u32 %v11229_v25, %v9644_v22  ;;  %v9706_v29 = vld [vmem:[#allocation9 + $0x2b0] sm:$0xf]  ;;  %v9695_v25 = vor.u32 %v11241_v51, %v9692_v43  ;;  %v11240_v22 = vld [vmem:[#allocation9 + $0x284] sm:$0xf0]  ;;  %v11283_v51 = vld [vmem:[#allocation9 + $0x3e4] sm:$0xf] }
 0x62e   : > { %5589 = vmatpush.bf16.msrb.mxu2 %v9659_v24  ;;  %v11246_v24 = vld [vmem:[#allocation9 + $0x2b4] sm:$0xf0]  ;;  %v9860_v43 = vld [vmem:[#allocation9 + $0x3e8] sm:$0xf0] }
 0x62f   : > { %v9707_v35 = vor.u32 %v11246_v24, %v9706_v29  ;;  %5614 = vmatpush.bf16.msrb.mxu0 %v9647_v8  ;;  %v5675_v8 = vor.u32 %v16356_v9, %v5671_v39  ;;  %v9619_v29 = vor.u32 %v11224_v36, %v9618_v63  ;;  %v11239_v24 = vld [vmem:[#allocation9 + $0x284] sm:$0xf]  ;;  %v9859_v63 = vor.u32 %v11284_v58, %v9858_v18  ;;  %v11266_v36 = vld [vmem:[#allocation9 + $0x354] sm:$0xf0]  ;;  %v9764_v18 = vld [vmem:[#allocation9 + $0x328] sm:$0xf0] }
 0x630   : > { %v11276_v58 = vld [vmem:[#allocation9 + $0x3a4] sm:$0xf0] }
 0x631   : > { %5771 = vmatpush.bf16.msrb.mxu1 %v9707_v35  ;;  %v5847_v35 = vrot.slane %v16334_v26, 2  ;;  %v16422_v39 = vsel %vm4212_vm10, %v5675_v8, %v5679_v0  ;;  %v9852_v8 = vld [vmem:[#allocation9 + $0x3d8] sm:$0xf0] }
 0x632   : > { %5590 = vmatpush.bf16.msrb.mxu2 %v9651_v60  ;;  %v9703_v60 = vor.u32 %v11243_v21, %v9700_v55  ;;  %v11285_v21 = vld [vmem:[#allocation9 + $0x3f4] sm:$0xf]  ;;  %v9868_v55 = vld [vmem:[#allocation9 + $0x3f8] sm:$0xf0] }
 0x633   : > { %5615 = vmatpush.bf16.msrb.mxu0 %v9639_v14  ;;  %v16424_v19 = vor.u32 %v5848_v20, %v5847_v35  ;;  %v9807_v14 = vor.u32 %v11269_v44, %v9804_v17  ;;  %v9871_v59 = vor.u32 %v11285_v21, %v9868_v55  ;;  %v9778_v35 = vld [vmem:[#allocation9 + $0x340] sm:$0xf]  ;;  %v11264_v20 = vld [vmem:[#allocation9 + $0x344] sm:$0xf0]  ;;  %v11262_v44 = vld [vmem:[#allocation9 + $0x334] sm:$0xf0] }
 0x634   : > { %5795 = vmatpush.bf16.msra.mxu3 %v9703_v60  ;;  %v11267_v60 = vld [vmem:[#allocation9 + $0x364] sm:$0xf]  ;;  %v9834_v21 = vld [vmem:[#allocation9 + $0x3b0] sm:$0xf] }
 0x635   : > { %5772 = vmatpush.bf16.msrb.mxu1 %v9699_v53  ;;  %v16439_v61 = vsel %vm3133_vm6, %v16387_v28, %v16424_v19  ;;  %v11270_v28 = vld [vmem:[#allocation9 + $0x374] sm:$0xf0]  ;;  %v9794_v53 = vld [vmem:[#allocation9 + $0x360] sm:$0xf] }
 0x636   : > { %5591 = vmatpush.bf16.msrb.mxu2 %v9643_v4  ;;  %v9682_v4 = vld [vmem:[#allocation9 + $0x280] sm:$0xf]  ;;  %v9795_v62 = vor.u32 %v11268_v34, %v9794_v53  ;;  %v9836_v53 = vld [vmem:[#allocation9 + $0x3b8] sm:$0xf0] }
 0x637   : > { %5616 = vmatpush.bf16.msrb.mxu0 %v9631_v13  ;;  %v9683_v9 = vor.u32 %v11240_v22, %v9682_v4  ;;  %v9863_v13 = vor.u32 %v11283_v51, %v9860_v43  ;;  %v11281_v22 = vld [vmem:[#allocation9 + $0x3d4] sm:$0xf]  ;;  %v11275_v43 = vld [vmem:[#allocation9 + $0x3a4] sm:$0xf] }
 0x638   : > { %5796 = vmatpush.bf16.msra.mxu3 %v9695_v25  ;;  %v11282_v25 = vld [vmem:[#allocation9 + $0x3d4] sm:$0xf0] }
 0x639   : > { %5773 = vmatpush.bf16.msrb.mxu1 %v9691_v3  ;;  %v9786_v3 = vld [vmem:[#allocation9 + $0x350] sm:$0xf] }
 0x63b   : > { %5272 = vmatmul.bf16.vlgmr.msra.gmra.mxu2 %v5176_v16  ;;  %5295 = vmatmul.bf16.vlgmr.msra.gmra.mxu0 %v5176_v16  ;;  %v9635_v16 = vor.u32 %v11228_v6, %v9634_v46  ;;  %v5180_v46 = vsel %vm4608_vm11, %v16338_v31, %v5179_v49  ;;  %v9687_v6 = vor.u32 %v11239_v24, %v9684_v48  ;;  %v9802_v31 = vld [vmem:[#allocation9 + $0x370] sm:$0xf] }
 0x63c   : > { %v9803_v57 = vor.u32 %v11270_v28, %v9802_v31  ;;  %v9855_v24 = vor.u32 %v11281_v22, %v9852_v8  ;;  %v9779_v48 = vor.u32 %v11264_v20, %v9778_v35  ;;  %v9844_v31 = vld [vmem:[#allocation9 + $0x3c8] sm:$0xf0]  ;;  %v9770_v28 = vld [vmem:[#allocation9 + $0x330] sm:$0xf]  ;;  %v11273_v22 = vld [vmem:[#allocation9 + $0x394] sm:$0xf] }
 0x63d   : > { %5439 = vmatmul.bf16.vlgmr.msra.gmra.mxu1 %v5343_v1  ;;  %5462 = vmatmul.bf16.vlgmr.msrb.gmra.mxu3 %v5343_v1  ;;  %v9620_v1 = vld [vmem:[#allocation9 + $0x208] sm:$0xf0]  ;;  %v9771_v17 = vor.u32 %v11262_v44, %v9770_v28  ;;  %v9746_v35 = vld [vmem:[#allocation9 + $0x300] sm:$0xf]  ;;  %v11256_v20 = vld [vmem:[#allocation9 + $0x304] sm:$0xf0] }
 0x63e   : > { %5592 = vmatpush.bf16.msrb.mxu2 %v9635_v16  ;;  %v9623_v56 = vor.u32 %v11223_v40, %v9620_v1  ;;  %v5347_v16 = vsel %vm3789_vm9, %v16363_v30, %v5346_v23  ;;  %5774 = vmatpush.bf16.msrb.mxu1 %v9683_v9  ;;  %v9867_v30 = vor.u32 %v11286_v5, %v9866_v38  ;;  %v11265_v40 = vld [vmem:[#allocation9 + $0x354] sm:$0xf]  ;;  %v9842_v9 = vld [vmem:[#allocation9 + $0x3c0] sm:$0xf]  ;;  %v9772_v38 = vld [vmem:[#allocation9 + $0x338] sm:$0xf0] }
 0x63f   : > { %5797 = vmatpush.bf16.msra.mxu3 %v9687_v6  ;;  %v9787_v1 = vor.u32 %v11266_v36, %v9786_v3  ;;  %v11279_v6 = vld [vmem:[#allocation9 + $0x3c4] sm:$0xf]  ;;  %v11258_v36 = vld [vmem:[#allocation9 + $0x314] sm:$0xf0] }
 0x640   : > { %5617 = vmatpush.bf16.msrb.mxu0 %v9623_v56  ;;  %v11263_v56 = vld [vmem:[#allocation9 + $0x344] sm:$0xf] }
 0x641   : > { %v9783_v54 = vor.u32 %v11263_v56, %v9780_v45  ;;  %v11255_v56 = vld [vmem:[#allocation9 + $0x304] sm:$0xf]  ;;  %v9748_v45 = vld [vmem:[#allocation9 + $0x308] sm:$0xf0] }
 0x642   : > { %5593 = vmatpush.bf16.msrb.mxu2 %v9627_v32  ;;  %v9796_v32 = vld [vmem:[#allocation9 + $0x368] sm:$0xf0]  ;;  %6098 = vmatpush.bf16.msra.mxu1 %v9867_v30  ;;  %v11278_v30 = vld [vmem:[#allocation9 + $0x3b4] sm:$0xf0] }
 0x643   : > { %v9799_v42 = vor.u32 %v11267_v60, %v9796_v32  ;;  %6121 = vmatpush.bf16.msrb.mxu3 %v9871_v59  ;;  %v9835_v55 = vor.u32 %v11278_v30, %v9834_v21  ;;  %v9762_v59 = vld [vmem:[#allocation9 + $0x320] sm:$0xf]  ;;  %v11259_v60 = vld [vmem:[#allocation9 + $0x324] sm:$0xf]  ;;  %v9932_v30 = vld [vmem:[#allocation9 + $0x478] sm:$0xf0] }
 0x644   : > { %5957 = vmatpush.bf16.msra.mxu0 %v9807_v14  ;;  %v11261_v14 = vld [vmem:[#allocation9 + $0x334] sm:$0xf] }
 0x645   : > { %v9775_v5 = vor.u32 %v11261_v14, %v9772_v38  ;;  %v9930_v14 = vld [vmem:[#allocation9 + $0x470] sm:$0xf]  ;;  %v11302_v38 = vld [vmem:[#allocation9 + $0x474] sm:$0xf0] }
 0x646   : > { %5594 = vmatpush.bf16.msrb.mxu2 %v9619_v29  ;;  %6099 = vmatpush.bf16.msra.mxu1 %v9859_v63  ;;  %v9828_v63 = vld [vmem:[#allocation9 + $0x3a8] sm:$0xf0]  ;;  %v9931_v21 = vor.u32 %v11302_v38, %v9930_v14 }
 0x647   : > { %6122 = vmatpush.bf16.msrb.mxu3 %v9863_v13  ;;  %v9754_v13 = vld [vmem:[#allocation9 + $0x310] sm:$0xf]  ;;  %v9831_v3 = vor.u32 %v11275_v43, %v9828_v63 }
 0x648   : > { %5958 = vmatpush.bf16.msra.mxu0 %v9799_v42  ;;  %v9826_v42 = vld [vmem:[#allocation9 + $0x3a0] sm:$0xf] }
 0x649   : > { %v9827_v51 = vor.u32 %v11276_v58, %v9826_v42  ;;  %v11297_v58 = vld [vmem:[#allocation9 + $0x454] sm:$0xf] }
 0x64a   : > { %5934 = vmatpush.bf16.msra.mxu2 %v9803_v57  ;;  %v9847_v57 = vor.u32 %v11279_v6, %v9844_v31  ;;  %v9812_v31 = vld [vmem:[#allocation9 + $0x388] sm:$0xf0] }
 0x64b   : > { %5277 = vmatmul.bf16.gmra.mxu2 %v5180_v46  ;;  %5300 = vmatmul.bf16.gmra.mxu0 %v5180_v46  ;;  %v11280_v46 = vld [vmem:[#allocation9 + $0x3c4] sm:$0xf0] }
 0x64c   : > { %6123 = vmatpush.bf16.msrb.mxu3 %v9855_v24 }
 0x64d   : > { %5444 = vmatmul.bf16.gmra.mxu1 %v5347_v16  ;;  %5467 = vmatmul.bf16.gmra.mxu3 %v5347_v16  ;;  %v9843_v16 = vor.u32 %v11280_v46, %v9842_v9  ;;  %v11272_v9 = vld [vmem:[#allocation9 + $0x384] sm:$0xf0]  ;;  %v9751_v46 = vor.u32 %v11255_v56, %v9748_v45 }
 0x64e   : > { %5935 = vmatpush.bf16.msra.mxu2 %v9795_v62  ;;  %v11260_v62 = vld [vmem:[#allocation9 + $0x324] sm:$0xf0] }
 0x64f   : > { %v9763_v32 = vor.u32 %v11260_v62, %v9762_v59 }
 0x650   : > { %6124 = vmatpush.bf16.msrb.mxu3 %v9847_v57  ;;  %v5489_v57 = vpack.c.bf16 %v16285_v10, %v16285_v10 }
 0x652   : > { %5936 = vmatpush.bf16.msra.mxu2 %v9787_v1  ;;  %v9756_v1 = vld [vmem:[#allocation9 + $0x318] sm:$0xf0] }
 0x656   : > { %5937 = vmatpush.bf16.msra.mxu2 %v9779_v48  ;;  %v9747_v48 = vor.u32 %v11256_v20, %v9746_v35  ;;  %v9900_v35 = vld [vmem:[#allocation9 + $0x438] sm:$0xf0] }
 0x65a   : > { %5938 = vmatpush.bf16.msra.mxu2 %v9771_v17 }
 0x65b   : > { %5282 = vmatmul.bf16.gmra.mxu2 %v5179_v49  ;;  %5305 = vmatmul.bf16.gmra.mxu0 %v5179_v49  ;;  %v9788_v49 = vld [vmem:[#allocation9 + $0x358] sm:$0xf0] }
 0x65c   : > { %v9791_v4 = vor.u32 %v11265_v40, %v9788_v49  ;;  %v11257_v40 = vld [vmem:[#allocation9 + $0x314] sm:$0xf]  ;;  %v9755_v49 = vor.u32 %v11258_v36, %v9754_v13  ;;  %v9906_v36 = vld [vmem:[#allocation9 + $0x440] sm:$0xf] }
 0x65d   : > { %5449 = vmatmul.bf16.gmra.mxu1 %v5346_v23  ;;  %5472 = vmatmul.bf16.gmra.mxu3 %v5346_v23  ;;  %v9850_v23 = vld [vmem:[#allocation9 + $0x3d0] sm:$0xf] }
 0x65e   : > { %v9851_v29 = vor.u32 %v11282_v25, %v9850_v23  ;;  %5959 = vmatpush.bf16.msra.mxu0 %v9791_v4  ;;  %5939 = vmatpush.bf16.msra.mxu2 %v9763_v32  ;;  %v9759_v23 = vor.u32 %v11257_v40, %v9756_v1  ;;  %v9818_v25 = vld [vmem:[#allocation9 + $0x390] sm:$0xf]  ;;  %v11274_v4 = vld [vmem:[#allocation9 + $0x394] sm:$0xf0]  ;;  %v11296_v40 = vld [vmem:[#allocation9 + $0x444] sm:$0xf0] }
 0x65f   : > { %v9819_v8 = vor.u32 %v11274_v4, %v9818_v25  ;;  %v9914_v32 = vld [vmem:[#allocation9 + $0x450] sm:$0xf]  ;;  %v11295_v1 = vld [vmem:[#allocation9 + $0x444] sm:$0xf]  ;;  %v9908_v25 = vld [vmem:[#allocation9 + $0x448] sm:$0xf0] }
 0x660   : > { %6100 = vmatpush.bf16.msra.mxu1 %v9851_v29  ;;  %v9820_v29 = vld [vmem:[#allocation9 + $0x398] sm:$0xf0]  ;;  %v9911_v4 = vor.u32 %v11295_v1, %v9908_v25 }
 0x661   : > { %v9823_v24 = vor.u32 %v11273_v22, %v9820_v29  ;;  %v9898_v22 = vld [vmem:[#allocation9 + $0x430] sm:$0xf]  ;;  %v11293_v29 = vld [vmem:[#allocation9 + $0x434] sm:$0xf] }
 0x662   : > { %5960 = vmatpush.bf16.msra.mxu0 %v9783_v54  ;;  %5940 = vmatpush.bf16.msra.mxu2 %v9755_v49  ;;  %v9810_v54 = vld [vmem:[#allocation9 + $0x380] sm:$0xf]  ;;  %v9903_v56 = vor.u32 %v11293_v29, %v9900_v35 }
 0x663   : > { %v9811_v6 = vor.u32 %v11272_v9, %v9810_v54  ;;  %v9890_v9 = vld [vmem:[#allocation9 + $0x420] sm:$0xf] }
 0x664   : > { %6101 = vmatpush.bf16.msra.mxu1 %v9843_v16  ;;  %v11271_v16 = vld [vmem:[#allocation9 + $0x384] sm:$0xf] }
 0x665   : > { %v9815_v28 = vor.u32 %v11271_v16, %v9812_v31 }
 0x666   : > { %5961 = vmatpush.bf16.msra.mxu0 %v9775_v5  ;;  %5941 = vmatpush.bf16.msra.mxu2 %v9747_v48  ;;  %v11301_v5 = vld [vmem:[#allocation9 + $0x474] sm:$0xf] }
 0x668   : > { %6102 = vmatpush.bf16.msra.mxu1 %v9835_v55 }
 0x66b   : > { %5595 = vmatmul.bf16.vlgmr.msrb.gmra.mxu2 %v16304_v52  ;;  %5618 = vmatmul.bf16.vlgmr.msrb.gmra.mxu0 %v16304_v52  ;;  %v11277_v52 = vld [vmem:[#allocation9 + $0x3b4] sm:$0xf] }
 0x66c   : > { %v9839_v34 = vor.u32 %v11277_v52, %v9836_v53  ;;  %6103 = vmatpush.bf16.msra.mxu1 %v9827_v51  ;;  %6265 = vmatpush.bf16.msrb.mxu2 %v9931_v21 }
 0x66d   : > { %5775 = vmatmul.bf16.vlgmr.msrb.gmra.mxu1 %v16385_v11  ;;  %5798 = vmatmul.bf16.vlgmr.msra.gmra.mxu3 %v16385_v11  ;;  %v9767_v11 = vor.u32 %v11259_v60, %v9764_v18  ;;  %v9924_v60 = vld [vmem:[#allocation9 + $0x468] sm:$0xf0]  ;;  %v11298_v18 = vld [vmem:[#allocation9 + $0x454] sm:$0xf0] }
 0x66e   : > { %6125 = vmatpush.bf16.msrb.mxu3 %v9839_v34  ;;  %v9915_v51 = vor.u32 %v11298_v18, %v9914_v32 }
 0x66f   : > { %5962 = vmatpush.bf16.msra.mxu0 %v9767_v11  ;;  %v9916_v11 = vld [vmem:[#allocation9 + $0x458] sm:$0xf0] }
 0x670   : > { %6104 = vmatpush.bf16.msra.mxu1 %v9819_v8  ;;  %v9919_v43 = vor.u32 %v11297_v58, %v9916_v11  ;;  %v11294_v8 = vld [vmem:[#allocation9 + $0x434] sm:$0xf0] }
 0x672   : > { %6126 = vmatpush.bf16.msrb.mxu3 %v9831_v3 }
 0x673   : > { %5963 = vmatpush.bf16.msra.mxu0 %v9759_v23  ;;  %v9907_v23 = vor.u32 %v11296_v40, %v9906_v36 }
 0x674   : > { %6105 = vmatpush.bf16.msra.mxu1 %v9811_v6  ;;  %v11291_v6 = vld [vmem:[#allocation9 + $0x424] sm:$0xf] }
 0x676   : > { %6127 = vmatpush.bf16.msrb.mxu3 %v9823_v24  ;;  %v9899_v24 = vor.u32 %v11294_v8, %v9898_v22 }
 0x677   : > { %5964 = vmatpush.bf16.msra.mxu0 %v9751_v46  ;;  %v11292_v46 = vld [vmem:[#allocation9 + $0x424] sm:$0xf0] }
 0x678   : > { %v9891_v31 = vor.u32 %v11292_v46, %v9890_v9 }
 0x67a   : > { %6128 = vmatpush.bf16.msrb.mxu3 %v9815_v28  ;;  %v9892_v28 = vld [vmem:[#allocation9 + $0x428] sm:$0xf0] }
 0x67b   : > { %5600 = vmatmul.bf16.gmra.mxu2 %v16342_v41  ;;  %5623 = vmatmul.bf16.gmra.mxu0 %v16342_v41  ;;  %v5683_v41 = vor.u32 %v16334_v26, %v5679_v0  ;;  %v11300_v26 = vld [vmem:[#allocation9 + $0x464] sm:$0xf0]  ;;  %v11299_v0 = vld [vmem:[#allocation9 + $0x464] sm:$0xf] }
 0x67c   : > { %v9923_v62 = vor.u32 %v11300_v26, %v9922_v37  ;;  %v9927_v42 = vor.u32 %v11299_v0, %v9924_v60  ;;  %v9876_v0 = vld [vmem:[#allocation9 + $0x408] sm:$0xf0] }
 0x67d   : > { %5780 = vmatmul.bf16.gmra.mxu1 %v16422_v39  ;;  %5803 = vmatmul.bf16.gmra.mxu3 %v16422_v39  ;;  %v9935_v39 = vor.u32 %v11301_v5, %v9932_v30 }
 0x67e   : > { %6266 = vmatpush.bf16.msrb.mxu2 %v9923_v62 }
 0x67f   : > { %6288 = vmatpush.bf16.msrb.mxu0 %v9935_v39  ;;  %v9874_v39 = vld [vmem:[#allocation9 + $0x400] sm:$0xf] }
 0x682   : > { %6267 = vmatpush.bf16.msrb.mxu2 %v9915_v51 }
 0x683   : > { %6289 = vmatpush.bf16.msrb.mxu0 %v9927_v42 }
 0x686   : > { %6268 = vmatpush.bf16.msrb.mxu2 %v9907_v23 }
 0x687   : > { %6290 = vmatpush.bf16.msrb.mxu0 %v9919_v43 }
 0x688   : > { %v4987_v44 = vpop.f32.mrf.mxu0 }
 0x68a   : > { %v5116_v17 = vpop.f32.mrf.mxu1  ;;  %6269 = vmatpush.bf16.msrb.mxu2 %v9899_v24 }
 0x68b   : > { %5605 = vmatmul.bf16.gmra.mxu2 %v5489_v57  ;;  %5628 = vmatmul.bf16.gmra.mxu0 %v5489_v57  ;;  %v9895_v57 = vor.u32 %v11291_v6, %v9892_v28 }
 0x68c   : > { %6291 = vmatpush.bf16.msrb.mxu0 %v9911_v4 }
 0x68d   : > { %5785 = vmatmul.bf16.gmra.mxu1 %v5683_v41  ;;  %5808 = vmatmul.bf16.gmra.mxu3 %v5683_v41  ;;  %v9884_v41 = vld [vmem:[#allocation9 + $0x418] sm:$0xf0] }
 0x68e   : > { %v4964_v52 = vpop.f32.mrf.mxu2  ;;  %6270 = vmatpush.bf16.msrb.mxu2 %v9891_v31 }
 0x68f   : > { %v16461_v55 = vadd.f32 %v5116_v17, %v4964_v52  ;;  %v11289_v17 = vld [vmem:[#allocation9 + $0x414] sm:$0xf]  ;;  %v11288_v52 = vld [vmem:[#allocation9 + $0x404] sm:$0xf0] }
 0x690   : > { %v16463_v10 = vpop.f32.mrf.mxu0  ;;  %v5139_v53 = vpop.f32.mrf.mxu3  ;;  %6292 = vmatpush.bf16.msrb.mxu0 %v9903_v56  ;;  %v9887_v5 = vor.u32 %v11289_v17, %v9884_v41  ;;  %v9875_v26 = vor.u32 %v11288_v52, %v9874_v39 }
 0x691   : > { %v16465_v34 = vadd.f32 %v5139_v53, %v4987_v44  ;;  %v9882_v44 = vld [vmem:[#allocation9 + $0x410] sm:$0xf]  ;;  %v11287_v53 = vld [vmem:[#allocation9 + $0x404] sm:$0xf] }
 0x692   : > { %v16467_v59 = vpop.f32.mrf.mxu1  ;;  %v9879_v62 = vor.u32 %v11287_v53, %v9876_v0 }
 0x694   : > { %6293 = vmatpush.bf16.msrb.mxu0 %v9895_v57 }
 0x696   : > { %v16469_v63 = vpop.f32.mrf.mxu2 }
 0x698   : > { %v4992_v13 = vpop.f32.mrf.mxu0  ;;  %v16471_v3 = vpop.f32.mrf.mxu3  ;;  %6294 = vmatpush.bf16.msrb.mxu0 %v9887_v5 }
 0x69a   : > { %v5121_v49 = vpop.f32.mrf.mxu1 }
 0x69b   : > { %5942 = vmatmul.bf16.vlgmr.msra.gmra.mxu2 %v16397_v50  ;;  %5965 = vmatmul.bf16.vlgmr.msra.gmra.mxu0 %v16397_v50 }
 0x69c   : > { %6295 = vmatpush.bf16.msrb.mxu0 %v9879_v62 }
 0x69d   : > { %6106 = vmatmul.bf16.vlgmr.msra.gmra.mxu1 %v16376_v2  ;;  %6129 = vmatmul.bf16.vlgmr.msrb.gmra.mxu3 %v16376_v2  ;;  %v11290_v2 = vld [vmem:[#allocation9 + $0x414] sm:$0xf0] }
 0x69e   : > { %v4969_v20 = vpop.f32.mrf.mxu2  ;;  %v9883_v14 = vor.u32 %v11290_v2, %v9882_v44 }
 0x69f   : > { %v16477_v48 = vadd.f32 %v5121_v49, %v4969_v20 }
 0x6a0   : > { %v16479_v45 = vpop.f32.mrf.mxu0  ;;  %v5144_v54 = vpop.f32.mrf.mxu3  ;;  %6271 = vmatpush.bf16.msrb.mxu2 %v9883_v14 }
 0x6a1   : > { %v5145_v50 = vadd.f32 %v5144_v54, %v4992_v13 }
 0x6a2   : > { %v16481_v16 = vpop.f32.mrf.mxu1 }
 0x6a4   : > { %6272 = vmatpush.bf16.msrb.mxu2 %v9875_v26 }
 0x6a6   : > { %v16483_v38 = vpop.f32.mrf.mxu2 }
 0x6a8   : > { %v4997_v21 = vpop.f32.mrf.mxu0  ;;  %v16485_v30 = vpop.f32.mrf.mxu3 }
 0x6aa   : > { %v5126_v37 = vpop.f32.mrf.mxu1 }
 0x6ab   : > { %5947 = vmatmul.bf16.gmra.mxu2 %v16439_v61  ;;  %5970 = vmatmul.bf16.gmra.mxu0 %v16439_v61 }
 0x6ad   : > { %6111 = vmatmul.bf16.gmra.mxu1 %v16430_v33  ;;  %6134 = vmatmul.bf16.gmra.mxu3 %v16430_v33 }
 0x6ae   : > { %v4974_v60 = vpop.f32.mrf.mxu2 }
 0x6af   : > { %v5127_v32 = vadd.f32 %v5126_v37, %v4974_v60 }
 0x6b0   : > { %v4999_v18 = vpop.f32.mrf.mxu0  ;;  %v5149_v42 = vpop.f32.mrf.mxu3 }
 0x6b1   : > { %v5150_v58 = vadd.f32 %v5149_v42, %v4997_v21 }
 0x6b2   : > { %v5128_v11 = vpop.f32.mrf.mxu1 }
 0x6b6   : > { %v4976_v51 = vpop.f32.mrf.mxu2 }
 0x6b8   : > { %v5151_v43 = vpop.f32.mrf.mxu3  ;;  %v5296_v13 = vpop.f32.mrf.mxu0 }
 0x6b9   : > { %v5311_v36 = vadd.f32 %v5296_v13, %v16465_v34 }
 0x6ba   : > { %v5440_v40 = vpop.f32.mrf.mxu1 }
 0x6bb   : > { %5952 = vmatmul.bf16.gmra.mxu2 %v16424_v19  ;;  %5975 = vmatmul.bf16.gmra.mxu0 %v16424_v19 }
 0x6bd   : > { %6116 = vmatmul.bf16.gmra.mxu1 %v16415_v27  ;;  %6139 = vmatmul.bf16.gmra.mxu3 %v16415_v27 }
 0x6be   : > { %v5273_v33 = vpop.f32.mrf.mxu2 }
 0x6bf   : > { %v5310_v61 = vadd.f32 %v5273_v33, %v16461_v55 }
 0x6c0   : > { %v16497_v1 = vpop.f32.mrf.mxu0  ;;  %v5463_v49 = vpop.f32.mrf.mxu3 }
 0x6c1   : > { %v5478_v23 = vadd.f32 %v5463_v49, %v5311_v36  ;;  %v5477_v27 = vadd.f32 %v5440_v40, %v5310_v61 }
 0x6c2   : > { %v16499_v25 = vpop.f32.mrf.mxu1 }
 0x6c6   : > { %v16501_v4 = vpop.f32.mrf.mxu2 }
 0x6c8   : > { %v5301_v34 = vpop.f32.mrf.mxu0  ;;  %v16503_v22 = vpop.f32.mrf.mxu3 }
 0x6c9   : > { %v5315_v8 = vadd.f32 %v5301_v34, %v5145_v50 }
 0x6ca   : > { %v5445_v19 = vpop.f32.mrf.mxu1 }
 0x6cb   : > { %6273 = vmatmul.bf16.vlgmr.msrb.gmra.mxu2 %v16402_v47  ;;  %6296 = vmatmul.bf16.vlgmr.msrb.gmra.mxu0 %v16402_v47 }
 0x6ce   : > { %v5278_v29 = vpop.f32.mrf.mxu2 }
 0x6cf   : > { %v5314_v55 = vadd.f32 %v5278_v29, %v16477_v48 }
 0x6d0   : > { %v16508_v24 = vpop.f32.mrf.mxu0  ;;  %v5468_v35 = vpop.f32.mrf.mxu3 }
 0x6d1   : > { %v5482_v20 = vadd.f32 %v5468_v35, %v5315_v8  ;;  %v5481_v31 = vadd.f32 %v5445_v19, %v5314_v55 }
 0x6d2   : > { %v16510_v56 = vpop.f32.mrf.mxu1 }
 0x6d6   : > { %v16512_v54 = vpop.f32.mrf.mxu2 }
 0x6d8   : > { %v5306_v9 = vpop.f32.mrf.mxu0  ;;  %v16514_v46 = vpop.f32.mrf.mxu3 }
 0x6d9   : > { %v5319_v50 = vadd.f32 %v5306_v9, %v5150_v58 }
 0x6da   : > { %v5450_v6 = vpop.f32.mrf.mxu1 }
 0x6db   : > { %6278 = vmatmul.bf16.gmra.mxu2 %v16444_v12  ;;  %6301 = vmatmul.bf16.gmra.mxu0 %v16444_v12 }
 0x6de   : > { %v5283_v47 = vpop.f32.mrf.mxu2 }
 0x6df   : > { %v5318_v48 = vadd.f32 %v5283_v47, %v5127_v32 }
 0x6e0   : > { %v5308_v28 = vpop.f32.mrf.mxu0  ;;  %v5473_v44 = vpop.f32.mrf.mxu3 }
 0x6e1   : > { %v5486_v2 = vadd.f32 %v5473_v44, %v5319_v50  ;;  %v5485_v39 = vadd.f32 %v5450_v6, %v5318_v48 }
 0x6e2   : > { %v5452_v57 = vpop.f32.mrf.mxu1 }
 0x6e6   : > { %v5285_v17 = vpop.f32.mrf.mxu2 }
 0x6e8   : > { %v5475_v41 = vpop.f32.mrf.mxu3  ;;  %v5619_v14 = vpop.f32.mrf.mxu0 }
 0x6e9   : > { %v5634_v5 = vadd.f32 %v5619_v14, %v5478_v23 }
 0x6ea   : > { %v5776_v21 = vpop.f32.mrf.mxu1 }
 0x6eb   : > { %6283 = vmatmul.bf16.gmra.mxu2 %v16432_v7  ;;  %6306 = vmatmul.bf16.gmra.mxu0 %v16432_v7 }
 0x6ee   : > { %v5596_v52 = vpop.f32.mrf.mxu2 }
 0x6ef   : > { %v5633_v53 = vadd.f32 %v5596_v52, %v5477_v27  ;;  %v5147_v52 = vadd.f32 %v16485_v30, %v16479_v45 }
 0x6f0   : > { %v16520_v37 = vpop.f32.mrf.mxu0  ;;  %v5799_v12 = vpop.f32.mrf.mxu3 }
 0x6f1   : > { %v5814_v26 = vadd.f32 %v5799_v12, %v5634_v5  ;;  %v5813_v58 = vadd.f32 %v5776_v21, %v5633_v53 }
 0x6f2   : > { %v16522_v0 = vpop.f32.mrf.mxu1 }
 0x6f6   : > { %v16524_v62 = vpop.f32.mrf.mxu2 }
 0x6f8   : > { %v5624_v60 = vpop.f32.mrf.mxu0  ;;  %v16526_v32 = vpop.f32.mrf.mxu3 }
 0x6f9   : > { %v5638_v18 = vadd.f32 %v5624_v60, %v5482_v20 }
 0x6fa   : > { %v5781_v42 = vpop.f32.mrf.mxu1 }
 0x6fe   : > { %v5601_v11 = vpop.f32.mrf.mxu2 }
 0x6ff   : > { %v5637_v51 = vadd.f32 %v5601_v11, %v5481_v31 }
 0x700   : > { %v5626_v43 = vpop.f32.mrf.mxu0  ;;  %v5804_v7 = vpop.f32.mrf.mxu3 }
 0x701   : > { %v5818_v13 = vadd.f32 %v5804_v7, %v5638_v18  ;;  %v5817_v34 = vadd.f32 %v5781_v42, %v5637_v51 }
 0x702   : > { %v16528_v36 = vpop.f32.mrf.mxu1 }
 0x706   : > { %v16530_v40 = vpop.f32.mrf.mxu2 }
 0x708   : > { %v5629_v33 = vpop.f32.mrf.mxu0  ;;  %v5806_v61 = vpop.f32.mrf.mxu3 }
 0x709   : > { %v5642_v49 = vadd.f32 %v5629_v33, %v5486_v2 }
 0x70a   : > { %v5786_v23 = vpop.f32.mrf.mxu1 }
 0x70e   : > { %v5606_v8 = vpop.f32.mrf.mxu2 }
 0x70f   : > { %v5641_v19 = vadd.f32 %v5606_v8, %v5485_v39 }
 0x710   : > { %v5631_v27 = vpop.f32.mrf.mxu0  ;;  %v5809_v29 = vpop.f32.mrf.mxu3 }
 0x711   : > { %v16532_v55 = vadd.f32 %v5809_v29, %v5642_v49  ;;  %v16534_v47 = vadd.f32 %v5786_v23, %v5641_v19  ;;  %v5119_v29 = vadd.f32 %v16467_v59, %v16469_v63 }
 0x712   : > { %v5788_v35 = vpop.f32.mrf.mxu1 }
 0x716   : > { %v5608_v20 = vpop.f32.mrf.mxu2 }
 0x718   : > { %v5811_v9 = vpop.f32.mrf.mxu3  ;;  %v5966_v50 = vpop.f32.mrf.mxu0 }
 0x719   : > { %v5981_v6 = vadd.f32 %v5966_v50, %v5814_v26  ;;  %v5317_v26 = vadd.f32 %v16508_v24, %v5147_v52  ;;  %v5142_v50 = vadd.f32 %v16471_v3, %v16463_v10 }
 0x71a   : > { %v6107_v31 = vpop.f32.mrf.mxu1 }
 0x71e   : > { %v5943_v48 = vpop.f32.mrf.mxu2 }
 0x71f   : > { %v5980_v28 = vadd.f32 %v5943_v48, %v5813_v58  ;;  %v5484_v58 = vadd.f32 %v16514_v46, %v5317_v26 }
 0x720   : > { %v5968_v44 = vpop.f32.mrf.mxu0  ;;  %v6130_v2 = vpop.f32.mrf.mxu3 }
 0x721   : > { %v6145_v57 = vadd.f32 %v6130_v2, %v5981_v6  ;;  %v6144_v53 = vadd.f32 %v6107_v31, %v5980_v28  ;;  %v5640_v7 = vadd.f32 %v5626_v43, %v5484_v58  ;;  %v5312_v43 = vadd.f32 %v16501_v4, %v5119_v29 }
 0x722   : > { %v6109_v17 = vpop.f32.mrf.mxu1  ;;  %v5313_v31 = vadd.f32 %v16497_v1, %v5142_v50 }
 0x723   : > { %v5820_v33 = vadd.f32 %v5806_v61, %v5640_v7  ;;  %v5479_v9 = vadd.f32 %v16499_v25, %v5312_v43  ;;  %v6321_v25 = vld [vmem:[#allocation10] sm:$0x3] }
 0x724   : > { %v5480_v28 = vadd.f32 %v16503_v22, %v5313_v31  ;;  %v6323_v3 = vperm.slane %v6321_v25, 0 }
 0x725   : > { %v5635_v6 = vadd.f32 %v16524_v62, %v5479_v9 }
 0x726   : > { %v5945_v41 = vpop.f32.mrf.mxu2  ;;  %v5636_v63 = vadd.f32 %v16520_v37, %v5480_v28 }
 0x727   : > { %v5815_v2 = vadd.f32 %v16522_v0, %v5635_v6 }
 0x728   : > { %v5971_v14 = vpop.f32.mrf.mxu0  ;;  %v6132_v5 = vpop.f32.mrf.mxu3 }
 0x729   : > { %v5985_v21 = vadd.f32 %v5971_v14, %v5818_v13  ;;  %v5982_v4 = vadd.f32 %v5945_v41, %v5815_v2  ;;  %v5124_v14 = vadd.f32 %v16481_v16, %v16483_v38 }
 0x72a   : > { %v6112_v39 = vpop.f32.mrf.mxu1 }
 0x72b   : > { %v5316_v62 = vadd.f32 %v16512_v54, %v5124_v14 }
 0x72d   : > { %v5483_v26 = vadd.f32 %v16510_v56, %v5316_v62  ;;  %v10002_v62 = vld [vmem:[#allocation12 + $0x178] sm:$0xf0] }
 0x72e   : > { %v5948_v12 = vpop.f32.mrf.mxu2 }
 0x72f   : > { %v5984_v60 = vadd.f32 %v5948_v12, %v5817_v34  ;;  %v5639_v16 = vadd.f32 %v16530_v40, %v5483_v26  ;;  %v11347_v26 = vld [vmem:[#allocation12 + $0x154] sm:$0xf0] }
 0x730   : > { %v5973_v18 = vpop.f32.mrf.mxu0  ;;  %v6135_v42 = vpop.f32.mrf.mxu3 }
 0x731   : > { %v6149_v11 = vadd.f32 %v6135_v42, %v5985_v21  ;;  %v5987_v13 = vadd.f32 %v5973_v18, %v5820_v33  ;;  %v6148_v19 = vadd.f32 %v6112_v39, %v5984_v60  ;;  %v5816_v21 = vadd.f32 %v16526_v32, %v5636_v63 }
 0x732   : > { %v16540_v51 = vpop.f32.mrf.mxu1  ;;  %v6146_v39 = vadd.f32 %v6109_v17, %v5982_v4  ;;  %v6324_v18 = vperm.slane %v6321_v25, 1  ;;  %v5819_v17 = vadd.f32 %v16528_v36, %v5639_v16  ;;  %v10000_v25 = vld [vmem:[#allocation12 + $0x170] sm:$0xf] }
 0x733   : > { %v5983_v1 = vadd.f32 %v5968_v44, %v5816_v21  ;;  %v11351_v21 = vld [vmem:[#allocation12 + $0x174] sm:$0xf0]  ;;  %v10064_v16 = vld [vmem:[#allocation12 + $0x1f0] sm:$0xf] }
 0x735   : > { %v6147_v22 = vadd.f32 %v6132_v5, %v5983_v1  ;;  %v9992_v1 = vld [vmem:[#allocation12 + $0x160] sm:$0xf] }
 0x736   : > { %v5950_v49 = vpop.f32.mrf.mxu2 }
 0x737   : > { %v5986_v33 = vadd.f32 %v5950_v49, %v5819_v17 }
 0x738   : > { %v16542_v23 = vpop.f32.mrf.mxu0  ;;  %v6137_v8 = vpop.f32.mrf.mxu3 }
 0x739   : > { %v6151_v45 = vadd.f32 %v6137_v8, %v5987_v13  ;;  %v6150_v43 = vadd.f32 %v16540_v51, %v5986_v33  ;;  %v11365_v33 = vld [vmem:[#allocation12 + $0x1e4] sm:$0xf0] }
 0x73a   : > { %v16544_v30 = vpop.f32.mrf.mxu1 }
 0x73e   : > { %v16546_v24 = vpop.f32.mrf.mxu2 }
 0x73f   : > { %v5988_v49 = vadd.f32 %v16546_v24, %v16534_v47  ;;  %v10001_v24 = vor.u32 %v11351_v21, %v10000_v25  ;;  %v10058_v21 = vld [vmem:[#allocation12 + $0x1e8] sm:$0xf0] }
 0x740   : > { %v5978_v34 = vpop.f32.mrf.mxu0  ;;  %v16548_v27 = vpop.f32.mrf.mxu3 }
 0x741   : > { %v6152_v31 = vadd.f32 %v16544_v30, %v5988_v49  ;;  %v11348_v30 = vld [vmem:[#allocation12 + $0x164] sm:$0xf]  ;;  %6640 = vmatpush.bf16.msra.mxu3 %v10001_v24  ;;  %v11366_v49 = vld [vmem:[#allocation12 + $0x1f4] sm:$0xf]  ;;  %v11339_v24 = vld [vmem:[#allocation12 + $0x114] sm:$0xf0] }
 0x742   : > { %v6119_v46 = vpop.f32.mrf.mxu1 }
 0x746   : > { %v5955_v61 = vpop.f32.mrf.mxu2 }
 0x748   : > { %v6142_v35 = vpop.f32.mrf.mxu3  ;;  %v6297_v20 = vpop.f32.mrf.mxu0 }
 0x749   : > { %v6312_v38 = vadd.f32 %v6297_v20, %v6145_v57 }
 0x74b   : > { %v6328_v5 = vadd.f32 %v6324_v18, %v6312_v38 }
 0x74d   : > { %v6338_v34 = vmax.f32 %v6328_v5, 0.0  ;;  %v9978_v5 = vld [vmem:[#allocation12 + $0x148] sm:$0xf0] }
 0x74e   : > { %v6274_v48 = vpop.f32.mrf.mxu2 }
 0x74f   : > { %v6311_v10 = vadd.f32 %v6274_v48, %v6144_v53 }
 0x750   : > { %v6299_v59 = vpop.f32.mrf.mxu0 }
 0x751   : > { %v6327_v12 = vadd.f32 %v6323_v3, %v6311_v10  ;;  %v6314_v41 = vadd.f32 %v6299_v59, %v6147_v22  ;;  %v11350_v10 = vld [vmem:[#allocation12 + $0x174] sm:$0xf] }
 0x753   : > { %v6337_v32 = vmax.f32 %v6327_v12, 0.0  ;;  %v6330_v42 = vadd.f32 %v6324_v18, %v6314_v41  ;;  %v11346_v41 = vld [vmem:[#allocation12 + $0x154] sm:$0xf] }
 0x755   : > { %v6340_v56 = vmax.f32 %v6330_v42, 0.0  ;;  %v11345_v42 = vld [vmem:[#allocation12 + $0x144] sm:$0xf0] }
 0x756   : > { %v6276_v52 = vpop.f32.mrf.mxu2 }
 0x757   : > { %v6313_v0 = vadd.f32 %v6276_v52, %v6146_v39  ;;  %v16571_v61 = vpack.c.bf16 %v6340_v56, %v6338_v34  ;;  %v9994_v52 = vld [vmem:[#allocation12 + $0x168] sm:$0xf0]  ;;  %v9968_v34 = vld [vmem:[#allocation12 + $0x130] sm:$0xf] }
 0x758   : > { %v6302_v37 = vpop.f32.mrf.mxu0 }
 0x759   : > { %v6329_v60 = vadd.f32 %v6323_v3, %v6313_v0  ;;  %v6316_v58 = vadd.f32 %v6302_v37, %v6149_v11  ;;  %v9984_v0 = vld [vmem:[#allocation12 + $0x150] sm:$0xf] }
 0x75a   : > { %v9985_v38 = vor.u32 %v11347_v26, %v9984_v0  ;;  %v9946_v0 = vld [vmem:[#allocation12 + $0x108] sm:$0xf0]  ;;  %v10128_v26 = vld [vmem:[#allocation12 + $0x70] sm:$0xf] }
 0x75b   : > { %v6339_v53 = vmax.f32 %v6329_v60, 0.0  ;;  %v6332_v13 = vadd.f32 %v6324_v18, %v6316_v58  ;;  %v9986_v60 = vld [vmem:[#allocation12 + $0x158] sm:$0xf0]  ;;  %v11344_v58 = vld [vmem:[#allocation12 + $0x144] sm:$0xf] }
 0x75d   : > { %v16567_v54 = vpack.c.bf16 %v6339_v53, %v6337_v32  ;;  %v6342_v57 = vmax.f32 %v6332_v13, 0.0  ;;  %v9989_v32 = vor.u32 %v11346_v41, %v9986_v60  ;;  %v9976_v53 = vld [vmem:[#allocation12 + $0x140] sm:$0xf]  ;;  %v16582_v13 = vld [vmem:[#allocation18] sm:$0xff] }
 0x75e   : > { %v6279_v44 = vpop.f32.mrf.mxu2  ;;  %v11318_v41 = vld [vmem:[#allocation12 + $0x74] sm:$0xf] }
 0x75f   : > { %v6315_v46 = vadd.f32 %v6279_v44, %v6148_v19  ;;  %v5989_v19 = vadd.f32 %v16542_v23, %v16532_v55  ;;  %v10005_v55 = vor.u32 %v11350_v10, %v10002_v62  ;;  %v11349_v23 = vld [vmem:[#allocation12 + $0x164] sm:$0xf0]  ;;  %v11338_v10 = vld [vmem:[#allocation12 + $0x114] sm:$0xf]  ;;  %v9954_v62 = vld [vmem:[#allocation12 + $0x118] sm:$0xf0] }
 0x760   : > { %v6304_v7 = vpop.f32.mrf.mxu0 }
 0x761   : > { %v6318_v8 = vadd.f32 %v6304_v7, %v6151_v45  ;;  %v6331_v35 = vadd.f32 %v6323_v3, %v6315_v46  ;;  %v6153_v48 = vadd.f32 %v16548_v27, %v5989_v19  ;;  %v9993_v27 = vor.u32 %v11349_v23, %v9992_v1  ;;  %6668 = vmatpush.bf16.msra.mxu0 %v10005_v55  ;;  %v10056_v7 = vld [vmem:[#allocation12 + $0x1e0] sm:$0xf]  ;;  %v10066_v19 = vld [vmem:[#allocation12 + $0x1f8] sm:$0xf0]  ;;  %v11362_v55 = vld [vmem:[#allocation12 + $0x1d4] sm:$0xf] }
 0x762   : > { %v10057_v56 = vor.u32 %v11365_v33, %v10056_v7  ;;  %v9981_v46 = vor.u32 %v11344_v58, %v9978_v5  ;;  %v10024_v23 = vld [vmem:[#allocation12 + $0x1a0] sm:$0xf]  ;;  %v10042_v58 = vld [vmem:[#allocation12 + $0x1c8] sm:$0xf0]  ;;  %v11317_v7 = vld [vmem:[#allocation12 + $0x64] sm:$0xf0] }
 0x763   : > { %v6334_v40 = vadd.f32 %v6324_v18, %v6318_v8  ;;  %v6341_v45 = vmax.f32 %v6331_v35, 0.0  ;;  %6641 = vmatpush.bf16.msra.mxu3 %v9993_v27  ;;  %v9977_v8 = vor.u32 %v11345_v42, %v9976_v53  ;;  %v9970_v35 = vld [vmem:[#allocation12 + $0x138] sm:$0xf0]  ;;  %v9944_v27 = vld [vmem:[#allocation12 + $0x100] sm:$0xf] }
 0x764   : > { %v11360_v42 = vld [vmem:[#allocation12 + $0x1c4] sm:$0xf]  ;;  %v10120_v5 = vld [vmem:[#allocation12 + $0x60] sm:$0xf] }
 0x765   : > { %v6344_v29 = vmax.f32 %v6334_v40, 0.0  ;;  %v11343_v40 = vld [vmem:[#allocation12 + $0x134] sm:$0xf0]  ;;  %v11316_v33 = vld [vmem:[#allocation12 + $0x64] sm:$0xf] }
 0x766   : > { %v6281_v11 = vpop.f32.mrf.mxu2 }
 0x767   : > { %v6317_v20 = vadd.f32 %v6281_v11, %v6150_v43  ;;  %v16573_v9 = vpack.c.bf16 %v6344_v29, %v6342_v57  ;;  %6642 = vmatpush.bf16.msra.mxu3 %v9985_v38  ;;  %v10048_v57 = vld [vmem:[#allocation12 + $0x1d0] sm:$0xf]  ;;  %v11363_v29 = vld [vmem:[#allocation12 + $0x1d4] sm:$0xf0]  ;;  %v11342_v11 = vld [vmem:[#allocation12 + $0x134] sm:$0xf] }
 0x768   : > { %v6307_v36 = vpop.f32.mrf.mxu0 }
 0x769   : > { %v6333_v50 = vadd.f32 %v6323_v3, %v6317_v20  ;;  %v6320_v59 = vadd.f32 %v6307_v36, %v6153_v48  ;;  %v10049_v20 = vor.u32 %v11363_v29, %v10048_v57  ;;  %v9969_v36 = vor.u32 %v11343_v40, %v9968_v34  ;;  %v9962_v48 = vld [vmem:[#allocation12 + $0x128] sm:$0xf0]  ;;  %v10034_v40 = vld [vmem:[#allocation12 + $0x1b8] sm:$0xf0] }
 0x76a   : > { %v10045_v34 = vor.u32 %v11360_v42, %v10042_v58  ;;  %v10121_v57 = vor.u32 %v11317_v7, %v10120_v5  ;;  %v10080_v42 = vld [vmem:[#allocation12 + $0x10] sm:$0xf]  ;;  %v11307_v58 = vld [vmem:[#allocation12 + $0x14] sm:$0xf0]  ;;  %v11306_v7 = vld [vmem:[#allocation12 + $0x14] sm:$0xf] }
 0x76b   : > { %v6343_v6 = vmax.f32 %v6333_v50, 0.0  ;;  %v6336_v47 = vadd.f32 %v6324_v18, %v6320_v59  ;;  %v11367_v18 = vld [vmem:[#allocation12 + $0x1f4] sm:$0xf0]  ;;  %6643 = vmatpush.bf16.msra.mxu3 %v9977_v8  ;;  %v10040_v50 = vld [vmem:[#allocation12 + $0x1c0] sm:$0xf] }
 0x76c   : > { %v10065_v44 = vor.u32 %v11367_v18, %v10064_v16  ;;  %v10016_v18 = vld [vmem:[#allocation12 + $0x190] sm:$0xf]  ;;  %v11331_v5 = vld [vmem:[#allocation12 + $0xd4] sm:$0xf0] }
 0x76d   : > { %v6351_v51 = vpack.c.bf16 %v6343_v6, %v6341_v45  ;;  %v6346_v37 = vmax.f32 %v6336_v47, 0.0  ;;  %v11361_v45 = vld [vmem:[#allocation12 + $0x1c4] sm:$0xf0]  ;;  %v9973_v6 = vor.u32 %v11342_v11, %v9970_v35  ;;  %v9952_v47 = vld [vmem:[#allocation12 + $0x110] sm:$0xf] }
 0x76e   : > { %v6284_v28 = vpop.f32.mrf.mxu2  ;;  %6654 = vmatpush.bf16.msra.mxu2 %v10065_v44  ;;  %v11315_v11 = vld [vmem:[#allocation12 + $0x54] sm:$0xf0]  ;;  %v11314_v35 = vld [vmem:[#allocation12 + $0x54] sm:$0xf] }
 0x76f   : > { %v6319_v2 = vadd.f32 %v6284_v28, %v6152_v31  ;;  %v6354_v17 = vpack.c.bf16 %v6346_v37, %v6346_v37  ;;  %v11341_v31 = vld [vmem:[#allocation12 + $0x124] sm:$0xf0]  ;;  %v10041_v28 = vor.u32 %v11361_v45, %v10040_v50  ;;  %6644 = vmatpush.bf16.msra.mxu3 %v9969_v36  ;;  %v11319_v37 = vld [vmem:[#allocation12 + $0x74] sm:$0xf0]  ;;  %v10026_v50 = vld [vmem:[#allocation12 + $0x1a8] sm:$0xf0] }
 0x770   : > { %v6309_v63 = vpop.f32.mrf.mxu0  ;;  %v10129_v44 = vor.u32 %v11319_v37, %v10128_v26  ;;  %v10184_v26 = vld [vmem:[#allocation12 + $0xe0] sm:$0xf] }
 0x771   : > { %v6335_v4 = vadd.f32 %v6323_v3, %v6319_v2  ;;  %v9997_v3 = vor.u32 %v11348_v30, %v9994_v52  ;;  %v6368_v43 = vsel %vm1996_vm3, %v6354_v17, 0  ;;  %v10069_v2 = vor.u32 %v11366_v49, %v10066_v19  ;;  %v11364_v63 = vld [vmem:[#allocation12 + $0x1e4] sm:$0xf]  ;;  %v11357_v30 = vld [vmem:[#allocation12 + $0x1a4] sm:$0xf0] }
 0x772   : > { %6655 = vmatpush.bf16.msra.mxu2 %v10057_v56  ;;  %v9957_v52 = vor.u32 %v11338_v10, %v9954_v62  ;;  %v10025_v60 = vor.u32 %v11357_v30, %v10024_v23  ;;  %v10122_v56 = vld [vmem:[#allocation12 + $0x68] sm:$0xf0]  ;;  %v11356_v49 = vld [vmem:[#allocation12 + $0x1a4] sm:$0xf]  ;;  %v11313_v19 = vld [vmem:[#allocation12 + $0x44] sm:$0xf0] }
 0x773   : > { %v6345_v14 = vmax.f32 %v6335_v4, 0.0  ;;  %6669 = vmatpush.bf16.msra.mxu0 %v9997_v3  ;;  %v10032_v4 = vld [vmem:[#allocation12 + $0x1b0] sm:$0xf]  ;;  %v11336_v3 = vld [vmem:[#allocation12 + $0x104] sm:$0xf]  ;;  %v10125_v29 = vor.u32 %v11316_v33, %v10122_v56 }
 0x774   : > { %v9949_v53 = vor.u32 %v11336_v3, %v9946_v0  ;;  %v11311_v10 = vld [vmem:[#allocation12 + $0x34] sm:$0xf0]  ;;  %v10098_v30 = vld [vmem:[#allocation12 + $0x38] sm:$0xf0]  ;;  %v10088_v3 = vld [vmem:[#allocation12 + $0x20] sm:$0xf] }
 0x775   : > { %v6353_v39 = vpack.c.bf16 %v6345_v14, %v6345_v14  ;;  %v11359_v14 = vld [vmem:[#allocation12 + $0x1b4] sm:$0xf0]  ;;  %v11309_v0 = vld [vmem:[#allocation12 + $0x24] sm:$0xf0]  ;;  %v10082_v33 = vld [vmem:[#allocation12 + $0x18] sm:$0xf0] }
 0x776   : > { %v6286_v22 = vpop.f32.mrf.mxu2  ;;  %6656 = vmatpush.bf16.msra.mxu2 %v10049_v20  ;;  %v10033_v1 = vor.u32 %v11359_v14, %v10032_v4  ;;  %v10114_v20 = vld [vmem:[#allocation12 + $0x58] sm:$0xf0]  ;;  %v10008_v4 = vld [vmem:[#allocation12 + $0x180] sm:$0xf]  ;;  %v11353_v14 = vld [vmem:[#allocation12 + $0x184] sm:$0xf0]  ;;  %v10089_v37 = vor.u32 %v11309_v0, %v10088_v3 }
 0x777   : > { %v6365_v12 = vsel %vm1996_vm3, %v6353_v39, 0  ;;  %6670 = vmatpush.bf16.msra.mxu0 %v9989_v32  ;;  %v9953_v39 = vor.u32 %v11339_v24, %v9952_v47  ;;  %v10050_v22 = vld [vmem:[#allocation12 + $0x1d8] sm:$0xf0]  ;;  %v11355_v32 = vld [vmem:[#allocation12 + $0x194] sm:$0xf0] }
 0x778   : > { %6375 = vmatpush.bf16.msrb.mxu1 %v6365_v12  ;;  %v11337_v12 = vld [vmem:[#allocation12 + $0x104] sm:$0xf0]  ;;  %v10053_v16 = vor.u32 %v11362_v55, %v10050_v22  ;;  %v10017_v8 = vor.u32 %v11355_v32, %v10016_v18  ;;  %v10010_v47 = vld [vmem:[#allocation12 + $0x188] sm:$0xf0]  ;;  %v10096_v24 = vld [vmem:[#allocation12 + $0x30] sm:$0xf] }
 0x779   : > { %v9945_v38 = vor.u32 %v11337_v12, %v9944_v27  ;;  %v11310_v55 = vld [vmem:[#allocation12 + $0x34] sm:$0xf]  ;;  %v10194_v22 = vld [vmem:[#allocation12 + $0xf8] sm:$0xf0]  ;;  %v11332_v18 = vld [vmem:[#allocation12 + $0xe4] sm:$0xf] }
 0x77a   : > { %6657 = vmatpush.bf16.msra.mxu2 %v10041_v28  ;;  %v10018_v28 = vld [vmem:[#allocation12 + $0x198] sm:$0xf0]  ;;  %v10101_v27 = vor.u32 %v11310_v55, %v10098_v30  ;;  %v10186_v32 = vld [vmem:[#allocation12 + $0xe8] sm:$0xf0]  ;;  %v11321_v55 = vld [vmem:[#allocation12 + $0x84] sm:$0xf0] }
 0x77b   : > { %6671 = vmatpush.bf16.msra.mxu0 %v9981_v46  ;;  %v11358_v46 = vld [vmem:[#allocation12 + $0x1b4] sm:$0xf]  ;;  %v10138_v30 = vld [vmem:[#allocation12 + $0x88] sm:$0xf0]  ;;  %v10256_v3 = vld [vmem:[#allocation12 + $0x270] sm:$0xf] }
 0x77c   : > { %6376 = vmatpush.bf16.msrb.mxu1 %v6351_v51  ;;  %v11340_v51 = vld [vmem:[#allocation12 + $0x124] sm:$0xf]  ;;  %v10037_v36 = vor.u32 %v11358_v46, %v10034_v40  ;;  %v10178_v46 = vld [vmem:[#allocation12 + $0xd8] sm:$0xf0]  ;;  %v10072_v40 = vld [vmem:[#allocation12] sm:$0xf] }
 0x77d   : > { %v9965_v25 = vor.u32 %v11340_v51, %v9962_v48  ;;  %v10029_v51 = vor.u32 %v11356_v49, %v10026_v50  ;;  %v11354_v48 = vld [vmem:[#allocation12 + $0x194] sm:$0xf]  ;;  %v11328_v49 = vld [vmem:[#allocation12 + $0xc4] sm:$0xf] }
 0x77e   : > { %6658 = vmatpush.bf16.msra.mxu2 %v10033_v1  ;;  %v10097_v1 = vor.u32 %v11311_v10, %v10096_v24  ;;  %v11322_v24 = vld [vmem:[#allocation12 + $0x94] sm:$0xf] }
 0x77f   : > { %6672 = vmatpush.bf16.msra.mxu0 %v9973_v6  ;;  %v10104_v6 = vld [vmem:[#allocation12 + $0x40] sm:$0xf] }
 0x780   : > { %6377 = vmatpush.bf16.msrb.mxu1 %v16567_v54  ;;  %v9960_v54 = vld [vmem:[#allocation12 + $0x120] sm:$0xf] }
 0x781   : > { %v9961_v59 = vor.u32 %v11341_v31, %v9960_v54  ;;  %v11312_v54 = vld [vmem:[#allocation12 + $0x44] sm:$0xf]  ;;  %v10106_v31 = vld [vmem:[#allocation12 + $0x48] sm:$0xf0] }
 0x782   : > { %6659 = vmatpush.bf16.msra.mxu2 %v10025_v60  ;;  %v10090_v60 = vld [vmem:[#allocation12 + $0x28] sm:$0xf0] }
 0x783   : > { %9940 = vmatmul.msk.bf16.vlgmr.msrb.gmra.mxu1 %vm6360_vm13, %v16582_v13  ;;  %6645 = vmatpush.bf16.msra.mxu3 %v9961_v59  ;;  %v10109_v59 = vor.u32 %v11312_v54, %v10106_v31  ;;  %v11327_v54 = vld [vmem:[#allocation12 + $0xb4] sm:$0xf0]  ;;  %v11326_v31 = vld [vmem:[#allocation12 + $0xb4] sm:$0xf] }
 0x784   : > { %6389 = vmatpush.bf16.msra.mxu1 %v6368_v43  ;;  %6673 = vmatpush.bf16.msra.mxu0 %v9965_v25  ;;  %v10112_v43 = vld [vmem:[#allocation12 + $0x50] sm:$0xf]  ;;  %v11352_v25 = vld [vmem:[#allocation12 + $0x184] sm:$0xf] }
 0x785   : > { %v10113_v45 = vor.u32 %v11315_v11, %v10112_v43  ;;  %v10013_v62 = vor.u32 %v11352_v25, %v10010_v47  ;;  %v10168_v43 = vld [vmem:[#allocation12 + $0xc0] sm:$0xf]  ;;  %v11329_v11 = vld [vmem:[#allocation12 + $0xc4] sm:$0xf0]  ;;  %v11323_v47 = vld [vmem:[#allocation12 + $0x94] sm:$0xf0] }
 0x786   : > { %6660 = vmatpush.bf16.msra.mxu2 %v10017_v8  ;;  %v10085_v8 = vor.u32 %v11306_v7, %v10082_v33  ;;  %v10169_v50 = vor.u32 %v11329_v11, %v10168_v43  ;;  %v10240_v33 = vld [vmem:[#allocation12 + $0x250] sm:$0xf]  ;;  %v10232_v43 = vld [vmem:[#allocation12 + $0x240] sm:$0xf]  ;;  %v11377_v11 = vld [vmem:[#allocation12 + $0x244] sm:$0xf0] }
 0x787   : > { %6646 = vmatpush.bf16.msra.mxu3 %v9953_v39  ;;  %v11335_v39 = vld [vmem:[#allocation12 + $0xf4] sm:$0xf0] }
 0x788   : > { %6390 = vmatpush.bf16.msra.mxu1 %v16573_v9  ;;  %v10061_v9 = vor.u32 %v11364_v63, %v10058_v21  ;;  %6674 = vmatpush.bf16.msra.mxu0 %v9957_v52  ;;  %v10021_v63 = vor.u32 %v11354_v48, %v10018_v28  ;;  %v10009_v21 = vor.u32 %v11353_v14, %v10008_v4  ;;  %v11334_v52 = vld [vmem:[#allocation12 + $0xf4] sm:$0xf]  ;;  %v10162_v48 = vld [vmem:[#allocation12 + $0xb8] sm:$0xf0]  ;;  %v10154_v4 = vld [vmem:[#allocation12 + $0xa8] sm:$0xf0] }
 0x789   : > { %v10197_v12 = vor.u32 %v11334_v52, %v10194_v22  ;;  %v10165_v28 = vor.u32 %v11326_v31, %v10162_v48  ;;  %v10224_v31 = vld [vmem:[#allocation12 + $0x230] sm:$0xf] }
 0x78a   : > { %6661 = vmatpush.bf16.msra.mxu2 %v10009_v21  ;;  %v10144_v21 = vld [vmem:[#allocation12 + $0x90] sm:$0xf] }
 0x78b   : > { %6647 = vmatpush.bf16.msra.mxu3 %v9945_v38  ;;  %v10145_v10 = vor.u32 %v11323_v47, %v10144_v21  ;;  %v11398_v21 = vld [vmem:[#allocation12 + $0x2f4] sm:$0xf]  ;;  %v10322_v47 = vld [vmem:[#allocation12 + $0x2f8] sm:$0xf0] }
 0x78c   : > { %6391 = vmatpush.bf16.msra.mxu1 %v16571_v61  ;;  %v10130_v61 = vld [vmem:[#allocation12 + $0x78] sm:$0xf0]  ;;  %6675 = vmatpush.bf16.msra.mxu0 %v9949_v53  ;;  %v10189_v53 = vor.u32 %v11332_v18, %v10186_v32  ;;  %v10248_v32 = vld [vmem:[#allocation12 + $0x260] sm:$0xf] }
 0x78d   : > { %v10133_v17 = vor.u32 %v11318_v41, %v10130_v61  ;;  %v11333_v41 = vld [vmem:[#allocation12 + $0xe4] sm:$0xf0]  ;;  %v11308_v61 = vld [vmem:[#allocation12 + $0x24] sm:$0xf] }
 0x78e   : > { %v10093_v38 = vor.u32 %v11308_v61, %v10090_v60  ;;  %v10258_v61 = vld [vmem:[#allocation12 + $0x278] sm:$0xf0] }
 0x78f   : > { %6892 = vmatpush.bf16.msrb.mxu3 %v10129_v44  ;;  %v10176_v44 = vld [vmem:[#allocation12 + $0xd0] sm:$0xf] }
 0x790   : > { %6682 = vmatpush.bf16.msrb.mxu1 %v10069_v2  ;;  %6920 = vmatpush.bf16.msrb.mxu0 %v10133_v17  ;;  %v10105_v2 = vor.u32 %v11313_v19, %v10104_v6  ;;  %v10081_v17 = vor.u32 %v11307_v58, %v10080_v42  ;;  %v10177_v56 = vor.u32 %v11331_v5, %v10176_v44  ;;  %v10160_v19 = vld [vmem:[#allocation12 + $0xb0] sm:$0xf]  ;;  %v11380_v42 = vld [vmem:[#allocation12 + $0x264] sm:$0xf]  ;;  %v10250_v58 = vld [vmem:[#allocation12 + $0x268] sm:$0xf0] }
 0x791   : > { %v10253_v7 = vor.u32 %v11380_v42, %v10250_v58  ;;  %v11370_v42 = vld [vmem:[#allocation12 + $0x214] sm:$0xf]  ;;  %v10210_v58 = vld [vmem:[#allocation12 + $0x218] sm:$0xf0] }
 0x793   : > { %9941 = vmatmul.msk.bf16.vlgmr.msra.gmra.mxu1 %vm6360_vm13, %v16582_v13  ;;  %6893 = vmatpush.bf16.msrb.mxu3 %v10121_v57  ;;  %v10117_v13 = vor.u32 %v11314_v35, %v10114_v20  ;;  %v11304_v20 = vld [vmem:[#allocation12 + $0x4] sm:$0xf] }
 0x794   : > { %6683 = vmatpush.bf16.msrb.mxu1 %v10061_v9  ;;  %6921 = vmatpush.bf16.msrb.mxu0 %v10125_v29  ;;  %v10192_v9 = vld [vmem:[#allocation12 + $0xf0] sm:$0xf]  ;;  %v11305_v29 = vld [vmem:[#allocation12 + $0x4] sm:$0xf0] }
 0x795   : > { %v10193_v23 = vor.u32 %v11335_v39, %v10192_v9  ;;  %v10073_v35 = vor.u32 %v11305_v29, %v10072_v40  ;;  %v10136_v39 = vld [vmem:[#allocation12 + $0x80] sm:$0xf] }
 0x796   : > { %v10137_v52 = vor.u32 %v11321_v55, %v10136_v39  ;;  %v11373_v39 = vld [vmem:[#allocation12 + $0x224] sm:$0xf0] }
 0x797   : > { %6894 = vmatpush.bf16.msrb.mxu3 %v10113_v45  ;;  %6906 = vmatpush.bf16.msrb.mxu2 %v10193_v23  ;;  %v10170_v45 = vld [vmem:[#allocation12 + $0xc8] sm:$0xf0]  ;;  %v11320_v23 = vld [vmem:[#allocation12 + $0x84] sm:$0xf] }
 0x798   : > { %6684 = vmatpush.bf16.msrb.mxu1 %v10053_v16  ;;  %6922 = vmatpush.bf16.msrb.mxu0 %v10117_v13  ;;  %v10185_v16 = vor.u32 %v11333_v41, %v10184_v26  ;;  %v10173_v6 = vor.u32 %v11328_v49, %v10170_v45  ;;  %v10141_v22 = vor.u32 %v11320_v23, %v10138_v30  ;;  %v11382_v41 = vld [vmem:[#allocation12 + $0x274] sm:$0xf]  ;;  %v10234_v49 = vld [vmem:[#allocation12 + $0x248] sm:$0xf0] }
 0x799   : > { %v10261_v18 = vor.u32 %v11382_v41, %v10258_v61  ;;  %v10325_v30 = vor.u32 %v11398_v21, %v10322_v47 }
 0x79b   : > { %6895 = vmatpush.bf16.msrb.mxu3 %v10105_v2  ;;  %6907 = vmatpush.bf16.msrb.mxu2 %v10185_v16  ;;  %v10152_v2 = vld [vmem:[#allocation12 + $0xa0] sm:$0xf] }
 0x79c   : > { %6685 = vmatpush.bf16.msrb.mxu1 %v10045_v34  ;;  %6923 = vmatpush.bf16.msrb.mxu0 %v10109_v59  ;;  %v11330_v34 = vld [vmem:[#allocation12 + $0xd4] sm:$0xf]  ;;  %v11325_v59 = vld [vmem:[#allocation12 + $0xa4] sm:$0xf0] }
 0x79d   : > { %v10181_v57 = vor.u32 %v11330_v34, %v10178_v46  ;;  %v10153_v14 = vor.u32 %v11325_v59, %v10152_v2  ;;  %v10242_v34 = vld [vmem:[#allocation12 + $0x258] sm:$0xf0]  ;;  %v11375_v2 = vld [vmem:[#allocation12 + $0x234] sm:$0xf0]  ;;  %v10320_v59 = vld [vmem:[#allocation12 + $0x2f0] sm:$0xf] }
 0x79f   : > { %6896 = vmatpush.bf16.msrb.mxu3 %v10097_v1  ;;  %6908 = vmatpush.bf16.msrb.mxu2 %v10177_v56  ;;  %v11379_v56 = vld [vmem:[#allocation12 + $0x254] sm:$0xf0] }
 0x7a0   : > { %6686 = vmatpush.bf16.msrb.mxu1 %v10037_v36  ;;  %6924 = vmatpush.bf16.msrb.mxu0 %v10101_v27  ;;  %v10074_v36 = vld [vmem:[#allocation12 + $0x8] sm:$0xf0] }
 0x7a1   : > { %v10077_v13 = vor.u32 %v11304_v20, %v10074_v36  ;;  %v11376_v36 = vld [vmem:[#allocation12 + $0x244] sm:$0xf] }
 0x7a3   : > { %6897 = vmatpush.bf16.msrb.mxu3 %v10089_v37  ;;  %6909 = vmatpush.bf16.msrb.mxu2 %v10169_v50  ;;  %v11383_v37 = vld [vmem:[#allocation12 + $0x274] sm:$0xf0] }
 0x7a4   : > { %6687 = vmatpush.bf16.msrb.mxu1 %v10029_v51  ;;  %6925 = vmatpush.bf16.msrb.mxu0 %v10093_v38  ;;  %v10161_v51 = vor.u32 %v11327_v54, %v10160_v19  ;;  %v10257_v38 = vor.u32 %v11383_v37, %v10256_v3  ;;  %v10233_v19 = vor.u32 %v11377_v11, %v10232_v43  ;;  %v10218_v3 = vld [vmem:[#allocation12 + $0x228] sm:$0xf0] }
 0x7a5   : > { %v10237_v54 = vor.u32 %v11376_v36, %v10234_v49  ;;  %v10314_v37 = vld [vmem:[#allocation12 + $0x2e8] sm:$0xf0]  ;;  %v10296_v49 = vld [vmem:[#allocation12 + $0x2c0] sm:$0xf] }
 0x7a7   : > { %6898 = vmatpush.bf16.msrb.mxu3 %v10081_v17  ;;  %6910 = vmatpush.bf16.msrb.mxu2 %v10161_v51 }
 0x7a8   : > { %6688 = vmatpush.bf16.msrb.mxu1 %v10021_v63  ;;  %6926 = vmatpush.bf16.msrb.mxu0 %v10085_v8  ;;  %v11324_v63 = vld [vmem:[#allocation12 + $0xa4] sm:$0xf]  ;;  %v11378_v8 = vld [vmem:[#allocation12 + $0x254] sm:$0xf] }
 0x7a9   : > { %v10157_v25 = vor.u32 %v11324_v63, %v10154_v4  ;;  %v10245_v29 = vor.u32 %v11378_v8, %v10242_v34  ;;  %v11399_v63 = vld [vmem:[#allocation12 + $0x2f4] sm:$0xf0]  ;;  %v11374_v4 = vld [vmem:[#allocation12 + $0x234] sm:$0xf]  ;;  %v10200_v34 = vld [vmem:[#allocation12 + $0x200] sm:$0xf] }
 0x7ab   : > { %6899 = vmatpush.bf16.msrb.mxu3 %v10073_v35  ;;  %6911 = vmatpush.bf16.msrb.mxu2 %v10153_v14 }
 0x7ac   : > { %6689 = vmatpush.bf16.msrb.mxu1 %v10013_v62  ;;  %6927 = vmatpush.bf16.msrb.mxu0 %v10077_v13  ;;  %v10146_v62 = vld [vmem:[#allocation12 + $0x98] sm:$0xf0] }
 0x7ad   : > { %v10149_v9 = vor.u32 %v11322_v24, %v10146_v62  ;;  %v10225_v62 = vor.u32 %v11375_v2, %v10224_v31  ;;  %v10202_v31 = vld [vmem:[#allocation12 + $0x208] sm:$0xf0] }
 0x7ae   : > { %v10298_v2 = vld [vmem:[#allocation12 + $0x2c8] sm:$0xf0] }
 0x7af   : > { %6912 = vmatpush.bf16.msrb.mxu2 %v10145_v10 }
 0x7b0   : > { %6934 = vmatpush.bf16.msra.mxu1 %v10197_v12 }
 0x7b3   : > { %6913 = vmatpush.bf16.msrb.mxu2 %v10137_v52  ;;  %v10312_v52 = vld [vmem:[#allocation12 + $0x2e0] sm:$0xf] }
 0x7b4   : > { %6935 = vmatpush.bf16.msra.mxu1 %v10189_v53  ;;  %v11381_v53 = vld [vmem:[#allocation12 + $0x264] sm:$0xf0] }
 0x7b5   : > { %v10249_v5 = vor.u32 %v11381_v53, %v10248_v32  ;;  %v11395_v53 = vld [vmem:[#allocation12 + $0x2d4] sm:$0xf0] }
 0x7b8   : > { %6936 = vmatpush.bf16.msra.mxu1 %v10181_v57  ;;  %v10241_v57 = vor.u32 %v11379_v56, %v10240_v33  ;;  %v10306_v33 = vld [vmem:[#allocation12 + $0x2d8] sm:$0xf0] }
 0x7bc   : > { %6937 = vmatpush.bf16.msra.mxu1 %v10173_v6 }
 0x7c0   : > { %6938 = vmatpush.bf16.msra.mxu1 %v10165_v28 }
 0x7c4   : > { %6939 = vmatpush.bf16.msra.mxu1 %v10157_v25 }
 0x7c8   : > { %6940 = vmatpush.bf16.msra.mxu1 %v10149_v9  ;;  %v10216_v9 = vld [vmem:[#allocation12 + $0x220] sm:$0xf] }
 0x7c9   : > { %v10217_v41 = vor.u32 %v11373_v39, %v10216_v9  ;;  %v11391_v9 = vld [vmem:[#allocation12 + $0x2b4] sm:$0xf0] }
 0x7cc   : > { %6941 = vmatpush.bf16.msra.mxu1 %v10141_v22  ;;  %v11397_v22 = vld [vmem:[#allocation12 + $0x2e4] sm:$0xf0] }
 0x7cd   : > { %v10313_v61 = vor.u32 %v11397_v22, %v10312_v52  ;;  %v10290_v52 = vld [vmem:[#allocation12 + $0x2b8] sm:$0xf0]  ;;  %v10376_v22 = vld [vmem:[#allocation12 + $0x360] sm:$0xf] }
 0x800   : > { %v6379_v1 = vpop.f32.mrf.mxu1 }
 0x801   : > { %v6398_v27 = vpack.c.bf16 %v6379_v1, %v18157_v15 }
 0x803   : > { %v6472_v16 = vrot.slane %v6398_v27, 2  ;;  %v16602_v35 = vshrl.u32 %v6398_v27, 16  ;;  %v16604_v20 = vshll.u32 %v6398_v27, 16  ;;  %v11372_v27 = vld [vmem:[#allocation12 + $0x224] sm:$0xf] }
 0x805   : > { %v6699_v51 = vrot.slane %v16602_v35, 1  ;;  %v6702_v48 = vrot.slane %v16604_v20, 2  ;;  %v6981_v47 = vrot.slane %v16602_v35, 2 }
 0x807   : > { %v6703_v10 = vor.u32 %v6702_v48, %v6699_v51  ;;  %v11392_v51 = vld [vmem:[#allocation12 + $0x2c4] sm:$0xf] }
 0x808   : > { %v6381_v12 = vpop.f32.mrf.mxu1 }
 0x809   : > { %v6400_v0 = vpack.c.bf16 %v6381_v12, %v6381_v12  ;;  %v16593_v26 = vpack.c.bf16 %v6381_v12, %v6379_v1  ;;  %v10321_v1 = vor.u32 %v11399_v63, %v10320_v59  ;;  %v11415_v59 = vld [vmem:[#allocation12 + $0x374] sm:$0xf0]  ;;  %v11414_v63 = vld [vmem:[#allocation12 + $0x374] sm:$0xf] }
 0x80b   : > { %v6473_v60 = vrot.slane %v6400_v0, 2  ;;  %v16598_v46 = vshrl.u32 %v6400_v0, 16  ;;  %v16600_v40 = vshll.u32 %v6400_v0, 16  ;;  %v11396_v0 = vld [vmem:[#allocation12 + $0x2e4] sm:$0xf] }
 0x80c   : > { %v10317_v32 = vor.u32 %v11396_v0, %v10314_v37  ;;  %v10378_v0 = vld [vmem:[#allocation12 + $0x368] sm:$0xf0] }
 0x80d   : > { %v6474_v44 = vsel %vm1247_vm1, %v6472_v16, %v6473_v60  ;;  %v6707_v50 = vrot.slane %v16598_v46, 1  ;;  %v6710_v45 = vrot.slane %v16600_v40, 2  ;;  %v10208_v60 = vld [vmem:[#allocation12 + $0x210] sm:$0xf]  ;;  %v11371_v16 = vld [vmem:[#allocation12 + $0x214] sm:$0xf0] }
 0x80e   : > { %6648 = vmatmul.bf16.vlgmr.msra.gmra.mxu3 %v6474_v44  ;;  %6676 = vmatmul.bf16.vlgmr.msra.gmra.mxu0 %v6474_v44  ;;  %v6984_v56 = vrot.slane %v16598_v46, 2  ;;  %v6985_v8 = vrot.slane %v16600_v40, 3  ;;  %v10209_v11 = vor.u32 %v11371_v16, %v10208_v60  ;;  %v10280_v16 = vld [vmem:[#allocation12 + $0x2a0] sm:$0xf] }
 0x80f   : > { %7157 = vmatpush.bf16.msra.mxu3 %v10257_v38  ;;  %7185 = vmatpush.bf16.msra.mxu0 %v10261_v18  ;;  %v6711_v25 = vor.u32 %v6710_v45, %v6707_v50  ;;  %v10304_v38 = vld [vmem:[#allocation12 + $0x2d0] sm:$0xf]  ;;  %v10221_v18 = vor.u32 %v11372_v27, %v10218_v3  ;;  %v11393_v50 = vld [vmem:[#allocation12 + $0x2c4] sm:$0xf0]  ;;  %v10213_v45 = vor.u32 %v11370_v42, %v10210_v58  ;;  %v11412_v3 = vld [vmem:[#allocation12 + $0x364] sm:$0xf] }
 0x810   : > { %v16596_v17 = vpop.f32.mrf.mxu1  ;;  %v10305_v36 = vor.u32 %v11395_v53, %v10304_v38  ;;  %v10297_v21 = vor.u32 %v11393_v50, %v10296_v49  ;;  %v6986_v27 = vor.u32 %v6985_v8, %v6984_v56  ;;  %v11389_v38 = vld [vmem:[#allocation12 + $0x2a4] sm:$0xf0]  ;;  %v10381_v53 = vor.u32 %v11412_v3, %v10378_v0  ;;  %v11388_v42 = vld [vmem:[#allocation12 + $0x2a4] sm:$0xf]  ;;  %v10282_v58 = vld [vmem:[#allocation12 + $0x2a8] sm:$0xf0] }
 0x811   : > { %v16610_v13 = vpack.c.bf16 %v16596_v17, %v18157_v15  ;;  %v10226_v15 = vld [vmem:[#allocation12 + $0x238] sm:$0xf0]  ;;  %v6712_v12 = vsel %vm4608_vm11, %v6703_v10, %v6711_v25  ;;  %v11411_v56 = vld [vmem:[#allocation12 + $0x354] sm:$0xf0]  ;;  %v11410_v8 = vld [vmem:[#allocation12 + $0x354] sm:$0xf]  ;;  %v10285_v49 = vor.u32 %v11388_v42, %v10282_v58 }
 0x812   : > { %v10229_v23 = vor.u32 %v11374_v4, %v10226_v15  ;;  %v10386_v4 = vld [vmem:[#allocation12 + $0x378] sm:$0xf0]  ;;  %v10272_v50 = vld [vmem:[#allocation12 + $0x290] sm:$0xf]  ;;  %v11430_v3 = vld [vmem:[#allocation12 + $0x3f4] sm:$0xf] }
 0x813   : > { %7158 = vmatpush.bf16.msra.mxu3 %v10249_v5  ;;  %7186 = vmatpush.bf16.msra.mxu0 %v10253_v7  ;;  %v6475_v24 = vrot.slane %v16610_v13, 2  ;;  %v11394_v7 = vld [vmem:[#allocation12 + $0x2d4] sm:$0xf]  ;;  %v16631_v43 = vshll.u32 %v16610_v13, 16  ;;  %v10450_v0 = vld [vmem:[#allocation12 + $0x3f8] sm:$0xf0] }
 0x814   : > { %v10453_v42 = vor.u32 %v11430_v3, %v10450_v0  ;;  %v11405_v58 = vld [vmem:[#allocation12 + $0x324] sm:$0xf0] }
 0x817   : > { %7159 = vmatpush.bf16.msra.mxu3 %v10241_v57  ;;  %7187 = vmatpush.bf16.msra.mxu0 %v10245_v29  ;;  %v11369_v57 = vld [vmem:[#allocation12 + $0x204] sm:$0xf0]  ;;  %v16628_v29 = vshrl.u32 %v16610_v13, 16  ;;  %v10384_v13 = vld [vmem:[#allocation12 + $0x370] sm:$0xf] }
 0x818   : > { %v16612_v6 = vpop.f32.mrf.mxu1  ;;  %v10201_v25 = vor.u32 %v11369_v57, %v10200_v34  ;;  %v10385_v39 = vor.u32 %v11415_v59, %v10384_v13  ;;  %v10370_v34 = vld [vmem:[#allocation12 + $0x358] sm:$0xf0]  ;;  %v10281_v57 = vor.u32 %v11389_v38, %v10280_v16  ;;  %v10362_v13 = vld [vmem:[#allocation12 + $0x348] sm:$0xf0] }
 0x819   : > { %v6401_v28 = vpack.c.bf16 %v16612_v6, %v16612_v6  ;;  %v6716_v15 = vrot.slane %v16628_v29, 1 }
 0x81b   : > { %v6476_v14 = vrot.slane %v6401_v28, 2  ;;  %7160 = vmatpush.bf16.msra.mxu3 %v10233_v19  ;;  %7188 = vmatpush.bf16.msra.mxu0 %v10237_v54  ;;  %v16621_v44 = vshrl.u32 %v6401_v28, 16  ;;  %v16623_v5 = vshll.u32 %v6401_v28, 16  ;;  %v10309_v19 = vor.u32 %v11394_v7, %v10306_v33  ;;  %v11368_v54 = vld [vmem:[#allocation12 + $0x204] sm:$0xf] }
 0x81c   : > { %v10205_v10 = vor.u32 %v11368_v54, %v10202_v31  ;;  %v10368_v7 = vld [vmem:[#allocation12 + $0x350] sm:$0xf]  ;;  %v10373_v54 = vor.u32 %v11410_v8, %v10370_v34  ;;  %v11386_v31 = vld [vmem:[#allocation12 + $0x294] sm:$0xf]  ;;  %v11428_v8 = vld [vmem:[#allocation12 + $0x3e4] sm:$0xf] }
 0x81d   : > { %v6477_v55 = vsel %vm1247_vm1, %v6475_v24, %v6476_v14  ;;  %v6724_v48 = vrot.slane %v16621_v44, 1  ;;  %v6727_v28 = vrot.slane %v16623_v5, 2  ;;  %v6719_v14 = vrot.slane %v16631_v43, 2  ;;  %v10442_v34 = vld [vmem:[#allocation12 + $0x3e8] sm:$0xf0] }
 0x81e   : > { %6662 = vmatmul.bf16.vlgmr.msra.gmra.mxu2 %v6477_v55  ;;  %6690 = vmatmul.bf16.vlgmr.msrb.gmra.mxu1 %v6477_v55  ;;  %v6982_v24 = vrot.slane %v16604_v20, 3  ;;  %v10389_v55 = vor.u32 %v11414_v63, %v10386_v4  ;;  %v10264_v63 = vld [vmem:[#allocation12 + $0x280] sm:$0xf]  ;;  %v11385_v4 = vld [vmem:[#allocation12 + $0x284] sm:$0xf0] }
 0x81f   : > { %6900 = vmatmul.bf16.vlgmr.msrb.gmra.mxu3 %v6712_v12  ;;  %6928 = vmatmul.bf16.vlgmr.msrb.gmra.mxu0 %v6712_v12  ;;  %v11413_v12 = vld [vmem:[#allocation12 + $0x364] sm:$0xf0]  ;;  %v6720_v37 = vor.u32 %v6719_v14, %v6716_v15  ;;  %v11384_v15 = vld [vmem:[#allocation12 + $0x284] sm:$0xf]  ;;  %v6991_v14 = vrot.slane %v16621_v44, 2 }
 0x820   : > { %7161 = vmatpush.bf16.msra.mxu3 %v10225_v62  ;;  %7171 = vmatpush.bf16.msra.mxu2 %v10321_v1  ;;  %v10301_v62 = vor.u32 %v11392_v51, %v10298_v2  ;;  %v10288_v1 = vld [vmem:[#allocation12 + $0x2b0] sm:$0xf]  ;;  %v10274_v51 = vld [vmem:[#allocation12 + $0x298] sm:$0xf0]  ;;  %v11408_v2 = vld [vmem:[#allocation12 + $0x344] sm:$0xf] }
 0x821   : > { %7189 = vmatpush.bf16.msra.mxu0 %v10229_v23  ;;  %7199 = vmatpush.bf16.msrb.mxu1 %v10325_v30  ;;  %v6728_v23 = vor.u32 %v6727_v28, %v6724_v48  ;;  %v11390_v30 = vld [vmem:[#allocation12 + $0x2b4] sm:$0xf]  ;;  %v10360_v48 = vld [vmem:[#allocation12 + $0x340] sm:$0xf]  ;;  %v11409_v28 = vld [vmem:[#allocation12 + $0x344] sm:$0xf0] }
 0x822   : > { %v10293_v60 = vor.u32 %v11390_v30, %v10290_v52  ;;  %v11406_v30 = vld [vmem:[#allocation12 + $0x334] sm:$0xf]  ;;  %v10354_v52 = vld [vmem:[#allocation12 + $0x338] sm:$0xf0] }
 0x823   : > { %v10357_v16 = vor.u32 %v11406_v30, %v10354_v52  ;;  %v7250_v30 = vrot.slane %v16602_v35, 3 }
 0x824   : > { %7162 = vmatpush.bf16.msra.mxu3 %v10217_v41  ;;  %7172 = vmatpush.bf16.msra.mxu2 %v10313_v61  ;;  %v10289_v41 = vor.u32 %v11391_v9, %v10288_v1  ;;  %v6983_v61 = vor.u32 %v6982_v24, %v6981_v47  ;;  %v10352_v47 = vld [vmem:[#allocation12 + $0x330] sm:$0xf]  ;;  %v10365_v1 = vor.u32 %v11408_v2, %v10362_v13  ;;  %v11402_v2 = vld [vmem:[#allocation12 + $0x314] sm:$0xf]  ;;  %v10338_v13 = vld [vmem:[#allocation12 + $0x318] sm:$0xf0] }
 0x825   : > { %7190 = vmatpush.bf16.msra.mxu0 %v10221_v18  ;;  %7200 = vmatpush.bf16.msrb.mxu1 %v10317_v32  ;;  %v6729_v18 = vsel %vm4608_vm11, %v6720_v37, %v6728_v23  ;;  %v10377_v32 = vor.u32 %v11413_v12, %v10376_v22  ;;  %v10448_v9 = vld [vmem:[#allocation12 + $0x3f0] sm:$0xf]  ;;  %v11407_v23 = vld [vmem:[#allocation12 + $0x334] sm:$0xf0]  ;;  %v6988_v22 = vrot.slane %v16628_v29, 2  ;;  %v10265_v12 = vor.u32 %v11385_v4, %v10264_v63 }
 0x826   : > { %v6987_v33 = vsel %vm3133_vm6, %v6983_v61, %v6986_v27  ;;  %v6989_v27 = vrot.slane %v16631_v43, 3  ;;  %v7254_v63 = vrot.slane %v16600_v40, 4  ;;  %v10330_v40 = vld [vmem:[#allocation12 + $0x308] sm:$0xf0] }
 0x828   : > { %7163 = vmatpush.bf16.msra.mxu3 %v10209_v11  ;;  %7173 = vmatpush.bf16.msra.mxu2 %v10305_v36  ;;  %v16642_v11 = vshrl.u32 %v16593_v26, 16  ;;  %v16645_v36 = vshll.u32 %v16593_v26, 16 }
 0x829   : > { %7191 = vmatpush.bf16.msra.mxu0 %v10213_v45  ;;  %7201 = vmatpush.bf16.msrb.mxu1 %v10309_v19  ;;  %v11387_v45 = vld [vmem:[#allocation12 + $0x294] sm:$0xf0]  ;;  %v10369_v19 = vor.u32 %v11411_v56, %v10368_v7  ;;  %v11404_v7 = vld [vmem:[#allocation12 + $0x324] sm:$0xf]  ;;  %v6990_v56 = vor.u32 %v6989_v27, %v6988_v22  ;;  %v11446_v22 = vld [vmem:[#allocation12 + $0x474] sm:$0xf] }
 0x82a   : > { %v10273_v59 = vor.u32 %v11387_v45, %v10272_v50  ;;  %v8570_v24 = vrot.slane %v16642_v11, 2  ;;  %v10514_v27 = vld [vmem:[#allocation12 + $0x478] sm:$0xf0] }
 0x82c   : > { %7164 = vmatpush.bf16.msra.mxu3 %v10201_v25  ;;  %7174 = vmatpush.bf16.msra.mxu2 %v10297_v21  ;;  %v10277_v25 = vor.u32 %v11386_v31, %v10274_v51  ;;  %v10266_v21 = vld [vmem:[#allocation12 + $0x288] sm:$0xf0]  ;;  %v10432_v31 = vld [vmem:[#allocation12 + $0x3d0] sm:$0xf]  ;;  %v11427_v51 = vld [vmem:[#allocation12 + $0x3d4] sm:$0xf0] }
 0x82d   : > { %7192 = vmatpush.bf16.msra.mxu0 %v10205_v10  ;;  %7202 = vmatpush.bf16.msrb.mxu1 %v10301_v62  ;;  %v6992_v10 = vrot.slane %v16623_v5, 3  ;;  %v10361_v62 = vor.u32 %v11409_v28, %v10360_v48  ;;  %v10445_v48 = vor.u32 %v11428_v8, %v10442_v34  ;;  %v11403_v28 = vld [vmem:[#allocation12 + $0x314] sm:$0xf0] }
 0x82e   : > { %6914 = vmatmul.bf16.vlgmr.msrb.gmra.mxu2 %v6729_v18  ;;  %6942 = vmatmul.bf16.vlgmr.msra.gmra.mxu1 %v6729_v18  ;;  %v10344_v18 = vld [vmem:[#allocation12 + $0x320] sm:$0xf] }
 0x82f   : > { %7165 = vmatmul.bf16.vlgmr.msra.gmra.mxu3 %v6987_v33  ;;  %v6993_v38 = vor.u32 %v6992_v10, %v6991_v14  ;;  %v10345_v45 = vor.u32 %v11405_v58, %v10344_v18  ;;  %v10433_v14 = vor.u32 %v11427_v51, %v10432_v31  ;;  %v11425_v10 = vld [vmem:[#allocation12 + $0x3c4] sm:$0xf0]  ;;  %v11422_v18 = vld [vmem:[#allocation12 + $0x3b4] sm:$0xf]  ;;  %v10504_v58 = vld [vmem:[#allocation12 + $0x460] sm:$0xf] }
 0x830   : > { %7426 = vmatpush.bf16.msrb.mxu3 %v10385_v39  ;;  %7175 = vmatpush.bf16.msra.mxu2 %v10289_v41  ;;  %v11431_v39 = vld [vmem:[#allocation12 + $0x3f4] sm:$0xf0]  ;;  %v10269_v41 = vor.u32 %v11384_v15, %v10266_v21 }
 0x831   : > { %7454 = vmatpush.bf16.msrb.mxu0 %v10389_v55  ;;  %7203 = vmatpush.bf16.msrb.mxu1 %v10293_v60  ;;  %v8571_v55 = vrot.slane %v16645_v36, 3  ;;  %v10449_v61 = vor.u32 %v11431_v39, %v10448_v9  ;;  %v10353_v60 = vor.u32 %v11407_v23, %v10352_v47  ;;  %v6994_v50 = vsel %vm3133_vm6, %v6990_v56, %v6993_v38  ;;  %v11424_v9 = vld [vmem:[#allocation12 + $0x3c4] sm:$0xf]  ;;  %v10426_v39 = vld [vmem:[#allocation12 + $0x3c8] sm:$0xf0] }
 0x832   : > { %7193 = vmatmul.bf16.vlgmr.msra.gmra.mxu0 %v6987_v33  ;;  %v10346_v33 = vld [vmem:[#allocation12 + $0x328] sm:$0xf0]  ;;  %v10341_v47 = vor.u32 %v11402_v2, %v10338_v13  ;;  %v11447_v23 = vld [vmem:[#allocation12 + $0x474] sm:$0xf0]  ;;  %v11442_v13 = vld [vmem:[#allocation12 + $0x454] sm:$0xf] }
 0x833   : > { %v16653_v37 = vor.u32 %v8571_v55, %v8570_v24  ;;  %v11401_v24 = vld [vmem:[#allocation12 + $0x304] sm:$0xf0]  ;;  %v10512_v55 = vld [vmem:[#allocation12 + $0x470] sm:$0xf]  ;;  %v11423_v38 = vld [vmem:[#allocation12 + $0x3b4] sm:$0xf0] }
 0x834   : > { %7427 = vmatpush.bf16.msrb.mxu3 %v10377_v32  ;;  %7176 = vmatpush.bf16.msra.mxu2 %v10281_v57  ;;  %v10440_v32 = vld [vmem:[#allocation12 + $0x3e0] sm:$0xf]  ;;  %v16657_v57 = vpack.c.bf16 %v16612_v6, %v16596_v17  ;;  %v7253_v17 = vrot.slane %v16598_v46, 3  ;;  %v11426_v6 = vld [vmem:[#allocation12 + $0x3d4] sm:$0xf] }
 0x835   : > { %7455 = vmatpush.bf16.msrb.mxu0 %v10381_v53  ;;  %7204 = vmatpush.bf16.msrb.mxu1 %v10285_v49  ;;  %v11429_v53 = vld [vmem:[#allocation12 + $0x3e4] sm:$0xf0]  ;;  %v10424_v46 = vld [vmem:[#allocation12 + $0x3c0] sm:$0xf]  ;;  %v11443_v2 = vld [vmem:[#allocation12 + $0x454] sm:$0xf0] }
 0x836   : > { %v10441_v49 = vor.u32 %v11429_v53, %v10440_v32  ;;  %v16663_v4 = vshrl.u32 %v16657_v57, 16  ;;  %v16666_v15 = vshll.u32 %v16657_v57, 16  ;;  %v10425_v52 = vor.u32 %v11425_v10, %v10424_v46  ;;  %v10488_v46 = vld [vmem:[#allocation12 + $0x440] sm:$0xf]  ;;  %v11441_v10 = vld [vmem:[#allocation12 + $0x444] sm:$0xf0] }
 0x837   : > { %v10517_v32 = vor.u32 %v11446_v22, %v10514_v27  ;;  %v7255_v53 = vor.u32 %v7254_v63, %v7253_v17  ;;  %v10498_v17 = vld [vmem:[#allocation12 + $0x458] sm:$0xf0]  ;;  %v11416_v22 = vld [vmem:[#allocation12 + $0x384] sm:$0xf]  ;;  %v10394_v27 = vld [vmem:[#allocation12 + $0x388] sm:$0xf0] }
 0x838   : > { %7428 = vmatpush.bf16.msrb.mxu3 %v10369_v19  ;;  %7177 = vmatpush.bf16.msra.mxu2 %v10273_v59  ;;  %v10349_v19 = vor.u32 %v11404_v7, %v10346_v33  ;;  %v10434_v59 = vld [vmem:[#allocation12 + $0x3d8] sm:$0xf0]  ;;  %v8575_v35 = vrot.slane %v16666_v15, 3  ;;  %v11445_v7 = vld [vmem:[#allocation12 + $0x464] sm:$0xf0] }
 0x839   : > { %7456 = vmatpush.bf16.msrb.mxu0 %v10373_v54  ;;  %7205 = vmatpush.bf16.msrb.mxu1 %v10277_v25  ;;  %v10336_v54 = vld [vmem:[#allocation12 + $0x310] sm:$0xf]  ;;  %v10328_v25 = vld [vmem:[#allocation12 + $0x300] sm:$0xf]  ;;  %v10506_v33 = vld [vmem:[#allocation12 + $0x468] sm:$0xf0] }
 0x83a   : > { %v10337_v21 = vor.u32 %v11403_v28, %v10336_v54  ;;  %v10329_v3 = vor.u32 %v11401_v24, %v10328_v25  ;;  %v11420_v54 = vld [vmem:[#allocation12 + $0x3a4] sm:$0xf]  ;;  %v10496_v28 = vld [vmem:[#allocation12 + $0x450] sm:$0xf]  ;;  %v11419_v25 = vld [vmem:[#allocation12 + $0x394] sm:$0xf0] }
 0x83b   : > { %v10497_v63 = vor.u32 %v11443_v2, %v10496_v28  ;;  %v10402_v24 = vld [vmem:[#allocation12 + $0x398] sm:$0xf0]  ;;  %v10464_v28 = vld [vmem:[#allocation12 + $0x410] sm:$0xf]  ;;  %v11435_v2 = vld [vmem:[#allocation12 + $0x414] sm:$0xf0] }
 0x83c   : > { %7429 = vmatpush.bf16.msrb.mxu3 %v10361_v62  ;;  %7178 = vmatpush.bf16.msra.mxu2 %v10265_v12  ;;  %v10437_v62 = vor.u32 %v11426_v6, %v10434_v59  ;;  %v7251_v12 = vrot.slane %v16604_v20, 4  ;;  %v11444_v20 = vld [vmem:[#allocation12 + $0x464] sm:$0xf] }
 0x83d   : > { %7457 = vmatpush.bf16.msrb.mxu0 %v10365_v1  ;;  %7206 = vmatpush.bf16.msrb.mxu1 %v10269_v41  ;;  %v11400_v1 = vld [vmem:[#allocation12 + $0x304] sm:$0xf]  ;;  %v10416_v41 = vld [vmem:[#allocation12 + $0x3b0] sm:$0xf]  ;;  %v10509_v51 = vor.u32 %v11444_v20, %v10506_v33  ;;  %v10472_v20 = vld [vmem:[#allocation12 + $0x420] sm:$0xf] }
 0x83e   : > { %v10333_v0 = vor.u32 %v11400_v1, %v10330_v40  ;;  %v7252_v8 = vor.u32 %v7251_v12, %v7250_v30  ;;  %v10417_v34 = vor.u32 %v11423_v38, %v10416_v41  ;;  %v10490_v1 = vld [vmem:[#allocation12 + $0x448] sm:$0xf0]  ;;  %v7260_v40 = vrot.slane %v16621_v44, 3  ;;  %v10576_v41 = vld [vmem:[#allocation12 + $0x4f0] sm:$0xf] }
 0x83f   : > { %7179 = vmatmul.bf16.vlgmr.msra.gmra.mxu2 %v6994_v50  ;;  %v10489_v30 = vor.u32 %v11441_v10, %v10488_v46  ;;  %v10482_v44 = vld [vmem:[#allocation12 + $0x438] sm:$0xf0]  ;;  %v11437_v33 = vld [vmem:[#allocation12 + $0x424] sm:$0xf0] }
 0x840   : > { %7440 = vmatpush.bf16.msrb.mxu2 %v10449_v61  ;;  %7430 = vmatpush.bf16.msrb.mxu3 %v10353_v60  ;;  %v8574_v61 = vrot.slane %v16663_v4, 2  ;;  %v10429_v60 = vor.u32 %v11424_v9, %v10426_v39  ;;  %v7256_v31 = vsel %vm3789_vm9, %v7252_v8, %v7255_v53  ;;  %v7261_v9 = vrot.slane %v16623_v5, 4  ;;  %v10568_v8 = vld [vmem:[#allocation12 + $0x4e0] sm:$0xf]  ;;  %v11433_v10 = vld [vmem:[#allocation12 + $0x404] sm:$0xf0] }
 0x841   : > { %7458 = vmatpush.bf16.msrb.mxu0 %v10357_v16  ;;  %7468 = vmatpush.bf16.msra.mxu1 %v10453_v42  ;;  %v10513_v16 = vor.u32 %v11447_v23, %v10512_v55  ;;  %v10418_v42 = vld [vmem:[#allocation12 + $0x3b8] sm:$0xf0]  ;;  %v10392_v55 = vld [vmem:[#allocation12 + $0x380] sm:$0xf]  ;;  %v7257_v5 = vrot.slane %v16628_v29, 3 }
 0x842   : > { %7207 = vmatmul.bf16.vlgmr.msrb.gmra.mxu1 %v6994_v50  ;;  %v16672_v56 = vor.u32 %v8575_v35, %v8574_v61  ;;  %v10505_v50 = vor.u32 %v11445_v7, %v10504_v58  ;;  %v11463_v61 = vld [vmem:[#allocation12 + $0x4f4] sm:$0xf0]  ;;  %v10578_v35 = vld [vmem:[#allocation12 + $0x4f8] sm:$0xf0]  ;;  %v7262_v7 = vor.u32 %v7261_v9, %v7260_v40  ;;  %v11436_v29 = vld [vmem:[#allocation12 + $0x424] sm:$0xf] }
 0x843   : > { %v11432_v9 = vld [vmem:[#allocation12 + $0x404] sm:$0xf] }
 0x844   : > { %7441 = vmatpush.bf16.msrb.mxu2 %v10441_v49  ;;  %7431 = vmatpush.bf16.msrb.mxu3 %v10345_v45  ;;  %v10421_v49 = vor.u32 %v11422_v18, %v10418_v42  ;;  %v10408_v45 = vld [vmem:[#allocation12 + $0x3a0] sm:$0xf]  ;;  %v11462_v18 = vld [vmem:[#allocation12 + $0x4f4] sm:$0xf]  ;;  %v10577_v42 = vor.u32 %v11463_v61, %v10576_v41 }
 0x845   : > { %7459 = vmatpush.bf16.msrb.mxu0 %v10349_v19  ;;  %7469 = vmatpush.bf16.msra.mxu1 %v10445_v48  ;;  %v11421_v19 = vld [vmem:[#allocation12 + $0x3a4] sm:$0xf0]  ;;  %v10410_v48 = vld [vmem:[#allocation12 + $0x3a8] sm:$0xf0] }
 0x846   : > { %v10409_v6 = vor.u32 %v11421_v19, %v10408_v45  ;;  %v10413_v59 = vor.u32 %v11420_v54, %v10410_v48  ;;  %v11460_v45 = vld [vmem:[#allocation12 + $0x4e4] sm:$0xf]  ;;  %v10570_v19 = vld [vmem:[#allocation12 + $0x4e8] sm:$0xf0]  ;;  %v10473_v54 = vor.u32 %v11437_v33, %v10472_v20  ;;  %v10536_v20 = vld [vmem:[#allocation12 + $0x4a0] sm:$0xf] }
 0x847   : > { %v11453_v33 = vld [vmem:[#allocation12 + $0x4a4] sm:$0xf0] }
 0x848   : > { %7442 = vmatpush.bf16.msrb.mxu2 %v10433_v14  ;;  %7432 = vmatpush.bf16.msrb.mxu3 %v10337_v21  ;;  %v10400_v14 = vld [vmem:[#allocation12 + $0x390] sm:$0xf]  ;;  %v11418_v21 = vld [vmem:[#allocation12 + $0x394] sm:$0xf] }
 0x849   : > { %7460 = vmatpush.bf16.msrb.mxu0 %v10341_v47  ;;  %7470 = vmatpush.bf16.msra.mxu1 %v10437_v62  ;;  %v10501_v47 = vor.u32 %v11442_v13, %v10498_v17  ;;  %v11440_v62 = vld [vmem:[#allocation12 + $0x444] sm:$0xf]  ;;  %v10401_v39 = vor.u32 %v11419_v25, %v10400_v14  ;;  %v10405_v23 = vor.u32 %v11418_v21, %v10402_v24  ;;  %v10560_v13 = vld [vmem:[#allocation12 + $0x4d0] sm:$0xf]  ;;  %v11458_v14 = vld [vmem:[#allocation12 + $0x4d4] sm:$0xf] }
 0x84a   : > { %v10493_v12 = vor.u32 %v11440_v62, %v10490_v1  ;;  %v10573_v17 = vor.u32 %v11460_v45, %v10570_v19  ;;  %v10562_v25 = vld [vmem:[#allocation12 + $0x4d8] sm:$0xf0]  ;;  %v10465_v21 = vor.u32 %v11435_v2, %v10464_v28  ;;  %v10552_v62 = vld [vmem:[#allocation12 + $0x4c0] sm:$0xf]  ;;  %v11457_v1 = vld [vmem:[#allocation12 + $0x4c4] sm:$0xf0]  ;;  %v10537_v19 = vor.u32 %v11453_v33, %v10536_v20 }
 0x84b   : > { %v10565_v40 = vor.u32 %v11458_v14, %v10562_v25  ;;  %v10626_v45 = vld [vmem:[#allocation12 + $0x558] sm:$0xf0]  ;;  %v11450_v28 = vld [vmem:[#allocation12 + $0x494] sm:$0xf]  ;;  %v10520_v25 = vld [vmem:[#allocation12 + $0x480] sm:$0xf] }
 0x84c   : > { %7443 = vmatpush.bf16.msrb.mxu2 %v10425_v52  ;;  %7433 = vmatpush.bf16.msrb.mxu3 %v10329_v3  ;;  %v11417_v52 = vld [vmem:[#allocation12 + $0x384] sm:$0xf0]  ;;  %v10480_v3 = vld [vmem:[#allocation12 + $0x430] sm:$0xf] }
 0x84d   : > { %7461 = vmatpush.bf16.msrb.mxu0 %v10333_v0  ;;  %7471 = vmatpush.bf16.msra.mxu1 %v10429_v60  ;;  %v11439_v0 = vld [vmem:[#allocation12 + $0x434] sm:$0xf0]  ;;  %v11438_v60 = vld [vmem:[#allocation12 + $0x434] sm:$0xf]  ;;  %v10393_v38 = vor.u32 %v11417_v52, %v10392_v55  ;;  %v11456_v55 = vld [vmem:[#allocation12 + $0x4c4] sm:$0xf] }
 0x84e   : > { %v10481_v53 = vor.u32 %v11439_v0, %v10480_v3  ;;  %v10485_v58 = vor.u32 %v11438_v60, %v10482_v44  ;;  %v11479_v52 = vld [vmem:[#allocation12 + $0x574] sm:$0xf0]  ;;  %v10553_v3 = vor.u32 %v11457_v1, %v10552_v62  ;;  %v10544_v60 = vld [vmem:[#allocation12 + $0x4b0] sm:$0xf] }
 0x84f   : > { %7434 = vmatmul.bf16.vlgmr.msrb.gmra.mxu3 %v7256_v31  ;;  %v11455_v44 = vld [vmem:[#allocation12 + $0x4b4] sm:$0xf0]  ;;  %v10608_v1 = vld [vmem:[#allocation12 + $0x530] sm:$0xf] }
 0x850   : > { %7681 = vmatpush.bf16.msra.mxu3 %v10513_v16  ;;  %7462 = vmatmul.bf16.vlgmr.msrb.gmra.mxu0 %v7256_v31  ;;  %v7258_v16 = vrot.slane %v16631_v43, 4  ;;  %v10688_v20 = vld [vmem:[#allocation12 + $0x5d0] sm:$0xf] }
 0x851   : > { %7709 = vmatpush.bf16.msra.mxu0 %v10517_v32  ;;  %7444 = vmatpush.bf16.msrb.mxu2 %v10417_v34  ;;  %v10397_v32 = vor.u32 %v11416_v22, %v10394_v27  ;;  %v10581_v34 = vor.u32 %v11462_v18, %v10578_v35  ;;  %v11478_v27 = vld [vmem:[#allocation12 + $0x574] sm:$0xf]  ;;  %v10632_v18 = vld [vmem:[#allocation12 + $0x560] sm:$0xf]  ;;  %v11477_v35 = vld [vmem:[#allocation12 + $0x564] sm:$0xf0] }
 0x852   : > { %7472 = vmatpush.bf16.msra.mxu1 %v10421_v49  ;;  %v11461_v49 = vld [vmem:[#allocation12 + $0x4e4] sm:$0xf0]  ;;  %v7259_v43 = vor.u32 %v7258_v16, %v7257_v5  ;;  %v11454_v5 = vld [vmem:[#allocation12 + $0x4b4] sm:$0xf] }
 0x854   : > { %7682 = vmatpush.bf16.msra.mxu3 %v10505_v50  ;;  %v10474_v50 = vld [vmem:[#allocation12 + $0x428] sm:$0xf0]  ;;  %v7263_v31 = vsel %vm3789_vm9, %v7259_v43, %v7262_v7  ;;  %v10633_v7 = vor.u32 %v11477_v35, %v10632_v18  ;;  %v11474_v43 = vld [vmem:[#allocation12 + $0x554] sm:$0xf]  ;;  %v11492_v18 = vld [vmem:[#allocation12 + $0x5e4] sm:$0xf] }
 0x855   : > { %7710 = vmatpush.bf16.msra.mxu0 %v10509_v51  ;;  %7445 = vmatpush.bf16.msrb.mxu2 %v10409_v6  ;;  %v10569_v51 = vor.u32 %v11461_v49, %v10568_v8  ;;  %v10477_v48 = vor.u32 %v11436_v29, %v10474_v50  ;;  %v11459_v6 = vld [vmem:[#allocation12 + $0x4d4] sm:$0xf0]  ;;  %v11452_v8 = vld [vmem:[#allocation12 + $0x4a4] sm:$0xf]  ;;  %v10538_v49 = vld [vmem:[#allocation12 + $0x4a8] sm:$0xf0]  ;;  %v10629_v2 = vor.u32 %v11474_v43, %v10626_v45 }
 0x856   : > { %7473 = vmatpush.bf16.msra.mxu1 %v10413_v59  ;;  %v11434_v59 = vld [vmem:[#allocation12 + $0x414] sm:$0xf]  ;;  %v10561_v24 = vor.u32 %v11459_v6, %v10560_v13  ;;  %v10624_v29 = vld [vmem:[#allocation12 + $0x550] sm:$0xf]  ;;  %v11475_v50 = vld [vmem:[#allocation12 + $0x554] sm:$0xf0] }
 0x857   : > { %v10530_v13 = vld [vmem:[#allocation12 + $0x498] sm:$0xf0]  ;;  %v11473_v6 = vld [vmem:[#allocation12 + $0x544] sm:$0xf0]  ;;  %v10698_v35 = vld [vmem:[#allocation12 + $0x5e8] sm:$0xf0] }
 0x858   : > { %7683 = vmatpush.bf16.msra.mxu3 %v10497_v63  ;;  %v10466_v63 = vld [vmem:[#allocation12 + $0x418] sm:$0xf0]  ;;  %v10701_v33 = vor.u32 %v11492_v18, %v10698_v35  ;;  %v10584_v45 = vld [vmem:[#allocation12 + $0x500] sm:$0xf]  ;;  %v10752_v18 = vld [vmem:[#allocation12 + $0x650] sm:$0xf] }
 0x859   : > { %7711 = vmatpush.bf16.msra.mxu0 %v10501_v47  ;;  %7446 = vmatpush.bf16.msrb.mxu2 %v10401_v39  ;;  %v10456_v47 = vld [vmem:[#allocation12 + $0x400] sm:$0xf]  ;;  %v10469_v46 = vor.u32 %v11434_v59, %v10466_v63  ;;  %v10458_v39 = vld [vmem:[#allocation12 + $0x408] sm:$0xf0]  ;;  %v11472_v59 = vld [vmem:[#allocation12 + $0x544] sm:$0xf] }
 0x85a   : > { %7474 = vmatpush.bf16.msra.mxu1 %v10405_v23  ;;  %v10554_v23 = vld [vmem:[#allocation12 + $0x4c8] sm:$0xf0]  ;;  %v10457_v22 = vor.u32 %v11433_v10, %v10456_v47  ;;  %v10461_v0 = vor.u32 %v11432_v9, %v10458_v39  ;;  %v10704_v9 = vld [vmem:[#allocation12 + $0x5f0] sm:$0xf]  ;;  %v11495_v39 = vld [vmem:[#allocation12 + $0x5f4] sm:$0xf0] }
 0x85b   : > { %v10557_v41 = vor.u32 %v11456_v55, %v10554_v23  ;;  %v10618_v63 = vld [vmem:[#allocation12 + $0x548] sm:$0xf0]  ;;  %v11470_v55 = vld [vmem:[#allocation12 + $0x534] sm:$0xf]  ;;  %v10610_v23 = vld [vmem:[#allocation12 + $0x538] sm:$0xf0] }
 0x85c   : > { %7684 = vmatpush.bf16.msra.mxu3 %v10489_v30  ;;  %v10640_v30 = vld [vmem:[#allocation12 + $0x570] sm:$0xf]  ;;  %v10522_v10 = vld [vmem:[#allocation12 + $0x488] sm:$0xf0]  ;;  %v10621_v62 = vor.u32 %v11472_v59, %v10618_v63  ;;  %v11507_v35 = vld [vmem:[#allocation12 + $0x654] sm:$0xf0] }
 0x85d   : > { %7712 = vmatpush.bf16.msra.mxu0 %v10493_v12  ;;  %7447 = vmatpush.bf16.msrb.mxu2 %v10393_v38  ;;  %v10642_v12 = vld [vmem:[#allocation12 + $0x578] sm:$0xf0]  ;;  %v10641_v61 = vor.u32 %v11479_v52, %v10640_v30  ;;  %v11494_v52 = vld [vmem:[#allocation12 + $0x5f4] sm:$0xf]  ;;  %v10682_v59 = vld [vmem:[#allocation12 + $0x5c8] sm:$0xf0] }
 0x85e   : > { %7475 = vmatpush.bf16.msra.mxu1 %v10397_v32  ;;  %v10645_v16 = vor.u32 %v11478_v27, %v10642_v12  ;;  %v10546_v38 = vld [vmem:[#allocation12 + $0x4b8] sm:$0xf0]  ;;  %v11476_v32 = vld [vmem:[#allocation12 + $0x564] sm:$0xf]  ;;  %v10768_v63 = vld [vmem:[#allocation12 + $0x670] sm:$0xf] }
 0x860   : > { %7685 = vmatpush.bf16.msra.mxu3 %v10481_v53  ;;  %7448 = vmatmul.bf16.vlgmr.msrb.gmra.mxu2 %v7263_v31  ;;  %v10634_v53 = vld [vmem:[#allocation12 + $0x568] sm:$0xf0] }
 0x861   : > { %7695 = vmatpush.bf16.msra.mxu2 %v10577_v42  ;;  %7713 = vmatpush.bf16.msra.mxu0 %v10485_v58  ;;  %v10545_v42 = vor.u32 %v11455_v44, %v10544_v60  ;;  %v10549_v58 = vor.u32 %v11454_v5, %v10546_v38  ;;  %v10696_v60 = vld [vmem:[#allocation12 + $0x5e0] sm:$0xf]  ;;  %v11493_v5 = vld [vmem:[#allocation12 + $0x5e4] sm:$0xf0]  ;;  %v10602_v38 = vld [vmem:[#allocation12 + $0x528] sm:$0xf0] }
 0x862   : > { %7723 = vmatpush.bf16.msrb.mxu1 %v10581_v34  ;;  %v10637_v34 = vor.u32 %v11476_v32, %v10634_v53  ;;  %v10697_v53 = vor.u32 %v11493_v5, %v10696_v60  ;;  %v10664_v60 = vld [vmem:[#allocation12 + $0x5a0] sm:$0xf]  ;;  %v11484_v5 = vld [vmem:[#allocation12 + $0x5a4] sm:$0xf] }
 0x863   : > { %7476 = vmatmul.bf16.vlgmr.msra.gmra.mxu1 %v7263_v31  ;;  %v10625_v31 = vor.u32 %v11475_v50, %v10624_v29  ;;  %v11490_v29 = vld [vmem:[#allocation12 + $0x5d4] sm:$0xf]  ;;  %v10690_v50 = vld [vmem:[#allocation12 + $0x5d8] sm:$0xf0] }
 0x864   : > { %7686 = vmatpush.bf16.msra.mxu3 %v10473_v54  ;;  %v10541_v54 = vor.u32 %v11452_v8, %v10538_v49  ;;  %v11491_v8 = vld [vmem:[#allocation12 + $0x5d4] sm:$0xf0]  ;;  %v10594_v49 = vld [vmem:[#allocation12 + $0x518] sm:$0xf0] }
 0x865   : > { %7696 = vmatpush.bf16.msra.mxu2 %v10569_v51  ;;  %7714 = vmatpush.bf16.msra.mxu0 %v10477_v48  ;;  %v10528_v51 = vld [vmem:[#allocation12 + $0x490] sm:$0xf]  ;;  %v11451_v48 = vld [vmem:[#allocation12 + $0x494] sm:$0xf0] }
 0x866   : > { %7724 = vmatpush.bf16.msrb.mxu1 %v10573_v17  ;;  %v10616_v17 = vld [vmem:[#allocation12 + $0x540] sm:$0xf]  ;;  %v10529_v14 = vor.u32 %v11451_v48, %v10528_v51  ;;  %v11465_v51 = vld [vmem:[#allocation12 + $0x504] sm:$0xf0] }
 0x867   : > { %v10617_v47 = vor.u32 %v11473_v6, %v10616_v17  ;;  %v10680_v48 = vld [vmem:[#allocation12 + $0x5c0] sm:$0xf]  ;;  %v10586_v17 = vld [vmem:[#allocation12 + $0x508] sm:$0xf0]  ;;  %v11488_v6 = vld [vmem:[#allocation12 + $0x5c4] sm:$0xf] }
 0x868   : > { %7687 = vmatpush.bf16.msra.mxu3 %v10465_v21  ;;  %v10533_v21 = vor.u32 %v11450_v28, %v10530_v13  ;;  %v11489_v28 = vld [vmem:[#allocation12 + $0x5c4] sm:$0xf0]  ;;  %v11464_v13 = vld [vmem:[#allocation12 + $0x504] sm:$0xf] }
 0x869   : > { %7697 = vmatpush.bf16.msra.mxu2 %v10561_v24  ;;  %7715 = vmatpush.bf16.msra.mxu0 %v10469_v46  ;;  %v11449_v24 = vld [vmem:[#allocation12 + $0x484] sm:$0xf0]  ;;  %v11448_v46 = vld [vmem:[#allocation12 + $0x484] sm:$0xf] }
 0x86a   : > { %7725 = vmatpush.bf16.msrb.mxu1 %v10565_v40  ;;  %v11471_v40 = vld [vmem:[#allocation12 + $0x534] sm:$0xf0]  ;;  %v10521_v30 = vor.u32 %v11449_v24, %v10520_v25  ;;  %v10525_v27 = vor.u32 %v11448_v46, %v10522_v10  ;;  %v10585_v25 = vor.u32 %v11465_v51, %v10584_v45  ;;  %v10681_v24 = vor.u32 %v11489_v28, %v10680_v48  ;;  %v11504_v45 = vld [vmem:[#allocation12 + $0x644] sm:$0xf] }
 0x86b   : > { %v10609_v12 = vor.u32 %v11471_v40, %v10608_v1  ;;  %v10589_v46 = vor.u32 %v11464_v13, %v10586_v17  ;;  %v10685_v10 = vor.u32 %v11488_v6, %v10682_v59  ;;  %v10672_v40 = vld [vmem:[#allocation12 + $0x5b0] sm:$0xf]  ;;  %v7787_v51 = vrot.slane %v16666_v15, 1  ;;  %v11480_v13 = vld [vmem:[#allocation12 + $0x584] sm:$0xf] }
 0x86c   : > { %7688 = vmatpush.bf16.msra.mxu3 %v10457_v22  ;;  %v10706_v22 = vld [vmem:[#allocation12 + $0x5f8] sm:$0xf0]  ;;  %v10650_v17 = vld [vmem:[#allocation12 + $0x588] sm:$0xf0]  ;;  %v10736_v59 = vld [vmem:[#allocation12 + $0x630] sm:$0xf] }
 0x86d   : > { %7698 = vmatpush.bf16.msra.mxu2 %v10553_v3  ;;  %7716 = vmatpush.bf16.msra.mxu0 %v10461_v0  ;;  %v10705_v3 = vor.u32 %v11495_v39, %v10704_v9  ;;  %v10613_v0 = vor.u32 %v11470_v55, %v10610_v23  ;;  %v10709_v44 = vor.u32 %v11494_v52, %v10706_v22  ;;  %v11487_v9 = vld [vmem:[#allocation12 + $0x5b4] sm:$0xf0]  ;;  %v11486_v39 = vld [vmem:[#allocation12 + $0x5b4] sm:$0xf]  ;;  %v10674_v23 = vld [vmem:[#allocation12 + $0x5b8] sm:$0xf0] }
 0x86e   : > { %7726 = vmatpush.bf16.msrb.mxu1 %v10557_v41  ;;  %v10600_v41 = vld [vmem:[#allocation12 + $0x520] sm:$0xf]  ;;  %v11509_v52 = vld [vmem:[#allocation12 + $0x664] sm:$0xf0]  ;;  %v11508_v22 = vld [vmem:[#allocation12 + $0x664] sm:$0xf] }
 0x86f   : > { %7689 = vmatmul.bf16.vlgmr.msra.gmra.mxu3 %v16593_v26 }
 0x870   : > { %7952 = vmatpush.bf16.msrb.mxu3 %v10641_v61  ;;  %7717 = vmatmul.bf16.vlgmr.msra.gmra.mxu0 %v16593_v26  ;;  %v11469_v61 = vld [vmem:[#allocation12 + $0x524] sm:$0xf0] }
 0x871   : > { %7980 = vmatpush.bf16.msrb.mxu0 %v10645_v16  ;;  %7699 = vmatpush.bf16.msra.mxu2 %v10545_v42  ;;  %v11468_v16 = vld [vmem:[#allocation12 + $0x524] sm:$0xf]  ;;  %v10601_v32 = vor.u32 %v11469_v61, %v10600_v41  ;;  %v10677_v41 = vor.u32 %v11486_v39, %v10674_v23  ;;  %v7788_v23 = vor.u32 %v7787_v51, %v16663_v4  ;;  %v11497_v51 = vld [vmem:[#allocation12 + $0x604] sm:$0xf0] }
 0x872   : > { %7727 = vmatpush.bf16.msrb.mxu1 %v10549_v58  ;;  %v10605_v42 = vor.u32 %v11468_v16, %v10602_v38  ;;  %v10592_v58 = vld [vmem:[#allocation12 + $0x510] sm:$0xf]  ;;  %v10666_v38 = vld [vmem:[#allocation12 + $0x5a8] sm:$0xf0] }
 0x874   : > { %7953 = vmatpush.bf16.msrb.mxu3 %v10633_v7  ;;  %v11467_v7 = vld [vmem:[#allocation12 + $0x514] sm:$0xf0] }
 0x875   : > { %7981 = vmatpush.bf16.msrb.mxu0 %v10637_v34  ;;  %7700 = vmatpush.bf16.msra.mxu2 %v10537_v19  ;;  %v11466_v34 = vld [vmem:[#allocation12 + $0x514] sm:$0xf]  ;;  %v10593_v43 = vor.u32 %v11467_v7, %v10592_v58  ;;  %v7779_v19 = vrot.slane %v16645_v36, 1  ;;  %v10669_v58 = vor.u32 %v11484_v5, %v10666_v38  ;;  %v10753_v7 = vor.u32 %v11507_v35, %v10752_v18  ;;  %v10720_v18 = vld [vmem:[#allocation12 + $0x610] sm:$0xf] }
 0x876   : > { %7728 = vmatpush.bf16.msrb.mxu1 %v10541_v54  ;;  %v10689_v54 = vor.u32 %v11491_v8, %v10688_v20  ;;  %v11483_v8 = vld [vmem:[#allocation12 + $0x594] sm:$0xf0] }
 0x877   : > { %v7780_v1 = vor.u32 %v7779_v19, %v16642_v11  ;;  %v10746_v19 = vld [vmem:[#allocation12 + $0x648] sm:$0xf0]  ;;  %v11499_v35 = vld [vmem:[#allocation12 + $0x614] sm:$0xf0] }
 0x878   : > { %7954 = vmatpush.bf16.msrb.mxu3 %v10625_v31  ;;  %v10597_v31 = vor.u32 %v11466_v34, %v10594_v49  ;;  %v11482_v34 = vld [vmem:[#allocation12 + $0x594] sm:$0xf]  ;;  %v10749_v6 = vor.u32 %v11504_v45, %v10746_v19 }
 0x879   : > { %7982 = vmatpush.bf16.msrb.mxu0 %v10629_v2  ;;  %7701 = vmatpush.bf16.msra.mxu2 %v10529_v14  ;;  %v10693_v2 = vor.u32 %v11490_v29, %v10690_v50  ;;  %v11511_v14 = vld [vmem:[#allocation12 + $0x674] sm:$0xf0]  ;;  %v10658_v29 = vld [vmem:[#allocation12 + $0x598] sm:$0xf0]  ;;  %v10744_v50 = vld [vmem:[#allocation12 + $0x640] sm:$0xf] }
 0x87a   : > { %7729 = vmatpush.bf16.msrb.mxu1 %v10533_v21  ;;  %v11510_v21 = vld [vmem:[#allocation12 + $0x674] sm:$0xf]  ;;  %v10661_v48 = vor.u32 %v11482_v34, %v10658_v29  ;;  %v10818_v34 = vld [vmem:[#allocation12 + $0x6d8] sm:$0xf0] }
 0x87c   : > { %7955 = vmatpush.bf16.msrb.mxu3 %v10617_v47  ;;  %v10770_v47 = vld [vmem:[#allocation12 + $0x678] sm:$0xf0] }
 0x87d   : > { %7983 = vmatpush.bf16.msrb.mxu0 %v10621_v62  ;;  %7702 = vmatpush.bf16.msra.mxu2 %v10521_v30  ;;  %v10769_v62 = vor.u32 %v11511_v14, %v10768_v63  ;;  %v10773_v55 = vor.u32 %v11510_v21, %v10770_v47  ;;  %v10760_v30 = vld [vmem:[#allocation12 + $0x660] sm:$0xf]  ;;  %v11503_v63 = vld [vmem:[#allocation12 + $0x634] sm:$0xf0]  ;;  %v10832_v14 = vld [vmem:[#allocation12 + $0x6f0] sm:$0xf] }
 0x87e   : > { %7730 = vmatpush.bf16.msrb.mxu1 %v10525_v27  ;;  %v10762_v27 = vld [vmem:[#allocation12 + $0x668] sm:$0xf0]  ;;  %v10761_v61 = vor.u32 %v11509_v52, %v10760_v30  ;;  %v11527_v21 = vld [vmem:[#allocation12 + $0x6f4] sm:$0xf0]  ;;  %v11502_v47 = vld [vmem:[#allocation12 + $0x634] sm:$0xf] }
 0x87f   : > { %v10765_v16 = vor.u32 %v11508_v22, %v10762_v27  ;;  %v10833_v39 = vor.u32 %v11527_v21, %v10832_v14  ;;  %v10728_v30 = vld [vmem:[#allocation12 + $0x620] sm:$0xf]  ;;  %v11501_v52 = vld [vmem:[#allocation12 + $0x624] sm:$0xf0]  ;;  %v11542_v21 = vld [vmem:[#allocation12 + $0x774] sm:$0xf] }
 0x880   : > { %7956 = vmatpush.bf16.msrb.mxu3 %v10609_v12  ;;  %7703 = vmatmul.bf16.vlgmr.msra.gmra.mxu2 %v16657_v57  ;;  %v10673_v12 = vor.u32 %v11487_v9, %v10672_v40  ;;  %v10737_v40 = vor.u32 %v11503_v63, %v10736_v59  ;;  %v10824_v22 = vld [vmem:[#allocation12 + $0x6e0] sm:$0xf]  ;;  %v10896_v63 = vld [vmem:[#allocation12 + $0x770] sm:$0xf] }
 0x881   : > { %7966 = vmatpush.bf16.msrb.mxu2 %v10705_v3  ;;  %7984 = vmatpush.bf16.msrb.mxu0 %v10613_v0  ;;  %v18158_v3 = vld [vmem:[#allocation50_spill] sm:$0xff] }
 0x882   : > { %7994 = vmatpush.bf16.msra.mxu1 %v10709_v44  ;;  %v7781_v0 = vsel %vm4212_vm10, %v7780_v1, %v18158_v3  ;;  %v11485_v44 = vld [vmem:[#allocation12 + $0x5a4] sm:$0xf0]  ;;  %v10653_v1 = vor.u32 %v11480_v13, %v10650_v17  ;;  %v7789_v5 = vsel %vm4212_vm10, %v7788_v23, %v18158_v3  ;;  %v10712_v3 = vld [vmem:[#allocation12 + $0x600] sm:$0xf]  ;;  %v11496_v13 = vld [vmem:[#allocation12 + $0x604] sm:$0xf] }
 0x883   : > { %7731 = vmatmul.bf16.vlgmr.msrb.gmra.mxu1 %v16657_v57  ;;  %v10714_v17 = vld [vmem:[#allocation12 + $0x608] sm:$0xf0]  ;;  %v10713_v14 = vor.u32 %v11497_v51, %v10712_v3 }
 0x884   : > { %7957 = vmatpush.bf16.msrb.mxu3 %v10601_v32  ;;  %v11506_v32 = vld [vmem:[#allocation12 + $0x654] sm:$0xf] }
 0x885   : > { %7967 = vmatpush.bf16.msrb.mxu2 %v10697_v53  ;;  %7985 = vmatpush.bf16.msrb.mxu0 %v10605_v42  ;;  %v10754_v53 = vld [vmem:[#allocation12 + $0x658] sm:$0xf0]  ;;  %v10665_v42 = vor.u32 %v11485_v44, %v10664_v60  ;;  %v10826_v60 = vld [vmem:[#allocation12 + $0x6e8] sm:$0xf0]  ;;  %v10729_v44 = vor.u32 %v11501_v52, %v10728_v30 }
 0x886   : > { %7995 = vmatpush.bf16.msra.mxu1 %v10701_v33  ;;  %v10656_v33 = vld [vmem:[#allocation12 + $0x590] sm:$0xf]  ;;  %v10757_v49 = vor.u32 %v11506_v32, %v10754_v53 }
 0x887   : > { %v10816_v32 = vld [vmem:[#allocation12 + $0x6d0] sm:$0xf] }
 0x888   : > { %7958 = vmatpush.bf16.msrb.mxu3 %v10593_v43  ;;  %v11505_v43 = vld [vmem:[#allocation12 + $0x644] sm:$0xf0] }
 0x889   : > { %7968 = vmatpush.bf16.msrb.mxu2 %v10689_v54  ;;  %7986 = vmatpush.bf16.msrb.mxu0 %v10597_v31  ;;  %v10657_v54 = vor.u32 %v11483_v8, %v10656_v33  ;;  %v10648_v31 = vld [vmem:[#allocation12 + $0x580] sm:$0xf]  ;;  %v10745_v28 = vor.u32 %v11505_v43, %v10744_v50  ;;  %v10722_v33 = vld [vmem:[#allocation12 + $0x618] sm:$0xf0]  ;;  %v11522_v8 = vld [vmem:[#allocation12 + $0x6d4] sm:$0xf] }
 0x88a   : > { %7996 = vmatpush.bf16.msra.mxu1 %v10693_v2  ;;  %v11481_v2 = vld [vmem:[#allocation12 + $0x584] sm:$0xf0]  ;;  %v8045_v50 = vrot.slane %v16642_v11, 1  ;;  %v8046_v43 = vrot.slane %v16645_v36, 2  ;;  %v10810_v11 = vld [vmem:[#allocation12 + $0x6c8] sm:$0xf0] }
 0x88b   : > { %v16688_v20 = vpop.f32.mrf.mxu0  ;;  %v11543_v36 = vld [vmem:[#allocation12 + $0x774] sm:$0xf0] }
 0x88c   : > { %7959 = vmatpush.bf16.msrb.mxu3 %v10585_v25 }
 0x88d   : > { %7969 = vmatpush.bf16.msrb.mxu2 %v10681_v24  ;;  %7987 = vmatpush.bf16.msrb.mxu0 %v10589_v46  ;;  %v10738_v24 = vld [vmem:[#allocation12 + $0x638] sm:$0xf0]  ;;  %v10649_v46 = vor.u32 %v11481_v2, %v10648_v31  ;;  %v10821_v2 = vor.u32 %v11522_v8, %v10818_v34  ;;  %v10794_v8 = vld [vmem:[#allocation12 + $0x6a8] sm:$0xf0]  ;;  %v10880_v34 = vld [vmem:[#allocation12 + $0x750] sm:$0xf] }
 0x88e   : > { %7997 = vmatpush.bf16.msra.mxu1 %v10685_v10  ;;  %v11526_v10 = vld [vmem:[#allocation12 + $0x6f4] sm:$0xf] }
 0x88f   : > { %7960 = vmatmul.bf16.vlgmr.msrb.gmra.mxu3 %v7781_v0 }
 0x890   : > { %8215 = vmatpush.bf16.msra.mxu3 %v10769_v62  ;;  %7988 = vmatmul.bf16.vlgmr.msrb.gmra.mxu0 %v7781_v0  ;;  %v10834_v62 = vld [vmem:[#allocation12 + $0x6f8] sm:$0xf0]  ;;  %v11500_v0 = vld [vmem:[#allocation12 + $0x624] sm:$0xf] }
 0x891   : > { %8243 = vmatpush.bf16.msra.mxu0 %v10773_v55  ;;  %7970 = vmatpush.bf16.msrb.mxu2 %v10673_v12  ;;  %v16691_v25 = vpop.f32.mrf.mxu3  ;;  %v10741_v55 = vor.u32 %v11502_v47, %v10738_v24  ;;  %v10837_v27 = vor.u32 %v11526_v10, %v10834_v62  ;;  %v11525_v12 = vld [vmem:[#allocation12 + $0x6e4] sm:$0xf0]  ;;  %v10898_v47 = vld [vmem:[#allocation12 + $0x778] sm:$0xf0]  ;;  %v10717_v24 = vor.u32 %v11496_v13, %v10714_v17 }
 0x892   : > { %7998 = vmatpush.bf16.msra.mxu1 %v10677_v41  ;;  %v10730_v41 = vld [vmem:[#allocation12 + $0x628] sm:$0xf0]  ;;  %v10897_v10 = vor.u32 %v11543_v36, %v10896_v63  ;;  %v10901_v23 = vor.u32 %v11542_v21, %v10898_v47  ;;  %v11537_v13 = vld [vmem:[#allocation12 + $0x744] sm:$0xf0]  ;;  %v10776_v21 = vld [vmem:[#allocation12 + $0x680] sm:$0xf] }
 0x893   : > { %v16693_v9 = vpop.f32.mrf.mxu0  ;;  %v10733_v38 = vor.u32 %v11500_v0, %v10730_v41  ;;  %v11540_v41 = vld [vmem:[#allocation12 + $0x764] sm:$0xf]  ;;  %v8049_v47 = vrot.slane %v16663_v4, 1  ;;  %v10866_v4 = vld [vmem:[#allocation12 + $0x738] sm:$0xf0] }
 0x894   : > { %8216 = vmatpush.bf16.msra.mxu3 %v10761_v61  ;;  %v11524_v61 = vld [vmem:[#allocation12 + $0x6e4] sm:$0xf] }
 0x895   : > { %8244 = vmatpush.bf16.msra.mxu0 %v10765_v16  ;;  %7971 = vmatpush.bf16.msrb.mxu2 %v10665_v42  ;;  %v10825_v16 = vor.u32 %v11525_v12, %v10824_v22  ;;  %v10829_v53 = vor.u32 %v11524_v61, %v10826_v60  ;;  %v10802_v22 = vld [vmem:[#allocation12 + $0x6b8] sm:$0xf0]  ;;  %v11541_v12 = vld [vmem:[#allocation12 + $0x764] sm:$0xf0]  ;;  %v10890_v61 = vld [vmem:[#allocation12 + $0x768] sm:$0xf0] }
 0x896   : > { %7999 = vmatpush.bf16.msra.mxu1 %v10669_v58  ;;  %v11523_v58 = vld [vmem:[#allocation12 + $0x6d4] sm:$0xf0] }
 0x897   : > { %v10817_v45 = vor.u32 %v11523_v58, %v10816_v32  ;;  %v10792_v32 = vld [vmem:[#allocation12 + $0x6a0] sm:$0xf]  ;;  %v11516_v58 = vld [vmem:[#allocation12 + $0x6a4] sm:$0xf] }
 0x898   : > { %8217 = vmatpush.bf16.msra.mxu3 %v10753_v7  ;;  %v11498_v7 = vld [vmem:[#allocation12 + $0x614] sm:$0xf] }
 0x899   : > { %8245 = vmatpush.bf16.msra.mxu0 %v10757_v49  ;;  %7972 = vmatpush.bf16.msrb.mxu2 %v10657_v54  ;;  %v16698_v42 = vpop.f32.mrf.mxu3  ;;  %v10721_v49 = vor.u32 %v11499_v35, %v10720_v18  ;;  %v10725_v19 = vor.u32 %v11498_v7, %v10722_v33  ;;  %v10893_v33 = vor.u32 %v11540_v41, %v10890_v61 }
 0x89a   : > { %8000 = vmatpush.bf16.msra.mxu1 %v10661_v48  ;;  %v10808_v48 = vld [vmem:[#allocation12 + $0x6c0] sm:$0xf] }
 0x89b   : > { %v6691_v29 = vpop.f32.mrf.mxu1 }
 0x89c   : > { %8218 = vmatpush.bf16.msra.mxu3 %v10745_v28  ;;  %v6692_v54 = vadd.f32 %v6691_v29, %v16688_v20  ;;  %v6929_v31 = vpop.f32.mrf.mxu0  ;;  %v11521_v28 = vld [vmem:[#allocation12 + $0x6c4] sm:$0xf0]  ;;  %v10882_v29 = vld [vmem:[#allocation12 + $0x758] sm:$0xf0] }
 0x89d   : > { %8246 = vmatpush.bf16.msra.mxu0 %v10749_v6  ;;  %7973 = vmatpush.bf16.msrb.mxu2 %v10649_v46  ;;  %v11520_v6 = vld [vmem:[#allocation12 + $0x6c4] sm:$0xf]  ;;  %v10809_v20 = vor.u32 %v11521_v28, %v10808_v48  ;;  %v10786_v28 = vld [vmem:[#allocation12 + $0x698] sm:$0xf0] }
 0x89e   : > { %8001 = vmatpush.bf16.msra.mxu1 %v10653_v1  ;;  %v16703_v59 = vadd.f32 %v6929_v31, %v6692_v54  ;;  %v10813_v46 = vor.u32 %v11520_v6, %v10810_v11  ;;  %v8047_v1 = vor.u32 %v8046_v43, %v8045_v50  ;;  %v10797_v50 = vor.u32 %v11516_v58, %v10794_v8  ;;  %v11515_v54 = vld [vmem:[#allocation12 + $0x694] sm:$0xf0]  ;;  %v11514_v31 = vld [vmem:[#allocation12 + $0x694] sm:$0xf]  ;;  %v11536_v6 = vld [vmem:[#allocation12 + $0x744] sm:$0xf] }
 0x89f   : > { %v10874_v11 = vld [vmem:[#allocation12 + $0x748] sm:$0xf0]  ;;  %v11556_v8 = vld [vmem:[#allocation12 + $0x7e4] sm:$0xf] }
 0x8a0   : > { %8219 = vmatpush.bf16.msra.mxu3 %v10737_v40  ;;  %7974 = vmatmul.bf16.vlgmr.msrb.gmra.mxu2 %v7789_v5  ;;  %v10800_v40 = vld [vmem:[#allocation12 + $0x6b0] sm:$0xf]  ;;  %v10858_v58 = vld [vmem:[#allocation12 + $0x728] sm:$0xf0] }
 0x8a1   : > { %8229 = vmatpush.bf16.msra.mxu2 %v10833_v39  ;;  %8247 = vmatpush.bf16.msra.mxu0 %v10741_v55  ;;  %v6663_v62 = vpop.f32.mrf.mxu2  ;;  %v11519_v39 = vld [vmem:[#allocation12 + $0x6b4] sm:$0xf0]  ;;  %v11518_v55 = vld [vmem:[#allocation12 + $0x6b4] sm:$0xf] }
 0x8a2   : > { %8257 = vmatpush.bf16.msrb.mxu1 %v10837_v27  ;;  %v6664_v30 = vadd.f32 %v6663_v62, %v16691_v25  ;;  %v6901_v52 = vpop.f32.mrf.mxu3  ;;  %v10888_v27 = vld [vmem:[#allocation12 + $0x760] sm:$0xf]  ;;  %v11512_v62 = vld [vmem:[#allocation12 + $0x684] sm:$0xf] }
 0x8a3   : > { %8002 = vmatmul.bf16.vlgmr.msra.gmra.mxu1 %v7789_v5  ;;  %v6693_v0 = vpop.f32.mrf.mxu1  ;;  %v10889_v35 = vor.u32 %v11541_v12, %v10888_v27  ;;  %v10962_v27 = vld [vmem:[#allocation12 + $0x7f8] sm:$0xf0] }
 0x8a4   : > { %8220 = vmatpush.bf16.msra.mxu3 %v10729_v44  ;;  %v16706_v60 = vadd.f32 %v6901_v52, %v6664_v30  ;;  %v10801_v44 = vor.u32 %v11519_v39, %v10800_v40  ;;  %v6694_v5 = vadd.f32 %v6693_v0, %v16693_v9  ;;  %v6931_v18 = vpop.f32.mrf.mxu0  ;;  %v11538_v9 = vld [vmem:[#allocation12 + $0x754] sm:$0xf]  ;;  %v10877_v40 = vor.u32 %v11536_v6, %v10874_v11  ;;  %v10864_v39 = vld [vmem:[#allocation12 + $0x730] sm:$0xf]  ;;  %v11559_v30 = vld [vmem:[#allocation12 + $0x7f4] sm:$0xf0] }
 0x8a5   : > { %8230 = vmatpush.bf16.msra.mxu2 %v10825_v16  ;;  %8248 = vmatpush.bf16.msra.mxu0 %v10733_v38  ;;  %v18159_v16 = vld [vmem:[#allocation81_spill] sm:$0xff]  ;;  %v10805_v38 = vor.u32 %v11518_v55, %v10802_v22  ;;  %v10885_v51 = vor.u32 %v11538_v9, %v10882_v29  ;;  %v11535_v55 = vld [vmem:[#allocation12 + $0x734] sm:$0xf0]  ;;  %v11534_v52 = vld [vmem:[#allocation12 + $0x734] sm:$0xf] }
 0x8a6   : > { %8258 = vmatpush.bf16.msrb.mxu1 %v10829_v53  ;;  %v8048_v25 = vsel %vm4608_vm11, %v8047_v1, %v18159_v16  ;;  %v11517_v53 = vld [vmem:[#allocation12 + $0x6a4] sm:$0xf0]  ;;  %v16711_v7 = vadd.f32 %v6931_v18, %v6694_v5  ;;  %v10778_v1 = vld [vmem:[#allocation12 + $0x688] sm:$0xf0]  ;;  %v11558_v22 = vld [vmem:[#allocation12 + $0x7f4] sm:$0xf]  ;;  %v10865_v12 = vor.u32 %v11535_v55, %v10864_v39  ;;  %v10869_v41 = vor.u32 %v11534_v52, %v10866_v4 }
 0x8a7   : > { %v10793_v3 = vor.u32 %v11517_v53, %v10792_v32  ;;  %v10856_v5 = vld [vmem:[#allocation12 + $0x720] sm:$0xf]  ;;  %v10965_v18 = vor.u32 %v11558_v22, %v10962_v27  ;;  %v11557_v32 = vld [vmem:[#allocation12 + $0x7e4] sm:$0xf0]  ;;  %v11532_v53 = vld [vmem:[#allocation12 + $0x724] sm:$0xf] }
 0x8a8   : > { %8221 = vmatpush.bf16.msra.mxu3 %v10721_v49  ;;  %v11539_v49 = vld [vmem:[#allocation12 + $0x754] sm:$0xf0]  ;;  %v11529_v6 = vld [vmem:[#allocation12 + $0x704] sm:$0xf0]  ;;  %v10936_v11 = vld [vmem:[#allocation12 + $0x7c0] sm:$0xf] }
 0x8a9   : > { %8231 = vmatpush.bf16.msra.mxu2 %v10817_v45  ;;  %8249 = vmatpush.bf16.msra.mxu0 %v10725_v19  ;;  %v10881_v43 = vor.u32 %v11539_v49, %v10880_v34  ;;  %v6665_v45 = vpop.f32.mrf.mxu2  ;;  %v10784_v19 = vld [vmem:[#allocation12 + $0x690] sm:$0xf]  ;;  %v10954_v34 = vld [vmem:[#allocation12 + $0x7e8] sm:$0xf0]  ;;  %v11574_v55 = vld [vmem:[#allocation12 + $0x874] sm:$0xf] }
 0x8aa   : > { %8259 = vmatpush.bf16.msrb.mxu1 %v10821_v2  ;;  %v6666_v48 = vadd.f32 %v6665_v45, %v16698_v42  ;;  %v10872_v2 = vld [vmem:[#allocation12 + $0x740] sm:$0xf]  ;;  %v6903_v17 = vpop.f32.mrf.mxu3  ;;  %v10785_v36 = vor.u32 %v11515_v54, %v10784_v19  ;;  %v10944_v45 = vld [vmem:[#allocation12 + $0x7d0] sm:$0xf]  ;;  %v10957_v19 = vor.u32 %v11556_v8, %v10954_v34  ;;  %v11555_v54 = vld [vmem:[#allocation12 + $0x7d4] sm:$0xf0] }
 0x8ac   : > { %8222 = vmatpush.bf16.msra.mxu3 %v10713_v14  ;;  %v16714_v63 = vadd.f32 %v6903_v17, %v6666_v48  ;;  %v6943_v14 = vpop.f32.mrf.mxu1  ;;  %v10946_v48 = vld [vmem:[#allocation12 + $0x7d8] sm:$0xf0] }
 0x8ad   : > { %8232 = vmatpush.bf16.msra.mxu2 %v10809_v20  ;;  %8250 = vmatpush.bf16.msra.mxu0 %v10717_v24  ;;  %v8050_v20 = vrot.slane %v16666_v15, 2  ;;  %v10789_v24 = vor.u32 %v11514_v31, %v10786_v28  ;;  %v16719_v42 = vadd.f32 %v6943_v14, %v16703_v59  ;;  %v10781_v59 = vor.u32 %v11512_v62, %v10778_v1  ;;  %v11530_v31 = vld [vmem:[#allocation12 + $0x714] sm:$0xf]  ;;  %v11024_v62 = vld [vmem:[#allocation12 + $0x870] sm:$0xf] }
 0x8ae   : > { %8260 = vmatpush.bf16.msrb.mxu1 %v10813_v46  ;;  %v10873_v46 = vor.u32 %v11537_v13, %v10872_v2  ;;  %v10840_v2 = vld [vmem:[#allocation12 + $0x700] sm:$0xf]  ;;  %v11575_v1 = vld [vmem:[#allocation12 + $0x874] sm:$0xf0] }
 0x8af   : > { %8223 = vmatmul.bf16.vlgmr.msra.gmra.mxu3 %v8048_v25  ;;  %v7194_v14 = vpop.f32.mrf.mxu0  ;;  %v10841_v39 = vor.u32 %v11529_v6, %v10840_v2  ;;  %v11546_v6 = vld [vmem:[#allocation12 + $0x794] sm:$0xf] }
 0x8b0   : > { %8477 = vmatpush.bf16.msrb.mxu3 %v10897_v10  ;;  %8251 = vmatmul.bf16.vlgmr.msra.gmra.mxu0 %v8048_v25  ;;  %v11513_v10 = vld [vmem:[#allocation12 + $0x684] sm:$0xf0] }
 0x8b1   : > { %8505 = vmatpush.bf16.msrb.mxu0 %v10901_v23  ;;  %8233 = vmatpush.bf16.msra.mxu2 %v10801_v44  ;;  %v10960_v23 = vld [vmem:[#allocation12 + $0x7f0] sm:$0xf]  ;;  %v10777_v15 = vor.u32 %v11513_v10, %v10776_v21  ;;  %v6915_v61 = vpop.f32.mrf.mxu2  ;;  %v8051_v44 = vor.u32 %v8050_v20, %v8049_v47  ;;  %v11533_v25 = vld [vmem:[#allocation12 + $0x724] sm:$0xf0]  ;;  %v11528_v20 = vld [vmem:[#allocation12 + $0x704] sm:$0xf] }
 0x8b2   : > { %8261 = vmatpush.bf16.msrb.mxu1 %v10805_v38  ;;  %v10961_v0 = vor.u32 %v11559_v30, %v10960_v23  ;;  %v10952_v38 = vld [vmem:[#allocation12 + $0x7e0] sm:$0xf]  ;;  %v10857_v9 = vor.u32 %v11533_v25, %v10856_v5  ;;  %v10938_v10 = vld [vmem:[#allocation12 + $0x7c8] sm:$0xf0]  ;;  %v11026_v23 = vld [vmem:[#allocation12 + $0x878] sm:$0xf0] }
 0x8b3   : > { %v8052_v29 = vsel %vm4608_vm11, %v8051_v44, %v18159_v16  ;;  %v10945_v16 = vor.u32 %v11555_v54, %v10944_v45  ;;  %v8310_v30 = vrot.slane %v16593_v26, 2  ;;  %v11029_v5 = vor.u32 %v11574_v55, %v11026_v23  ;;  %v10930_v26 = vld [vmem:[#allocation12 + $0x7b8] sm:$0xf0]  ;;  %v11016_v25 = vld [vmem:[#allocation12 + $0x860] sm:$0xf] }
 0x8b4   : > { %8478 = vmatpush.bf16.msrb.mxu3 %v10889_v35  ;;  %v16722_v35 = vadd.f32 %v6915_v61, %v16706_v60  ;;  %v10953_v60 = vor.u32 %v11557_v32, %v10952_v38  ;;  %v7166_v61 = vpop.f32.mrf.mxu3  ;;  %v11573_v38 = vld [vmem:[#allocation12 + $0x864] sm:$0xf0]  ;;  %v11018_v32 = vld [vmem:[#allocation12 + $0x868] sm:$0xf0]  ;;  %v11571_v45 = vld [vmem:[#allocation12 + $0x854] sm:$0xf0] }
 0x8b5   : > { %8506 = vmatpush.bf16.msrb.mxu0 %v10893_v33  ;;  %8234 = vmatpush.bf16.msra.mxu2 %v10793_v3  ;;  %v6945_v33 = vpop.f32.mrf.mxu1  ;;  %v10861_v3 = vor.u32 %v11532_v53, %v10858_v58  ;;  %v11017_v34 = vor.u32 %v11573_v38, %v11016_v25  ;;  %v11545_v23 = vld [vmem:[#allocation12 + $0x784] sm:$0xf0]  ;;  %v8313_v38 = vrot.slane %v16657_v57, 2 }
 0x8b6   : > { %8262 = vmatpush.bf16.msrb.mxu1 %v10797_v50  ;;  %v16725_v49 = vadd.f32 %v6945_v33, %v16711_v7  ;;  %v10848_v50 = vld [vmem:[#allocation12 + $0x710] sm:$0xf]  ;;  %v11554_v7 = vld [vmem:[#allocation12 + $0x7d4] sm:$0xf] }
 0x8b7   : > { %v10949_v21 = vor.u32 %v11554_v7, %v10946_v48  ;;  %v11010_v7 = vld [vmem:[#allocation12 + $0x858] sm:$0xf0] }
 0x8b8   : > { %8479 = vmatpush.bf16.msrb.mxu3 %v10881_v43  ;;  %v11531_v43 = vld [vmem:[#allocation12 + $0x714] sm:$0xf0] }
 0x8b9   : > { %8507 = vmatpush.bf16.msrb.mxu0 %v10885_v51  ;;  %8235 = vmatpush.bf16.msra.mxu2 %v10785_v36  ;;  %v10850_v51 = vld [vmem:[#allocation12 + $0x718] sm:$0xf0]  ;;  %v10849_v28 = vor.u32 %v11531_v43, %v10848_v50  ;;  %v6917_v17 = vpop.f32.mrf.mxu2  ;;  %v11553_v36 = vld [vmem:[#allocation12 + $0x7c4] sm:$0xf0]  ;;  %v10922_v50 = vld [vmem:[#allocation12 + $0x7a8] sm:$0xf0] }
 0x8ba   : > { %8263 = vmatpush.bf16.msrb.mxu1 %v10789_v24  ;;  %v10853_v13 = vor.u32 %v11530_v31, %v10850_v51  ;;  %v16730_v47 = vadd.f32 %v6917_v17, %v16714_v63  ;;  %v10842_v24 = vld [vmem:[#allocation12 + $0x708] sm:$0xf0]  ;;  %v10937_v4 = vor.u32 %v11553_v36, %v10936_v11  ;;  %v18160_v63 = vmov 0.0|0.0   ;;  %v11008_v43 = vld [vmem:[#allocation12 + $0x850] sm:$0xf] }
 0x8bb   : > { %v16734_v22 = vrot.slane %v18160_v63, 2  ;;  %v11570_v51 = vld [vmem:[#allocation12 + $0x854] sm:$0xf]  ;;  %v11547_v17 = vld [vmem:[#allocation12 + $0x794] sm:$0xf0] }
 0x8bc   : > { %8480 = vmatpush.bf16.msrb.mxu3 %v10873_v46  ;;  %v11552_v46 = vld [vmem:[#allocation12 + $0x7c4] sm:$0xf]  ;;  %v11013_v36 = vor.u32 %v11570_v51, %v11010_v7  ;;  %v11088_v63 = vld [vmem:[#allocation12 + $0x8f0] sm:$0xf]  ;;  %v11587_v51 = vld [vmem:[#allocation12 + $0x8d4] sm:$0xf0] }
 0x8bd   : > { %8508 = vmatpush.bf16.msrb.mxu0 %v10877_v40  ;;  %8236 = vmatpush.bf16.msra.mxu2 %v10777_v15  ;;  %v10845_v15 = vor.u32 %v11528_v20, %v10842_v24  ;;  %v10941_v27 = vor.u32 %v11552_v46, %v10938_v10  ;;  %v8312_v53 = vsel %vm1247_vm1, %v8310_v30, %v16734_v22  ;;  %v11568_v20 = vld [vmem:[#allocation12 + $0x844] sm:$0xf]  ;;  %v11002_v24 = vld [vmem:[#allocation12 + $0x848] sm:$0xf0]  ;;  %v7168_v46 = vpop.f32.mrf.mxu3  ;;  %v11562_v7 = vld [vmem:[#allocation12 + $0x814] sm:$0xf] }
 0x8be   : > { %8264 = vmatpush.bf16.msrb.mxu1 %v10781_v59  ;;  %v11025_v59 = vor.u32 %v11575_v1, %v11024_v62  ;;  %v10904_v1 = vld [vmem:[#allocation12 + $0x780] sm:$0xf]  ;;  %v11544_v30 = vld [vmem:[#allocation12 + $0x784] sm:$0xf]  ;;  %v8314_v57 = vsel %vm1247_vm1, %v8313_v38, %v16734_v22 }
 0x8bf   : > { %v7208_v40 = vpop.f32.mrf.mxu1  ;;  %v11580_v38 = vld [vmem:[#allocation12 + $0x8a4] sm:$0xf] }
 0x8c0   : > { %8481 = vmatpush.bf16.msrb.mxu3 %v10865_v12  ;;  %8237 = vmatmul.bf16.vlgmr.msra.gmra.mxu2 %v8052_v29  ;;  %v7209_v52 = vadd.f32 %v7208_v40, %v7194_v14  ;;  %v10928_v12 = vld [vmem:[#allocation12 + $0x7b0] sm:$0xf]  ;;  %v11000_v14 = vld [vmem:[#allocation12 + $0x840] sm:$0xf] }
 0x8c1   : > { %8491 = vmatpush.bf16.msrb.mxu2 %v10961_v0  ;;  %8509 = vmatpush.bf16.msrb.mxu0 %v10869_v41  ;;  %v11551_v0 = vld [vmem:[#allocation12 + $0x7b4] sm:$0xf0]  ;;  %v11550_v41 = vld [vmem:[#allocation12 + $0x7b4] sm:$0xf] }
 0x8c2   : > { %8519 = vmatpush.bf16.msra.mxu1 %v10965_v18  ;;  %v16737_v44 = vadd.f32 %v7209_v52, %v16719_v42  ;;  %v11572_v18 = vld [vmem:[#allocation12 + $0x864] sm:$0xf]  ;;  %v10929_v58 = vor.u32 %v11551_v0, %v10928_v12  ;;  %v7180_v33 = vpop.f32.mrf.mxu2  ;;  %v10933_v8 = vor.u32 %v11550_v41, %v10930_v26  ;;  %v11005_v52 = vor.u32 %v11568_v20, %v11002_v24  ;;  %v11566_v12 = vld [vmem:[#allocation12 + $0x834] sm:$0xf]  ;;  %v10994_v0 = vld [vmem:[#allocation12 + $0x838] sm:$0xf0] }
 0x8c3   : > { %8265 = vmatmul.bf16.vlgmr.msrb.gmra.mxu1 %v8052_v29  ;;  %v7181_v42 = vadd.f32 %v7180_v33, %v7166_v61  ;;  %v11549_v29 = vld [vmem:[#allocation12 + $0x7a4] sm:$0xf0]  ;;  %v10905_v41 = vor.u32 %v11545_v23, %v10904_v1  ;;  %v11590_v61 = vld [vmem:[#allocation12 + $0x8f4] sm:$0xf]  ;;  %v11560_v20 = vld [vmem:[#allocation12 + $0x804] sm:$0xf] }
 0x8c4   : > { %8482 = vmatpush.bf16.msrb.mxu3 %v10857_v9  ;;  %v10920_v9 = vld [vmem:[#allocation12 + $0x7a0] sm:$0xf]  ;;  %v10970_v24 = vld [vmem:[#allocation12 + $0x808] sm:$0xf0] }
 0x8c5   : > { %8492 = vmatpush.bf16.msrb.mxu2 %v10953_v60  ;;  %8510 = vmatpush.bf16.msrb.mxu0 %v10861_v3  ;;  %v11548_v60 = vld [vmem:[#allocation12 + $0x7a4] sm:$0xf]  ;;  %v11021_v3 = vor.u32 %v11572_v18, %v11018_v32  ;;  %v16742_v54 = vadd.f32 %v7181_v42, %v16722_v35  ;;  %v10914_v35 = vld [vmem:[#allocation12 + $0x798] sm:$0xf0]  ;;  %v10997_v32 = vor.u32 %v11566_v12, %v10994_v0  ;;  %v10986_v42 = vld [vmem:[#allocation12 + $0x828] sm:$0xf0] }
 0x8c6   : > { %8520 = vmatpush.bf16.msra.mxu1 %v10957_v19  ;;  %v7196_v19 = vpop.f32.mrf.mxu0  ;;  %v10925_v2 = vor.u32 %v11548_v60, %v10922_v50  ;;  %v10917_v40 = vor.u32 %v11546_v6, %v10914_v35  ;;  %v11561_v6 = vld [vmem:[#allocation12 + $0x804] sm:$0xf0]  ;;  %v18161_v0 = vld [vmem:[#allocation167_spill] sm:$0xff] }
 0x8c7   : > { %v7210_v31 = vpop.f32.mrf.mxu1 }
 0x8c8   : > { %8483 = vmatpush.bf16.msrb.mxu3 %v10849_v28  ;;  %v7211_v48 = vadd.f32 %v7210_v31, %v7196_v19  ;;  %v10921_v28 = vor.u32 %v11549_v29, %v10920_v9  ;;  %v11588_v9 = vld [vmem:[#allocation12 + $0x8e4] sm:$0xf]  ;;  %v11082_v29 = vld [vmem:[#allocation12 + $0x8e8] sm:$0xf0]  ;;  %v11072_v19 = vld [vmem:[#allocation12 + $0x8d0] sm:$0xf] }
 0x8c9   : > { %8493 = vmatpush.bf16.msrb.mxu2 %v10945_v16  ;;  %8511 = vmatpush.bf16.msrb.mxu0 %v10853_v13  ;;  %v11009_v16 = vor.u32 %v11571_v45, %v11008_v43  ;;  %v10912_v13 = vld [vmem:[#allocation12 + $0x790] sm:$0xf]  ;;  %v11563_v45 = vld [vmem:[#allocation12 + $0x814] sm:$0xf0]  ;;  %v11085_v31 = vor.u32 %v11588_v9, %v11082_v29  ;;  %v11042_v9 = vld [vmem:[#allocation12 + $0x898] sm:$0xf0] }
 0x8ca   : > { %8521 = vmatpush.bf16.msra.mxu1 %v10949_v21  ;;  %v16745_v11 = vadd.f32 %v7211_v48, %v16725_v49  ;;  %v11569_v21 = vld [vmem:[#allocation12 + $0x844] sm:$0xf0]  ;;  %v10913_v10 = vor.u32 %v11547_v17, %v10912_v13  ;;  %v7182_v62 = vpop.f32.mrf.mxu2  ;;  %v10906_v49 = vld [vmem:[#allocation12 + $0x788] sm:$0xf0]  ;;  %v10976_v43 = vld [vmem:[#allocation12 + $0x810] sm:$0xf]  ;;  %v11073_v13 = vor.u32 %v11587_v51, %v11072_v19 }
 0x8cb   : > { %v7183_v55 = vadd.f32 %v7182_v62, %v7168_v46  ;;  %v10909_v26 = vor.u32 %v11544_v30, %v10906_v49  ;;  %v10978_v48 = vld [vmem:[#allocation12 + $0x818] sm:$0xf0]  ;;  %v10968_v17 = vld [vmem:[#allocation12 + $0x800] sm:$0xf]  ;;  %v11584_v46 = vld [vmem:[#allocation12 + $0x8c4] sm:$0xf] }
 0x8cc   : > { %8484 = vmatpush.bf16.msrb.mxu3 %v10841_v39  ;;  %v11001_v39 = vor.u32 %v11569_v21, %v11000_v14  ;;  %v10981_v22 = vor.u32 %v11562_v7, %v10978_v48  ;;  %v11585_v21 = vld [vmem:[#allocation12 + $0x8c4] sm:$0xf0]  ;;  %v10969_v1 = vor.u32 %v11561_v6, %v10968_v17  ;;  %v11056_v30 = vld [vmem:[#allocation12 + $0x8b0] sm:$0xf]  ;;  %v11583_v49 = vld [vmem:[#allocation12 + $0x8b4] sm:$0xf0]  ;;  %v8577_v7 = vsel %vm3133_vm6, %v16672_v56, %v18161_v0 }
 0x8cd   : > { %8494 = vmatpush.bf16.msrb.mxu2 %v10937_v4  ;;  %8512 = vmatpush.bf16.msrb.mxu0 %v10845_v15  ;;  %v10992_v4 = vld [vmem:[#allocation12 + $0x830] sm:$0xf]  ;;  %v11567_v15 = vld [vmem:[#allocation12 + $0x834] sm:$0xf0]  ;;  %v11034_v19 = vld [vmem:[#allocation12 + $0x888] sm:$0xf0] }
 0x8ce   : > { %8522 = vmatpush.bf16.msra.mxu1 %v10941_v27  ;;  %v16748_v27 = vadd.f32 %v7183_v55, %v16730_v47  ;;  %v10993_v25 = vor.u32 %v11567_v15, %v10992_v4  ;;  %v11080_v47 = vld [vmem:[#allocation12 + $0x8e0] sm:$0xf]  ;;  %v7463_v35 = vpop.f32.mrf.mxu0  ;;  %v10973_v55 = vor.u32 %v11560_v20, %v10970_v24  ;;  %v11582_v15 = vld [vmem:[#allocation12 + $0x8b4] sm:$0xf] }
 0x8cf   : > { %8485 = vmatmul.bf16.vlgmr.msrb.gmra.mxu3 %v8312_v53 }
 0x8d0   : > { %8740 = vmatpush.bf16.msra.mxu3 %v11025_v59  ;;  %8513 = vmatmul.bf16.vlgmr.msrb.gmra.mxu0 %v8312_v53  ;;  %v11591_v59 = vld [vmem:[#allocation12 + $0x8f4] sm:$0xf0]  ;;  %v10984_v53 = vld [vmem:[#allocation12 + $0x820] sm:$0xf] }
 0x8d1   : > { %8768 = vmatpush.bf16.msra.mxu0 %v11029_v5  ;;  %8495 = vmatpush.bf16.msrb.mxu2 %v10929_v58  ;;  %v11090_v5 = vld [vmem:[#allocation12 + $0x8f8] sm:$0xf0]  ;;  %v11089_v18 = vor.u32 %v11591_v59, %v11088_v63  ;;  %v11565_v58 = vld [vmem:[#allocation12 + $0x824] sm:$0xf0]  ;;  %v11057_v59 = vor.u32 %v11583_v49, %v11056_v30 }
 0x8d2   : > { %8523 = vmatpush.bf16.msra.mxu1 %v10933_v8  ;;  %v11093_v33 = vor.u32 %v11590_v61, %v11090_v5  ;;  %v11589_v8 = vld [vmem:[#allocation12 + $0x8e4] sm:$0xf0]  ;;  %v10985_v60 = vor.u32 %v11565_v58, %v10984_v53  ;;  %v11058_v63 = vld [vmem:[#allocation12 + $0x8b8] sm:$0xf0] }
 0x8d3   : > { %v11061_v61 = vor.u32 %v11582_v15, %v11058_v63 }
 0x8d4   : > { %8741 = vmatpush.bf16.msra.mxu3 %v11017_v34  ;;  %v11564_v34 = vld [vmem:[#allocation12 + $0x824] sm:$0xf] }
 0x8d5   : > { %8769 = vmatpush.bf16.msra.mxu0 %v11021_v3  ;;  %8496 = vmatpush.bf16.msrb.mxu2 %v10921_v28  ;;  %v11081_v3 = vor.u32 %v11589_v8, %v11080_v47  ;;  %v10989_v50 = vor.u32 %v11564_v34, %v10986_v42  ;;  %v11586_v28 = vld [vmem:[#allocation12 + $0x8d4] sm:$0xf]  ;;  %v11040_v8 = vld [vmem:[#allocation12 + $0x890] sm:$0xf]  ;;  %v11579_v34 = vld [vmem:[#allocation12 + $0x894] sm:$0xf0] }
 0x8d6   : > { %8524 = vmatpush.bf16.msra.mxu1 %v10925_v2  ;;  %v11074_v2 = vld [vmem:[#allocation12 + $0x8d8] sm:$0xf0]  ;;  %v11578_v42 = vld [vmem:[#allocation12 + $0x894] sm:$0xf] }
 0x8d7   : > { %v11077_v14 = vor.u32 %v11586_v28, %v11074_v2 }
 0x8d8   : > { %8742 = vmatpush.bf16.msra.mxu3 %v11009_v16  ;;  %v10977_v16 = vor.u32 %v11563_v45, %v10976_v43  ;;  %v11577_v43 = vld [vmem:[#allocation12 + $0x884] sm:$0xf0]  ;;  %v11576_v45 = vld [vmem:[#allocation12 + $0x884] sm:$0xf] }
 0x8d9   : > { %8770 = vmatpush.bf16.msra.mxu0 %v11013_v36  ;;  %8497 = vmatpush.bf16.msrb.mxu2 %v10913_v10  ;;  %v11064_v36 = vld [vmem:[#allocation12 + $0x8c0] sm:$0xf]  ;;  %v11066_v10 = vld [vmem:[#allocation12 + $0x8c8] sm:$0xf0] }
 0x8da   : > { %8525 = vmatpush.bf16.msra.mxu1 %v10917_v40  ;;  %v11069_v23 = vor.u32 %v11584_v46, %v11066_v10 }
 0x8dc   : > { %8743 = vmatpush.bf16.msra.mxu3 %v11001_v39  ;;  %v11065_v39 = vor.u32 %v11585_v21, %v11064_v36 }
 0x8dd   : > { %8771 = vmatpush.bf16.msra.mxu0 %v11005_v52  ;;  %8498 = vmatpush.bf16.msrb.mxu2 %v10905_v41  ;;  %v7435_v52 = vpop.f32.mrf.mxu3  ;;  %v8573_v41 = vsel %vm3133_vm6, %v16653_v37, %v18161_v0 }
 0x8de   : > { %8526 = vmatpush.bf16.msra.mxu1 %v10909_v26  ;;  %v11048_v26 = vld [vmem:[#allocation12 + $0x8a0] sm:$0xf] }
 0x8e0   : > { %8744 = vmatpush.bf16.msra.mxu3 %v10993_v25  ;;  %8499 = vmatmul.bf16.vlgmr.msrb.gmra.mxu2 %v8314_v57  ;;  %v7477_v62 = vpop.f32.mrf.mxu1  ;;  %v11581_v25 = vld [vmem:[#allocation12 + $0x8a4] sm:$0xf0] }
 0x8e1   : > { %8754 = vmatpush.bf16.msra.mxu2 %v11089_v18  ;;  %8772 = vmatpush.bf16.msra.mxu0 %v10997_v32  ;;  %v7478_v40 = vadd.f32 %v7477_v62, %v7463_v35  ;;  %v11050_v18 = vld [vmem:[#allocation12 + $0x8a8] sm:$0xf0]  ;;  %v11049_v47 = vor.u32 %v11581_v25, %v11048_v26 }
 0x8e2   : > { %8782 = vmatpush.bf16.msrb.mxu1 %v11093_v33  ;;  %v11053_v33 = vor.u32 %v11580_v38, %v11050_v18 }
 0x8e3   : > { %8527 = vmatmul.bf16.vlgmr.msra.gmra.mxu1 %v8314_v57  ;;  %v7483_v4 = vadd.f32 %v7478_v40, %v16737_v44  ;;  %v7449_v12 = vpop.f32.mrf.mxu2  ;;  %v7465_v44 = vpop.f32.mrf.mxu0 }
 0x8e4   : > { %8745 = vmatpush.bf16.msra.mxu3 %v10985_v60  ;;  %v7450_v5 = vadd.f32 %v7449_v12, %v7435_v52  ;;  %v11041_v60 = vor.u32 %v11579_v34, %v11040_v8 }
 0x8e5   : > { %8755 = vmatpush.bf16.msra.mxu2 %v11081_v3  ;;  %8773 = vmatpush.bf16.msra.mxu0 %v10989_v50  ;;  %v7437_v29 = vpop.f32.mrf.mxu3  ;;  %v11045_v3 = vor.u32 %v11578_v42, %v11042_v9  ;;  %v11032_v50 = vld [vmem:[#allocation12 + $0x880] sm:$0xf] }
 0x8e6   : > { %8783 = vmatpush.bf16.msrb.mxu1 %v11085_v31  ;;  %v7482_v32 = vadd.f32 %v7450_v5, %v16742_v54  ;;  %v11033_v51 = vor.u32 %v11577_v43, %v11032_v50 }
 0x8e8   : > { %8746 = vmatpush.bf16.msra.mxu3 %v10977_v16  ;;  %v7479_v53 = vpop.f32.mrf.mxu1 }
 0x8e9   : > { %8756 = vmatpush.bf16.msra.mxu2 %v11073_v13  ;;  %8774 = vmatpush.bf16.msra.mxu0 %v10981_v22  ;;  %v7480_v58 = vadd.f32 %v7479_v53, %v7465_v44 }
 0x8ea   : > { %8784 = vmatpush.bf16.msrb.mxu1 %v11077_v14 }
 0x8eb   : > { %v16759_v37 = vadd.f32 %v7480_v58, %v16745_v11  ;;  %v7451_v57 = vpop.f32.mrf.mxu2  ;;  %v11037_v11 = vor.u32 %v11576_v45, %v11034_v19 }
 0x8ec   : > { %8747 = vmatpush.bf16.msra.mxu3 %v10969_v1  ;;  %v7452_v54 = vadd.f32 %v7451_v57, %v7437_v29  ;;  %v8800_v57 = vld [vmem:[#allocation13] sm:$0x3] }
 0x8ed   : > { %8757 = vmatpush.bf16.msra.mxu2 %v11065_v39  ;;  %8775 = vmatpush.bf16.msra.mxu0 %v10973_v55  ;;  %v7718_v48 = vpop.f32.mrf.mxu0 }
 0x8ee   : > { %8785 = vmatpush.bf16.msrb.mxu1 %v11069_v23  ;;  %v16762_v31 = vadd.f32 %v7452_v54, %v16748_v27 }
 0x8ef   : > { %8748 = vmatmul.bf16.vlgmr.msra.gmra.mxu3 %v8573_v41 }
 0x8f0   : > { %8776 = vmatmul.bf16.vlgmr.msra.gmra.mxu0 %v8573_v41 }
 0x8f1   : > { %8758 = vmatpush.bf16.msra.mxu2 %v11057_v59 }
 0x8f2   : > { %8786 = vmatpush.bf16.msrb.mxu1 %v11061_v61  ;;  %v7690_v13 = vpop.f32.mrf.mxu3 }
 0x8f5   : > { %8759 = vmatpush.bf16.msra.mxu2 %v11049_v47  ;;  %v7720_v6 = vpop.f32.mrf.mxu0 }
 0x8f6   : > { %8787 = vmatpush.bf16.msrb.mxu1 %v11053_v33 }
 0x8f9   : > { %8760 = vmatpush.bf16.msra.mxu2 %v11041_v60 }
 0x8fa   : > { %8788 = vmatpush.bf16.msrb.mxu1 %v11045_v3  ;;  %v7692_v35 = vpop.f32.mrf.mxu3 }
 0x8fd   : > { %8761 = vmatpush.bf16.msra.mxu2 %v11033_v51 }
 0x8fe   : > { %8789 = vmatpush.bf16.msrb.mxu1 %v11037_v11 }
 0x900   : > { %8762 = vmatmul.bf16.vlgmr.msra.gmra.mxu2 %v8577_v7  ;;  %v7732_v28 = vpop.f32.mrf.mxu1 }
 0x901   : > { %8790 = vmatmul.bf16.vlgmr.msrb.gmra.mxu1 %v8577_v7  ;;  %v7733_v2 = vadd.f32 %v7732_v28, %v7718_v48  ;;  %v8803_v48 = vperm.slane %v8800_v57, 1 }
 0x903   : > { %v7738_v16 = vadd.f32 %v7733_v2, %v7483_v4  ;;  %v7704_v22 = vpop.f32.mrf.mxu2 }
 0x904   : > { %v7705_v27 = vadd.f32 %v7704_v22, %v7690_v13 }
 0x906   : > { %v7737_v17 = vadd.f32 %v7705_v27, %v7482_v32 }
 0x908   : > { %v7734_v36 = vpop.f32.mrf.mxu1 }
 0x909   : > { %v7735_v38 = vadd.f32 %v7734_v36, %v7720_v6 }
 0x90b   : > { %v7706_v14 = vpop.f32.mrf.mxu2  ;;  %v7740_v33 = vadd.f32 %v7735_v38, %v16759_v37 }
 0x90c   : > { %v7707_v29 = vadd.f32 %v7706_v14, %v7692_v35 }
 0x90d   : > { %v7989_v21 = vpop.f32.mrf.mxu0 }
 0x90e   : > { %v7739_v28 = vadd.f32 %v7707_v29, %v16762_v31 }
 0x912   : > { %v7961_v24 = vpop.f32.mrf.mxu3 }
 0x915   : > { %v7991_v10 = vpop.f32.mrf.mxu0 }
 0x91a   : > { %v7963_v62 = vpop.f32.mrf.mxu3 }
 0x920   : > { %v8003_v20 = vpop.f32.mrf.mxu1 }
 0x921   : > { %v8004_v5 = vadd.f32 %v8003_v20, %v7989_v21 }
 0x923   : > { %v7975_v46 = vpop.f32.mrf.mxu2  ;;  %v8009_v32 = vadd.f32 %v8004_v5, %v7738_v16 }
 0x924   : > { %v7976_v47 = vadd.f32 %v7975_v46, %v7961_v24  ;;  %v8802_v46 = vperm.slane %v8800_v57, 0 }
 0x926   : > { %v8008_v45 = vadd.f32 %v7976_v47, %v7737_v17 }
 0x928   : > { %v8005_v56 = vpop.f32.mrf.mxu1 }
 0x929   : > { %v8006_v53 = vadd.f32 %v8005_v56, %v7991_v10 }
 0x92b   : > { %v7977_v1 = vpop.f32.mrf.mxu2  ;;  %v8011_v3 = vadd.f32 %v8006_v53, %v7740_v33 }
 0x92c   : > { %v7978_v19 = vadd.f32 %v7977_v1, %v7963_v62 }
 0x92d   : > { %v8252_v40 = vpop.f32.mrf.mxu0 }
 0x92e   : > { %v8010_v36 = vadd.f32 %v7978_v19, %v7739_v28 }
 0x932   : > { %v8224_v55 = vpop.f32.mrf.mxu3 }
 0x935   : > { %v8254_v30 = vpop.f32.mrf.mxu0 }
 0x93a   : > { %v8226_v52 = vpop.f32.mrf.mxu3 }
 0x940   : > { %v8266_v39 = vpop.f32.mrf.mxu1 }
 0x941   : > { %v8267_v18 = vadd.f32 %v8266_v39, %v8252_v40 }
 0x943   : > { %v8238_v23 = vpop.f32.mrf.mxu2  ;;  %v8272_v8 = vadd.f32 %v8267_v18, %v8009_v32 }
 0x944   : > { %v8239_v60 = vadd.f32 %v8238_v23, %v8224_v55 }
 0x946   : > { %v8271_v37 = vadd.f32 %v8239_v60, %v8008_v45 }
 0x948   : > { %v8268_v49 = vpop.f32.mrf.mxu1 }
 0x949   : > { %v8269_v34 = vadd.f32 %v8268_v49, %v8254_v30 }
 0x94b   : > { %v8240_v4 = vpop.f32.mrf.mxu2  ;;  %v8274_v11 = vadd.f32 %v8269_v34, %v8011_v3 }
 0x94c   : > { %v8241_v2 = vadd.f32 %v8240_v4, %v8226_v52  ;;  %v11592_v52 = vld [vmem:[#allocation19] sm:$0xff] }
 0x94d   : > { %v8514_v15 = vpop.f32.mrf.mxu0 }
 0x94e   : > { %v8273_v17 = vadd.f32 %v8241_v2, %v8010_v36 }
 0x952   : > { %v8486_v59 = vpop.f32.mrf.mxu3 }
 0x955   : > { %v8516_v0 = vpop.f32.mrf.mxu0 }
 0x95a   : > { %v8488_v61 = vpop.f32.mrf.mxu3 }
 0x960   : > { %v8528_v63 = vpop.f32.mrf.mxu1 }
 0x961   : > { %v8529_v58 = vadd.f32 %v8528_v63, %v8514_v15 }
 0x963   : > { %v8500_v12 = vpop.f32.mrf.mxu2  ;;  %v8534_v54 = vadd.f32 %v8529_v58, %v8272_v8 }
 0x964   : > { %v8501_v51 = vadd.f32 %v8500_v12, %v8486_v59 }
 0x966   : > { %v8533_v35 = vadd.f32 %v8501_v51, %v8271_v37 }
 0x968   : > { %v8530_v41 = vpop.f32.mrf.mxu1 }
 0x969   : > { %v8531_v50 = vadd.f32 %v8530_v41, %v8516_v0 }
 0x96b   : > { %v8502_v26 = vpop.f32.mrf.mxu2  ;;  %v8536_v27 = vadd.f32 %v8531_v50, %v8274_v11 }
 0x96c   : > { %v8503_v14 = vadd.f32 %v8502_v26, %v8488_v61 }
 0x96d   : > { %v8777_v25 = vpop.f32.mrf.mxu0 }
 0x96e   : > { %v8535_v1 = vadd.f32 %v8503_v14, %v8273_v17 }
 0x972   : > { %v8749_v42 = vpop.f32.mrf.mxu3 }
 0x975   : > { %v8779_v16 = vpop.f32.mrf.mxu0 }
 0x97a   : > { %v8751_v10 = vpop.f32.mrf.mxu3 }
 0x97e   : > { %v8791_v44 = vpop.f32.mrf.mxu1 }
 0x97f   : > { %v8792_v9 = vadd.f32 %v8791_v44, %v8777_v25 }
 0x981   : > { %v8797_v7 = vadd.f32 %v8792_v9, %v8534_v54 }
 0x983   : > { %v8763_v43 = vpop.f32.mrf.mxu2  ;;  %v8807_v21 = vadd.f32 %v8803_v48, %v8797_v7 }
 0x984   : > { %v8764_v13 = vadd.f32 %v8763_v43, %v8749_v42 }
 0x985   : > { %v8811_v40 = vmax.f32 %v8807_v21, 0.0 }
 0x986   : > { %v8793_v22 = vpop.f32.mrf.mxu1  ;;  %v8796_v24 = vadd.f32 %v8764_v13, %v8533_v35 }
 0x987   : > { %v8794_v6 = vadd.f32 %v8793_v22, %v8779_v16 }
 0x988   : > { %v8806_v55 = vadd.f32 %v8802_v46, %v8796_v24 }
 0x989   : > { %v8799_v20 = vadd.f32 %v8794_v6, %v8536_v27 }
 0x98a   : > { %v8810_v4 = vmax.f32 %v8806_v55, 0.0 }
 0x98b   : > { %v8809_v56 = vadd.f32 %v8803_v48, %v8799_v20  ;;  %v8765_v62 = vpop.f32.mrf.mxu2 }
 0x98c   : > { %v8766_v31 = vadd.f32 %v8765_v62, %v8751_v10 }
 0x98d   : > { %v8813_v39 = vmax.f32 %v8809_v56, 0.0 }
 0x98e   : > { %v8798_v23 = vadd.f32 %v8766_v31, %v8535_v1 }
 0x98f   : > { %v8817_v30 = vpack.c.bf16 %v8813_v39, %v8811_v40 }
 0x990   : > { %v8808_v49 = vadd.f32 %v8802_v46, %v8798_v23 }
 0x991   : > { %8848 = vmatpush.bf16.msrb.mxu2 %v8817_v30 }
 0x992   : > { %v8812_v15 = vmax.f32 %v8808_v49, 0.0 }
 0x994   : > { %v8816_v63 = vpack.c.bf16 %v8812_v15, %v8810_v4  ;;  %11099 = vmatmul.msk.bf16.vlgmr.msrb.gmra.mxu2 %vm8823_vm14, %v11592_v52 }
 0x996   : > { %8834 = vmatpush.bf16.msrb.mxu3 %v8816_v63 }
 0x999   : > { %11098 = vmatmul.msk.bf16.vlgmr.msrb.gmra.mxu3 %vm8823_vm14, %v11592_v52 }
 0xa17   : > { %v8850_v59 = vpop.f32.mrf.mxu2 }
 0xa18   : > { %8856 = vst [vmem:[%s631_s18 + $0x8] sm:$0xff] %v8850_v59 }
 0xa1c   : > { %v8836_v12 = vpop.f32.mrf.mxu3 }
 0xa1d   : > { %8855 = vst [vmem:[%s631_s18] sm:$0xff] %v8836_v12 }
 0xa1f   : > { %v8852_v0 = vpop.f32.mrf.mxu2 }
 0xa20   : > { %8858 = vst [vmem:[%s631_s18 + $0x18] sm:$0xff] %v8852_v0 }
 0xa24   : > { %v8838_v41 = vpop.f32.mrf.mxu3 }
 0xa25   : > { %8857 = vst [vmem:[%s631_s18 + $0x10] sm:$0xff] %v8838_v41 }
 0xa26 PF: > { %s30_s25 = sadd.s32 1, %s12135_s25  }
 0xa27   : > { %p27_p7 = scmp.ge.s32.totalorder %s30_s25, 4  }
 0xa29   :  { %29 = sbr.rel (!%p27_p7) target bundleno = 12 (0xc), region = 175 }
 0xa2e   :  { %8880 = vsyncpa [#allocation3], 1 }
 0xa2f   :  { %8882 = vsyncpa [#allocation3 + $0x1], 1 }
 0xa30   :  { %8883 = vsyncpa [#allocation5], 1 }
 0xa31   :  { %8884 = vsyncpa [#allocation8], 1 }
 0xa32   :  { %8885 = vsyncpa [#allocation11], 1 }
 0xa33   :  { %8886 = vsyncpa [#allocation14], 1 }
 0xa34   :  { %8887 = vsyncpa [#allocation17], 1 }
 0xa35   :  { %8888 = vsyncpa [#allocation20], 1 }

</bundles_post_ra>
